<compile_context>
chip_gen: v6e
topology: v6e:2x2x1
jax: 0.10.0
libtpu: 0.0.40
codegen_flags: <defaults>
</compile_context>

<pallas_src>
import functools

import numpy as np
import jax
import jax.numpy as jnp
from jax import lax
from jax.experimental import pallas as pl
from jax.experimental.pallas import tpu as pltpu


def _layer_norm(v, gamma, beta, eps=1e-5):
    mu = jnp.mean(v, axis=-1, keepdims=True)
    var = jnp.mean(v * v, axis=-1, keepdims=True) - mu * mu
    return (v - mu) * lax.rsqrt(var + eps) * gamma + beta


def _softmax_rows(s):
    s = s - jnp.max(s, axis=-1, keepdims=True)
    e = jnp.exp(s)
    return e / jnp.sum(e, axis=-1, keepdims=True)


def decoder_pre_kernel(z_ref, dec_ref, w_in2_ref, w_in_ref, z1b_ref,
                       wqkv_s_ref, bqkv_s_ref, wo_s_ref, bo_s_ref,
                       wq_c_ref, bq_c_ref, wkv_c_ref, bkv_c_ref,
                       wo_c_ref, bo_c_ref,
                       w_ff1_ref, b_ff1_ref, w_ff2_ref, b_ff2_ref,
                       ln_ref, w_out_ref, b_out_ref,
                       perm_ref, mask_ref,
                       out_ref, mix_scr, *, n_heads):
    f32 = jnp.float32
    x = dec_ref[0]                                  # (L, d_model)
    L, dm = x.shape
    H = n_heads
    Dh = dm // H
    G = L // H
    scale = 1.0 / float(Dh) ** 0.5
    ln = ln_ref[...]                                # rows: g1,b1,g2,b2,g3,b3,gF,bF

    # ---- z1 = relu(fc_in2(permute(fc_in(permute(z))))), fused rank-1 form ----
    u = jnp.dot(z_ref[0], w_in2_ref[...], preferred_element_type=f32)     # (1, dm)
    z1 = jnp.maximum(w_in_ref[...] * u + z1b_ref[...], 0.0)               # (S, dm)

    # ---- self-attention: causal FullAttention, H heads, mix=True ----
    qkv = jnp.dot(x, wqkv_s_ref[...], preferred_element_type=f32) + bqkv_s_ref[...]
    q = qkv[:, :dm]
    k = qkv[:, dm:2 * dm]
    v = qkv[:, 2 * dm:]
    # Row-permute the queries so the mix=True (head, position) interleave later
    # becomes contiguous slices (perm / permuted causal mask built host-side).
    qp = jnp.dot(perm_ref[...], q, preferred_element_type=f32)
    mask = mask_ref[...]
    for h in range(H):
        qh = qp[:, h * Dh:(h + 1) * Dh]
        kh = k[:, h * Dh:(h + 1) * Dh]
        vh = v[:, h * Dh:(h + 1) * Dh]
        s = lax.dot_general(qh, kh, (((1,), (1,)), ((), ())),
                            preferred_element_type=f32) * scale + mask
        a = _softmax_rows(s)
        ctx = jnp.dot(a, vh, preferred_element_type=f32)                  # (L, Dh)
        for blk in range(H):
            mix_scr[h * G:(h + 1) * G, blk * Dh:(blk + 1) * Dh] = (
                ctx[blk * G:(blk + 1) * G, :])
    x = _layer_norm(
        x + jnp.dot(mix_scr[...], wo_s_ref[...], preferred_element_type=f32)
        + bo_s_ref[...],
        ln[0:1, :], ln[1:2, :])

    # ---- cross-attention against z1: FullAttention, no mask, mix=False ----
    qc = jnp.dot(x, wq_c_ref[...], preferred_element_type=f32) + bq_c_ref[...]
    kv = jnp.dot(z1, wkv_c_ref[...], preferred_element_type=f32) + bkv_c_ref[...]
    kc = kv[:, :dm]
    vc = kv[:, dm:]
    for h in range(H):
        qh = qc[:, h * Dh:(h + 1) * Dh]
        kh = kc[:, h * Dh:(h + 1) * Dh]
        vh = vc[:, h * Dh:(h + 1) * Dh]
        s = lax.dot_general(qh, kh, (((1,), (1,)), ((), ())),
                            preferred_element_type=f32) * scale
        a = _softmax_rows(s)
        mix_scr[:, h * Dh:(h + 1) * Dh] = jnp.dot(a, vh, preferred_element_type=f32)
    x = _layer_norm(
        x + jnp.dot(mix_scr[...], wo_c_ref[...], preferred_element_type=f32)
        + bo_c_ref[...],
        ln[2:3, :], ln[3:4, :])

    # ---- position-wise FFN (Conv1d kernel_size=1 == Linear), gelu ----
    y = jnp.dot(x, w_ff1_ref[...], preferred_element_type=f32) + b_ff1_ref[...]
    # TODO(synk): PyTorch F.gelu is erf-exact; tanh-approximate gelu used (EUP path).
    y = jax.nn.gelu(y, approximate=True)
    y = jnp.dot(y, w_ff2_ref[...], preferred_element_type=f32) + b_ff2_ref[...]
    x = _layer_norm(x + y, ln[4:5, :], ln[5:6, :])

    # ---- DecoderP final LayerNorm + fc_out ----
    x = _layer_norm(x, ln[6:7, :], ln[7:8, :])
    out_ref[0] = (jnp.dot(x, w_out_ref[...], preferred_element_type=f32)
                  + b_out_ref[...])


def decoder_pre(num_of_task, dec_out, z, params, n_heads):
    """Pallas forward of Decoder_Pre.forward(num_of_task, dec_out, z, None, None)."""
    p = params[num_of_task]
    dec_out = dec_out.astype(jnp.float32)
    z = z.astype(jnp.float32)                       # (B, 1, latent_dim)
    B, L, dm = dec_out.shape
    latent = z.shape[-1]
    c_out = p["w_out"].shape[1]
    H = n_heads
    assert dm % H == 0
    # TODO(synk): the mix=True interleave is folded into a row permutation that
    # assumes L % n_heads == 0; general L would need an in-kernel relayout.
    assert L % H == 0
    G = L // H

    # Host-side precompute: z-independent part of fc_in/fc_in2 folded into one
    # bias map; mix row-permutation matrix; (permuted) additive causal mask.
    z1_bias = (p["b_in"][:, None] * jnp.sum(p["w_in2"], axis=0)[None, :]
               + p["b_in2"]).astype(jnp.float32)                    # (pred_len, dm)
    r = np.arange(L)
    pos = (r % G) * H + r // G
    perm = np.zeros((L, L), np.float32)
    perm[r, pos] = 1.0
    mask_perm = np.where(np.arange(L)[None, :] <= pos[:, None],
                         0.0, -1e30).astype(np.float32)

    args = (z, dec_out,
            p["w_in2"], p["w_in"], z1_bias,
            p["wqkv_s"], p["bqkv_s"], p["wo_s"], p["bo_s"],
            p["wq_c"], p["bq_c"], p["wkv_c"], p["bkv_c"], p["wo_c"], p["bo_c"],
            p["w_ff1"], p["b_ff1"], p["w_ff2"], p["b_ff2"],
            p["ln"], p["w_out"], p["b_out"],
            jnp.asarray(perm), jnp.asarray(mask_perm))

    def full_spec(a):
        return pl.BlockSpec(a.shape, lambda b, _n=a.ndim: (0,) * _n)

    in_specs = ([pl.BlockSpec((1, 1, latent), lambda b: (b, 0, 0)),
                 pl.BlockSpec((1, L, dm), lambda b: (b, 0, 0))]
                + [full_spec(a) for a in args[2:]])

    return pl.pallas_call(
        functools.partial(decoder_pre_kernel, n_heads=H),
        out_shape=jax.ShapeDtypeStruct((B, L, c_out), jnp.float32),
        grid=(B,),
        in_specs=in_specs,
        out_specs=pl.BlockSpec((1, L, c_out), lambda b: (b, 0, 0)),
        scratch_shapes=[pltpu.VMEM((L, dm), jnp.float32)],
        compiler_params=pltpu.CompilerParams(
            dimension_semantics=("parallel",)),      # megacore-shard over batch
    )(*args)


def init_params(key, num_tasks, pred_len, latent_dim, d_model, d_ff, c_out):
    """Per-task parameter dicts; linear weights stored (in_features, out_features)."""

    def dense(k, fan_in, fan_out):
        std = (2.0 / (fan_in + fan_out)) ** 0.5
        return std * jax.random.normal(k, (fan_in, fan_out), jnp.float32)

    ln = jnp.stack([jnp.ones((d_model,), jnp.float32),
                    jnp.zeros((d_model,), jnp.float32)] * 4)   # g1,b1,g2,b2,g3,b3,gF,bF

    params = []
    for t in range(num_tasks):
        ks = jax.random.split(jax.random.fold_in(key, t), 12)
        params.append(dict(
            w_in=dense(ks[0], pred_len, 1),              # torch Linear(1, pred_len).weight
            b_in=0.05 * jax.random.normal(ks[1], (pred_len,), jnp.float32),
            w_in2=dense(ks[2], latent_dim, d_model),
            b_in2=jnp.full((1, d_model), 0.02, jnp.float32),
            wqkv_s=dense(ks[3], d_model, 3 * d_model),
            bqkv_s=jnp.zeros((1, 3 * d_model), jnp.float32),
            wo_s=dense(ks[4], d_model, d_model),
            bo_s=jnp.zeros((1, d_model), jnp.float32),
            wq_c=dense(ks[5], d_model, d_model),
            bq_c=jnp.zeros((1, d_model), jnp.float32),
            wkv_c=dense(ks[6], d_model, 2 * d_model),
            bkv_c=jnp.zeros((1, 2 * d_model), jnp.float32),
            wo_c=dense(ks[7], d_model, d_model),
            bo_c=jnp.zeros((1, d_model), jnp.float32),
            w_ff1=dense(ks[8], d_model, d_ff),
            b_ff1=jnp.zeros((1, d_ff), jnp.float32),
            w_ff2=dense(ks[9], d_ff, d_model),
            b_ff2=jnp.zeros((1, d_model), jnp.float32),
            ln=ln,
            w_out=dense(ks[10], d_model, c_out),
            b_out=jnp.full((1, c_out), 0.01, jnp.float32),
        ))
    return params


def reference(num_of_task, dec_out, z, params, n_heads):
    """Literal (unfused) pure-JAX mirror of the PyTorch forward, for validation."""
    p = params[num_of_task]
    B, L, dm = dec_out.shape
    H = n_heads
    Dh = dm // H
    scale = 1.0 / float(Dh) ** 0.5
    ln = p["ln"]

    def norm(v, i):
        return _layer_norm(v, ln[2 * i:2 * i + 1, :], ln[2 * i + 1:2 * i + 2, :])

    # fc_in -> permute -> fc_in2 -> relu
    zp = jnp.transpose(z, (0, 2, 1))                            # (B, latent, 1)
    z1 = zp @ p["w_in"].T + p["b_in"]                           # (B, latent, S)
    z1 = jnp.transpose(z1, (0, 2, 1))                           # (B, S, latent)
    z1 = jax.nn.relu(z1 @ p["w_in2"] + p["b_in2"])              # (B, S, dm)
    S = z1.shape[1]

    # self-attention (causal, mix=True)
    qkv = dec_out @ p["wqkv_s"] + p["bqkv_s"]
    q, k, v = jnp.split(qkv, 3, axis=-1)
    q = q.reshape(B, L, H, Dh)
    k = k.reshape(B, L, H, Dh)
    v = v.reshape(B, L, H, Dh)
    causal = jnp.where(jnp.arange(L)[None, :] <= jnp.arange(L)[:, None], 0.0, -1e30)
    s = jnp.einsum('blhe,bshe->bhls', q, k) * scale + causal[None, None]
    a = jax.nn.softmax(s, axis=-1)
    ctx = jnp.einsum('bhls,bshd->blhd', a, v)
    ctx = jnp.transpose(ctx, (0, 2, 1, 3)).reshape(B, L, dm)    # mix=True view
    x = norm(dec_out + ctx @ p["wo_s"] + p["bo_s"], 0)

    # cross-attention (unmasked, mix=False)
    qc = (x @ p["wq_c"] + p["bq_c"]).reshape(B, L, H, Dh)
    kvc = z1 @ p["wkv_c"] + p["bkv_c"]
    kc, vc = jnp.split(kvc, 2, axis=-1)
    kc = kc.reshape(B, S, H, Dh)
    vc = vc.reshape(B, S, H, Dh)
    s = jnp.einsum('blhe,bshe->bhls', qc, kc) * scale
    a = jax.nn.softmax(s, axis=-1)
    ctx = jnp.einsum('bhls,bshd->blhd', a, vc).reshape(B, L, dm)
    x = norm(x + ctx @ p["wo_c"] + p["bo_c"], 1)

    # FFN + norms + fc_out
    y = jax.nn.gelu(x @ p["w_ff1"] + p["b_ff1"], approximate=True)
    y = y @ p["w_ff2"] + p["b_ff2"]
    x = norm(x + y, 2)
    x = norm(x, 3)
    return x @ p["w_out"] + p["b_out"]


if __name__ == "__main__":
    # Small shapes consistent with the module defaults (d_model=64, n_heads=8,
    # d_ff=64, c_out=1, d_layers=1): batch=2, pred_len=24, latent_dim=16.
    B = 2
    pred_len = 24            # decoder / prediction length (L == S == pred_len)
    latent_dim = 16
    d_model, n_heads, d_ff, c_out = 64, 8, 64, 1
    num_tasks, task = 2, 1

    key = jax.random.PRNGKey(0)
    kz, kd, kp = jax.random.split(key, 3)
    z = jax.random.normal(kz, (B, 1, latent_dim), dtype=jnp.float32)
    dec_out = jax.random.normal(kd, (B, pred_len, d_model), dtype=jnp.float32)
    params = init_params(kp, num_tasks, pred_len, latent_dim, d_model, d_ff, c_out)

    out = jax.block_until_ready(decoder_pre(task, dec_out, z, params, n_heads))
    assert out.shape == (B, pred_len, c_out)

    with jax.default_matmul_precision("highest"):
        ref = jax.block_until_ready(reference(task, dec_out, z, params, n_heads))

    err = float(jnp.max(jnp.abs(out - ref)))
    assert err < 1e-2, f"max abs err {err}"

    print("KERNEL_OK")
</pallas_src>

<mosaic_0001>
module attributes {stable_mosaic.version = 11 : i64} {
  func.func @decoder_pre_kernel(%arg0: i32, %arg1: memref<1x1x16xf32, #tpu.memory_space<vmem>>, %arg2: memref<1x24x64xf32, #tpu.memory_space<vmem>>, %arg3: memref<16x64xf32, #tpu.memory_space<vmem>>, %arg4: memref<24x1xf32, #tpu.memory_space<vmem>>, %arg5: memref<24x64xf32, #tpu.memory_space<vmem>>, %arg6: memref<64x192xf32, #tpu.memory_space<vmem>>, %arg7: memref<1x192xf32, #tpu.memory_space<vmem>>, %arg8: memref<64x64xf32, #tpu.memory_space<vmem>>, %arg9: memref<1x64xf32, #tpu.memory_space<vmem>>, %arg10: memref<64x64xf32, #tpu.memory_space<vmem>>, %arg11: memref<1x64xf32, #tpu.memory_space<vmem>>, %arg12: memref<64x128xf32, #tpu.memory_space<vmem>>, %arg13: memref<1x128xf32, #tpu.memory_space<vmem>>, %arg14: memref<64x64xf32, #tpu.memory_space<vmem>>, %arg15: memref<1x64xf32, #tpu.memory_space<vmem>>, %arg16: memref<64x64xf32, #tpu.memory_space<vmem>>, %arg17: memref<1x64xf32, #tpu.memory_space<vmem>>, %arg18: memref<64x64xf32, #tpu.memory_space<vmem>>, %arg19: memref<1x64xf32, #tpu.memory_space<vmem>>, %arg20: memref<8x64xf32, #tpu.memory_space<vmem>>, %arg21: memref<64x1xf32, #tpu.memory_space<vmem>>, %arg22: memref<1x1xf32, #tpu.memory_space<vmem>>, %arg23: memref<24x24xf32, #tpu.memory_space<vmem>>, %arg24: memref<24x24xf32, #tpu.memory_space<vmem>>, %arg25: memref<1x24x1xf32, #tpu.memory_space<vmem>>, %arg26: memref<24x64xf32, #tpu.memory_space<vmem>>) attributes {dimension_semantics = [#tpu.dimension_semantics<parallel>], iteration_bounds = array<i64: 2>, scalar_prefetch = 0 : i64, scratch_operands = 1 : i64, tpu.core_type = #tpu.core_type<tc>, window_params = [{transform_indices = @transform_0, window_bounds = array<i64: 1, 1, 16>}, {transform_indices = @transform_1, window_bounds = array<i64: 1, 24, 64>}, {pipeline_mode = #tpu.pipeline_mode<synchronous>, transform_indices = @transform_2, window_bounds = array<i64: 16, 64>}, {pipeline_mode = #tpu.pipeline_mode<synchronous>, transform_indices = @transform_3, window_bounds = array<i64: 24, 1>}, {pipeline_mode = #tpu.pipeline_mode<synchronous>, transform_indices = @transform_4, window_bounds = array<i64: 24, 64>}, {pipeline_mode = #tpu.pipeline_mode<synchronous>, transform_indices = @transform_5, window_bounds = array<i64: 64, 192>}, {pipeline_mode = #tpu.pipeline_mode<synchronous>, transform_indices = @transform_6, window_bounds = array<i64: 1, 192>}, {pipeline_mode = #tpu.pipeline_mode<synchronous>, transform_indices = @transform_7, window_bounds = array<i64: 64, 64>}, {pipeline_mode = #tpu.pipeline_mode<synchronous>, transform_indices = @transform_8, window_bounds = array<i64: 1, 64>}, {pipeline_mode = #tpu.pipeline_mode<synchronous>, transform_indices = @transform_9, window_bounds = array<i64: 64, 64>}, {pipeline_mode = #tpu.pipeline_mode<synchronous>, transform_indices = @transform_10, window_bounds = array<i64: 1, 64>}, {pipeline_mode = #tpu.pipeline_mode<synchronous>, transform_indices = @transform_11, window_bounds = array<i64: 64, 128>}, {pipeline_mode = #tpu.pipeline_mode<synchronous>, transform_indices = @transform_12, window_bounds = array<i64: 1, 128>}, {pipeline_mode = #tpu.pipeline_mode<synchronous>, transform_indices = @transform_13, window_bounds = array<i64: 64, 64>}, {pipeline_mode = #tpu.pipeline_mode<synchronous>, transform_indices = @transform_14, window_bounds = array<i64: 1, 64>}, {pipeline_mode = #tpu.pipeline_mode<synchronous>, transform_indices = @transform_15, window_bounds = array<i64: 64, 64>}, {pipeline_mode = #tpu.pipeline_mode<synchronous>, transform_indices = @transform_16, window_bounds = array<i64: 1, 64>}, {pipeline_mode = #tpu.pipeline_mode<synchronous>, transform_indices = @transform_17, window_bounds = array<i64: 64, 64>}, {pipeline_mode = #tpu.pipeline_mode<synchronous>, transform_indices = @transform_18, window_bounds = array<i64: 1, 64>}, {pipeline_mode = #tpu.pipeline_mode<synchronous>, transform_indices = @transform_19, window_bounds = array<i64: 8, 64>}, {pipeline_mode = #tpu.pipeline_mode<synchronous>, transform_indices = @transform_20, window_bounds = array<i64: 64, 1>}, {pipeline_mode = #tpu.pipeline_mode<synchronous>, transform_indices = @transform_21, window_bounds = array<i64: 1, 1>}, {pipeline_mode = #tpu.pipeline_mode<synchronous>, transform_indices = @transform_22, window_bounds = array<i64: 24, 24>}, {pipeline_mode = #tpu.pipeline_mode<synchronous>, transform_indices = @transform_23, window_bounds = array<i64: 24, 24>}, {transform_indices = @transform_24, window_bounds = array<i64: 1, 24, 1>}]} {
    %c0 = arith.constant 0 : index
    %c0_0 = arith.constant 0 : index
    %c0_1 = arith.constant 0 : index
    %0 = vector.load %arg2[%c0, %c0_0, %c0_1] : memref<1x24x64xf32, #tpu.memory_space<vmem>>, vector<1x24x64xf32>
    %1 = vector.shape_cast %0 : vector<1x24x64xf32> to vector<24x64xf32>
    %c0_2 = arith.constant 0 : index
    %c0_3 = arith.constant 0 : index
    %2 = vector.load %arg20[%c0_2, %c0_3] : memref<8x64xf32, #tpu.memory_space<vmem>>, vector<8x64xf32>
    %c0_4 = arith.constant 0 : index
    %c0_5 = arith.constant 0 : index
    %c0_6 = arith.constant 0 : index
    %3 = vector.load %arg1[%c0_4, %c0_5, %c0_6] : memref<1x1x16xf32, #tpu.memory_space<vmem>>, vector<1x1x16xf32>
    %4 = vector.shape_cast %3 : vector<1x1x16xf32> to vector<1x16xf32>
    %c0_7 = arith.constant 0 : index
    %c0_8 = arith.constant 0 : index
    %5 = vector.load %arg3[%c0_7, %c0_8] : memref<16x64xf32, #tpu.memory_space<vmem>>, vector<16x64xf32>
    %cst = arith.constant dense<0.000000e+00> : vector<1x64xf32>
    %6 = tpu.matmul %4, %5, %cst {dimension_numbers = #tpu.dot_dimension_numbers<[1], [0], [0], [1], [0, 0, 1, 1], [], []>} : vector<1x16xf32>, vector<16x64xf32>, vector<1x64xf32> -> vector<1x64xf32>
    %c0_9 = arith.constant 0 : index
    %c0_10 = arith.constant 0 : index
    %7 = vector.load %arg4[%c0_9, %c0_10] : memref<24x1xf32, #tpu.memory_space<vmem>>, vector<24x1xf32>
    %8 = vector.broadcast %7 : vector<24x1xf32> to vector<24x64xf32>
    %9 = vector.broadcast %6 : vector<1x64xf32> to vector<24x64xf32>
    %10 = arith.mulf %8, %9 : vector<24x64xf32>
    %c0_11 = arith.constant 0 : index
    %c0_12 = arith.constant 0 : index
    %11 = vector.load %arg5[%c0_11, %c0_12] : memref<24x64xf32, #tpu.memory_space<vmem>>, vector<24x64xf32>
    %12 = arith.addf %10, %11 : vector<24x64xf32>
    %cst_13 = arith.constant 0.000000e+00 : f32
    %13 = vector.broadcast %cst_13 : f32 to vector<24x64xf32>
    %14 = arith.maximumf %12, %13 : vector<24x64xf32>
    %c0_14 = arith.constant 0 : index
    %c0_15 = arith.constant 0 : index
    %15 = vector.load %arg6[%c0_14, %c0_15] : memref<64x192xf32, #tpu.memory_space<vmem>>, vector<64x192xf32>
    %cst_16 = arith.constant dense<0.000000e+00> : vector<24x192xf32>
    %16 = tpu.matmul %1, %15, %cst_16 {dimension_numbers = #tpu.dot_dimension_numbers<[1], [0], [0], [1], [0, 0, 1, 1], [], []>} : vector<24x64xf32>, vector<64x192xf32>, vector<24x192xf32> -> vector<24x192xf32>
    %c0_17 = arith.constant 0 : index
    %c0_18 = arith.constant 0 : index
    %17 = vector.load %arg7[%c0_17, %c0_18] : memref<1x192xf32, #tpu.memory_space<vmem>>, vector<1x192xf32>
    %18 = vector.broadcast %17 : vector<1x192xf32> to vector<24x192xf32>
    %19 = arith.addf %16, %18 : vector<24x192xf32>
    %20 = vector.extract_strided_slice %19 {offsets = [0, 0], sizes = [24, 64], strides = [1, 1]} : vector<24x192xf32> to vector<24x64xf32>
    %21 = vector.extract_strided_slice %19 {offsets = [0, 64], sizes = [24, 64], strides = [1, 1]} : vector<24x192xf32> to vector<24x64xf32>
    %22 = vector.extract_strided_slice %19 {offsets = [0, 128], sizes = [24, 64], strides = [1, 1]} : vector<24x192xf32> to vector<24x64xf32>
    %c0_19 = arith.constant 0 : index
    %c0_20 = arith.constant 0 : index
    %23 = vector.load %arg23[%c0_19, %c0_20] : memref<24x24xf32, #tpu.memory_space<vmem>>, vector<24x24xf32>
    %cst_21 = arith.constant dense<0.000000e+00> : vector<24x64xf32>
    %24 = tpu.matmul %23, %20, %cst_21 {dimension_numbers = #tpu.dot_dimension_numbers<[1], [0], [0], [1], [0, 0, 1, 1], [], []>} : vector<24x24xf32>, vector<24x64xf32>, vector<24x64xf32> -> vector<24x64xf32>
    %c0_22 = arith.constant 0 : index
    %c0_23 = arith.constant 0 : index
    %25 = vector.load %arg24[%c0_22, %c0_23] : memref<24x24xf32, #tpu.memory_space<vmem>>, vector<24x24xf32>
    %26 = vector.extract_strided_slice %24 {offsets = [0, 0], sizes = [24, 8], strides = [1, 1]} : vector<24x64xf32> to vector<24x8xf32>
    %27 = vector.extract_strided_slice %21 {offsets = [0, 0], sizes = [24, 8], strides = [1, 1]} : vector<24x64xf32> to vector<24x8xf32>
    %28 = vector.extract_strided_slice %22 {offsets = [0, 0], sizes = [24, 8], strides = [1, 1]} : vector<24x64xf32> to vector<24x8xf32>
    %cst_24 = arith.constant dense<0.000000e+00> : vector<24x24xf32>
    %29 = tpu.matmul %26, %27, %cst_24 {dimension_numbers = #tpu.dot_dimension_numbers<[1], [1], [0], [0], [0, 0, 1, 0], [], []>} : vector<24x8xf32>, vector<24x8xf32>, vector<24x24xf32> -> vector<24x24xf32>
    %cst_25 = arith.constant 0.353553385 : f32
    %30 = vector.broadcast %cst_25 : f32 to vector<24x24xf32>
    %31 = arith.mulf %29, %30 : vector<24x24xf32>
    %32 = arith.addf %31, %25 : vector<24x24xf32>
    %cst_26 = arith.constant dense<0xFF800000> : vector<24xf32>
    %33 = vector.multi_reduction <maximumf>, %32, %cst_26 [1] : vector<24x24xf32> to vector<24xf32>
    %34 = vector.shape_cast %33 : vector<24xf32> to vector<24x1xf32>
    %35 = vector.broadcast %34 : vector<24x1xf32> to vector<24x24xf32>
    %36 = arith.subf %32, %35 : vector<24x24xf32>
    %37 = math.exp %36 : vector<24x24xf32>
    %cst_27 = arith.constant dense<0.000000e+00> : vector<24xf32>
    %38 = vector.multi_reduction <add>, %37, %cst_27 [1] : vector<24x24xf32> to vector<24xf32>
    %39 = vector.shape_cast %38 : vector<24xf32> to vector<24x1xf32>
    %40 = vector.broadcast %39 : vector<24x1xf32> to vector<24x24xf32>
    %41 = arith.divf %37, %40 : vector<24x24xf32>
    %cst_28 = arith.constant dense<0.000000e+00> : vector<24x8xf32>
    %42 = tpu.matmul %41, %28, %cst_28 {dimension_numbers = #tpu.dot_dimension_numbers<[1], [0], [0], [1], [0, 0, 1, 1], [], []>} : vector<24x24xf32>, vector<24x8xf32>, vector<24x8xf32> -> vector<24x8xf32>
    %43 = vector.extract_strided_slice %42 {offsets = [0, 0], sizes = [3, 8], strides = [1, 1]} : vector<24x8xf32> to vector<3x8xf32>
    %c0_29 = arith.constant 0 : index
    %c0_30 = arith.constant 0 : index
    %44 = vector.load %arg26[%c0_29, %c0_30] : memref<24x64xf32, #tpu.memory_space<vmem>>, vector<3x8xf32>
    tpu.vector_store %arg26[%c0_29, %c0_30], %43 {strides = array<i32>} : memref<24x64xf32, #tpu.memory_space<vmem>>, vector<3x8xf32>,
    %45 = vector.extract_strided_slice %42 {offsets = [3, 0], sizes = [3, 8], strides = [1, 1]} : vector<24x8xf32> to vector<3x8xf32>
    %c0_31 = arith.constant 0 : index
    %c8 = arith.constant 8 : index
    %46 = vector.load %arg26[%c0_31, %c8] : memref<24x64xf32, #tpu.memory_space<vmem>>, vector<3x8xf32>
    tpu.vector_store %arg26[%c0_31, %c8], %45 {strides = array<i32>} : memref<24x64xf32, #tpu.memory_space<vmem>>, vector<3x8xf32>,
    %47 = vector.extract_strided_slice %42 {offsets = [6, 0], sizes = [3, 8], strides = [1, 1]} : vector<24x8xf32> to vector<3x8xf32>
    %c0_32 = arith.constant 0 : index
    %c16 = arith.constant 16 : index
    %48 = vector.load %arg26[%c0_32, %c16] : memref<24x64xf32, #tpu.memory_space<vmem>>, vector<3x8xf32>
    tpu.vector_store %arg26[%c0_32, %c16], %47 {strides = array<i32>} : memref<24x64xf32, #tpu.memory_space<vmem>>, vector<3x8xf32>,
    %49 = vector.extract_strided_slice %42 {offsets = [9, 0], sizes = [3, 8], strides = [1, 1]} : vector<24x8xf32> to vector<3x8xf32>
    %c0_33 = arith.constant 0 : index
    %c24 = arith.constant 24 : index
    %50 = vector.load %arg26[%c0_33, %c24] : memref<24x64xf32, #tpu.memory_space<vmem>>, vector<3x8xf32>
    tpu.vector_store %arg26[%c0_33, %c24], %49 {strides = array<i32>} : memref<24x64xf32, #tpu.memory_space<vmem>>, vector<3x8xf32>,
    %51 = vector.extract_strided_slice %42 {offsets = [12, 0], sizes = [3, 8], strides = [1, 1]} : vector<24x8xf32> to vector<3x8xf32>
    %c0_34 = arith.constant 0 : index
    %c32 = arith.constant 32 : index
    %52 = vector.load %arg26[%c0_34, %c32] : memref<24x64xf32, #tpu.memory_space<vmem>>, vector<3x8xf32>
    tpu.vector_store %arg26[%c0_34, %c32], %51 {strides = array<i32>} : memref<24x64xf32, #tpu.memory_space<vmem>>, vector<3x8xf32>,
    %53 = vector.extract_strided_slice %42 {offsets = [15, 0], sizes = [3, 8], strides = [1, 1]} : vector<24x8xf32> to vector<3x8xf32>
    %c0_35 = arith.constant 0 : index
    %c40 = arith.constant 40 : index
    %54 = vector.load %arg26[%c0_35, %c40] : memref<24x64xf32, #tpu.memory_space<vmem>>, vector<3x8xf32>
    tpu.vector_store %arg26[%c0_35, %c40], %53 {strides = array<i32>} : memref<24x64xf32, #tpu.memory_space<vmem>>, vector<3x8xf32>,
    %55 = vector.extract_strided_slice %42 {offsets = [18, 0], sizes = [3, 8], strides = [1, 1]} : vector<24x8xf32> to vector<3x8xf32>
    %c0_36 = arith.constant 0 : index
    %c48 = arith.constant 48 : index
    %56 = vector.load %arg26[%c0_36, %c48] : memref<24x64xf32, #tpu.memory_space<vmem>>, vector<3x8xf32>
    tpu.vector_store %arg26[%c0_36, %c48], %55 {strides = array<i32>} : memref<24x64xf32, #tpu.memory_space<vmem>>, vector<3x8xf32>,
    %57 = vector.extract_strided_slice %42 {offsets = [21, 0], sizes = [3, 8], strides = [1, 1]} : vector<24x8xf32> to vector<3x8xf32>
    %c0_37 = arith.constant 0 : index
    %c56 = arith.constant 56 : index
    %58 = vector.load %arg26[%c0_37, %c56] : memref<24x64xf32, #tpu.memory_space<vmem>>, vector<3x8xf32>
    tpu.vector_store %arg26[%c0_37, %c56], %57 {strides = array<i32>} : memref<24x64xf32, #tpu.memory_space<vmem>>, vector<3x8xf32>,
    %59 = vector.extract_strided_slice %24 {offsets = [0, 8], sizes = [24, 8], strides = [1, 1]} : vector<24x64xf32> to vector<24x8xf32>
    %60 = vector.extract_strided_slice %21 {offsets = [0, 8], sizes = [24, 8], strides = [1, 1]} : vector<24x64xf32> to vector<24x8xf32>
    %61 = vector.extract_strided_slice %22 {offsets = [0, 8], sizes = [24, 8], strides = [1, 1]} : vector<24x64xf32> to vector<24x8xf32>
    %cst_38 = arith.constant dense<0.000000e+00> : vector<24x24xf32>
    %62 = tpu.matmul %59, %60, %cst_38 {dimension_numbers = #tpu.dot_dimension_numbers<[1], [1], [0], [0], [0, 0, 1, 0], [], []>} : vector<24x8xf32>, vector<24x8xf32>, vector<24x24xf32> -> vector<24x24xf32>
    %cst_39 = arith.constant 0.353553385 : f32
    %63 = vector.broadcast %cst_39 : f32 to vector<24x24xf32>
    %64 = arith.mulf %62, %63 : vector<24x24xf32>
    %65 = arith.addf %64, %25 : vector<24x24xf32>
    %cst_40 = arith.constant dense<0xFF800000> : vector<24xf32>
    %66 = vector.multi_reduction <maximumf>, %65, %cst_40 [1] : vector<24x24xf32> to vector<24xf32>
    %67 = vector.shape_cast %66 : vector<24xf32> to vector<24x1xf32>
    %68 = vector.broadcast %67 : vector<24x1xf32> to vector<24x24xf32>
    %69 = arith.subf %65, %68 : vector<24x24xf32>
    %70 = math.exp %69 : vector<24x24xf32>
    %cst_41 = arith.constant dense<0.000000e+00> : vector<24xf32>
    %71 = vector.multi_reduction <add>, %70, %cst_41 [1] : vector<24x24xf32> to vector<24xf32>
    %72 = vector.shape_cast %71 : vector<24xf32> to vector<24x1xf32>
    %73 = vector.broadcast %72 : vector<24x1xf32> to vector<24x24xf32>
    %74 = arith.divf %70, %73 : vector<24x24xf32>
    %cst_42 = arith.constant dense<0.000000e+00> : vector<24x8xf32>
    %75 = tpu.matmul %74, %61, %cst_42 {dimension_numbers = #tpu.dot_dimension_numbers<[1], [0], [0], [1], [0, 0, 1, 1], [], []>} : vector<24x24xf32>, vector<24x8xf32>, vector<24x8xf32> -> vector<24x8xf32>
    %76 = vector.extract_strided_slice %75 {offsets = [0, 0], sizes = [3, 8], strides = [1, 1]} : vector<24x8xf32> to vector<3x8xf32>
    %c3 = arith.constant 3 : index
    %c0_43 = arith.constant 0 : index
    %77 = vector.load %arg26[%c3, %c0_43] : memref<24x64xf32, #tpu.memory_space<vmem>>, vector<3x8xf32>
    tpu.vector_store %arg26[%c3, %c0_43], %76 {strides = array<i32>} : memref<24x64xf32, #tpu.memory_space<vmem>>, vector<3x8xf32>,
    %78 = vector.extract_strided_slice %75 {offsets = [3, 0], sizes = [3, 8], strides = [1, 1]} : vector<24x8xf32> to vector<3x8xf32>
    %c3_44 = arith.constant 3 : index
    %c8_45 = arith.constant 8 : index
    %79 = vector.load %arg26[%c3_44, %c8_45] : memref<24x64xf32, #tpu.memory_space<vmem>>, vector<3x8xf32>
    tpu.vector_store %arg26[%c3_44, %c8_45], %78 {strides = array<i32>} : memref<24x64xf32, #tpu.memory_space<vmem>>, vector<3x8xf32>,
    %80 = vector.extract_strided_slice %75 {offsets = [6, 0], sizes = [3, 8], strides = [1, 1]} : vector<24x8xf32> to vector<3x8xf32>
    %c3_46 = arith.constant 3 : index
    %c16_47 = arith.constant 16 : index
    %81 = vector.load %arg26[%c3_46, %c16_47] : memref<24x64xf32, #tpu.memory_space<vmem>>, vector<3x8xf32>
    tpu.vector_store %arg26[%c3_46, %c16_47], %80 {strides = array<i32>} : memref<24x64xf32, #tpu.memory_space<vmem>>, vector<3x8xf32>,
    %82 = vector.extract_strided_slice %75 {offsets = [9, 0], sizes = [3, 8], strides = [1, 1]} : vector<24x8xf32> to vector<3x8xf32>
    %c3_48 = arith.constant 3 : index
    %c24_49 = arith.constant 24 : index
    %83 = vector.load %arg26[%c3_48, %c24_49] : memref<24x64xf32, #tpu.memory_space<vmem>>, vector<3x8xf32>
    tpu.vector_store %arg26[%c3_48, %c24_49], %82 {strides = array<i32>} : memref<24x64xf32, #tpu.memory_space<vmem>>, vector<3x8xf32>,
    %84 = vector.extract_strided_slice %75 {offsets = [12, 0], sizes = [3, 8], strides = [1, 1]} : vector<24x8xf32> to vector<3x8xf32>
    %c3_50 = arith.constant 3 : index
    %c32_51 = arith.constant 32 : index
    %85 = vector.load %arg26[%c3_50, %c32_51] : memref<24x64xf32, #tpu.memory_space<vmem>>, vector<3x8xf32>
    tpu.vector_store %arg26[%c3_50, %c32_51], %84 {strides = array<i32>} : memref<24x64xf32, #tpu.memory_space<vmem>>, vector<3x8xf32>,
    %86 = vector.extract_strided_slice %75 {offsets = [15, 0], sizes = [3, 8], strides = [1, 1]} : vector<24x8xf32> to vector<3x8xf32>
    %c3_52 = arith.constant 3 : index
    %c40_53 = arith.constant 40 : index
    %87 = vector.load %arg26[%c3_52, %c40_53] : memref<24x64xf32, #tpu.memory_space<vmem>>, vector<3x8xf32>
    tpu.vector_store %arg26[%c3_52, %c40_53], %86 {strides = array<i32>} : memref<24x64xf32, #tpu.memory_space<vmem>>, vector<3x8xf32>,
    %88 = vector.extract_strided_slice %75 {offsets = [18, 0], sizes = [3, 8], strides = [1, 1]} : vector<24x8xf32> to vector<3x8xf32>
    %c3_54 = arith.constant 3 : index
    %c48_55 = arith.constant 48 : index
    %89 = vector.load %arg26[%c3_54, %c48_55] : memref<24x64xf32, #tpu.memory_space<vmem>>, vector<3x8xf32>
    tpu.vector_store %arg26[%c3_54, %c48_55], %88 {strides = array<i32>} : memref<24x64xf32, #tpu.memory_space<vmem>>, vector<3x8xf32>,
    %90 = vector.extract_strided_slice %75 {offsets = [21, 0], sizes = [3, 8], strides = [1, 1]} : vector<24x8xf32> to vector<3x8xf32>
    %c3_56 = arith.constant 3 : index
    %c56_57 = arith.constant 56 : index
    %91 = vector.load %arg26[%c3_56, %c56_57] : memref<24x64xf32, #tpu.memory_space<vmem>>, vector<3x8xf32>
    tpu.vector_store %arg26[%c3_56, %c56_57], %90 {strides = array<i32>} : memref<24x64xf32, #tpu.memory_space<vmem>>, vector<3x8xf32>,
    %92 = vector.extract_strided_slice %24 {offsets = [0, 16], sizes = [24, 8], strides = [1, 1]} : vector<24x64xf32> to vector<24x8xf32>
    %93 = vector.extract_strided_slice %21 {offsets = [0, 16], sizes = [24, 8], strides = [1, 1]} : vector<24x64xf32> to vector<24x8xf32>
    %94 = vector.extract_strided_slice %22 {offsets = [0, 16], sizes = [24, 8], strides = [1, 1]} : vector<24x64xf32> to vector<24x8xf32>
    %cst_58 = arith.constant dense<0.000000e+00> : vector<24x24xf32>
    %95 = tpu.matmul %92, %93, %cst_58 {dimension_numbers = #tpu.dot_dimension_numbers<[1], [1], [0], [0], [0, 0, 1, 0], [], []>} : vector<24x8xf32>, vector<24x8xf32>, vector<24x24xf32> -> vector<24x24xf32>
    %cst_59 = arith.constant 0.353553385 : f32
    %96 = vector.broadcast %cst_59 : f32 to vector<24x24xf32>
    %97 = arith.mulf %95, %96 : vector<24x24xf32>
    %98 = arith.addf %97, %25 : vector<24x24xf32>
    %cst_60 = arith.constant dense<0xFF800000> : vector<24xf32>
    %99 = vector.multi_reduction <maximumf>, %98, %cst_60 [1] : vector<24x24xf32> to vector<24xf32>
    %100 = vector.shape_cast %99 : vector<24xf32> to vector<24x1xf32>
    %101 = vector.broadcast %100 : vector<24x1xf32> to vector<24x24xf32>
    %102 = arith.subf %98, %101 : vector<24x24xf32>
    %103 = math.exp %102 : vector<24x24xf32>
    %cst_61 = arith.constant dense<0.000000e+00> : vector<24xf32>
    %104 = vector.multi_reduction <add>, %103, %cst_61 [1] : vector<24x24xf32> to vector<24xf32>
    %105 = vector.shape_cast %104 : vector<24xf32> to vector<24x1xf32>
    %106 = vector.broadcast %105 : vector<24x1xf32> to vector<24x24xf32>
    %107 = arith.divf %103, %106 : vector<24x24xf32>
    %cst_62 = arith.constant dense<0.000000e+00> : vector<24x8xf32>
    %108 = tpu.matmul %107, %94, %cst_62 {dimension_numbers = #tpu.dot_dimension_numbers<[1], [0], [0], [1], [0, 0, 1, 1], [], []>} : vector<24x24xf32>, vector<24x8xf32>, vector<24x8xf32> -> vector<24x8xf32>
    %109 = vector.extract_strided_slice %108 {offsets = [0, 0], sizes = [3, 8], strides = [1, 1]} : vector<24x8xf32> to vector<3x8xf32>
    %c6 = arith.constant 6 : index
    %c0_63 = arith.constant 0 : index
    %110 = vector.load %arg26[%c6, %c0_63] : memref<24x64xf32, #tpu.memory_space<vmem>>, vector<3x8xf32>
    tpu.vector_store %arg26[%c6, %c0_63], %109 {strides = array<i32>} : memref<24x64xf32, #tpu.memory_space<vmem>>, vector<3x8xf32>,
    %111 = vector.extract_strided_slice %108 {offsets = [3, 0], sizes = [3, 8], strides = [1, 1]} : vector<24x8xf32> to vector<3x8xf32>
    %c6_64 = arith.constant 6 : index
    %c8_65 = arith.constant 8 : index
    %112 = vector.load %arg26[%c6_64, %c8_65] : memref<24x64xf32, #tpu.memory_space<vmem>>, vector<3x8xf32>
    tpu.vector_store %arg26[%c6_64, %c8_65], %111 {strides = array<i32>} : memref<24x64xf32, #tpu.memory_space<vmem>>, vector<3x8xf32>,
    %113 = vector.extract_strided_slice %108 {offsets = [6, 0], sizes = [3, 8], strides = [1, 1]} : vector<24x8xf32> to vector<3x8xf32>
    %c6_66 = arith.constant 6 : index
    %c16_67 = arith.constant 16 : index
    %114 = vector.load %arg26[%c6_66, %c16_67] : memref<24x64xf32, #tpu.memory_space<vmem>>, vector<3x8xf32>
    tpu.vector_store %arg26[%c6_66, %c16_67], %113 {strides = array<i32>} : memref<24x64xf32, #tpu.memory_space<vmem>>, vector<3x8xf32>,
    %115 = vector.extract_strided_slice %108 {offsets = [9, 0], sizes = [3, 8], strides = [1, 1]} : vector<24x8xf32> to vector<3x8xf32>
    %c6_68 = arith.constant 6 : index
    %c24_69 = arith.constant 24 : index
    %116 = vector.load %arg26[%c6_68, %c24_69] : memref<24x64xf32, #tpu.memory_space<vmem>>, vector<3x8xf32>
    tpu.vector_store %arg26[%c6_68, %c24_69], %115 {strides = array<i32>} : memref<24x64xf32, #tpu.memory_space<vmem>>, vector<3x8xf32>,
    %117 = vector.extract_strided_slice %108 {offsets = [12, 0], sizes = [3, 8], strides = [1, 1]} : vector<24x8xf32> to vector<3x8xf32>
    %c6_70 = arith.constant 6 : index
    %c32_71 = arith.constant 32 : index
    %118 = vector.load %arg26[%c6_70, %c32_71] : memref<24x64xf32, #tpu.memory_space<vmem>>, vector<3x8xf32>
    tpu.vector_store %arg26[%c6_70, %c32_71], %117 {strides = array<i32>} : memref<24x64xf32, #tpu.memory_space<vmem>>, vector<3x8xf32>,
    %119 = vector.extract_strided_slice %108 {offsets = [15, 0], sizes = [3, 8], strides = [1, 1]} : vector<24x8xf32> to vector<3x8xf32>
    %c6_72 = arith.constant 6 : index
    %c40_73 = arith.constant 40 : index
    %120 = vector.load %arg26[%c6_72, %c40_73] : memref<24x64xf32, #tpu.memory_space<vmem>>, vector<3x8xf32>
    tpu.vector_store %arg26[%c6_72, %c40_73], %119 {strides = array<i32>} : memref<24x64xf32, #tpu.memory_space<vmem>>, vector<3x8xf32>,
    %121 = vector.extract_strided_slice %108 {offsets = [18, 0], sizes = [3, 8], strides = [1, 1]} : vector<24x8xf32> to vector<3x8xf32>
    %c6_74 = arith.constant 6 : index
    %c48_75 = arith.constant 48 : index
    %122 = vector.load %arg26[%c6_74, %c48_75] : memref<24x64xf32, #tpu.memory_space<vmem>>, vector<3x8xf32>
    tpu.vector_store %arg26[%c6_74, %c48_75], %121 {strides = array<i32>} : memref<24x64xf32, #tpu.memory_space<vmem>>, vector<3x8xf32>,
    %123 = vector.extract_strided_slice %108 {offsets = [21, 0], sizes = [3, 8], strides = [1, 1]} : vector<24x8xf32> to vector<3x8xf32>
    %c6_76 = arith.constant 6 : index
    %c56_77 = arith.constant 56 : index
    %124 = vector.load %arg26[%c6_76, %c56_77] : memref<24x64xf32, #tpu.memory_space<vmem>>, vector<3x8xf32>
    tpu.vector_store %arg26[%c6_76, %c56_77], %123 {strides = array<i32>} : memref<24x64xf32, #tpu.memory_space<vmem>>, vector<3x8xf32>,
    %125 = vector.extract_strided_slice %24 {offsets = [0, 24], sizes = [24, 8], strides = [1, 1]} : vector<24x64xf32> to vector<24x8xf32>
    %126 = vector.extract_strided_slice %21 {offsets = [0, 24], sizes = [24, 8], strides = [1, 1]} : vector<24x64xf32> to vector<24x8xf32>
    %127 = vector.extract_strided_slice %22 {offsets = [0, 24], sizes = [24, 8], strides = [1, 1]} : vector<24x64xf32> to vector<24x8xf32>
    %cst_78 = arith.constant dense<0.000000e+00> : vector<24x24xf32>
    %128 = tpu.matmul %125, %126, %cst_78 {dimension_numbers = #tpu.dot_dimension_numbers<[1], [1], [0], [0], [0, 0, 1, 0], [], []>} : vector<24x8xf32>, vector<24x8xf32>, vector<24x24xf32> -> vector<24x24xf32>
    %cst_79 = arith.constant 0.353553385 : f32
    %129 = vector.broadcast %cst_79 : f32 to vector<24x24xf32>
    %130 = arith.mulf %128, %129 : vector<24x24xf32>
    %131 = arith.addf %130, %25 : vector<24x24xf32>
    %cst_80 = arith.constant dense<0xFF800000> : vector<24xf32>
    %132 = vector.multi_reduction <maximumf>, %131, %cst_80 [1] : vector<24x24xf32> to vector<24xf32>
    %133 = vector.shape_cast %132 : vector<24xf32> to vector<24x1xf32>
    %134 = vector.broadcast %133 : vector<24x1xf32> to vector<24x24xf32>
    %135 = arith.subf %131, %134 : vector<24x24xf32>
    %136 = math.exp %135 : vector<24x24xf32>
    %cst_81 = arith.constant dense<0.000000e+00> : vector<24xf32>
    %137 = vector.multi_reduction <add>, %136, %cst_81 [1] : vector<24x24xf32> to vector<24xf32>
    %138 = vector.shape_cast %137 : vector<24xf32> to vector<24x1xf32>
    %139 = vector.broadcast %138 : vector<24x1xf32> to vector<24x24xf32>
    %140 = arith.divf %136, %139 : vector<24x24xf32>
    %cst_82 = arith.constant dense<0.000000e+00> : vector<24x8xf32>
    %141 = tpu.matmul %140, %127, %cst_82 {dimension_numbers = #tpu.dot_dimension_numbers<[1], [0], [0], [1], [0, 0, 1, 1], [], []>} : vector<24x24xf32>, vector<24x8xf32>, vector<24x8xf32> -> vector<24x8xf32>
    %142 = vector.extract_strided_slice %141 {offsets = [0, 0], sizes = [3, 8], strides = [1, 1]} : vector<24x8xf32> to vector<3x8xf32>
    %c9 = arith.constant 9 : index
    %c0_83 = arith.constant 0 : index
    %143 = vector.load %arg26[%c9, %c0_83] : memref<24x64xf32, #tpu.memory_space<vmem>>, vector<3x8xf32>
    tpu.vector_store %arg26[%c9, %c0_83], %142 {strides = array<i32>} : memref<24x64xf32, #tpu.memory_space<vmem>>, vector<3x8xf32>,
    %144 = vector.extract_strided_slice %141 {offsets = [3, 0], sizes = [3, 8], strides = [1, 1]} : vector<24x8xf32> to vector<3x8xf32>
    %c9_84 = arith.constant 9 : index
    %c8_85 = arith.constant 8 : index
    %145 = vector.load %arg26[%c9_84, %c8_85] : memref<24x64xf32, #tpu.memory_space<vmem>>, vector<3x8xf32>
    tpu.vector_store %arg26[%c9_84, %c8_85], %144 {strides = array<i32>} : memref<24x64xf32, #tpu.memory_space<vmem>>, vector<3x8xf32>,
    %146 = vector.extract_strided_slice %141 {offsets = [6, 0], sizes = [3, 8], strides = [1, 1]} : vector<24x8xf32> to vector<3x8xf32>
    %c9_86 = arith.constant 9 : index
    %c16_87 = arith.constant 16 : index
    %147 = vector.load %arg26[%c9_86, %c16_87] : memref<24x64xf32, #tpu.memory_space<vmem>>, vector<3x8xf32>
    tpu.vector_store %arg26[%c9_86, %c16_87], %146 {strides = array<i32>} : memref<24x64xf32, #tpu.memory_space<vmem>>, vector<3x8xf32>,
    %148 = vector.extract_strided_slice %141 {offsets = [9, 0], sizes = [3, 8], strides = [1, 1]} : vector<24x8xf32> to vector<3x8xf32>
    %c9_88 = arith.constant 9 : index
    %c24_89 = arith.constant 24 : index
    %149 = vector.load %arg26[%c9_88, %c24_89] : memref<24x64xf32, #tpu.memory_space<vmem>>, vector<3x8xf32>
    tpu.vector_store %arg26[%c9_88, %c24_89], %148 {strides = array<i32>} : memref<24x64xf32, #tpu.memory_space<vmem>>, vector<3x8xf32>,
    %150 = vector.extract_strided_slice %141 {offsets = [12, 0], sizes = [3, 8], strides = [1, 1]} : vector<24x8xf32> to vector<3x8xf32>
    %c9_90 = arith.constant 9 : index
    %c32_91 = arith.constant 32 : index
    %151 = vector.load %arg26[%c9_90, %c32_91] : memref<24x64xf32, #tpu.memory_space<vmem>>, vector<3x8xf32>
    tpu.vector_store %arg26[%c9_90, %c32_91], %150 {strides = array<i32>} : memref<24x64xf32, #tpu.memory_space<vmem>>, vector<3x8xf32>,
    %152 = vector.extract_strided_slice %141 {offsets = [15, 0], sizes = [3, 8], strides = [1, 1]} : vector<24x8xf32> to vector<3x8xf32>
    %c9_92 = arith.constant 9 : index
    %c40_93 = arith.constant 40 : index
    %153 = vector.load %arg26[%c9_92, %c40_93] : memref<24x64xf32, #tpu.memory_space<vmem>>, vector<3x8xf32>
    tpu.vector_store %arg26[%c9_92, %c40_93], %152 {strides = array<i32>} : memref<24x64xf32, #tpu.memory_space<vmem>>, vector<3x8xf32>,
    %154 = vector.extract_strided_slice %141 {offsets = [18, 0], sizes = [3, 8], strides = [1, 1]} : vector<24x8xf32> to vector<3x8xf32>
    %c9_94 = arith.constant 9 : index
    %c48_95 = arith.constant 48 : index
    %155 = vector.load %arg26[%c9_94, %c48_95] : memref<24x64xf32, #tpu.memory_space<vmem>>, vector<3x8xf32>
    tpu.vector_store %arg26[%c9_94, %c48_95], %154 {strides = array<i32>} : memref<24x64xf32, #tpu.memory_space<vmem>>, vector<3x8xf32>,
    %156 = vector.extract_strided_slice %141 {offsets = [21, 0], sizes = [3, 8], strides = [1, 1]} : vector<24x8xf32> to vector<3x8xf32>
    %c9_96 = arith.constant 9 : index
    %c56_97 = arith.constant 56 : index
    %157 = vector.load %arg26[%c9_96, %c56_97] : memref<24x64xf32, #tpu.memory_space<vmem>>, vector<3x8xf32>
    tpu.vector_store %arg26[%c9_96, %c56_97], %156 {strides = array<i32>} : memref<24x64xf32, #tpu.memory_space<vmem>>, vector<3x8xf32>,
    %158 = vector.extract_strided_slice %24 {offsets = [0, 32], sizes = [24, 8], strides = [1, 1]} : vector<24x64xf32> to vector<24x8xf32>
    %159 = vector.extract_strided_slice %21 {offsets = [0, 32], sizes = [24, 8], strides = [1, 1]} : vector<24x64xf32> to vector<24x8xf32>
    %160 = vector.extract_strided_slice %22 {offsets = [0, 32], sizes = [24, 8], strides = [1, 1]} : vector<24x64xf32> to vector<24x8xf32>
    %cst_98 = arith.constant dense<0.000000e+00> : vector<24x24xf32>
    %161 = tpu.matmul %158, %159, %cst_98 {dimension_numbers = #tpu.dot_dimension_numbers<[1], [1], [0], [0], [0, 0, 1, 0], [], []>} : vector<24x8xf32>, vector<24x8xf32>, vector<24x24xf32> -> vector<24x24xf32>
    %cst_99 = arith.constant 0.353553385 : f32
    %162 = vector.broadcast %cst_99 : f32 to vector<24x24xf32>
    %163 = arith.mulf %161, %162 : vector<24x24xf32>
    %164 = arith.addf %163, %25 : vector<24x24xf32>
    %cst_100 = arith.constant dense<0xFF800000> : vector<24xf32>
    %165 = vector.multi_reduction <maximumf>, %164, %cst_100 [1] : vector<24x24xf32> to vector<24xf32>
    %166 = vector.shape_cast %165 : vector<24xf32> to vector<24x1xf32>
    %167 = vector.broadcast %166 : vector<24x1xf32> to vector<24x24xf32>
    %168 = arith.subf %164, %167 : vector<24x24xf32>
    %169 = math.exp %168 : vector<24x24xf32>
    %cst_101 = arith.constant dense<0.000000e+00> : vector<24xf32>
    %170 = vector.multi_reduction <add>, %169, %cst_101 [1] : vector<24x24xf32> to vector<24xf32>
    %171 = vector.shape_cast %170 : vector<24xf32> to vector<24x1xf32>
    %172 = vector.broadcast %171 : vector<24x1xf32> to vector<24x24xf32>
    %173 = arith.divf %169, %172 : vector<24x24xf32>
    %cst_102 = arith.constant dense<0.000000e+00> : vector<24x8xf32>
    %174 = tpu.matmul %173, %160, %cst_102 {dimension_numbers = #tpu.dot_dimension_numbers<[1], [0], [0], [1], [0, 0, 1, 1], [], []>} : vector<24x24xf32>, vector<24x8xf32>, vector<24x8xf32> -> vector<24x8xf32>
    %175 = vector.extract_strided_slice %174 {offsets = [0, 0], sizes = [3, 8], strides = [1, 1]} : vector<24x8xf32> to vector<3x8xf32>
    %c12 = arith.constant 12 : index
    %c0_103 = arith.constant 0 : index
    %176 = vector.load %arg26[%c12, %c0_103] : memref<24x64xf32, #tpu.memory_space<vmem>>, vector<3x8xf32>
    tpu.vector_store %arg26[%c12, %c0_103], %175 {strides = array<i32>} : memref<24x64xf32, #tpu.memory_space<vmem>>, vector<3x8xf32>,
    %177 = vector.extract_strided_slice %174 {offsets = [3, 0], sizes = [3, 8], strides = [1, 1]} : vector<24x8xf32> to vector<3x8xf32>
    %c12_104 = arith.constant 12 : index
    %c8_105 = arith.constant 8 : index
    %178 = vector.load %arg26[%c12_104, %c8_105] : memref<24x64xf32, #tpu.memory_space<vmem>>, vector<3x8xf32>
    tpu.vector_store %arg26[%c12_104, %c8_105], %177 {strides = array<i32>} : memref<24x64xf32, #tpu.memory_space<vmem>>, vector<3x8xf32>,
    %179 = vector.extract_strided_slice %174 {offsets = [6, 0], sizes = [3, 8], strides = [1, 1]} : vector<24x8xf32> to vector<3x8xf32>
    %c12_106 = arith.constant 12 : index
    %c16_107 = arith.constant 16 : index
    %180 = vector.load %arg26[%c12_106, %c16_107] : memref<24x64xf32, #tpu.memory_space<vmem>>, vector<3x8xf32>
    tpu.vector_store %arg26[%c12_106, %c16_107], %179 {strides = array<i32>} : memref<24x64xf32, #tpu.memory_space<vmem>>, vector<3x8xf32>,
    %181 = vector.extract_strided_slice %174 {offsets = [9, 0], sizes = [3, 8], strides = [1, 1]} : vector<24x8xf32> to vector<3x8xf32>
    %c12_108 = arith.constant 12 : index
    %c24_109 = arith.constant 24 : index
    %182 = vector.load %arg26[%c12_108, %c24_109] : memref<24x64xf32, #tpu.memory_space<vmem>>, vector<3x8xf32>
    tpu.vector_store %arg26[%c12_108, %c24_109], %181 {strides = array<i32>} : memref<24x64xf32, #tpu.memory_space<vmem>>, vector<3x8xf32>,
    %183 = vector.extract_strided_slice %174 {offsets = [12, 0], sizes = [3, 8], strides = [1, 1]} : vector<24x8xf32> to vector<3x8xf32>
    %c12_110 = arith.constant 12 : index
    %c32_111 = arith.constant 32 : index
    %184 = vector.load %arg26[%c12_110, %c32_111] : memref<24x64xf32, #tpu.memory_space<vmem>>, vector<3x8xf32>
    tpu.vector_store %arg26[%c12_110, %c32_111], %183 {strides = array<i32>} : memref<24x64xf32, #tpu.memory_space<vmem>>, vector<3x8xf32>,
    %185 = vector.extract_strided_slice %174 {offsets = [15, 0], sizes = [3, 8], strides = [1, 1]} : vector<24x8xf32> to vector<3x8xf32>
    %c12_112 = arith.constant 12 : index
    %c40_113 = arith.constant 40 : index
    %186 = vector.load %arg26[%c12_112, %c40_113] : memref<24x64xf32, #tpu.memory_space<vmem>>, vector<3x8xf32>
    tpu.vector_store %arg26[%c12_112, %c40_113], %185 {strides = array<i32>} : memref<24x64xf32, #tpu.memory_space<vmem>>, vector<3x8xf32>,
    %187 = vector.extract_strided_slice %174 {offsets = [18, 0], sizes = [3, 8], strides = [1, 1]} : vector<24x8xf32> to vector<3x8xf32>
    %c12_114 = arith.constant 12 : index
    %c48_115 = arith.constant 48 : index
    %188 = vector.load %arg26[%c12_114, %c48_115] : memref<24x64xf32, #tpu.memory_space<vmem>>, vector<3x8xf32>
    tpu.vector_store %arg26[%c12_114, %c48_115], %187 {strides = array<i32>} : memref<24x64xf32, #tpu.memory_space<vmem>>, vector<3x8xf32>,
    %189 = vector.extract_strided_slice %174 {offsets = [21, 0], sizes = [3, 8], strides = [1, 1]} : vector<24x8xf32> to vector<3x8xf32>
    %c12_116 = arith.constant 12 : index
    %c56_117 = arith.constant 56 : index
    %190 = vector.load %arg26[%c12_116, %c56_117] : memref<24x64xf32, #tpu.memory_space<vmem>>, vector<3x8xf32>
    tpu.vector_store %arg26[%c12_116, %c56_117], %189 {strides = array<i32>} : memref<24x64xf32, #tpu.memory_space<vmem>>, vector<3x8xf32>,
    %191 = vector.extract_strided_slice %24 {offsets = [0, 40], sizes = [24, 8], strides = [1, 1]} : vector<24x64xf32> to vector<24x8xf32>
    %192 = vector.extract_strided_slice %21 {offsets = [0, 40], sizes = [24, 8], strides = [1, 1]} : vector<24x64xf32> to vector<24x8xf32>
    %193 = vector.extract_strided_slice %22 {offsets = [0, 40], sizes = [24, 8], strides = [1, 1]} : vector<24x64xf32> to vector<24x8xf32>
    %cst_118 = arith.constant dense<0.000000e+00> : vector<24x24xf32>
    %194 = tpu.matmul %191, %192, %cst_118 {dimension_numbers = #tpu.dot_dimension_numbers<[1], [1], [0], [0], [0, 0, 1, 0], [], []>} : vector<24x8xf32>, vector<24x8xf32>, vector<24x24xf32> -> vector<24x24xf32>
    %cst_119 = arith.constant 0.353553385 : f32
    %195 = vector.broadcast %cst_119 : f32 to vector<24x24xf32>
    %196 = arith.mulf %194, %195 : vector<24x24xf32>
    %197 = arith.addf %196, %25 : vector<24x24xf32>
    %cst_120 = arith.constant dense<0xFF800000> : vector<24xf32>
    %198 = vector.multi_reduction <maximumf>, %197, %cst_120 [1] : vector<24x24xf32> to vector<24xf32>
    %199 = vector.shape_cast %198 : vector<24xf32> to vector<24x1xf32>
    %200 = vector.broadcast %199 : vector<24x1xf32> to vector<24x24xf32>
    %201 = arith.subf %197, %200 : vector<24x24xf32>
    %202 = math.exp %201 : vector<24x24xf32>
    %cst_121 = arith.constant dense<0.000000e+00> : vector<24xf32>
    %203 = vector.multi_reduction <add>, %202, %cst_121 [1] : vector<24x24xf32> to vector<24xf32>
    %204 = vector.shape_cast %203 : vector<24xf32> to vector<24x1xf32>
    %205 = vector.broadcast %204 : vector<24x1xf32> to vector<24x24xf32>
    %206 = arith.divf %202, %205 : vector<24x24xf32>
    %cst_122 = arith.constant dense<0.000000e+00> : vector<24x8xf32>
    %207 = tpu.matmul %206, %193, %cst_122 {dimension_numbers = #tpu.dot_dimension_numbers<[1], [0], [0], [1], [0, 0, 1, 1], [], []>} : vector<24x24xf32>, vector<24x8xf32>, vector<24x8xf32> -> vector<24x8xf32>
    %208 = vector.extract_strided_slice %207 {offsets = [0, 0], sizes = [3, 8], strides = [1, 1]} : vector<24x8xf32> to vector<3x8xf32>
    %c15 = arith.constant 15 : index
    %c0_123 = arith.constant 0 : index
    %209 = vector.load %arg26[%c15, %c0_123] : memref<24x64xf32, #tpu.memory_space<vmem>>, vector<3x8xf32>
    tpu.vector_store %arg26[%c15, %c0_123], %208 {strides = array<i32>} : memref<24x64xf32, #tpu.memory_space<vmem>>, vector<3x8xf32>,
    %210 = vector.extract_strided_slice %207 {offsets = [3, 0], sizes = [3, 8], strides = [1, 1]} : vector<24x8xf32> to vector<3x8xf32>
    %c15_124 = arith.constant 15 : index
    %c8_125 = arith.constant 8 : index
    %211 = vector.load %arg26[%c15_124, %c8_125] : memref<24x64xf32, #tpu.memory_space<vmem>>, vector<3x8xf32>
    tpu.vector_store %arg26[%c15_124, %c8_125], %210 {strides = array<i32>} : memref<24x64xf32, #tpu.memory_space<vmem>>, vector<3x8xf32>,
    %212 = vector.extract_strided_slice %207 {offsets = [6, 0], sizes = [3, 8], strides = [1, 1]} : vector<24x8xf32> to vector<3x8xf32>
    %c15_126 = arith.constant 15 : index
    %c16_127 = arith.constant 16 : index
    %213 = vector.load %arg26[%c15_126, %c16_127] : memref<24x64xf32, #tpu.memory_space<vmem>>, vector<3x8xf32>
    tpu.vector_store %arg26[%c15_126, %c16_127], %212 {strides = array<i32>} : memref<24x64xf32, #tpu.memory_space<vmem>>, vector<3x8xf32>,
    %214 = vector.extract_strided_slice %207 {offsets = [9, 0], sizes = [3, 8], strides = [1, 1]} : vector<24x8xf32> to vector<3x8xf32>
    %c15_128 = arith.constant 15 : index
    %c24_129 = arith.constant 24 : index
    %215 = vector.load %arg26[%c15_128, %c24_129] : memref<24x64xf32, #tpu.memory_space<vmem>>, vector<3x8xf32>
    tpu.vector_store %arg26[%c15_128, %c24_129], %214 {strides = array<i32>} : memref<24x64xf32, #tpu.memory_space<vmem>>, vector<3x8xf32>,
    %216 = vector.extract_strided_slice %207 {offsets = [12, 0], sizes = [3, 8], strides = [1, 1]} : vector<24x8xf32> to vector<3x8xf32>
    %c15_130 = arith.constant 15 : index
    %c32_131 = arith.constant 32 : index
    %217 = vector.load %arg26[%c15_130, %c32_131] : memref<24x64xf32, #tpu.memory_space<vmem>>, vector<3x8xf32>
    tpu.vector_store %arg26[%c15_130, %c32_131], %216 {strides = array<i32>} : memref<24x64xf32, #tpu.memory_space<vmem>>, vector<3x8xf32>,
    %218 = vector.extract_strided_slice %207 {offsets = [15, 0], sizes = [3, 8], strides = [1, 1]} : vector<24x8xf32> to vector<3x8xf32>
    %c15_132 = arith.constant 15 : index
    %c40_133 = arith.constant 40 : index
    %219 = vector.load %arg26[%c15_132, %c40_133] : memref<24x64xf32, #tpu.memory_space<vmem>>, vector<3x8xf32>
    tpu.vector_store %arg26[%c15_132, %c40_133], %218 {strides = array<i32>} : memref<24x64xf32, #tpu.memory_space<vmem>>, vector<3x8xf32>,
    %220 = vector.extract_strided_slice %207 {offsets = [18, 0], sizes = [3, 8], strides = [1, 1]} : vector<24x8xf32> to vector<3x8xf32>
    %c15_134 = arith.constant 15 : index
    %c48_135 = arith.constant 48 : index
    %221 = vector.load %arg26[%c15_134, %c48_135] : memref<24x64xf32, #tpu.memory_space<vmem>>, vector<3x8xf32>
    tpu.vector_store %arg26[%c15_134, %c48_135], %220 {strides = array<i32>} : memref<24x64xf32, #tpu.memory_space<vmem>>, vector<3x8xf32>,
    %222 = vector.extract_strided_slice %207 {offsets = [21, 0], sizes = [3, 8], strides = [1, 1]} : vector<24x8xf32> to vector<3x8xf32>
    %c15_136 = arith.constant 15 : index
    %c56_137 = arith.constant 56 : index
    %223 = vector.load %arg26[%c15_136, %c56_137] : memref<24x64xf32, #tpu.memory_space<vmem>>, vector<3x8xf32>
    tpu.vector_store %arg26[%c15_136, %c56_137], %222 {strides = array<i32>} : memref<24x64xf32, #tpu.memory_space<vmem>>, vector<3x8xf32>,
    %224 = vector.extract_strided_slice %24 {offsets = [0, 48], sizes = [24, 8], strides = [1, 1]} : vector<24x64xf32> to vector<24x8xf32>
    %225 = vector.extract_strided_slice %21 {offsets = [0, 48], sizes = [24, 8], strides = [1, 1]} : vector<24x64xf32> to vector<24x8xf32>
    %226 = vector.extract_strided_slice %22 {offsets = [0, 48], sizes = [24, 8], strides = [1, 1]} : vector<24x64xf32> to vector<24x8xf32>
    %cst_138 = arith.constant dense<0.000000e+00> : vector<24x24xf32>
    %227 = tpu.matmul %224, %225, %cst_138 {dimension_numbers = #tpu.dot_dimension_numbers<[1], [1], [0], [0], [0, 0, 1, 0], [], []>} : vector<24x8xf32>, vector<24x8xf32>, vector<24x24xf32> -> vector<24x24xf32>
    %cst_139 = arith.constant 0.353553385 : f32
    %228 = vector.broadcast %cst_139 : f32 to vector<24x24xf32>
    %229 = arith.mulf %227, %228 : vector<24x24xf32>
    %230 = arith.addf %229, %25 : vector<24x24xf32>
    %cst_140 = arith.constant dense<0xFF800000> : vector<24xf32>
    %231 = vector.multi_reduction <maximumf>, %230, %cst_140 [1] : vector<24x24xf32> to vector<24xf32>
    %232 = vector.shape_cast %231 : vector<24xf32> to vector<24x1xf32>
    %233 = vector.broadcast %232 : vector<24x1xf32> to vector<24x24xf32>
    %234 = arith.subf %230, %233 : vector<24x24xf32>
    %235 = math.exp %234 : vector<24x24xf32>
    %cst_141 = arith.constant dense<0.000000e+00> : vector<24xf32>
    %236 = vector.multi_reduction <add>, %235, %cst_141 [1] : vector<24x24xf32> to vector<24xf32>
    %237 = vector.shape_cast %236 : vector<24xf32> to vector<24x1xf32>
    %238 = vector.broadcast %237 : vector<24x1xf32> to vector<24x24xf32>
    %239 = arith.divf %235, %238 : vector<24x24xf32>
    %cst_142 = arith.constant dense<0.000000e+00> : vector<24x8xf32>
    %240 = tpu.matmul %239, %226, %cst_142 {dimension_numbers = #tpu.dot_dimension_numbers<[1], [0], [0], [1], [0, 0, 1, 1], [], []>} : vector<24x24xf32>, vector<24x8xf32>, vector<24x8xf32> -> vector<24x8xf32>
    %241 = vector.extract_strided_slice %240 {offsets = [0, 0], sizes = [3, 8], strides = [1, 1]} : vector<24x8xf32> to vector<3x8xf32>
    %c18 = arith.constant 18 : index
    %c0_143 = arith.constant 0 : index
    %242 = vector.load %arg26[%c18, %c0_143] : memref<24x64xf32, #tpu.memory_space<vmem>>, vector<3x8xf32>
    tpu.vector_store %arg26[%c18, %c0_143], %241 {strides = array<i32>} : memref<24x64xf32, #tpu.memory_space<vmem>>, vector<3x8xf32>,
    %243 = vector.extract_strided_slice %240 {offsets = [3, 0], sizes = [3, 8], strides = [1, 1]} : vector<24x8xf32> to vector<3x8xf32>
    %c18_144 = arith.constant 18 : index
    %c8_145 = arith.constant 8 : index
    %244 = vector.load %arg26[%c18_144, %c8_145] : memref<24x64xf32, #tpu.memory_space<vmem>>, vector<3x8xf32>
    tpu.vector_store %arg26[%c18_144, %c8_145], %243 {strides = array<i32>} : memref<24x64xf32, #tpu.memory_space<vmem>>, vector<3x8xf32>,
    %245 = vector.extract_strided_slice %240 {offsets = [6, 0], sizes = [3, 8], strides = [1, 1]} : vector<24x8xf32> to vector<3x8xf32>
    %c18_146 = arith.constant 18 : index
    %c16_147 = arith.constant 16 : index
    %246 = vector.load %arg26[%c18_146, %c16_147] : memref<24x64xf32, #tpu.memory_space<vmem>>, vector<3x8xf32>
    tpu.vector_store %arg26[%c18_146, %c16_147], %245 {strides = array<i32>} : memref<24x64xf32, #tpu.memory_space<vmem>>, vector<3x8xf32>,
    %247 = vector.extract_strided_slice %240 {offsets = [9, 0], sizes = [3, 8], strides = [1, 1]} : vector<24x8xf32> to vector<3x8xf32>
    %c18_148 = arith.constant 18 : index
    %c24_149 = arith.constant 24 : index
    %248 = vector.load %arg26[%c18_148, %c24_149] : memref<24x64xf32, #tpu.memory_space<vmem>>, vector<3x8xf32>
    tpu.vector_store %arg26[%c18_148, %c24_149], %247 {strides = array<i32>} : memref<24x64xf32, #tpu.memory_space<vmem>>, vector<3x8xf32>,
    %249 = vector.extract_strided_slice %240 {offsets = [12, 0], sizes = [3, 8], strides = [1, 1]} : vector<24x8xf32> to vector<3x8xf32>
    %c18_150 = arith.constant 18 : index
    %c32_151 = arith.constant 32 : index
    %250 = vector.load %arg26[%c18_150, %c32_151] : memref<24x64xf32, #tpu.memory_space<vmem>>, vector<3x8xf32>
    tpu.vector_store %arg26[%c18_150, %c32_151], %249 {strides = array<i32>} : memref<24x64xf32, #tpu.memory_space<vmem>>, vector<3x8xf32>,
    %251 = vector.extract_strided_slice %240 {offsets = [15, 0], sizes = [3, 8], strides = [1, 1]} : vector<24x8xf32> to vector<3x8xf32>
    %c18_152 = arith.constant 18 : index
    %c40_153 = arith.constant 40 : index
    %252 = vector.load %arg26[%c18_152, %c40_153] : memref<24x64xf32, #tpu.memory_space<vmem>>, vector<3x8xf32>
    tpu.vector_store %arg26[%c18_152, %c40_153], %251 {strides = array<i32>} : memref<24x64xf32, #tpu.memory_space<vmem>>, vector<3x8xf32>,
    %253 = vector.extract_strided_slice %240 {offsets = [18, 0], sizes = [3, 8], strides = [1, 1]} : vector<24x8xf32> to vector<3x8xf32>
    %c18_154 = arith.constant 18 : index
    %c48_155 = arith.constant 48 : index
    %254 = vector.load %arg26[%c18_154, %c48_155] : memref<24x64xf32, #tpu.memory_space<vmem>>, vector<3x8xf32>
    tpu.vector_store %arg26[%c18_154, %c48_155], %253 {strides = array<i32>} : memref<24x64xf32, #tpu.memory_space<vmem>>, vector<3x8xf32>,
    %255 = vector.extract_strided_slice %240 {offsets = [21, 0], sizes = [3, 8], strides = [1, 1]} : vector<24x8xf32> to vector<3x8xf32>
    %c18_156 = arith.constant 18 : index
    %c56_157 = arith.constant 56 : index
    %256 = vector.load %arg26[%c18_156, %c56_157] : memref<24x64xf32, #tpu.memory_space<vmem>>, vector<3x8xf32>
    tpu.vector_store %arg26[%c18_156, %c56_157], %255 {strides = array<i32>} : memref<24x64xf32, #tpu.memory_space<vmem>>, vector<3x8xf32>,
    %257 = vector.extract_strided_slice %24 {offsets = [0, 56], sizes = [24, 8], strides = [1, 1]} : vector<24x64xf32> to vector<24x8xf32>
    %258 = vector.extract_strided_slice %21 {offsets = [0, 56], sizes = [24, 8], strides = [1, 1]} : vector<24x64xf32> to vector<24x8xf32>
    %259 = vector.extract_strided_slice %22 {offsets = [0, 56], sizes = [24, 8], strides = [1, 1]} : vector<24x64xf32> to vector<24x8xf32>
    %cst_158 = arith.constant dense<0.000000e+00> : vector<24x24xf32>
    %260 = tpu.matmul %257, %258, %cst_158 {dimension_numbers = #tpu.dot_dimension_numbers<[1], [1], [0], [0], [0, 0, 1, 0], [], []>} : vector<24x8xf32>, vector<24x8xf32>, vector<24x24xf32> -> vector<24x24xf32>
    %cst_159 = arith.constant 0.353553385 : f32
    %261 = vector.broadcast %cst_159 : f32 to vector<24x24xf32>
    %262 = arith.mulf %260, %261 : vector<24x24xf32>
    %263 = arith.addf %262, %25 : vector<24x24xf32>
    %cst_160 = arith.constant dense<0xFF800000> : vector<24xf32>
    %264 = vector.multi_reduction <maximumf>, %263, %cst_160 [1] : vector<24x24xf32> to vector<24xf32>
    %265 = vector.shape_cast %264 : vector<24xf32> to vector<24x1xf32>
    %266 = vector.broadcast %265 : vector<24x1xf32> to vector<24x24xf32>
    %267 = arith.subf %263, %266 : vector<24x24xf32>
    %268 = math.exp %267 : vector<24x24xf32>
    %cst_161 = arith.constant dense<0.000000e+00> : vector<24xf32>
    %269 = vector.multi_reduction <add>, %268, %cst_161 [1] : vector<24x24xf32> to vector<24xf32>
    %270 = vector.shape_cast %269 : vector<24xf32> to vector<24x1xf32>
    %271 = vector.broadcast %270 : vector<24x1xf32> to vector<24x24xf32>
    %272 = arith.divf %268, %271 : vector<24x24xf32>
    %cst_162 = arith.constant dense<0.000000e+00> : vector<24x8xf32>
    %273 = tpu.matmul %272, %259, %cst_162 {dimension_numbers = #tpu.dot_dimension_numbers<[1], [0], [0], [1], [0, 0, 1, 1], [], []>} : vector<24x24xf32>, vector<24x8xf32>, vector<24x8xf32> -> vector<24x8xf32>
    %274 = vector.extract_strided_slice %273 {offsets = [0, 0], sizes = [3, 8], strides = [1, 1]} : vector<24x8xf32> to vector<3x8xf32>
    %c21 = arith.constant 21 : index
    %c0_163 = arith.constant 0 : index
    %275 = vector.load %arg26[%c21, %c0_163] : memref<24x64xf32, #tpu.memory_space<vmem>>, vector<3x8xf32>
    tpu.vector_store %arg26[%c21, %c0_163], %274 {strides = array<i32>} : memref<24x64xf32, #tpu.memory_space<vmem>>, vector<3x8xf32>,
    %276 = vector.extract_strided_slice %273 {offsets = [3, 0], sizes = [3, 8], strides = [1, 1]} : vector<24x8xf32> to vector<3x8xf32>
    %c21_164 = arith.constant 21 : index
    %c8_165 = arith.constant 8 : index
    %277 = vector.load %arg26[%c21_164, %c8_165] : memref<24x64xf32, #tpu.memory_space<vmem>>, vector<3x8xf32>
    tpu.vector_store %arg26[%c21_164, %c8_165], %276 {strides = array<i32>} : memref<24x64xf32, #tpu.memory_space<vmem>>, vector<3x8xf32>,
    %278 = vector.extract_strided_slice %273 {offsets = [6, 0], sizes = [3, 8], strides = [1, 1]} : vector<24x8xf32> to vector<3x8xf32>
    %c21_166 = arith.constant 21 : index
    %c16_167 = arith.constant 16 : index
    %279 = vector.load %arg26[%c21_166, %c16_167] : memref<24x64xf32, #tpu.memory_space<vmem>>, vector<3x8xf32>
    tpu.vector_store %arg26[%c21_166, %c16_167], %278 {strides = array<i32>} : memref<24x64xf32, #tpu.memory_space<vmem>>, vector<3x8xf32>,
    %280 = vector.extract_strided_slice %273 {offsets = [9, 0], sizes = [3, 8], strides = [1, 1]} : vector<24x8xf32> to vector<3x8xf32>
    %c21_168 = arith.constant 21 : index
    %c24_169 = arith.constant 24 : index
    %281 = vector.load %arg26[%c21_168, %c24_169] : memref<24x64xf32, #tpu.memory_space<vmem>>, vector<3x8xf32>
    tpu.vector_store %arg26[%c21_168, %c24_169], %280 {strides = array<i32>} : memref<24x64xf32, #tpu.memory_space<vmem>>, vector<3x8xf32>,
    %282 = vector.extract_strided_slice %273 {offsets = [12, 0], sizes = [3, 8], strides = [1, 1]} : vector<24x8xf32> to vector<3x8xf32>
    %c21_170 = arith.constant 21 : index
    %c32_171 = arith.constant 32 : index
    %283 = vector.load %arg26[%c21_170, %c32_171] : memref<24x64xf32, #tpu.memory_space<vmem>>, vector<3x8xf32>
    tpu.vector_store %arg26[%c21_170, %c32_171], %282 {strides = array<i32>} : memref<24x64xf32, #tpu.memory_space<vmem>>, vector<3x8xf32>,
    %284 = vector.extract_strided_slice %273 {offsets = [15, 0], sizes = [3, 8], strides = [1, 1]} : vector<24x8xf32> to vector<3x8xf32>
    %c21_172 = arith.constant 21 : index
    %c40_173 = arith.constant 40 : index
    %285 = vector.load %arg26[%c21_172, %c40_173] : memref<24x64xf32, #tpu.memory_space<vmem>>, vector<3x8xf32>
    tpu.vector_store %arg26[%c21_172, %c40_173], %284 {strides = array<i32>} : memref<24x64xf32, #tpu.memory_space<vmem>>, vector<3x8xf32>,
    %286 = vector.extract_strided_slice %273 {offsets = [18, 0], sizes = [3, 8], strides = [1, 1]} : vector<24x8xf32> to vector<3x8xf32>
    %c21_174 = arith.constant 21 : index
    %c48_175 = arith.constant 48 : index
    %287 = vector.load %arg26[%c21_174, %c48_175] : memref<24x64xf32, #tpu.memory_space<vmem>>, vector<3x8xf32>
    tpu.vector_store %arg26[%c21_174, %c48_175], %286 {strides = array<i32>} : memref<24x64xf32, #tpu.memory_space<vmem>>, vector<3x8xf32>,
    %288 = vector.extract_strided_slice %273 {offsets = [21, 0], sizes = [3, 8], strides = [1, 1]} : vector<24x8xf32> to vector<3x8xf32>
    %c21_176 = arith.constant 21 : index
    %c56_177 = arith.constant 56 : index
    %289 = vector.load %arg26[%c21_176, %c56_177] : memref<24x64xf32, #tpu.memory_space<vmem>>, vector<3x8xf32>
    tpu.vector_store %arg26[%c21_176, %c56_177], %288 {strides = array<i32>} : memref<24x64xf32, #tpu.memory_space<vmem>>, vector<3x8xf32>,
    %c0_178 = arith.constant 0 : index
    %c0_179 = arith.constant 0 : index
    %290 = vector.load %arg26[%c0_178, %c0_179] : memref<24x64xf32, #tpu.memory_space<vmem>>, vector<24x64xf32>
    %c0_180 = arith.constant 0 : index
    %c0_181 = arith.constant 0 : index
    %291 = vector.load %arg8[%c0_180, %c0_181] : memref<64x64xf32, #tpu.memory_space<vmem>>, vector<64x64xf32>
    %cst_182 = arith.constant dense<0.000000e+00> : vector<24x64xf32>
    %292 = tpu.matmul %290, %291, %cst_182 {dimension_numbers = #tpu.dot_dimension_numbers<[1], [0], [0], [1], [0, 0, 1, 1], [], []>} : vector<24x64xf32>, vector<64x64xf32>, vector<24x64xf32> -> vector<24x64xf32>
    %293 = arith.addf %1, %292 : vector<24x64xf32>
    %c0_183 = arith.constant 0 : index
    %c0_184 = arith.constant 0 : index
    %294 = vector.load %arg9[%c0_183, %c0_184] : memref<1x64xf32, #tpu.memory_space<vmem>>, vector<1x64xf32>
    %295 = vector.broadcast %294 : vector<1x64xf32> to vector<24x64xf32>
    %296 = arith.addf %293, %295 : vector<24x64xf32>
    %297 = vector.extract_strided_slice %2 {offsets = [0, 0], sizes = [1, 64], strides = [1, 1]} : vector<8x64xf32> to vector<1x64xf32>
    %298 = vector.extract_strided_slice %2 {offsets = [1, 0], sizes = [1, 64], strides = [1, 1]} : vector<8x64xf32> to vector<1x64xf32>
    %cst_185 = arith.constant dense<0.000000e+00> : vector<24xf32>
    %299 = vector.multi_reduction <add>, %296, %cst_185 [1] : vector<24x64xf32> to vector<24xf32>
    %300 = vector.shape_cast %299 : vector<24xf32> to vector<24x1xf32>
    %cst_186 = arith.constant 6.400000e+01 : f32
    %301 = vector.broadcast %cst_186 : f32 to vector<24x1xf32>
    %302 = arith.divf %300, %301 : vector<24x1xf32>
    %303 = arith.mulf %296, %296 : vector<24x64xf32>
    %cst_187 = arith.constant dense<0.000000e+00> : vector<24xf32>
    %304 = vector.multi_reduction <add>, %303, %cst_187 [1] : vector<24x64xf32> to vector<24xf32>
    %305 = vector.shape_cast %304 : vector<24xf32> to vector<24x1xf32>
    %cst_188 = arith.constant 6.400000e+01 : f32
    %306 = vector.broadcast %cst_188 : f32 to vector<24x1xf32>
    %307 = arith.divf %305, %306 : vector<24x1xf32>
    %308 = arith.mulf %302, %302 : vector<24x1xf32>
    %309 = arith.subf %307, %308 : vector<24x1xf32>
    %310 = vector.broadcast %302 : vector<24x1xf32> to vector<24x64xf32>
    %311 = arith.subf %296, %310 : vector<24x64xf32>
    %cst_189 = arith.constant 9.99999974E-6 : f32
    %312 = vector.broadcast %cst_189 : f32 to vector<24x1xf32>
    %313 = arith.addf %309, %312 : vector<24x1xf32>
    %314 = math.rsqrt %313 : vector<24x1xf32>
    %315 = vector.broadcast %314 : vector<24x1xf32> to vector<24x64xf32>
    %316 = arith.mulf %311, %315 : vector<24x64xf32>
    %317 = vector.broadcast %297 : vector<1x64xf32> to vector<24x64xf32>
    %318 = arith.mulf %316, %317 : vector<24x64xf32>
    %319 = vector.broadcast %298 : vector<1x64xf32> to vector<24x64xf32>
    %320 = arith.addf %318, %319 : vector<24x64xf32>
    %c0_190 = arith.constant 0 : index
    %c0_191 = arith.constant 0 : index
    %321 = vector.load %arg10[%c0_190, %c0_191] : memref<64x64xf32, #tpu.memory_space<vmem>>, vector<64x64xf32>
    %cst_192 = arith.constant dense<0.000000e+00> : vector<24x64xf32>
    %322 = tpu.matmul %320, %321, %cst_192 {dimension_numbers = #tpu.dot_dimension_numbers<[1], [0], [0], [1], [0, 0, 1, 1], [], []>} : vector<24x64xf32>, vector<64x64xf32>, vector<24x64xf32> -> vector<24x64xf32>
    %c0_193 = arith.constant 0 : index
    %c0_194 = arith.constant 0 : index
    %323 = vector.load %arg11[%c0_193, %c0_194] : memref<1x64xf32, #tpu.memory_space<vmem>>, vector<1x64xf32>
    %324 = vector.broadcast %323 : vector<1x64xf32> to vector<24x64xf32>
    %325 = arith.addf %322, %324 : vector<24x64xf32>
    %c0_195 = arith.constant 0 : index
    %c0_196 = arith.constant 0 : index
    %326 = vector.load %arg12[%c0_195, %c0_196] : memref<64x128xf32, #tpu.memory_space<vmem>>, vector<64x128xf32>
    %cst_197 = arith.constant dense<0.000000e+00> : vector<24x128xf32>
    %327 = tpu.matmul %14, %326, %cst_197 {dimension_numbers = #tpu.dot_dimension_numbers<[1], [0], [0], [1], [0, 0, 1, 1], [], []>} : vector<24x64xf32>, vector<64x128xf32>, vector<24x128xf32> -> vector<24x128xf32>
    %c0_198 = arith.constant 0 : index
    %c0_199 = arith.constant 0 : index
    %328 = vector.load %arg13[%c0_198, %c0_199] : memref<1x128xf32, #tpu.memory_space<vmem>>, vector<1x128xf32>
    %329 = vector.broadcast %328 : vector<1x128xf32> to vector<24x128xf32>
    %330 = arith.addf %327, %329 : vector<24x128xf32>
    %331 = vector.extract_strided_slice %330 {offsets = [0, 0], sizes = [24, 64], strides = [1, 1]} : vector<24x128xf32> to vector<24x64xf32>
    %332 = vector.extract_strided_slice %330 {offsets = [0, 64], sizes = [24, 64], strides = [1, 1]} : vector<24x128xf32> to vector<24x64xf32>
    %333 = vector.extract_strided_slice %325 {offsets = [0, 0], sizes = [24, 8], strides = [1, 1]} : vector<24x64xf32> to vector<24x8xf32>
    %334 = vector.extract_strided_slice %331 {offsets = [0, 0], sizes = [24, 8], strides = [1, 1]} : vector<24x64xf32> to vector<24x8xf32>
    %335 = vector.extract_strided_slice %332 {offsets = [0, 0], sizes = [24, 8], strides = [1, 1]} : vector<24x64xf32> to vector<24x8xf32>
    %cst_200 = arith.constant dense<0.000000e+00> : vector<24x24xf32>
    %336 = tpu.matmul %333, %334, %cst_200 {dimension_numbers = #tpu.dot_dimension_numbers<[1], [1], [0], [0], [0, 0, 1, 0], [], []>} : vector<24x8xf32>, vector<24x8xf32>, vector<24x24xf32> -> vector<24x24xf32>
    %cst_201 = arith.constant 0.353553385 : f32
    %337 = vector.broadcast %cst_201 : f32 to vector<24x24xf32>
    %338 = arith.mulf %336, %337 : vector<24x24xf32>
    %cst_202 = arith.constant dense<0xFF800000> : vector<24xf32>
    %339 = vector.multi_reduction <maximumf>, %338, %cst_202 [1] : vector<24x24xf32> to vector<24xf32>
    %340 = vector.shape_cast %339 : vector<24xf32> to vector<24x1xf32>
    %341 = vector.broadcast %340 : vector<24x1xf32> to vector<24x24xf32>
    %342 = arith.subf %338, %341 : vector<24x24xf32>
    %343 = math.exp %342 : vector<24x24xf32>
    %cst_203 = arith.constant dense<0.000000e+00> : vector<24xf32>
    %344 = vector.multi_reduction <add>, %343, %cst_203 [1] : vector<24x24xf32> to vector<24xf32>
    %345 = vector.shape_cast %344 : vector<24xf32> to vector<24x1xf32>
    %346 = vector.broadcast %345 : vector<24x1xf32> to vector<24x24xf32>
    %347 = arith.divf %343, %346 : vector<24x24xf32>
    %cst_204 = arith.constant dense<0.000000e+00> : vector<24x8xf32>
    %348 = tpu.matmul %347, %335, %cst_204 {dimension_numbers = #tpu.dot_dimension_numbers<[1], [0], [0], [1], [0, 0, 1, 1], [], []>} : vector<24x24xf32>, vector<24x8xf32>, vector<24x8xf32> -> vector<24x8xf32>
    %c0_205 = arith.constant 0 : index
    %c0_206 = arith.constant 0 : index
    %349 = vector.load %arg26[%c0_205, %c0_206] : memref<24x64xf32, #tpu.memory_space<vmem>>, vector<24x8xf32>
    tpu.vector_store %arg26[%c0_205, %c0_206], %348 {strides = array<i32>} : memref<24x64xf32, #tpu.memory_space<vmem>>, vector<24x8xf32>,
    %350 = vector.extract_strided_slice %325 {offsets = [0, 8], sizes = [24, 8], strides = [1, 1]} : vector<24x64xf32> to vector<24x8xf32>
    %351 = vector.extract_strided_slice %331 {offsets = [0, 8], sizes = [24, 8], strides = [1, 1]} : vector<24x64xf32> to vector<24x8xf32>
    %352 = vector.extract_strided_slice %332 {offsets = [0, 8], sizes = [24, 8], strides = [1, 1]} : vector<24x64xf32> to vector<24x8xf32>
    %cst_207 = arith.constant dense<0.000000e+00> : vector<24x24xf32>
    %353 = tpu.matmul %350, %351, %cst_207 {dimension_numbers = #tpu.dot_dimension_numbers<[1], [1], [0], [0], [0, 0, 1, 0], [], []>} : vector<24x8xf32>, vector<24x8xf32>, vector<24x24xf32> -> vector<24x24xf32>
    %cst_208 = arith.constant 0.353553385 : f32
    %354 = vector.broadcast %cst_208 : f32 to vector<24x24xf32>
    %355 = arith.mulf %353, %354 : vector<24x24xf32>
    %cst_209 = arith.constant dense<0xFF800000> : vector<24xf32>
    %356 = vector.multi_reduction <maximumf>, %355, %cst_209 [1] : vector<24x24xf32> to vector<24xf32>
    %357 = vector.shape_cast %356 : vector<24xf32> to vector<24x1xf32>
    %358 = vector.broadcast %357 : vector<24x1xf32> to vector<24x24xf32>
    %359 = arith.subf %355, %358 : vector<24x24xf32>
    %360 = math.exp %359 : vector<24x24xf32>
    %cst_210 = arith.constant dense<0.000000e+00> : vector<24xf32>
    %361 = vector.multi_reduction <add>, %360, %cst_210 [1] : vector<24x24xf32> to vector<24xf32>
    %362 = vector.shape_cast %361 : vector<24xf32> to vector<24x1xf32>
    %363 = vector.broadcast %362 : vector<24x1xf32> to vector<24x24xf32>
    %364 = arith.divf %360, %363 : vector<24x24xf32>
    %cst_211 = arith.constant dense<0.000000e+00> : vector<24x8xf32>
    %365 = tpu.matmul %364, %352, %cst_211 {dimension_numbers = #tpu.dot_dimension_numbers<[1], [0], [0], [1], [0, 0, 1, 1], [], []>} : vector<24x24xf32>, vector<24x8xf32>, vector<24x8xf32> -> vector<24x8xf32>
    %c0_212 = arith.constant 0 : index
    %c8_213 = arith.constant 8 : index
    %366 = vector.load %arg26[%c0_212, %c8_213] : memref<24x64xf32, #tpu.memory_space<vmem>>, vector<24x8xf32>
    tpu.vector_store %arg26[%c0_212, %c8_213], %365 {strides = array<i32>} : memref<24x64xf32, #tpu.memory_space<vmem>>, vector<24x8xf32>,
    %367 = vector.extract_strided_slice %325 {offsets = [0, 16], sizes = [24, 8], strides = [1, 1]} : vector<24x64xf32> to vector<24x8xf32>
    %368 = vector.extract_strided_slice %331 {offsets = [0, 16], sizes = [24, 8], strides = [1, 1]} : vector<24x64xf32> to vector<24x8xf32>
    %369 = vector.extract_strided_slice %332 {offsets = [0, 16], sizes = [24, 8], strides = [1, 1]} : vector<24x64xf32> to vector<24x8xf32>
    %cst_214 = arith.constant dense<0.000000e+00> : vector<24x24xf32>
    %370 = tpu.matmul %367, %368, %cst_214 {dimension_numbers = #tpu.dot_dimension_numbers<[1], [1], [0], [0], [0, 0, 1, 0], [], []>} : vector<24x8xf32>, vector<24x8xf32>, vector<24x24xf32> -> vector<24x24xf32>
    %cst_215 = arith.constant 0.353553385 : f32
    %371 = vector.broadcast %cst_215 : f32 to vector<24x24xf32>
    %372 = arith.mulf %370, %371 : vector<24x24xf32>
    %cst_216 = arith.constant dense<0xFF800000> : vector<24xf32>
    %373 = vector.multi_reduction <maximumf>, %372, %cst_216 [1] : vector<24x24xf32> to vector<24xf32>
    %374 = vector.shape_cast %373 : vector<24xf32> to vector<24x1xf32>
    %375 = vector.broadcast %374 : vector<24x1xf32> to vector<24x24xf32>
    %376 = arith.subf %372, %375 : vector<24x24xf32>
    %377 = math.exp %376 : vector<24x24xf32>
    %cst_217 = arith.constant dense<0.000000e+00> : vector<24xf32>
    %378 = vector.multi_reduction <add>, %377, %cst_217 [1] : vector<24x24xf32> to vector<24xf32>
    %379 = vector.shape_cast %378 : vector<24xf32> to vector<24x1xf32>
    %380 = vector.broadcast %379 : vector<24x1xf32> to vector<24x24xf32>
    %381 = arith.divf %377, %380 : vector<24x24xf32>
    %cst_218 = arith.constant dense<0.000000e+00> : vector<24x8xf32>
    %382 = tpu.matmul %381, %369, %cst_218 {dimension_numbers = #tpu.dot_dimension_numbers<[1], [0], [0], [1], [0, 0, 1, 1], [], []>} : vector<24x24xf32>, vector<24x8xf32>, vector<24x8xf32> -> vector<24x8xf32>
    %c0_219 = arith.constant 0 : index
    %c16_220 = arith.constant 16 : index
    %383 = vector.load %arg26[%c0_219, %c16_220] : memref<24x64xf32, #tpu.memory_space<vmem>>, vector<24x8xf32>
    tpu.vector_store %arg26[%c0_219, %c16_220], %382 {strides = array<i32>} : memref<24x64xf32, #tpu.memory_space<vmem>>, vector<24x8xf32>,
    %384 = vector.extract_strided_slice %325 {offsets = [0, 24], sizes = [24, 8], strides = [1, 1]} : vector<24x64xf32> to vector<24x8xf32>
    %385 = vector.extract_strided_slice %331 {offsets = [0, 24], sizes = [24, 8], strides = [1, 1]} : vector<24x64xf32> to vector<24x8xf32>
    %386 = vector.extract_strided_slice %332 {offsets = [0, 24], sizes = [24, 8], strides = [1, 1]} : vector<24x64xf32> to vector<24x8xf32>
    %cst_221 = arith.constant dense<0.000000e+00> : vector<24x24xf32>
    %387 = tpu.matmul %384, %385, %cst_221 {dimension_numbers = #tpu.dot_dimension_numbers<[1], [1], [0], [0], [0, 0, 1, 0], [], []>} : vector<24x8xf32>, vector<24x8xf32>, vector<24x24xf32> -> vector<24x24xf32>
    %cst_222 = arith.constant 0.353553385 : f32
    %388 = vector.broadcast %cst_222 : f32 to vector<24x24xf32>
    %389 = arith.mulf %387, %388 : vector<24x24xf32>
    %cst_223 = arith.constant dense<0xFF800000> : vector<24xf32>
    %390 = vector.multi_reduction <maximumf>, %389, %cst_223 [1] : vector<24x24xf32> to vector<24xf32>
    %391 = vector.shape_cast %390 : vector<24xf32> to vector<24x1xf32>
    %392 = vector.broadcast %391 : vector<24x1xf32> to vector<24x24xf32>
    %393 = arith.subf %389, %392 : vector<24x24xf32>
    %394 = math.exp %393 : vector<24x24xf32>
    %cst_224 = arith.constant dense<0.000000e+00> : vector<24xf32>
    %395 = vector.multi_reduction <add>, %394, %cst_224 [1] : vector<24x24xf32> to vector<24xf32>
    %396 = vector.shape_cast %395 : vector<24xf32> to vector<24x1xf32>
    %397 = vector.broadcast %396 : vector<24x1xf32> to vector<24x24xf32>
    %398 = arith.divf %394, %397 : vector<24x24xf32>
    %cst_225 = arith.constant dense<0.000000e+00> : vector<24x8xf32>
    %399 = tpu.matmul %398, %386, %cst_225 {dimension_numbers = #tpu.dot_dimension_numbers<[1], [0], [0], [1], [0, 0, 1, 1], [], []>} : vector<24x24xf32>, vector<24x8xf32>, vector<24x8xf32> -> vector<24x8xf32>
    %c0_226 = arith.constant 0 : index
    %c24_227 = arith.constant 24 : index
    %400 = vector.load %arg26[%c0_226, %c24_227] : memref<24x64xf32, #tpu.memory_space<vmem>>, vector<24x8xf32>
    tpu.vector_store %arg26[%c0_226, %c24_227], %399 {strides = array<i32>} : memref<24x64xf32, #tpu.memory_space<vmem>>, vector<24x8xf32>,
    %401 = vector.extract_strided_slice %325 {offsets = [0, 32], sizes = [24, 8], strides = [1, 1]} : vector<24x64xf32> to vector<24x8xf32>
    %402 = vector.extract_strided_slice %331 {offsets = [0, 32], sizes = [24, 8], strides = [1, 1]} : vector<24x64xf32> to vector<24x8xf32>
    %403 = vector.extract_strided_slice %332 {offsets = [0, 32], sizes = [24, 8], strides = [1, 1]} : vector<24x64xf32> to vector<24x8xf32>
    %cst_228 = arith.constant dense<0.000000e+00> : vector<24x24xf32>
    %404 = tpu.matmul %401, %402, %cst_228 {dimension_numbers = #tpu.dot_dimension_numbers<[1], [1], [0], [0], [0, 0, 1, 0], [], []>} : vector<24x8xf32>, vector<24x8xf32>, vector<24x24xf32> -> vector<24x24xf32>
    %cst_229 = arith.constant 0.353553385 : f32
    %405 = vector.broadcast %cst_229 : f32 to vector<24x24xf32>
    %406 = arith.mulf %404, %405 : vector<24x24xf32>
    %cst_230 = arith.constant dense<0xFF800000> : vector<24xf32>
    %407 = vector.multi_reduction <maximumf>, %406, %cst_230 [1] : vector<24x24xf32> to vector<24xf32>
    %408 = vector.shape_cast %407 : vector<24xf32> to vector<24x1xf32>
    %409 = vector.broadcast %408 : vector<24x1xf32> to vector<24x24xf32>
    %410 = arith.subf %406, %409 : vector<24x24xf32>
    %411 = math.exp %410 : vector<24x24xf32>
    %cst_231 = arith.constant dense<0.000000e+00> : vector<24xf32>
    %412 = vector.multi_reduction <add>, %411, %cst_231 [1] : vector<24x24xf32> to vector<24xf32>
    %413 = vector.shape_cast %412 : vector<24xf32> to vector<24x1xf32>
    %414 = vector.broadcast %413 : vector<24x1xf32> to vector<24x24xf32>
    %415 = arith.divf %411, %414 : vector<24x24xf32>
    %cst_232 = arith.constant dense<0.000000e+00> : vector<24x8xf32>
    %416 = tpu.matmul %415, %403, %cst_232 {dimension_numbers = #tpu.dot_dimension_numbers<[1], [0], [0], [1], [0, 0, 1, 1], [], []>} : vector<24x24xf32>, vector<24x8xf32>, vector<24x8xf32> -> vector<24x8xf32>
    %c0_233 = arith.constant 0 : index
    %c32_234 = arith.constant 32 : index
    %417 = vector.load %arg26[%c0_233, %c32_234] : memref<24x64xf32, #tpu.memory_space<vmem>>, vector<24x8xf32>
    tpu.vector_store %arg26[%c0_233, %c32_234], %416 {strides = array<i32>} : memref<24x64xf32, #tpu.memory_space<vmem>>, vector<24x8xf32>,
    %418 = vector.extract_strided_slice %325 {offsets = [0, 40], sizes = [24, 8], strides = [1, 1]} : vector<24x64xf32> to vector<24x8xf32>
    %419 = vector.extract_strided_slice %331 {offsets = [0, 40], sizes = [24, 8], strides = [1, 1]} : vector<24x64xf32> to vector<24x8xf32>
    %420 = vector.extract_strided_slice %332 {offsets = [0, 40], sizes = [24, 8], strides = [1, 1]} : vector<24x64xf32> to vector<24x8xf32>
    %cst_235 = arith.constant dense<0.000000e+00> : vector<24x24xf32>
    %421 = tpu.matmul %418, %419, %cst_235 {dimension_numbers = #tpu.dot_dimension_numbers<[1], [1], [0], [0], [0, 0, 1, 0], [], []>} : vector<24x8xf32>, vector<24x8xf32>, vector<24x24xf32> -> vector<24x24xf32>
    %cst_236 = arith.constant 0.353553385 : f32
    %422 = vector.broadcast %cst_236 : f32 to vector<24x24xf32>
    %423 = arith.mulf %421, %422 : vector<24x24xf32>
    %cst_237 = arith.constant dense<0xFF800000> : vector<24xf32>
    %424 = vector.multi_reduction <maximumf>, %423, %cst_237 [1] : vector<24x24xf32> to vector<24xf32>
    %425 = vector.shape_cast %424 : vector<24xf32> to vector<24x1xf32>
    %426 = vector.broadcast %425 : vector<24x1xf32> to vector<24x24xf32>
    %427 = arith.subf %423, %426 : vector<24x24xf32>
    %428 = math.exp %427 : vector<24x24xf32>
    %cst_238 = arith.constant dense<0.000000e+00> : vector<24xf32>
    %429 = vector.multi_reduction <add>, %428, %cst_238 [1] : vector<24x24xf32> to vector<24xf32>
    %430 = vector.shape_cast %429 : vector<24xf32> to vector<24x1xf32>
    %431 = vector.broadcast %430 : vector<24x1xf32> to vector<24x24xf32>
    %432 = arith.divf %428, %431 : vector<24x24xf32>
    %cst_239 = arith.constant dense<0.000000e+00> : vector<24x8xf32>
    %433 = tpu.matmul %432, %420, %cst_239 {dimension_numbers = #tpu.dot_dimension_numbers<[1], [0], [0], [1], [0, 0, 1, 1], [], []>} : vector<24x24xf32>, vector<24x8xf32>, vector<24x8xf32> -> vector<24x8xf32>
    %c0_240 = arith.constant 0 : index
    %c40_241 = arith.constant 40 : index
    %434 = vector.load %arg26[%c0_240, %c40_241] : memref<24x64xf32, #tpu.memory_space<vmem>>, vector<24x8xf32>
    tpu.vector_store %arg26[%c0_240, %c40_241], %433 {strides = array<i32>} : memref<24x64xf32, #tpu.memory_space<vmem>>, vector<24x8xf32>,
    %435 = vector.extract_strided_slice %325 {offsets = [0, 48], sizes = [24, 8], strides = [1, 1]} : vector<24x64xf32> to vector<24x8xf32>
    %436 = vector.extract_strided_slice %331 {offsets = [0, 48], sizes = [24, 8], strides = [1, 1]} : vector<24x64xf32> to vector<24x8xf32>
    %437 = vector.extract_strided_slice %332 {offsets = [0, 48], sizes = [24, 8], strides = [1, 1]} : vector<24x64xf32> to vector<24x8xf32>
    %cst_242 = arith.constant dense<0.000000e+00> : vector<24x24xf32>
    %438 = tpu.matmul %435, %436, %cst_242 {dimension_numbers = #tpu.dot_dimension_numbers<[1], [1], [0], [0], [0, 0, 1, 0], [], []>} : vector<24x8xf32>, vector<24x8xf32>, vector<24x24xf32> -> vector<24x24xf32>
    %cst_243 = arith.constant 0.353553385 : f32
    %439 = vector.broadcast %cst_243 : f32 to vector<24x24xf32>
    %440 = arith.mulf %438, %439 : vector<24x24xf32>
    %cst_244 = arith.constant dense<0xFF800000> : vector<24xf32>
    %441 = vector.multi_reduction <maximumf>, %440, %cst_244 [1] : vector<24x24xf32> to vector<24xf32>
    %442 = vector.shape_cast %441 : vector<24xf32> to vector<24x1xf32>
    %443 = vector.broadcast %442 : vector<24x1xf32> to vector<24x24xf32>
    %444 = arith.subf %440, %443 : vector<24x24xf32>
    %445 = math.exp %444 : vector<24x24xf32>
    %cst_245 = arith.constant dense<0.000000e+00> : vector<24xf32>
    %446 = vector.multi_reduction <add>, %445, %cst_245 [1] : vector<24x24xf32> to vector<24xf32>
    %447 = vector.shape_cast %446 : vector<24xf32> to vector<24x1xf32>
    %448 = vector.broadcast %447 : vector<24x1xf32> to vector<24x24xf32>
    %449 = arith.divf %445, %448 : vector<24x24xf32>
    %cst_246 = arith.constant dense<0.000000e+00> : vector<24x8xf32>
    %450 = tpu.matmul %449, %437, %cst_246 {dimension_numbers = #tpu.dot_dimension_numbers<[1], [0], [0], [1], [0, 0, 1, 1], [], []>} : vector<24x24xf32>, vector<24x8xf32>, vector<24x8xf32> -> vector<24x8xf32>
    %c0_247 = arith.constant 0 : index
    %c48_248 = arith.constant 48 : index
    %451 = vector.load %arg26[%c0_247, %c48_248] : memref<24x64xf32, #tpu.memory_space<vmem>>, vector<24x8xf32>
    tpu.vector_store %arg26[%c0_247, %c48_248], %450 {strides = array<i32>} : memref<24x64xf32, #tpu.memory_space<vmem>>, vector<24x8xf32>,
    %452 = vector.extract_strided_slice %325 {offsets = [0, 56], sizes = [24, 8], strides = [1, 1]} : vector<24x64xf32> to vector<24x8xf32>
    %453 = vector.extract_strided_slice %331 {offsets = [0, 56], sizes = [24, 8], strides = [1, 1]} : vector<24x64xf32> to vector<24x8xf32>
    %454 = vector.extract_strided_slice %332 {offsets = [0, 56], sizes = [24, 8], strides = [1, 1]} : vector<24x64xf32> to vector<24x8xf32>
    %cst_249 = arith.constant dense<0.000000e+00> : vector<24x24xf32>
    %455 = tpu.matmul %452, %453, %cst_249 {dimension_numbers = #tpu.dot_dimension_numbers<[1], [1], [0], [0], [0, 0, 1, 0], [], []>} : vector<24x8xf32>, vector<24x8xf32>, vector<24x24xf32> -> vector<24x24xf32>
    %cst_250 = arith.constant 0.353553385 : f32
    %456 = vector.broadcast %cst_250 : f32 to vector<24x24xf32>
    %457 = arith.mulf %455, %456 : vector<24x24xf32>
    %cst_251 = arith.constant dense<0xFF800000> : vector<24xf32>
    %458 = vector.multi_reduction <maximumf>, %457, %cst_251 [1] : vector<24x24xf32> to vector<24xf32>
    %459 = vector.shape_cast %458 : vector<24xf32> to vector<24x1xf32>
    %460 = vector.broadcast %459 : vector<24x1xf32> to vector<24x24xf32>
    %461 = arith.subf %457, %460 : vector<24x24xf32>
    %462 = math.exp %461 : vector<24x24xf32>
    %cst_252 = arith.constant dense<0.000000e+00> : vector<24xf32>
    %463 = vector.multi_reduction <add>, %462, %cst_252 [1] : vector<24x24xf32> to vector<24xf32>
    %464 = vector.shape_cast %463 : vector<24xf32> to vector<24x1xf32>
    %465 = vector.broadcast %464 : vector<24x1xf32> to vector<24x24xf32>
    %466 = arith.divf %462, %465 : vector<24x24xf32>
    %cst_253 = arith.constant dense<0.000000e+00> : vector<24x8xf32>
    %467 = tpu.matmul %466, %454, %cst_253 {dimension_numbers = #tpu.dot_dimension_numbers<[1], [0], [0], [1], [0, 0, 1, 1], [], []>} : vector<24x24xf32>, vector<24x8xf32>, vector<24x8xf32> -> vector<24x8xf32>
    %c0_254 = arith.constant 0 : index
    %c56_255 = arith.constant 56 : index
    %468 = vector.load %arg26[%c0_254, %c56_255] : memref<24x64xf32, #tpu.memory_space<vmem>>, vector<24x8xf32>
    tpu.vector_store %arg26[%c0_254, %c56_255], %467 {strides = array<i32>} : memref<24x64xf32, #tpu.memory_space<vmem>>, vector<24x8xf32>,
    %c0_256 = arith.constant 0 : index
    %c0_257 = arith.constant 0 : index
    %469 = vector.load %arg26[%c0_256, %c0_257] : memref<24x64xf32, #tpu.memory_space<vmem>>, vector<24x64xf32>
    %c0_258 = arith.constant 0 : index
    %c0_259 = arith.constant 0 : index
    %470 = vector.load %arg14[%c0_258, %c0_259] : memref<64x64xf32, #tpu.memory_space<vmem>>, vector<64x64xf32>
    %cst_260 = arith.constant dense<0.000000e+00> : vector<24x64xf32>
    %471 = tpu.matmul %469, %470, %cst_260 {dimension_numbers = #tpu.dot_dimension_numbers<[1], [0], [0], [1], [0, 0, 1, 1], [], []>} : vector<24x64xf32>, vector<64x64xf32>, vector<24x64xf32> -> vector<24x64xf32>
    %472 = arith.addf %320, %471 : vector<24x64xf32>
    %c0_261 = arith.constant 0 : index
    %c0_262 = arith.constant 0 : index
    %473 = vector.load %arg15[%c0_261, %c0_262] : memref<1x64xf32, #tpu.memory_space<vmem>>, vector<1x64xf32>
    %474 = vector.broadcast %473 : vector<1x64xf32> to vector<24x64xf32>
    %475 = arith.addf %472, %474 : vector<24x64xf32>
    %476 = vector.extract_strided_slice %2 {offsets = [2, 0], sizes = [1, 64], strides = [1, 1]} : vector<8x64xf32> to vector<1x64xf32>
    %477 = vector.extract_strided_slice %2 {offsets = [3, 0], sizes = [1, 64], strides = [1, 1]} : vector<8x64xf32> to vector<1x64xf32>
    %cst_263 = arith.constant dense<0.000000e+00> : vector<24xf32>
    %478 = vector.multi_reduction <add>, %475, %cst_263 [1] : vector<24x64xf32> to vector<24xf32>
    %479 = vector.shape_cast %478 : vector<24xf32> to vector<24x1xf32>
    %cst_264 = arith.constant 6.400000e+01 : f32
    %480 = vector.broadcast %cst_264 : f32 to vector<24x1xf32>
    %481 = arith.divf %479, %480 : vector<24x1xf32>
    %482 = arith.mulf %475, %475 : vector<24x64xf32>
    %cst_265 = arith.constant dense<0.000000e+00> : vector<24xf32>
    %483 = vector.multi_reduction <add>, %482, %cst_265 [1] : vector<24x64xf32> to vector<24xf32>
    %484 = vector.shape_cast %483 : vector<24xf32> to vector<24x1xf32>
    %cst_266 = arith.constant 6.400000e+01 : f32
    %485 = vector.broadcast %cst_266 : f32 to vector<24x1xf32>
    %486 = arith.divf %484, %485 : vector<24x1xf32>
    %487 = arith.mulf %481, %481 : vector<24x1xf32>
    %488 = arith.subf %486, %487 : vector<24x1xf32>
    %489 = vector.broadcast %481 : vector<24x1xf32> to vector<24x64xf32>
    %490 = arith.subf %475, %489 : vector<24x64xf32>
    %cst_267 = arith.constant 9.99999974E-6 : f32
    %491 = vector.broadcast %cst_267 : f32 to vector<24x1xf32>
    %492 = arith.addf %488, %491 : vector<24x1xf32>
    %493 = math.rsqrt %492 : vector<24x1xf32>
    %494 = vector.broadcast %493 : vector<24x1xf32> to vector<24x64xf32>
    %495 = arith.mulf %490, %494 : vector<24x64xf32>
    %496 = vector.broadcast %476 : vector<1x64xf32> to vector<24x64xf32>
    %497 = arith.mulf %495, %496 : vector<24x64xf32>
    %498 = vector.broadcast %477 : vector<1x64xf32> to vector<24x64xf32>
    %499 = arith.addf %497, %498 : vector<24x64xf32>
    %c0_268 = arith.constant 0 : index
    %c0_269 = arith.constant 0 : index
    %500 = vector.load %arg16[%c0_268, %c0_269] : memref<64x64xf32, #tpu.memory_space<vmem>>, vector<64x64xf32>
    %cst_270 = arith.constant dense<0.000000e+00> : vector<24x64xf32>
    %501 = tpu.matmul %499, %500, %cst_270 {dimension_numbers = #tpu.dot_dimension_numbers<[1], [0], [0], [1], [0, 0, 1, 1], [], []>} : vector<24x64xf32>, vector<64x64xf32>, vector<24x64xf32> -> vector<24x64xf32>
    %c0_271 = arith.constant 0 : index
    %c0_272 = arith.constant 0 : index
    %502 = vector.load %arg17[%c0_271, %c0_272] : memref<1x64xf32, #tpu.memory_space<vmem>>, vector<1x64xf32>
    %503 = vector.broadcast %502 : vector<1x64xf32> to vector<24x64xf32>
    %504 = arith.addf %501, %503 : vector<24x64xf32>
    %505 = arith.mulf %504, %504 : vector<24x64xf32>
    %506 = arith.mulf %504, %505 : vector<24x64xf32>
    %cst_273 = arith.constant 4.471500e-02 : f32
    %507 = vector.broadcast %cst_273 : f32 to vector<24x64xf32>
    %508 = arith.mulf %507, %506 : vector<24x64xf32>
    %509 = arith.addf %504, %508 : vector<24x64xf32>
    %cst_274 = arith.constant 0.797884583 : f32
    %510 = vector.broadcast %cst_274 : f32 to vector<24x64xf32>
    %511 = arith.mulf %510, %509 : vector<24x64xf32>
    %512 = math.tanh %511 : vector<24x64xf32>
    %cst_275 = arith.constant 1.000000e+00 : f32
    %513 = vector.broadcast %cst_275 : f32 to vector<24x64xf32>
    %514 = arith.addf %513, %512 : vector<24x64xf32>
    %cst_276 = arith.constant 5.000000e-01 : f32
    %515 = vector.broadcast %cst_276 : f32 to vector<24x64xf32>
    %516 = arith.mulf %515, %514 : vector<24x64xf32>
    %517 = arith.mulf %504, %516 : vector<24x64xf32>
    %c0_277 = arith.constant 0 : index
    %c0_278 = arith.constant 0 : index
    %518 = vector.load %arg18[%c0_277, %c0_278] : memref<64x64xf32, #tpu.memory_space<vmem>>, vector<64x64xf32>
    %cst_279 = arith.constant dense<0.000000e+00> : vector<24x64xf32>
    %519 = tpu.matmul %517, %518, %cst_279 {dimension_numbers = #tpu.dot_dimension_numbers<[1], [0], [0], [1], [0, 0, 1, 1], [], []>} : vector<24x64xf32>, vector<64x64xf32>, vector<24x64xf32> -> vector<24x64xf32>
    %c0_280 = arith.constant 0 : index
    %c0_281 = arith.constant 0 : index
    %520 = vector.load %arg19[%c0_280, %c0_281] : memref<1x64xf32, #tpu.memory_space<vmem>>, vector<1x64xf32>
    %521 = vector.broadcast %520 : vector<1x64xf32> to vector<24x64xf32>
    %522 = arith.addf %519, %521 : vector<24x64xf32>
    %523 = arith.addf %499, %522 : vector<24x64xf32>
    %524 = vector.extract_strided_slice %2 {offsets = [4, 0], sizes = [1, 64], strides = [1, 1]} : vector<8x64xf32> to vector<1x64xf32>
    %525 = vector.extract_strided_slice %2 {offsets = [5, 0], sizes = [1, 64], strides = [1, 1]} : vector<8x64xf32> to vector<1x64xf32>
    %cst_282 = arith.constant dense<0.000000e+00> : vector<24xf32>
    %526 = vector.multi_reduction <add>, %523, %cst_282 [1] : vector<24x64xf32> to vector<24xf32>
    %527 = vector.shape_cast %526 : vector<24xf32> to vector<24x1xf32>
    %cst_283 = arith.constant 6.400000e+01 : f32
    %528 = vector.broadcast %cst_283 : f32 to vector<24x1xf32>
    %529 = arith.divf %527, %528 : vector<24x1xf32>
    %530 = arith.mulf %523, %523 : vector<24x64xf32>
    %cst_284 = arith.constant dense<0.000000e+00> : vector<24xf32>
    %531 = vector.multi_reduction <add>, %530, %cst_284 [1] : vector<24x64xf32> to vector<24xf32>
    %532 = vector.shape_cast %531 : vector<24xf32> to vector<24x1xf32>
    %cst_285 = arith.constant 6.400000e+01 : f32
    %533 = vector.broadcast %cst_285 : f32 to vector<24x1xf32>
    %534 = arith.divf %532, %533 : vector<24x1xf32>
    %535 = arith.mulf %529, %529 : vector<24x1xf32>
    %536 = arith.subf %534, %535 : vector<24x1xf32>
    %537 = vector.broadcast %529 : vector<24x1xf32> to vector<24x64xf32>
    %538 = arith.subf %523, %537 : vector<24x64xf32>
    %cst_286 = arith.constant 9.99999974E-6 : f32
    %539 = vector.broadcast %cst_286 : f32 to vector<24x1xf32>
    %540 = arith.addf %536, %539 : vector<24x1xf32>
    %541 = math.rsqrt %540 : vector<24x1xf32>
    %542 = vector.broadcast %541 : vector<24x1xf32> to vector<24x64xf32>
    %543 = arith.mulf %538, %542 : vector<24x64xf32>
    %544 = vector.broadcast %524 : vector<1x64xf32> to vector<24x64xf32>
    %545 = arith.mulf %543, %544 : vector<24x64xf32>
    %546 = vector.broadcast %525 : vector<1x64xf32> to vector<24x64xf32>
    %547 = arith.addf %545, %546 : vector<24x64xf32>
    %548 = vector.extract_strided_slice %2 {offsets = [6, 0], sizes = [1, 64], strides = [1, 1]} : vector<8x64xf32> to vector<1x64xf32>
    %549 = vector.extract_strided_slice %2 {offsets = [7, 0], sizes = [1, 64], strides = [1, 1]} : vector<8x64xf32> to vector<1x64xf32>
    %cst_287 = arith.constant dense<0.000000e+00> : vector<24xf32>
    %550 = vector.multi_reduction <add>, %547, %cst_287 [1] : vector<24x64xf32> to vector<24xf32>
    %551 = vector.shape_cast %550 : vector<24xf32> to vector<24x1xf32>
    %cst_288 = arith.constant 6.400000e+01 : f32
    %552 = vector.broadcast %cst_288 : f32 to vector<24x1xf32>
    %553 = arith.divf %551, %552 : vector<24x1xf32>
    %554 = arith.mulf %547, %547 : vector<24x64xf32>
    %cst_289 = arith.constant dense<0.000000e+00> : vector<24xf32>
    %555 = vector.multi_reduction <add>, %554, %cst_289 [1] : vector<24x64xf32> to vector<24xf32>
    %556 = vector.shape_cast %555 : vector<24xf32> to vector<24x1xf32>
    %cst_290 = arith.constant 6.400000e+01 : f32
    %557 = vector.broadcast %cst_290 : f32 to vector<24x1xf32>
    %558 = arith.divf %556, %557 : vector<24x1xf32>
    %559 = arith.mulf %553, %553 : vector<24x1xf32>
    %560 = arith.subf %558, %559 : vector<24x1xf32>
    %561 = vector.broadcast %553 : vector<24x1xf32> to vector<24x64xf32>
    %562 = arith.subf %547, %561 : vector<24x64xf32>
    %cst_291 = arith.constant 9.99999974E-6 : f32
    %563 = vector.broadcast %cst_291 : f32 to vector<24x1xf32>
    %564 = arith.addf %560, %563 : vector<24x1xf32>
    %565 = math.rsqrt %564 : vector<24x1xf32>
    %566 = vector.broadcast %565 : vector<24x1xf32> to vector<24x64xf32>
    %567 = arith.mulf %562, %566 : vector<24x64xf32>
    %568 = vector.broadcast %548 : vector<1x64xf32> to vector<24x64xf32>
    %569 = arith.mulf %567, %568 : vector<24x64xf32>
    %570 = vector.broadcast %549 : vector<1x64xf32> to vector<24x64xf32>
    %571 = arith.addf %569, %570 : vector<24x64xf32>
    %c0_292 = arith.constant 0 : index
    %c0_293 = arith.constant 0 : index
    %572 = vector.load %arg21[%c0_292, %c0_293] : memref<64x1xf32, #tpu.memory_space<vmem>>, vector<64x1xf32>
    %cst_294 = arith.constant dense<0.000000e+00> : vector<24x1xf32>
    %573 = tpu.matmul %571, %572, %cst_294 {dimension_numbers = #tpu.dot_dimension_numbers<[1], [0], [0], [1], [0, 0, 1, 1], [], []>} : vector<24x64xf32>, vector<64x1xf32>, vector<24x1xf32> -> vector<24x1xf32>
    %c0_295 = arith.constant 0 : index
    %c0_296 = arith.constant 0 : index
    %574 = vector.load %arg22[%c0_295, %c0_296] : memref<1x1xf32, #tpu.memory_space<vmem>>, vector<1x1xf32>
    %575 = vector.broadcast %574 : vector<1x1xf32> to vector<24x1xf32>
    %576 = arith.addf %573, %575 : vector<24x1xf32>
    %c0_297 = arith.constant 0 : index
    %c0_298 = arith.constant 0 : index
    %c0_299 = arith.constant 0 : index
    %577 = vector.load %arg25[%c0_297, %c0_298, %c0_299] : memref<1x24x1xf32, #tpu.memory_space<vmem>>, vector<1x24x1xf32>
    %578 = vector.shape_cast %577 : vector<1x24x1xf32> to vector<24x1xf32>
    %579 = vector.shape_cast %576 : vector<24x1xf32> to vector<1x24x1xf32>
    tpu.vector_store %arg25[%c0_297, %c0_298, %c0_299], %579 {strides = array<i32>} : memref<1x24x1xf32, #tpu.memory_space<vmem>>, vector<1x24x1xf32>,
    return
  }
  func.func @transform_0(%arg0: i32) -> (i32, i32, i32) {
    %c0_i32 = arith.constant 0 : i32
    %c0_i32_0 = arith.constant 0 : i32
    %c0_i32_1 = arith.constant 0 : i32
    return %arg0, %c0_i32, %c0_i32_0 : i32, i32, i32
  }
  func.func @transform_1(%arg0: i32) -> (i32, i32, i32) {
    %c0_i32 = arith.constant 0 : i32
    %c0_i32_0 = arith.constant 0 : i32
    %c0_i32_1 = arith.constant 0 : i32
    return %arg0, %c0_i32, %c0_i32_0 : i32, i32, i32
  }
  func.func @transform_2(%arg0: i32) -> (i32, i32) {
    %c0_i32 = arith.constant 0 : i32
    %c0_i32_0 = arith.constant 0 : i32
    %c0_i32_1 = arith.constant 0 : i32
    return %c0_i32, %c0_i32_0 : i32, i32
  }
  func.func @transform_3(%arg0: i32) -> (i32, i32) {
    %c0_i32 = arith.constant 0 : i32
    %c0_i32_0 = arith.constant 0 : i32
    %c0_i32_1 = arith.constant 0 : i32
    return %c0_i32, %c0_i32_0 : i32, i32
  }
  func.func @transform_4(%arg0: i32) -> (i32, i32) {
    %c0_i32 = arith.constant 0 : i32
    %c0_i32_0 = arith.constant 0 : i32
    %c0_i32_1 = arith.constant 0 : i32
    return %c0_i32, %c0_i32_0 : i32, i32
  }
  func.func @transform_5(%arg0: i32) -> (i32, i32) {
    %c0_i32 = arith.constant 0 : i32
    %c0_i32_0 = arith.constant 0 : i32
    %c0_i32_1 = arith.constant 0 : i32
    return %c0_i32, %c0_i32_0 : i32, i32
  }
  func.func @transform_6(%arg0: i32) -> (i32, i32) {
    %c0_i32 = arith.constant 0 : i32
    %c0_i32_0 = arith.constant 0 : i32
    %c0_i32_1 = arith.constant 0 : i32
    return %c0_i32, %c0_i32_0 : i32, i32
  }
  func.func @transform_7(%arg0: i32) -> (i32, i32) {
    %c0_i32 = arith.constant 0 : i32
    %c0_i32_0 = arith.constant 0 : i32
    %c0_i32_1 = arith.constant 0 : i32
    return %c0_i32, %c0_i32_0 : i32, i32
  }
  func.func @transform_8(%arg0: i32) -> (i32, i32) {
    %c0_i32 = arith.constant 0 : i32
    %c0_i32_0 = arith.constant 0 : i32
    %c0_i32_1 = arith.constant 0 : i32
    return %c0_i32, %c0_i32_0 : i32, i32
  }
  func.func @transform_9(%arg0: i32) -> (i32, i32) {
    %c0_i32 = arith.constant 0 : i32
    %c0_i32_0 = arith.constant 0 : i32
    %c0_i32_1 = arith.constant 0 : i32
    return %c0_i32, %c0_i32_0 : i32, i32
  }
  func.func @transform_10(%arg0: i32) -> (i32, i32) {
    %c0_i32 = arith.constant 0 : i32
    %c0_i32_0 = arith.constant 0 : i32
    %c0_i32_1 = arith.constant 0 : i32
    return %c0_i32, %c0_i32_0 : i32, i32
  }
  func.func @transform_11(%arg0: i32) -> (i32, i32) {
    %c0_i32 = arith.constant 0 : i32
    %c0_i32_0 = arith.constant 0 : i32
    %c0_i32_1 = arith.constant 0 : i32
    return %c0_i32, %c0_i32_0 : i32, i32
  }
  func.func @transform_12(%arg0: i32) -> (i32, i32) {
    %c0_i32 = arith.constant 0 : i32
    %c0_i32_0 = arith.constant 0 : i32
    %c0_i32_1 = arith.constant 0 : i32
    return %c0_i32, %c0_i32_0 : i32, i32
  }
  func.func @transform_13(%arg0: i32) -> (i32, i32) {
    %c0_i32 = arith.constant 0 : i32
    %c0_i32_0 = arith.constant 0 : i32
    %c0_i32_1 = arith.constant 0 : i32
    return %c0_i32, %c0_i32_0 : i32, i32
  }
  func.func @transform_14(%arg0: i32) -> (i32, i32) {
    %c0_i32 = arith.constant 0 : i32
    %c0_i32_0 = arith.constant 0 : i32
    %c0_i32_1 = arith.constant 0 : i32
    return %c0_i32, %c0_i32_0 : i32, i32
  }
  func.func @transform_15(%arg0: i32) -> (i32, i32) {
    %c0_i32 = arith.constant 0 : i32
    %c0_i32_0 = arith.constant 0 : i32
    %c0_i32_1 = arith.constant 0 : i32
    return %c0_i32, %c0_i32_0 : i32, i32
  }
  func.func @transform_16(%arg0: i32) -> (i32, i32) {
    %c0_i32 = arith.constant 0 : i32
    %c0_i32_0 = arith.constant 0 : i32
    %c0_i32_1 = arith.constant 0 : i32
    return %c0_i32, %c0_i32_0 : i32, i32
  }
  func.func @transform_17(%arg0: i32) -> (i32, i32) {
    %c0_i32 = arith.constant 0 : i32
    %c0_i32_0 = arith.constant 0 : i32
    %c0_i32_1 = arith.constant 0 : i32
    return %c0_i32, %c0_i32_0 : i32, i32
  }
  func.func @transform_18(%arg0: i32) -> (i32, i32) {
    %c0_i32 = arith.constant 0 : i32
    %c0_i32_0 = arith.constant 0 : i32
    %c0_i32_1 = arith.constant 0 : i32
    return %c0_i32, %c0_i32_0 : i32, i32
  }
  func.func @transform_19(%arg0: i32) -> (i32, i32) {
    %c0_i32 = arith.constant 0 : i32
    %c0_i32_0 = arith.constant 0 : i32
    %c0_i32_1 = arith.constant 0 : i32
    return %c0_i32, %c0_i32_0 : i32, i32
  }
  func.func @transform_20(%arg0: i32) -> (i32, i32) {
    %c0_i32 = arith.constant 0 : i32
    %c0_i32_0 = arith.constant 0 : i32
    %c0_i32_1 = arith.constant 0 : i32
    return %c0_i32, %c0_i32_0 : i32, i32
  }
  func.func @transform_21(%arg0: i32) -> (i32, i32) {
    %c0_i32 = arith.constant 0 : i32
    %c0_i32_0 = arith.constant 0 : i32
    %c0_i32_1 = arith.constant 0 : i32
    return %c0_i32, %c0_i32_0 : i32, i32
  }
  func.func @transform_22(%arg0: i32) -> (i32, i32) {
    %c0_i32 = arith.constant 0 : i32
    %c0_i32_0 = arith.constant 0 : i32
    %c0_i32_1 = arith.constant 0 : i32
    return %c0_i32, %c0_i32_0 : i32, i32
  }
  func.func @transform_23(%arg0: i32) -> (i32, i32) {
    %c0_i32 = arith.constant 0 : i32
    %c0_i32_0 = arith.constant 0 : i32
    %c0_i32_1 = arith.constant 0 : i32
    return %c0_i32, %c0_i32_0 : i32, i32
  }
  func.func @transform_24(%arg0: i32) -> (i32, i32, i32) {
    %c0_i32 = arith.constant 0 : i32
    %c0_i32_0 = arith.constant 0 : i32
    %c0_i32_1 = arith.constant 0 : i32
    return %arg0, %c0_i32, %c0_i32_0 : i32, i32, i32
  }
}

</mosaic_0001>

<bundles_post_ra>
// kernel: tpu_custom_call.1
= control target key start
LH: loop header
LB: loop body
LE: loop exit
PB: predicated region body
PF: predicated region fallthrough
CT: control target
= control target key end

     0   :  { %s11271_s0 = inlined_call_operand.hbm [shape: f32[2,1,16], index: 0, kind: input, shape index: {}]   ;;  %s11272_s1 = inlined_call_operand.hbm [shape: f32[2,24,64], index: 1, kind: input, shape index: {}]   ;;  %s11273_s2 = inlined_call_operand.hbm [shape: f32[16,64], index: 2, kind: input, shape index: {}]   ;;  %s11274_s3 = inlined_call_operand.vmem [shape: f32[24,1], index: 3, kind: input, shape index: {}]   ;;  %s11275_s4 = inlined_call_operand.vmem [shape: f32[24,64], index: 4, kind: input, shape index: {}]   ;;  %s11276_s5 = inlined_call_operand.hbm [shape: f32[64,192], index: 5, kind: input, shape index: {}]   ;;  %s11277_s6 = inlined_call_operand.hbm [shape: f32[1,192], index: 6, kind: input, shape index: {}]   ;;  %s11278_s7 = inlined_call_operand.vmem [shape: f32[64,64], index: 7, kind: input, shape index: {}]   ;;  %s11279_s8 = inlined_call_operand.hbm [shape: f32[1,64], index: 8, kind: input, shape index: {}]   ;;  %s11280_s9 = inlined_call_operand.hbm [shape: f32[64,64], index: 9, kind: input, shape index: {}]   ;;  %s11281_s10 = inlined_call_operand.hbm [shape: f32[1,64], index: 10, kind: input, shape index: {}]   ;;  %s11282_s11 = inlined_call_operand.hbm [shape: f32[64,128], index: 11, kind: input, shape index: {}]   ;;  %s11283_s12 = inlined_call_operand.hbm [shape: f32[1,128], index: 12, kind: input, shape index: {}]   ;;  %s11284_s13 = inlined_call_operand.hbm [shape: f32[64,64], index: 13, kind: input, shape index: {}]   ;;  %s11285_s14 = inlined_call_operand.hbm [shape: f32[1,64], index: 14, kind: input, shape index: {}]   ;;  %s11286_s15 = inlined_call_operand.hbm [shape: f32[64,64], index: 15, kind: input, shape index: {}]   ;;  %s11287_s16 = inlined_call_operand.hbm [shape: f32[1,64], index: 16, kind: input, shape index: {}]   ;;  %s11288_s17 = inlined_call_operand.hbm [shape: f32[64,64], index: 17, kind: input, shape index: {}]   ;;  %s11289_s18 = inlined_call_operand.vmem [shape: f32[1,64], index: 18, kind: input, shape index: {}]   ;;  %s11290_s19 = inlined_call_operand.vmem [shape: f32[8,64], index: 19, kind: input, shape index: {}]   ;;  %s11291_s20 = inlined_call_operand.vmem [shape: f32[64,1], index: 20, kind: input, shape index: {}]   ;;  %s11292_s21 = inlined_call_operand.<no memory space> [shape: f32[1,1], index: 21, kind: input, shape index: {}]   ;;  %s11293_s22 = inlined_call_operand.vmem [shape: f32[24,24], index: 22, kind: input, shape index: {}]   ;;  %s11294_s23 = inlined_call_operand.hbm [shape: f32[24,24], index: 23, kind: input, shape index: {}]   ;;  %s11295_s24 = inlined_call_operand.vmem [shape: f32[2,24,1], index: 24, kind: output, shape index: {}]  }
   0x1   :  { %11315 = sst [smem:[#allocation39_spill]] %s11271_s0  ;;  %v29_v0 = vstv %s11292_s21 }
   0x2   :  { %11316 = sst [smem:[#allocation40_spill]] %s11272_s1  ;;  %30 = vst [vmem:[#allocation3] sm:$0x1] %v29_v0 }
   0x3   :  { %11317 = sst [smem:[#allocation41_spill]] %s11273_s2 }
   0x4   :  { %11318 = sst [smem:[#allocation42_spill]] %s11274_s3 }
   0x5   :  { %11319 = sst [smem:[#allocation43_spill]] %s11275_s4 }
   0x6   :  { %11320 = sst [smem:[#allocation44_spill]] %s11276_s5 }
   0x7   :  { %11321 = sst [smem:[#allocation45_spill]] %s11277_s6 }
   0x8   :  { %11322 = sst [smem:[#allocation46_spill]] %s11278_s7 }
   0x9   :  { %11323 = sst [smem:[#allocation47_spill]] %s11279_s8 }
   0xa   :  { %11324 = sst [smem:[#allocation48_spill]] %s11280_s9 }
   0xb   :  { %11325 = sst [smem:[#allocation49_spill]] %s11281_s10 }
   0xc   :  { %11326 = sst [smem:[#allocation50_spill]] %s11282_s11 }
   0xd   :  { %11327 = sst [smem:[#allocation51_spill]] %s11283_s12 }
   0xe   :  { %11328 = sst [smem:[#allocation52_spill]] %s11284_s13 }
   0xf   :  { %11329 = sst [smem:[#allocation53_spill]] %s11285_s14 }
  0x10   :  { %11330 = sst [smem:[#allocation54_spill]] %s11286_s15 }
  0x11   :  { %11331 = sst [smem:[#allocation55_spill]] %s11289_s18 }
  0x12   :  { %11332 = sst [smem:[#allocation56_spill]] %s11290_s19 }
  0x13   :  { %11333 = sst [smem:[#allocation57_spill]] %s11291_s20 }
  0x14   :  { %11334 = sst [smem:[#allocation58_spill]] %s11295_s24 }
  0x15   :  { %31 = vsyncpa [#allocation5], 0 }
  0x16   :  { %33 = vsyncpa [#allocation5 + $0x1], 0 }
  0x17   :  { %34 = vsyncpa [#allocation7], 0 }
  0x18   :  { %36 = vsyncpa [#allocation7 + $0x1], 0 }
  0x19   :  { %37 = vsyncpa [#allocation10], 0 }
  0x1a   :  { %38 = vsyncpa [#allocation13], 0 }
  0x1b   :  { %39 = vsyncpa [#allocation16], 0 }
  0x1c   :  { %40 = vsyncpa [#allocation19], 0 }
  0x1d   :  { %41 = vsyncpa [#allocation22], 0 }
  0x1e   :  { %42 = vsyncpa [#allocation25], 0 }
  0x1f   :  { %43 = vsyncpa [#allocation28], 0  ;;  %s9088_s27 = smov 0   ;;  %s9090_s28 = smov 0  }
  0x20   :  { %s9092_s6 = smov 0   ;;  %s9094_s2 = smov 0  }
  0x21 LB: > { %s8922_s21 = smov [#allocation8]   ;;  %s9109_s0 = sadd.s32 4294967295, %s8920_s2   ;;  %s8920_s2 = sphi %s9094_s2, %s11387_s2   ;;  %s8916_s6 = sphi %s9092_s6, %s11386_s6   ;;  %s8912_s28 = sphi %s9090_s28, %s11385_s28   ;;  %s8908_s27 = sphi %s9088_s27, %s11384_s27  }
  0x22   : > { %s606_s29 = sshll.u32 %s8922_s21, 4  ;;  %p6821_p0 = scmp.ge.s32.totalorder %s8920_s2, 1  ;;  %s607_s29 = int_to_ptr.vmem [resolvable:$true] %s606_s29 }
  0x23   : > { %p11307_p1 = scmp.eq.s32.totalorder %s9109_s0, 0  ;;  %p594_p2 = scmp.lt.s32.totalorder %s8920_s2, 3 }
  0x24   : > { %s8923_s30 = smov [#allocation9]   ;;  %s8924_s8 = smov [#allocation12]  }
  0x25   : > { %p9114_p3 = pnand %p6821_p0, %p594_p2  ;;  %s625_s3 = sshll.u32 %s8923_s30, 4  ;;  %s9126_s3 = int_to_ptr.vmem [resolvable:$true] %s625_s3 }
  0x26   : > { %s9128_s4 = sshll.u32 %s8924_s8, 4  ;;  %s8441_s5 = scalar_lea.vmem %s607_s29, 256  ;;  %s654_s4 = int_to_ptr.vmem [resolvable:$true] %s9128_s4 }
  0x27   : > { %s11335_s7 = scalar_select %p9114_p3, 1, 0 }
  0x28   : > { %p8055_p4 = pneg %p9114_p3  ;;  %p8442_p7 = scmp.ne.s32.totalorder %s607_s29, %s8441_s5 }
  0x29   : > { %p8449_p10 = scmp.lt.s32.totalorder %s607_s29, %s607_s29  ;;  %p8450_p11 = scmp.lt.s32.totalorder %s8441_s5, %s8441_s5 }
  0x2a   : > { %p9122_p5 = pnand %p8055_p4, %p11307_p1 }
  0x2b   : > { %p8451_p12 = por %p8450_p11, %p8449_p10 }
  0x2c   : > { %p9132_p6 = pneg %p9122_p5 }
  0x2e   : > { %p8444_p8 = pnand %p8442_p7, %p9132_p6 }
  0x30   : > { %p8445_p9 = pneg %p8444_p8 }
  0x32   : > { %p8452_p13 = pnand %p8451_p12, %p8445_p9 }
  0x34   : > { %8455 = shalt.err (!%p8452_p13)
}
  0x35   : > { %s11302_s26 = smov 128   ;;  %s11304_s21 = smov 8  }
  0x36   : > { %s11338_s24 = sld [smem:[#allocation41_spill]]  ;;  %s8467_s20 = scalar_lea.vmem %s9126_s3, 2048 }
  0x37   : > { %p8468_p0 = scmp.ne.s32.totalorder %s9126_s3, %s8467_s20  ;;  %p8475_p7 = scmp.lt.s32.totalorder %s9126_s3, %s9126_s3 }
  0x38   : > { %p8476_p8 = scmp.lt.s32.totalorder %s8467_s20, %s8467_s20 }
  0x39   : > { %p8470_p2 = pnand %p8468_p0, %p9132_p6 }
  0x3a   : > { %p8477_p9 = por %p8476_p8, %p8475_p7 }
  0x3b   : > { %p8471_p4 = pneg %p8470_p2 }
  0x3c   : > { %8058 = dma.hbm_to_vmem [thread:$0]  (!%p9122_p5), %s11338_s24, 256, %s607_s29, [#allocation7], %s11302_s26, %s11302_s26, %s11304_s21  }
  0x3d   : > { %p8478_p10 = pnand %p8477_p9, %p8471_p4 }
  0x3f   : > { %8481 = shalt.err (!%p8478_p10)
}
  0x40   : > { %s8927_s5 = smov 256   ;;  %s8928_s18 = smov 16  }
  0x41   : > { %s11339_s29 = sld [smem:[#allocation44_spill]]  ;;  %s8493_s8 = scalar_lea.vmem %s654_s4, 16 }
  0x42   : > { %p8494_p11 = scmp.ne.s32.totalorder %s654_s4, %s8493_s8  ;;  %s8500_s20 = scalar_lea.vmem %s654_s4, 32 }
  0x43   : > { %p8501_p0 = scmp.lt.s32.totalorder %s654_s4, %s654_s4  ;;  %p8502_p2 = scmp.lt.s32.totalorder %s8500_s20, %s8493_s8 }
  0x44   : > { %p8496_p12 = pnand %p8494_p11, %p9132_p6 }
  0x45   : > { %p8503_p4 = por %p8502_p2, %p8501_p0 }
  0x46   : > { %p8497_p13 = pneg %p8496_p12 }
  0x47   : > { %8061 = dma.hbm_to_vmem [thread:$0]  (!%p9122_p5), %s11339_s29, 2048, %s9126_s3, [#allocation10], %s8927_s5, %s8927_s5, %s8928_s18  }
  0x48   : > { %p8504_p7 = pnand %p8503_p4, %p8497_p13 }
  0x4a   : > { %8507 = shalt.err (!%p8504_p7)
}
  0x4b   : > { %s11340_s19 = sld [smem:[#allocation47_spill]]  ;;  %s8929_s18 = smov [#allocation15]  }
  0x4c   : > { %s677_s3 = sshll.u32 %s8929_s18, 4  ;;  %s8930_s5 = smov [#allocation18]   ;;  %s678_s3 = int_to_ptr.vmem [resolvable:$true] %s677_s3 }
  0x4d   : > { %s701_s30 = sshll.u32 %s8930_s5, 4  ;;  %s8519_s24 = scalar_lea.vmem %s678_s3, 16  ;;  %s702_s30 = int_to_ptr.vmem [resolvable:$true] %s701_s30 }
  0x4e   : > { %p8520_p8 = scmp.ne.s32.totalorder %s678_s3, %s8519_s24  ;;  %s8526_s29 = scalar_lea.vmem %s678_s3, 32 }
  0x4f   : > { %p8527_p11 = scmp.lt.s32.totalorder %s678_s3, %s678_s3  ;;  %p8528_p12 = scmp.lt.s32.totalorder %s8526_s29, %s8519_s24 }
  0x50   : > { %p8522_p9 = pnand %p8520_p8, %p9132_p6 }
  0x51   : > { %8067 = dma.hbm_to_vmem [thread:$0]  (!%p9122_p5), %s11340_s19, 16, %s654_s4, [#allocation13]  }
  0x52   : > { %p8523_p10 = pneg %p8522_p9  ;;  %p8529_p13 = por %p8528_p12, %p8527_p11 }
  0x54   : > { %p8530_p0 = pnand %p8529_p13, %p8523_p10 }
  0x56   : > { %8533 = shalt.err (!%p8530_p0)
}
  0x57   : > { %s11341_s10 = sld [smem:[#allocation49_spill]]  ;;  %s8545_s4 = scalar_lea.vmem %s702_s30, 16 }
  0x58   : > { %p8546_p2 = scmp.ne.s32.totalorder %s702_s30, %s8545_s4  ;;  %s8552_s21 = scalar_lea.vmem %s702_s30, 32 }
  0x59   : > { %p8553_p8 = scmp.lt.s32.totalorder %s702_s30, %s702_s30  ;;  %p8554_p9 = scmp.lt.s32.totalorder %s8552_s21, %s8545_s4 }
  0x5a   : > { %p8548_p4 = pnand %p8546_p2, %p9132_p6 }
  0x5b   : > { %p8555_p1 = por %p8554_p9, %p8553_p8 }
  0x5c   : > { %p8549_p7 = pneg %p8548_p4 }
  0x5d   : > { %8073 = dma.hbm_to_vmem [thread:$0]  (!%p9122_p5), %s11341_s10, 16, %s678_s3, [#allocation16]  }
  0x5e   : > { %p8556_p11 = pnand %p8555_p1, %p8549_p7 }
  0x60   : > { %8559 = shalt.err (!%p8556_p11)
}
  0x61   : > { %s11342_s12 = sld [smem:[#allocation51_spill]]  ;;  %s8931_s18 = smov [#allocation21]  }
  0x62   : > { %s725_s3 = sshll.u32 %s8931_s18, 4  ;;  %s8932_s5 = smov [#allocation24]   ;;  %s726_s3 = int_to_ptr.vmem [resolvable:$true] %s725_s3 }
  0x63   : > { %s749_s24 = sshll.u32 %s8932_s5, 4  ;;  %s8571_s29 = scalar_lea.vmem %s726_s3, 16  ;;  %s750_s24 = int_to_ptr.vmem [resolvable:$true] %s749_s24 }
  0x64   : > { %p8572_p10 = scmp.ne.s32.totalorder %s726_s3, %s8571_s29  ;;  %s8578_s26 = scalar_lea.vmem %s726_s3, 32 }
  0x65   : > { %p8579_p1 = scmp.lt.s32.totalorder %s726_s3, %s726_s3  ;;  %p8580_p0 = scmp.lt.s32.totalorder %s8578_s26, %s8571_s29 }
  0x66   : > { %p8574_p12 = pnand %p8572_p10, %p9132_p6 }
  0x67   : > { %8079 = dma.hbm_to_vmem [thread:$0]  (!%p9122_p5), %s11342_s12, 16, %s702_s30, [#allocation19]  }
  0x68   : > { %p8575_p13 = pneg %p8574_p12  ;;  %p8581_p2 = por %p8580_p0, %p8579_p1 }
  0x6a   : > { %p8582_p4 = pnand %p8581_p2, %p8575_p13 }
  0x6c   : > { %8585 = shalt.err (!%p8582_p4)
}
  0x6d   : > { %s11343_s14 = sld [smem:[#allocation53_spill]]  ;;  %s8597_s4 = scalar_lea.vmem %s750_s24, 16 }
  0x6e   : > { %p8598_p7 = scmp.ne.s32.totalorder %s750_s24, %s8597_s4  ;;  %s8604_s21 = scalar_lea.vmem %s750_s24, 32 }
  0x6f   : > { %p8605_p11 = scmp.lt.s32.totalorder %s750_s24, %s750_s24  ;;  %p8606_p10 = scmp.lt.s32.totalorder %s8604_s21, %s8597_s4 }
  0x70   : > { %p8600_p8 = pnand %p8598_p7, %p9132_p6 }
  0x71   : > { %p8607_p12 = por %p8606_p10, %p8605_p11 }
  0x72   : > { %p8601_p9 = pneg %p8600_p8 }
  0x73   : > { %8085 = dma.hbm_to_vmem [thread:$0]  (!%p9122_p5), %s11343_s14, 16, %s726_s3, [#allocation22]  }
  0x74   : > { %p8608_p1 = pnand %p8607_p12, %p8601_p9 }
  0x76   : > { %8611 = shalt.err (!%p8608_p1)
}
  0x77   : > { %8091 = dma.hbm_to_vmem [thread:$0]  (!%p9122_p5), %s11287_s16, 16, %s750_s24, [#allocation25]  }
  0x78   : > { %s8933_s18 = smov [#allocation11]   ;;  %s8934_s5 = smov [#allocation14]  }
  0x79   : > { %s639_s3 = sshll.u32 %s8933_s18, 4  ;;  %s663_s29 = sshll.u32 %s8934_s5, 4  ;;  %s640_s3 = int_to_ptr.vmem [resolvable:$true] %s639_s3  ;;  %s664_s29 = int_to_ptr.vmem [resolvable:$true] %s663_s29 }
  0x7a   : > { %s8623_s26 = scalar_lea.vmem %s640_s3, 32  ;;  %p8631_p4 = scmp.lt.s32.totalorder %s640_s3, %s640_s3 }
  0x7b   : > { %p8624_p13 = scmp.ne.s32.totalorder %s640_s3, %s8623_s26  ;;  %p8632_p7 = scmp.lt.s32.totalorder %s8623_s26, %s8623_s26 }
  0x7d   : > { %p8626_p0 = pnand %p8624_p13, %p9132_p6  ;;  %p8633_p8 = por %p8632_p7, %p8631_p4 }
  0x7f   : > { %p8627_p2 = pneg %p8626_p0 }
  0x81   : > { %p8634_p9 = pnand %p8633_p8, %p8627_p2 }
  0x83   : > { %8637 = shalt.err (!%p8634_p9)
}
  0x84   : > { %s11344_s24 = sld [smem:[#allocation45_spill]]  ;;  %s8649_s4 = scalar_lea.vmem %s664_s29, 1024 }
  0x85   : > { %p8650_p11 = scmp.ne.s32.totalorder %s664_s29, %s8649_s4  ;;  %p8657_p1 = scmp.lt.s32.totalorder %s664_s29, %s664_s29 }
  0x86   : > { %p8658_p13 = scmp.lt.s32.totalorder %s8649_s4, %s8649_s4 }
  0x87   : > { %p8652_p10 = pnand %p8650_p11, %p9132_p6 }
  0x88   : > { %p8659_p0 = por %p8658_p13, %p8657_p1 }
  0x89   : > { %p8653_p12 = pneg %p8652_p10 }
  0x8a   : > { %8064 = dma.hbm_to_vmem [thread:$0]  (!%p9122_p5), %s11344_s24, 32, %s640_s3, [#allocation10]  }
  0x8b   : > { %p8660_p3 = pnand %p8659_p0, %p8653_p12 }
  0x8d   : > { %8663 = shalt.err (!%p8660_p3)
}
  0x8e   : > { %s11345_s21 = smov 8   ;;  %s11346_s8 = smov 128  }
  0x8f   : > { %s11347_s9 = sld [smem:[#allocation48_spill]]  ;;  %s8935_s3 = smov [#allocation17]  }
  0x90   : > { %s687_s5 = sshll.u32 %s8935_s3, 4  ;;  %s8936_s26 = smov [#allocation20]   ;;  %s688_s5 = int_to_ptr.vmem [resolvable:$true] %s687_s5 }
  0x91   : > { %s711_s19 = sshll.u32 %s8936_s26, 4  ;;  %s8675_s30 = scalar_lea.vmem %s688_s5, 1024  ;;  %s712_s19 = int_to_ptr.vmem [resolvable:$true] %s711_s19 }
  0x92   : > { %p8676_p2 = scmp.ne.s32.totalorder %s688_s5, %s8675_s30  ;;  %p8683_p7 = scmp.lt.s32.totalorder %s688_s5, %s688_s5 }
  0x93   : > { %p8684_p8 = scmp.lt.s32.totalorder %s8675_s30, %s8675_s30 }
  0x94   : > { %p8678_p4 = pnand %p8676_p2, %p9132_p6 }
  0x95   : > { %8070 = dma.hbm_to_vmem [thread:$0]  (!%p9122_p5), %s11347_s9, 1024, %s664_s29, [#allocation13], %s11346_s8, %s11346_s8, %s11345_s21  }
  0x96   : > { %p8679_p3 = pneg %p8678_p4  ;;  %p8685_p9 = por %p8684_p8, %p8683_p7 }
  0x98   : > { %p8686_p11 = pnand %p8685_p9, %p8679_p3 }
  0x9a   : > { %8689 = shalt.err (!%p8686_p11)
}
  0x9b   : > { %s11348_s11 = sld [smem:[#allocation50_spill]]  ;;  %s8701_s4 = scalar_lea.vmem %s712_s19, 1024 }
  0x9c   : > { %p8702_p10 = scmp.ne.s32.totalorder %s712_s19, %s8701_s4  ;;  %p8709_p13 = scmp.lt.s32.totalorder %s712_s19, %s712_s19 }
  0x9d   : > { %p8710_p0 = scmp.lt.s32.totalorder %s8701_s4, %s8701_s4 }
  0x9e   : > { %p8704_p12 = pnand %p8702_p10, %p9132_p6 }
  0x9f   : > { %p8711_p2 = por %p8710_p0, %p8709_p13 }
  0xa0   : > { %p8705_p1 = pneg %p8704_p12 }
  0xa1   : > { %8076 = dma.hbm_to_vmem [thread:$0]  (!%p9122_p5), %s11348_s11, 1024, %s688_s5, [#allocation16], %s11346_s8, %s11346_s8, %s11345_s21  }
  0xa2   : > { %p8712_p4 = pnand %p8711_p2, %p8705_p1 }
  0xa4   : > { %8715 = shalt.err (!%p8712_p4)
}
  0xa5   : > { %s11349_s13 = sld [smem:[#allocation52_spill]]  ;;  %s8937_s3 = smov [#allocation23]  }
  0xa6   : > { %s735_s5 = sshll.u32 %s8937_s3, 4  ;;  %s8938_s26 = smov [#allocation26]   ;;  %s736_s5 = int_to_ptr.vmem [resolvable:$true] %s735_s5 }
  0xa7   : > { %s759_s30 = sshll.u32 %s8938_s26, 4  ;;  %s8727_s29 = scalar_lea.vmem %s736_s5, 1024  ;;  %s760_s30 = int_to_ptr.vmem [resolvable:$true] %s759_s30 }
  0xa8   : > { %p8728_p3 = scmp.ne.s32.totalorder %s736_s5, %s8727_s29  ;;  %p8735_p9 = scmp.lt.s32.totalorder %s736_s5, %s736_s5 }
  0xa9   : > { %p8736_p11 = scmp.lt.s32.totalorder %s8727_s29, %s8727_s29 }
  0xaa   : > { %p8730_p7 = pnand %p8728_p3, %p9132_p6 }
  0xab   : > { %8082 = dma.hbm_to_vmem [thread:$0]  (!%p9122_p5), %s11349_s13, 1024, %s712_s19, [#allocation19], %s11346_s8, %s11346_s8, %s11345_s21  }
  0xac   : > { %p8731_p8 = pneg %p8730_p7  ;;  %p8737_p10 = por %p8736_p11, %p8735_p9 }
  0xae   : > { %p8738_p12 = pnand %p8737_p10, %p8731_p8 }
  0xb0   : > { %8741 = shalt.err (!%p8738_p12)
}
  0xb1   : > { %s11350_s15 = sld [smem:[#allocation54_spill]]  ;;  %s8753_s4 = scalar_lea.vmem %s760_s30, 1024 }
  0xb2   : > { %p8754_p1 = scmp.ne.s32.totalorder %s760_s30, %s8753_s4  ;;  %p8761_p2 = scmp.lt.s32.totalorder %s760_s30, %s760_s30 }
  0xb3   : > { %p8762_p4 = scmp.lt.s32.totalorder %s8753_s4, %s8753_s4 }
  0xb4   : > { %p8756_p13 = pnand %p8754_p1, %p9132_p6 }
  0xb5   : > { %p8763_p3 = por %p8762_p4, %p8761_p2 }
  0xb6   : > { %p8757_p0 = pneg %p8756_p13 }
  0xb7   : > { %8088 = dma.hbm_to_vmem [thread:$0]  (!%p9122_p5), %s11350_s15, 1024, %s736_s5, [#allocation22], %s11346_s8, %s11346_s8, %s11345_s21  }
  0xb8   : > { %p8764_p7 = pnand %p8763_p3, %p8757_p0 }
  0xba   : > { %8767 = shalt.err (!%p8764_p7)
}
  0xbb   : > { %8094 = dma.hbm_to_vmem [thread:$0]  (!%p9122_p5), %s11288_s17, 1024, %s760_s30, [#allocation25], %s11346_s8, %s11346_s8, %s11345_s21  }
  0xbc   : > { %s8939_s3 = smov [#allocation27]  }
  0xbd   : > { %s787_s5 = sshll.u32 %s8939_s3, 4  ;;  %s788_s5 = int_to_ptr.vmem [resolvable:$true] %s787_s5 }
  0xbe   : > { %s8779_s26 = scalar_lea.vmem %s788_s5, 384  ;;  %p8787_p10 = scmp.lt.s32.totalorder %s788_s5, %s788_s5 }
  0xbf   : > { %p8780_p8 = scmp.ne.s32.totalorder %s788_s5, %s8779_s26  ;;  %p8788_p12 = scmp.lt.s32.totalorder %s8779_s26, %s8779_s26 }
  0xc1   : > { %p8782_p9 = pnand %p8780_p8, %p9132_p6  ;;  %p8789_p1 = por %p8788_p12, %p8787_p10 }
  0xc3   : > { %p8783_p11 = pneg %p8782_p9 }
  0xc5   : > { %p8790_p13 = pnand %p8789_p1, %p8783_p11 }
  0xc7   : > { %8793 = shalt.err (!%p8790_p13)
}
  0xc8   : > { %8097 = dma.hbm_to_vmem [thread:$0]  (!%p9122_p5), %s11294_s23, 384, %s788_s5, [#allocation28], %s11346_s8, %s11346_s8, %s11345_s21  }
  0xc9   : > { %s9262_s25 = sadd.s32 1, %s8920_s2   ;;  %s56_s1 = sadd.s32 1, %s8916_s6 }
  0xca   : > { %s53_s19 = ssub.s32 %s8920_s2, %s9262_s25  ;;  %p63_p6 = scmp.ne.s32.totalorder %s8916_s6, %s8912_s28 }
  0xcb   : > { %p54_p0 = scmp.eq.s32.totalorder %s53_s19, 0  ;;  %p64_p2 = scmp.eq.s32.totalorder %s8920_s2, 0 }
  0xcc   : > { %p69_p4 = scmp.ne.s32.totalorder %s8912_s28, %s8908_s27  ;;  %p8119_p3 = scmp.lt.s32.totalorder %s8920_s2, 2 }
  0xcd   : > { %s9274_s24 = scalar_select %p54_p0, %s8916_s6, %s56_s1  }
  0xce   : > { %p65_p7 = por %p64_p2, %p63_p6  ;;  %p11351_p8 = scmp.eq.s32.totalorder %s9109_s0, 0 }
  0xcf   : > { %s9283_s20 = sand.u32 1, %s8916_s6   ;;  %s6837_s18 = sshll.u32 %s8920_s2, 4 }
  0xd0   : > { %p9278_p9 = por %p11351_p8, %p69_p4  ;;  %s11353_s26 = sld [smem:[#allocation39_spill]] }
  0xd1   : > { %s804_s27 = scalar_lea.vmem [#allocation4], %s9283_s20  ;;  %p9294_p5 = pnand %p8119_p3, %p65_p7 }
  0xd2   : > { %s811_s30 = sshll.u32 %s804_s27, 4  ;;  %s802_s10 = scalar_lea.sflag [#allocation5], %s9283_s20  ;;  %s9292_s30 = int_to_ptr.vmem [resolvable:$true] %s811_s30 }
  0xd3   : > { %p8796_p10 = pneg %p9294_p5 }
  0xd6   : > { %s9289_s29 = scalar_lea.hbm %s11353_s26, %s6837_s18  ;;  %s8799_s5 = scalar_lea.hbm %s11353_s26, 32 }
  0xd7   : > { %s8794_s11 = scalar_lea.hbm %s9289_s29, 16  ;;  %p8800_p13 = scmp.lt.s32.totalorder %s9289_s29, %s11353_s26 }
  0xd8   : > { %p8795_p11 = scmp.ne.s32.totalorder %s9289_s29, %s8794_s11  ;;  %p8801_p6 = scmp.lt.s32.totalorder %s8799_s5, %s8794_s11 }
  0xda   : > { %p8797_p12 = pnand %p8796_p10, %p8795_p11  ;;  %p8802_p0 = por %p8801_p6, %p8800_p13 }
  0xdc   : > { %p8798_p1 = pneg %p8797_p12 }
  0xde   : > { %p8803_p2 = pnand %p8802_p0, %p8798_p1 }
  0xe0   : > { %8806 = shalt.err (!%p8803_p2)
}
  0xe1   : > { %s8807_s9 = scalar_lea.vmem %s9292_s30, 16  ;;  %s8940_s18 = smov [#allocation4]  }
  0xe2   : > { %p8808_p4 = scmp.ne.s32.totalorder %s9292_s30, %s8807_s9  ;;  %s8812_s3 = sshll.u32 %s8940_s18, 4  ;;  %s8813_s3 = int_to_ptr.vmem [resolvable:$false] %s8812_s3 }
  0xe3   : > { %s8814_s19 = scalar_lea.vmem %s8813_s3, 32  ;;  %p8815_p8 = scmp.lt.s32.totalorder %s9292_s30, %s8813_s3 }
  0xe4   : > { %p8810_p3 = pnand %p8808_p4, %p8796_p10  ;;  %p8816_p11 = scmp.lt.s32.totalorder %s8814_s19, %s8807_s9 }
  0xe6   : > { %p8811_p7 = pneg %p8810_p3  ;;  %p8817_p12 = por %p8816_p11, %p8815_p8 }
  0xe8   : > { %p8818_p13 = pnand %p8817_p12, %p8811_p7 }
  0xea   : > { %8821 = shalt.err (!%p8818_p13)
}
  0xeb   : > { %8101 = dma.hbm_to_vmem [thread:$0]  (!%p9294_p5), %s9289_s29, 16, %s9292_s30, %s802_s10  }
  0xec   : > { %s7992_s11 = smul.u32 384, %s8920_s2  ;;  %s11356_s19 = sld [smem:[#allocation40_spill]] }
  0xed   : > { %s11355_s12 = smul.u32 24, %s9283_s20  ;;  %s11357_s13 = sand.u32 1, %s8920_s2  }
  0xee   : > { %s819_s14 = scalar_lea.sflag [#allocation7], %s11357_s13 }
  0xef   : > { %s822_s5 = scalar_lea.vmem [#allocation6], %s11355_s12 }
  0xf0   : > { %s829_s27 = sshll.u32 %s822_s5, 4  ;;  %s9328_s27 = int_to_ptr.vmem [resolvable:$true] %s829_s27 }
  0xf2   : > { %s9333_s3 = scalar_lea.hbm %s11356_s19, %s7992_s11  ;;  %s8827_s29 = scalar_lea.hbm %s11356_s19, 768 }
  0xf3   : > { %s8822_s15 = scalar_lea.hbm %s9333_s3, 384  ;;  %p8828_p2 = scmp.lt.s32.totalorder %s9333_s3, %s11356_s19 }
  0xf4   : > { %p8823_p1 = scmp.ne.s32.totalorder %s9333_s3, %s8822_s15  ;;  %p8829_p4 = scmp.lt.s32.totalorder %s8827_s29, %s8822_s15 }
  0xf6   : > { %p8825_p6 = pnand %p8823_p1, %p8796_p10  ;;  %p8830_p3 = por %p8829_p4, %p8828_p2 }
  0xf8   : > { %p8826_p0 = pneg %p8825_p6 }
  0xfa   : > { %p8831_p7 = pnand %p8830_p3, %p8826_p0 }
  0xfc   : > { %8834 = shalt.err (!%p8831_p7)
}
  0xfd   : > { %s8835_s13 = scalar_lea.vmem %s9328_s27, 384  ;;  %s8941_s2 = smov [#allocation6]  }
  0xfe   : > { %p8836_p8 = scmp.ne.s32.totalorder %s9328_s27, %s8835_s13  ;;  %s8840_s11 = sshll.u32 %s8941_s2, 4  ;;  %s8841_s11 = int_to_ptr.vmem [resolvable:$false] %s8840_s11 }
  0xff   : > { %s8842_s5 = scalar_lea.vmem %s8841_s11, 768  ;;  %p8843_p13 = scmp.lt.s32.totalorder %s9328_s27, %s8841_s11 }
 0x100   : > { %p8838_p11 = pnand %p8836_p8, %p8796_p10  ;;  %p8844_p1 = scmp.lt.s32.totalorder %s8842_s5, %s8835_s13 }
 0x102   : > { %p8839_p12 = pneg %p8838_p11  ;;  %p8845_p6 = por %p8844_p1, %p8843_p13 }
 0x104   : > { %p8846_p2 = pnand %p8845_p6, %p8839_p12 }
 0x106   : > { %8849 = shalt.err (!%p8846_p2)
}
 0x107   : > { %8104 = dma.hbm_to_vmem [thread:$0]  (!%p9294_p5), %s9333_s3, 384, %s9328_s27, %s819_s14, %s11346_s8, %s11346_s8, %s11345_s21  }
 0x108   : > { %p11358_p10 = scmp.ne.s32.totalorder %s11335_s7, 0 }
 0x109   : > { %s9365_s15 = sand.u32 (!%p11358_p10), 1, %s8912_s28  }
 0x10a   : > { %841 = sbr.rel (%p11358_p10) target bundleno = 4849 (0x12f1), region = 116  ;;  %s844_s18 = scalar_lea.sflag (!%p11358_p10), [#allocation5], %s9365_s15 }
 0x10b   : > { %s846_s9 = scalar_lea.vmem (!%p11358_p10), [#allocation4], %s9365_s15 }
 0x10f   : > { %8867 = dma.done.wait (%p9278_p9), %s844_s18, 16  }
 0x110   : > { %8869 = vsyncadd (%p9278_p9), %s844_s18, 4294967280  ;;  %s851_s14 = sand.u32 1, %s9109_s0   ;;  %s7993_s21 = smul.u32 24, %s9365_s15 }
 0x111   : > { %s852_s7 = scalar_lea.sflag [#allocation7], %s851_s14 }
 0x112   : > { %s9375_s8 = scalar_lea.vmem [#allocation6], %s7993_s21 }
 0x113   : > { %8871 = dma.done.wait (%p9278_p9), %s852_s7, 384  }
 0x114   : > { %8873 = vsyncadd (%p9278_p9), %s852_s7, 4294966912  ;;  %p11359_p5 = scmp.eq.s32.totalorder %s9109_s0, 0 }
 0x116   : > { %8875 = dma.done.wait (%p11359_p5), [#allocation7], 256   ;;  %p11360_p0 = pmov %p11359_p5 }
 0x118   : > { %8877 = vsyncadd (%p11360_p0), [#allocation7], 4294967040  ;;  %p11361_p4 = pmov %p11360_p0 }
 0x119   : > { %p11362_p3 = pmov %p11360_p0 }
 0x11a   : > { %8879 = dma.done.wait (%p11361_p4), [#allocation10], 2080  }
 0x11b   : > { %8881 = vsyncadd (%p11362_p3), [#allocation10], 4294965216  ;;  %p11363_p7 = pmov %p11360_p0 }
 0x11c   : > { %p11364_p8 = pmov %p11360_p0 }
 0x11d   : > { %8883 = dma.done.wait (%p11363_p7), [#allocation13], 1040  }
 0x11e   : > { %8885 = vsyncadd (%p11364_p8), [#allocation13], 4294966256  ;;  %p11365_p9 = pmov %p11360_p0 }
 0x11f   : > { %p11366_p11 = pmov %p11360_p0 }
 0x120   : > { %8887 = dma.done.wait (%p11365_p9), [#allocation16], 1040  }
 0x121   : > { %8889 = vsyncadd (%p11366_p11), [#allocation16], 4294966256  ;;  %p11367_p12 = pmov %p11360_p0 }
 0x122   : > { %p11368_p13 = pmov %p11360_p0 }
 0x123   : > { %8891 = dma.done.wait (%p11367_p12), [#allocation19], 1040  }
 0x124   : > { %8893 = vsyncadd (%p11368_p13), [#allocation19], 4294966256  ;;  %p11369_p1 = pmov %p11360_p0 }
 0x125   : > { %p11370_p6 = pmov %p11360_p0 }
 0x126   : > { %8895 = dma.done.wait (%p11369_p1), [#allocation22], 1040  }
 0x127   : > { %8897 = vsyncadd (%p11370_p6), [#allocation22], 4294966256  ;;  %p11371_p2 = pmov %p11360_p0 }
 0x128   : > { %p11372_p10 = pmov %p11360_p0 }
 0x129   : > { %8899 = dma.done.wait (%p11371_p2), [#allocation25], 1040  }
 0x12a   : > { %8901 = vsyncadd (%p11372_p10), [#allocation25], 4294966256  ;;  %p11373_p5 = pmov %p11360_p0 }
 0x12c   : > { %8903 = dma.done.wait (%p11373_p5), [#allocation28], 384  }
 0x12d   : > { %8905 = vsyncadd (%p11360_p0), [#allocation28], 4294966912  ;;  %v8942_v1 = vmov 0.0   ;;  %vm8943_vm0 = vmmov 0   ;;  %v991_v2 = vld [vmem:[#allocation8 + $0x8] sm:$0xff]  ;;  %v990_v3 = vld [vmem:[#allocation8] sm:$0xff]  ;;  %v1084_v26 = vlaneseq }
 0x12e   : > { %7314 = vmatprep.subr.mxu1 %v8942_v1  ;;  %7318 = vmatprep.mubr.msk.f32.mxu1 %vm8943_vm0, %v8942_v1  ;;  %v989_v4 = vld [vmem:[%s846_s9] sm:$0x1]  ;;  %vm992_vm1 = vcmask 130048   ;;  %v1115_v5 = vld [vmem:[#allocation9 + $0x78] sm:$0xff]  ;;  %v1114_v6 = vld [vmem:[#allocation9 + $0x70] sm:$0xff]  ;;  %vm1128_vm2 = vcmask 523264  }
 0x12f   : > { %7321 = vmatprep.subr.mxu0 %v8942_v1  ;;  %7327 = vmatprep.mubr.msk.f32.mxu0 %vm8943_vm0, %v8942_v1  ;;  %v1113_v7 = vld [vmem:[#allocation9 + $0x68] sm:$0xff]  ;;  %v1112_v8 = vld [vmem:[#allocation9 + $0x60] sm:$0xff]  ;;  %v1111_v9 = vld [vmem:[#allocation9 + $0x58] sm:$0xff]  ;;  %v9436_v27 = vshrl.u32 %v1084_v26, 7  ;;  %s11309_s4 = smov 64   ;;  %s8945_s1 = smov 56  }
 0x130   : > { %7315 = vmatpush3.msra.mxu1 %v991_v2  ;;  %v1110_v10 = vld [vmem:[#allocation9 + $0x50] sm:$0xff]  ;;  %v1109_v11 = vld [vmem:[#allocation9 + $0x48] sm:$0xff]  ;;  %v1108_v12 = vld [vmem:[#allocation9 + $0x40] sm:$0xff]  ;;  %vm1224_vm3 = vcmask 195584   ;;  %s8946_s29 = smov 48   ;;  %s8947_s13 = smov 40  }
 0x131   : > { %7316 = vmatprep.subr.mxu1 %v8942_v1  ;;  %v1107_v13 = vld [vmem:[#allocation9 + $0x38] sm:$0xff]  ;;  %v1106_v14 = vld [vmem:[#allocation9 + $0x30] sm:$0xff]  ;;  %v1105_v15 = vld [vmem:[#allocation9 + $0x28] sm:$0xff]  ;;  %v9439_v29 = vsub.s32 0, %v9436_v27  ;;  %v1124_v35 = vsub.s32 1, %v9436_v27  ;;  %s8948_s2 = smov 32  }
 0x132   : > { %7317 = vmatpush3.msra.mxu1 %v990_v3  ;;  %v1104_v16 = vld [vmem:[#allocation9 + $0x20] sm:$0xff]  ;;  %v1103_v17 = vld [vmem:[#allocation9 + $0x18] sm:$0xff]  ;;  %v1102_v18 = vld [vmem:[#allocation9 + $0x10] sm:$0xff]  ;;  %s8949_s11 = smov 24   ;;  %s8950_s5 = smov 16   ;;  %vm1326_vm4 = vcmask 64512  }
 0x133   : > { %7319 = vmatmul.mubr.msk.f32.vlgmr.msra.gmra.mxu1 %vm992_vm1, %v989_v4  ;;  %1154 = vmatprep.subr.mxu1 %v1115_v5  ;;  %v1101_v19 = vld [vmem:[#allocation9 + $0x8] sm:$0xff]  ;;  %v1100_v20 = vld [vmem:[#allocation9] sm:$0xff]  ;;  %v1223_v47 = vld [vmem:[%s11293_s22 + $0x10] sm:$0xff]  ;;  %s8951_s15 = smov 8   ;;  %s8952_s18 = smov 120   ;;  %vm1550_vm5 = vcmask 59392  }
 0x134   : > { %1155 = vmatpush1.msra.mxu1 %v1114_v6  ;;  %1202 = vmatprep.mubr.f32.mxu1 %v8942_v1  ;;  %v985_v21 = vld [vmem:[%s9375_s8] sm:$0xff]  ;;  %v986_v22 = vld [vmem:[%s9375_s8 + $0x8] sm:$0xff]  ;;  %v987_v23 = vld [vmem:[%s9375_s8 + $0x10] sm:$0xff]  ;;  %s11311_s9 = smov 72   ;;  %s8954_s14 = smov 112   ;;  %vm1556_vm6 = vcmask 128067  }
 0x135   : > { %1156 = vmatprep.subr.mxu1 %v1113_v7  ;;  %v1116_v28 = vld [vmem:[#allocation11] sm:$0x3]  ;;  %v1221_v44 = vld [vmem:[%s11293_s22] sm:$0xff]  ;;  %v1222_v46 = vld [vmem:[%s11293_s22 + $0x8] sm:$0xff]  ;;  %s8955_s21 = smov 104   ;;  %s8956_s7 = smov 96  }
 0x136   : > { %1157 = vmatpush1.msra.mxu1 %v1112_v8  ;;  %v1121_v30 = vrot.slane %v1116_v28, %v9439_v29  ;;  %v1125_v38 = vrot.slane %v1116_v28, %v1124_v35  ;;  %s8957_s27 = smov 88   ;;  %s11313_s3 = smov 80   ;;  %vm1565_vm7 = vcmask 195718   ;;  %vm1567_vm8 = vcmask 188544  }
 0x137   : > { %1158 = vmatprep.subr.mxu1 %v1111_v9  ;;  %vm1572_vm9 = vcmask 257217   ;;  %vm1577_vm10 = vcmask 325892   ;;  %vm1586_vm11 = vcmask 392519   ;;  %vm1588_vm12 = vcmask 386368   ;;  %s11374_s30 = sld [smem:[#allocation46_spill]]  ;;  %p980_p4 = scmp.lt.s32.totalorder %s9109_s0, 1 }
 0x138   : > { %1159 = vmatpush1.msra.mxu1 %v1110_v10  ;;  %vm1593_vm13 = vcmask 455042   ;;  %vm1598_vm14 = vcmask 523717   ;;  %s11375_s10 = sld [smem:[#allocation42_spill]]  ;;  %vm4436_vm15 = vcmask 130112   ;;  %vm4690_vm1 = vcmask 195712  }
 0x139   : > { %1160 = vmatprep.subr.mxu1 %v1109_v11  ;;  %s11376_s20 = sld [smem:[#allocation56_spill]]  ;;  %s11389_s0 = smov (!%p980_p4, %s9109_s0), 1 }
 0x13a   : > { %1161 = vmatpush1.msra.mxu1 %v1108_v12  ;;  %s11383_s12 = sld [smem:[#allocation58_spill]] }
 0x13b   : > { %1162 = vmatprep.subr.mxu1 %v1107_v13 }
 0x13c   : > { %1163 = vmatpush1.msra.mxu1 %v1106_v14 }
 0x13d   : > { %1164 = vmatprep.subr.mxu1 %v1105_v15 }
 0x13e   : > { %1165 = vmatpush1.msra.mxu1 %v1104_v16 }
 0x13f   : > { %1166 = vmatprep.subr.mxu1 %v1103_v17 }
 0x140   : > { %1167 = vmatpush1.msra.mxu1 %v1102_v18 }
 0x141   : > { %1168 = vmatprep.subr.mxu1 %v1101_v19 }
 0x142   : > { %1169 = vmatpush1.msra.mxu1 %v1100_v20 }
 0x143   : > { %6856 = vmatmul.mubr.msk.f32.vlgmr.msra.gmra.mxu1 %vm1128_vm2, %v985_v21  ;;  %7351 = vmatprep.subr.mxu1 %v8942_v1 }
 0x144   : > { %1208 = vmatprep.mubr.f32.mxu1 %v8942_v1 }
 0x147   : > { %6857 = vmatmul.mubr.msk.f32.gmra.mxu1 %vm1128_vm2, %v986_v22 }
 0x148   : > { %1214 = vmatprep.mubr.f32.mxu1 %v8942_v1 }
 0x14b   : > { %6858 = vmatmul.mubr.msk.f32.gmra.mxu1 %vm1128_vm2, %v987_v23 }
 0x14c   : > { %7357 = vmatprep.mubr.msk.f32.mxu1 %vm8943_vm0, %v8942_v1 }
 0x1f3   : > { %v9434_v24 = vpop.f32.mrf.mxu1 }
 0x1f5   : > { %v7320_v25 = vpop.f32.mrf.mxu1 }
 0x203   : > { %v1204_v31 = vpop.f32.mrf.mxu1 }
 0x204   : > { %v9442_v32 = vadd.f32 %v1204_v31, %v1121_v30 }
 0x205   : > { %v1206_v33 = vpop.f32.mrf.mxu1 }
 0x206   : > { %1320 = vrot.lane.b32.xlu1 %v9442_v32, %s11309_s4  ;;  %v9464_v45 = vadd.f32 %v1206_v33, %v1125_v38 }
 0x207   : > { %v1210_v34 = vpop.f32.mrf.mxu1 }
 0x208   : > { %v1211_v41 = vadd.f32 %v1210_v34, %v1121_v30 }
 0x209   : > { %v1212_v36 = vpop.f32.mrf.mxu1 }
 0x20a   : > { %v9454_v43 = vadd.f32 %v1212_v36, %v1125_v38 }
 0x20b   : > { %v1216_v37 = vpop.f32.mrf.mxu1 }
 0x20c   : > { %v1217_v39 = vadd.f32 %v1216_v37, %v1121_v30 }
 0x20d   : > { %v1218_v40 = vpop.f32.mrf.mxu1 }
 0x20e   : > { %v9449_v42 = vadd.f32 %v1218_v40, %v1125_v38  ;;  %1324 = vrot.lane.b32.xlu0 %v1217_v39, %s11309_s4  ;;  %7322 = vmatpush3.msra.mxu0 %v1217_v39  ;;  %v9677_v40 = vld [vmem:[#allocation27] sm:$0xff] }
 0x20f   : > { %1610 = vrot.lane.b32.xlu1 %v1217_v39, %s8945_s1  ;;  %7323 = vmatprep.subr.mxu0 %v8942_v1 }
 0x210   : > { %7324 = vmatpush3.msra.mxu0 %v1211_v41  ;;  %7352 = vmatpush3.msra.mxu1 %v9449_v42 }
 0x211   : > { %7325 = vmatprep.subr.mxu0 %v8942_v1  ;;  %7353 = vmatprep.subr.mxu1 %v8942_v1 }
 0x212   : > { %7354 = vmatpush3.msra.mxu1 %v9454_v43  ;;  %1322 = vrot.lane.b32.xlu0 %v1211_v41, %s11309_s4 }
 0x213   : > { %1606 = vrot.lane.b32.xlu1 %v9442_v32, %s8945_s1  ;;  %7326 = vmatpush3.msra.mxu0 %v9442_v32 }
 0x214   : > { %7328 = vmatmul.mubr.msk.f32.vlgmr.msra.gmra.mxu0 %vm1224_vm3, %v1221_v44  ;;  %7355 = vmatprep.subr.mxu1 %v8942_v1 }
 0x215   : > { %7356 = vmatpush3.msra.mxu1 %v9464_v45  ;;  %7330 = vmatprep.mubr.msk.f32.mxu0 %vm8943_vm0, %v8942_v1 }
 0x216   : > { %1608 = vrot.lane.b32.xlu0 %v1211_v41, %s8945_s1  ;;  %7336 = vmatprep.subr.mxu0 %v8942_v1 }
 0x217   : > { %1894 = vrot.lane.b32.xlu1 %v1217_v39, %s8946_s29  ;;  %7381 = vmatprep.subr.mxu1 %v8942_v1 }
 0x218   : > { %7331 = vmatmul.mubr.msk.f32.gmra.mxu0 %vm1224_vm3, %v1222_v46 }
 0x219   : > { %7333 = vmatprep.mubr.msk.f32.mxu0 %vm8943_vm0, %v8942_v1 }
 0x21b   : > { %1892 = vrot.lane.b32.xlu1 %v1211_v41, %s8946_s29 }
 0x21c   : > { %7334 = vmatmul.mubr.msk.f32.gmra.mxu0 %vm1224_vm3, %v1223_v47 }
 0x21d   : > { %7342 = vmatprep.mubr.msk.f32.mxu0 %vm8943_vm0, %v8942_v1 }
 0x21f   : > { %1890 = vrot.lane.b32.xlu1 %v9442_v32, %s8946_s29 }
 0x223   : > { %2175 = vrot.lane.b32.xlu1 %v1217_v39, %s8947_s13 }
 0x227   : > { %2173 = vrot.lane.b32.xlu1 %v1211_v41, %s8947_s13 }
 0x22b   : > { %2171 = vrot.lane.b32.xlu1 %v9442_v32, %s8947_s13 }
 0x22f   : > { %2456 = vrot.lane.b32.xlu1 %v1217_v39, %s8948_s2 }
 0x233   : > { %2454 = vrot.lane.b32.xlu1 %v1211_v41, %s8948_s2 }
 0x237   : > { %2452 = vrot.lane.b32.xlu1 %v9442_v32, %s8948_s2 }
 0x23b   : > { %2737 = vrot.lane.b32.xlu1 %v1217_v39, %s8949_s11 }
 0x23f   : > { %2735 = vrot.lane.b32.xlu1 %v1211_v41, %s8949_s11 }
 0x243   : > { %2733 = vrot.lane.b32.xlu1 %v9442_v32, %s8949_s11 }
 0x247   : > { %3018 = vrot.lane.b32.xlu1 %v1217_v39, %s8950_s5 }
 0x24b   : > { %3016 = vrot.lane.b32.xlu1 %v1211_v41, %s8950_s5 }
 0x24f   : > { %3014 = vrot.lane.b32.xlu1 %v9442_v32, %s8950_s5 }
 0x253   : > { %3299 = vrot.lane.b32.xlu1 %v1217_v39, %s8951_s15 }
 0x257   : > { %3297 = vrot.lane.b32.xlu1 %v1211_v41, %s8951_s15 }
 0x25b   : > { %3295 = vrot.lane.b32.xlu1 %v9442_v32, %s8951_s15 }
 0x278   : > { %v1321_v50 = vpop.permute.xlu1 %1320 }
 0x280   : > { %v1325_v48 = vpop.permute.xlu0 %1324 }
 0x281   : > { %7337 = vmatpush3.xpose.msk.msra.mxu0 %vm1326_vm4, %v1325_v48  ;;  %v1611_v52 = vpop.permute.xlu1 %1610 }
 0x282   : > { %7338 = vmatprep.subr.mxu0 %v8942_v1 }
 0x284   : > { %v1323_v49 = vpop.permute.xlu0 %1322 }
 0x285   : > { %7339 = vmatpush3.xpose.msk.msra.mxu0 %vm1326_vm4, %v1323_v49  ;;  %v1607_v58 = vpop.permute.xlu1 %1606 }
 0x286   : > { %7340 = vmatprep.subr.mxu0 %v8942_v1 }
 0x288   : > { %v1609_v55 = vpop.permute.xlu0 %1608 }
 0x289   : > { %7341 = vmatpush3.xpose.msk.msra.mxu0 %vm1326_vm4, %v1321_v50  ;;  %v1895_v60 = vpop.permute.xlu1 %1894  ;;  %v9687_v50 = vld [vmem:[#allocation27 + $0x8] sm:$0xff] }
 0x28a   : > { %7366 = vmatprep.subr.mxu0 %v8942_v1 }
 0x28d   : > { %v1893_v61 = vpop.permute.xlu1 %1892 }
 0x291   : > { %v1891_v62 = vpop.permute.xlu1 %1890 }
 0x295   : > { %v2176_v63 = vpop.permute.xlu1 %2175 }
 0x299   : > { %v2174_v0 = vpop.permute.xlu1 %2173 }
 0x29d   : > { %v2172_v2 = vpop.permute.xlu1 %2171 }
 0x2a1   : > { %v2457_v4 = vpop.permute.xlu1 %2456 }
 0x2a5   : > { %v2455_v7 = vpop.permute.xlu1 %2454 }
 0x2a9   : > { %v2453_v9 = vpop.permute.xlu1 %2452 }
 0x2ad   : > { %v2738_v12 = vpop.permute.xlu1 %2737 }
 0x2b1   : > { %v2736_v14 = vpop.permute.xlu1 %2735 }
 0x2b5   : > { %v2734_v17 = vpop.permute.xlu1 %2733 }
 0x2b9   : > { %v3019_v19 = vpop.permute.xlu1 %3018 }
 0x2bd   : > { %v3017_v22 = vpop.permute.xlu1 %3016 }
 0x2c1   : > { %v3015_v25 = vpop.permute.xlu1 %3014 }
 0x2c5   : > { %v3300_v30 = vpop.permute.xlu1 %3299 }
 0x2c9   : > { %v3298_v32 = vpop.permute.xlu1 %3297 }
 0x2cd   : > { %v3296_v36 = vpop.permute.xlu1 %3295 }
 0x2d4   : > { %v1300_v51 = vpop.f32.mrf.mxu0 }
 0x2d5   : > { %1600 = vrot.lane.b32.xlu0 %v1300_v51, %s8952_s18  ;;  %7343 = vmatmul.mubr.msk.f32.vlgmr.msra.gmra.mxu0 %vm1326_vm4, %v1300_v51 }
 0x2d6   : > { %7367 = vmatpush3.xpose.msk.msra.mxu0 %vm1326_vm4, %v1611_v52  ;;  %v7329_v53 = vpop.f32.mrf.mxu0  ;;  %7345 = vmatprep.mubr.msk.f32.mxu0 %vm8943_vm0, %v8942_v1 }
 0x2d7   : > { %7368 = vmatprep.subr.mxu0 %v8942_v1 }
 0x2d8   : > { %v1305_v54 = vpop.f32.mrf.mxu0 }
 0x2d9   : > { %3291 = vrot.lane.b32.xlu1 %v1305_v54, %s11311_s9  ;;  %1602 = vrot.lane.b32.xlu0 %v1305_v54, %s8952_s18 }
 0x2da   : > { %7369 = vmatpush3.xpose.msk.msra.mxu0 %vm1326_vm4, %v1609_v55  ;;  %v7332_v56 = vpop.f32.mrf.mxu0  ;;  %v9692_v55 = vld [vmem:[#allocation27 + $0x10] sm:$0xff] }
 0x2db   : > { %7346 = vmatmul.mubr.msk.f32.gmra.mxu0 %vm1326_vm4, %v1305_v54  ;;  %7370 = vmatprep.subr.mxu0 %v8942_v1 }
 0x2dc   : > { %v1310_v57 = vpop.f32.mrf.mxu0  ;;  %7348 = vmatprep.mubr.msk.f32.mxu0 %vm8943_vm0, %v8942_v1 }
 0x2dd   : > { %1750 = vrot.lane.b32.xlu1 %v9449_v42, %s8952_s18  ;;  %1604 = vrot.lane.b32.xlu0 %v1310_v57, %s8952_s18 }
 0x2de   : > { %7371 = vmatpush3.xpose.msk.msra.mxu0 %vm1326_vm4, %v1607_v58  ;;  %v7335_v59 = vpop.f32.mrf.mxu0 }
 0x2df   : > { %7349 = vmatmul.mubr.msk.f32.gmra.mxu0 %vm1326_vm4, %v1310_v57  ;;  %7396 = vmatprep.subr.mxu0 %v8942_v1 }
 0x2e0   : > { %7372 = vmatprep.mubr.msk.f32.mxu0 %vm8943_vm0, %v8942_v1 }
 0x2e1   : > { %1746 = vrot.lane.b32.xlu1 %v9464_v45, %s8952_s18  ;;  %1884 = vrot.lane.b32.xlu0 %v1300_v51, %s8954_s14 }
 0x2e5   : > { %2031 = vrot.lane.b32.xlu1 %v9449_v42, %s8954_s14  ;;  %1886 = vrot.lane.b32.xlu0 %v1305_v54, %s8954_s14 }
 0x2e9   : > { %2027 = vrot.lane.b32.xlu1 %v9464_v45, %s8954_s14  ;;  %1888 = vrot.lane.b32.xlu0 %v1310_v57, %s8954_s14 }
 0x2ed   : > { %2312 = vrot.lane.b32.xlu1 %v9449_v42, %s8955_s21  ;;  %2165 = vrot.lane.b32.xlu0 %v1300_v51, %s8955_s21 }
 0x2f1   : > { %2308 = vrot.lane.b32.xlu1 %v9464_v45, %s8955_s21  ;;  %2167 = vrot.lane.b32.xlu0 %v1305_v54, %s8955_s21 }
 0x2f5   : > { %2593 = vrot.lane.b32.xlu1 %v9449_v42, %s8956_s7  ;;  %2169 = vrot.lane.b32.xlu0 %v1310_v57, %s8955_s21 }
 0x2f9   : > { %2589 = vrot.lane.b32.xlu1 %v9464_v45, %s8956_s7  ;;  %2446 = vrot.lane.b32.xlu0 %v1300_v51, %s8956_s7 }
 0x2fd   : > { %2874 = vrot.lane.b32.xlu1 %v9449_v42, %s8957_s27  ;;  %2448 = vrot.lane.b32.xlu0 %v1305_v54, %s8956_s7 }
 0x301   : > { %2450 = vrot.lane.b32.xlu0 %v1310_v57, %s8956_s7 }
 0x305   : > { %2727 = vrot.lane.b32.xlu0 %v1300_v51, %s8957_s27 }
 0x309   : > { %2729 = vrot.lane.b32.xlu0 %v1305_v54, %s8957_s27 }
 0x30d   : > { %2731 = vrot.lane.b32.xlu0 %v1310_v57, %s8957_s27 }
 0x311   : > { %3008 = vrot.lane.b32.xlu0 %v1300_v51, %s11313_s3 }
 0x315   : > { %3010 = vrot.lane.b32.xlu0 %v1305_v54, %s11313_s3 }
 0x319   : > { %3012 = vrot.lane.b32.xlu0 %v1310_v57, %s11313_s3 }
 0x31d   : > { %3289 = vrot.lane.b32.xlu0 %v1300_v51, %s11311_s9 }
 0x321   : > { %3293 = vrot.lane.b32.xlu0 %v1310_v57, %s11311_s9 }
 0x325   : > { %1748 = vrot.lane.b32.xlu0 %v9454_v43, %s8952_s18 }
 0x329   : > { %2029 = vrot.lane.b32.xlu0 %v9454_v43, %s8954_s14 }
 0x32d   : > { %2310 = vrot.lane.b32.xlu0 %v9454_v43, %s8955_s21 }
 0x331   : > { %2591 = vrot.lane.b32.xlu0 %v9454_v43, %s8956_s7 }
 0x347   : > { %v1601_v3 = vpop.permute.xlu0 %1600 }
 0x348   : > { %7373 = vmatmul.mubr.msk.f32.vlgmr.msra.gmra.mxu0 %vm1326_vm4, %v1601_v3 }
 0x349   : > { %7397 = vmatpush3.xpose.msk.msra.mxu0 %vm1326_vm4, %v1895_v60  ;;  %7375 = vmatprep.mubr.msk.f32.mxu0 %vm8943_vm0, %v8942_v1 }
 0x34a   : > { %7398 = vmatprep.subr.mxu0 %v8942_v1 }
 0x34b   : > { %v1603_v5 = vpop.permute.xlu0 %1602  ;;  %v3292_v38 = vpop.permute.xlu1 %3291 }
 0x34c   : > { %7376 = vmatmul.mubr.msk.f32.gmra.mxu0 %vm1326_vm4, %v1603_v5 }
 0x34d   : > { %7399 = vmatpush3.xpose.msk.msra.mxu0 %vm1326_vm4, %v1893_v61  ;;  %7378 = vmatprep.mubr.msk.f32.mxu0 %vm8943_vm0, %v8942_v1 }
 0x34e   : > { %7400 = vmatprep.subr.mxu0 %v8942_v1 }
 0x34f   : > { %v1605_v6 = vpop.permute.xlu0 %1604  ;;  %v9706_v5 = vpop.permute.xlu1 %1750 }
 0x350   : > { %7379 = vmatmul.mubr.msk.f32.gmra.mxu0 %vm1326_vm4, %v1605_v6 }
 0x351   : > { %7401 = vmatpush3.xpose.msk.msra.mxu0 %vm1326_vm4, %v1891_v62  ;;  %7402 = vmatprep.mubr.msk.f32.mxu0 %vm8943_vm0, %v8942_v1 }
 0x352   : > { %7426 = vmatprep.subr.mxu0 %v8942_v1 }
 0x353   : > { %v1885_v8 = vpop.permute.xlu0 %1884 }
 0x354   : > { %7403 = vmatmul.mubr.msk.f32.vlgmr.msra.gmra.mxu0 %vm1326_vm4, %v1885_v8 }
 0x355   : > { %7427 = vmatpush3.xpose.msk.msra.mxu0 %vm1326_vm4, %v2176_v63  ;;  %7405 = vmatprep.mubr.msk.f32.mxu0 %vm8943_vm0, %v8942_v1 }
 0x356   : > { %7428 = vmatprep.subr.mxu0 %v8942_v1 }
 0x357   : > { %v1887_v10 = vpop.permute.xlu0 %1886 }
 0x358   : > { %7406 = vmatmul.mubr.msk.f32.gmra.mxu0 %vm1326_vm4, %v1887_v10 }
 0x359   : > { %7429 = vmatpush3.xpose.msk.msra.mxu0 %vm1326_vm4, %v2174_v0  ;;  %7408 = vmatprep.mubr.msk.f32.mxu0 %vm8943_vm0, %v8942_v1 }
 0x35a   : > { %7430 = vmatprep.subr.mxu0 %v8942_v1 }
 0x35b   : > { %v1889_v11 = vpop.permute.xlu0 %1888 }
 0x35c   : > { %7409 = vmatmul.mubr.msk.f32.gmra.mxu0 %vm1326_vm4, %v1889_v11 }
 0x35d   : > { %7431 = vmatpush3.xpose.msk.msra.mxu0 %vm1326_vm4, %v2172_v2  ;;  %7432 = vmatprep.mubr.msk.f32.mxu0 %vm8943_vm0, %v8942_v1 }
 0x35e   : > { %7456 = vmatprep.subr.mxu0 %v8942_v1 }
 0x35f   : > { %v2166_v13 = vpop.permute.xlu0 %2165 }
 0x360   : > { %7433 = vmatmul.mubr.msk.f32.vlgmr.msra.gmra.mxu0 %vm1326_vm4, %v2166_v13  ;;  %v9716_v13 = vpop.permute.xlu1 %1746 }
 0x361   : > { %7457 = vmatpush3.xpose.msk.msra.mxu0 %vm1326_vm4, %v2457_v4  ;;  %7435 = vmatprep.mubr.msk.f32.mxu0 %vm8943_vm0, %v8942_v1 }
 0x362   : > { %7458 = vmatprep.subr.mxu0 %v8942_v1 }
 0x363   : > { %v2168_v15 = vpop.permute.xlu0 %2167 }
 0x364   : > { %7436 = vmatmul.mubr.msk.f32.gmra.mxu0 %vm1326_vm4, %v2168_v15 }
 0x365   : > { %7459 = vmatpush3.xpose.msk.msra.mxu0 %vm1326_vm4, %v2455_v7  ;;  %7438 = vmatprep.mubr.msk.f32.mxu0 %vm8943_vm0, %v8942_v1 }
 0x366   : > { %7460 = vmatprep.subr.mxu0 %v8942_v1 }
 0x367   : > { %v2170_v16 = vpop.permute.xlu0 %2169 }
 0x368   : > { %7439 = vmatmul.mubr.msk.f32.gmra.mxu0 %vm1326_vm4, %v2170_v16 }
 0x369   : > { %7461 = vmatpush3.xpose.msk.msra.mxu0 %vm1326_vm4, %v2453_v9  ;;  %7462 = vmatprep.mubr.msk.f32.mxu0 %vm8943_vm0, %v8942_v1 }
 0x36a   : > { %7486 = vmatprep.subr.mxu0 %v8942_v1 }
 0x36b   : > { %v2447_v18 = vpop.permute.xlu0 %2446 }
 0x36c   : > { %7463 = vmatmul.mubr.msk.f32.vlgmr.msra.gmra.mxu0 %vm1326_vm4, %v2447_v18 }
 0x36d   : > { %7487 = vmatpush3.xpose.msk.msra.mxu0 %vm1326_vm4, %v2738_v12  ;;  %7465 = vmatprep.mubr.msk.f32.mxu0 %vm8943_vm0, %v8942_v1 }
 0x36e   : > { %7488 = vmatprep.subr.mxu0 %v8942_v1 }
 0x36f   : > { %v2449_v20 = vpop.permute.xlu0 %2448 }
 0x370   : > { %7466 = vmatmul.mubr.msk.f32.gmra.mxu0 %vm1326_vm4, %v2449_v20 }
 0x371   : > { %7489 = vmatpush3.xpose.msk.msra.mxu0 %vm1326_vm4, %v2736_v14  ;;  %7468 = vmatprep.mubr.msk.f32.mxu0 %vm8943_vm0, %v8942_v1 }
 0x372   : > { %7490 = vmatprep.subr.mxu0 %v8942_v1 }
 0x373   : > { %v2451_v21 = vpop.permute.xlu0 %2450 }
 0x374   : > { %7469 = vmatmul.mubr.msk.f32.gmra.mxu0 %vm1326_vm4, %v2451_v21  ;;  %v9725_v21 = vpop.permute.xlu1 %2031 }
 0x375   : > { %7491 = vmatpush3.xpose.msk.msra.mxu0 %vm1326_vm4, %v2734_v17  ;;  %7492 = vmatprep.mubr.msk.f32.mxu0 %vm8943_vm0, %v8942_v1 }
 0x376   : > { %7516 = vmatprep.subr.mxu0 %v8942_v1 }
 0x377   : > { %v2728_v23 = vpop.permute.xlu0 %2727 }
 0x378   : > { %7493 = vmatmul.mubr.msk.f32.vlgmr.msra.gmra.mxu0 %vm1326_vm4, %v2728_v23 }
 0x379   : > { %7517 = vmatpush3.xpose.msk.msra.mxu0 %vm1326_vm4, %v3019_v19  ;;  %7495 = vmatprep.mubr.msk.f32.mxu0 %vm8943_vm0, %v8942_v1 }
 0x37a   : > { %7518 = vmatprep.subr.mxu0 %v8942_v1 }
 0x37b   : > { %v2730_v26 = vpop.permute.xlu0 %2729 }
 0x37c   : > { %7496 = vmatmul.mubr.msk.f32.gmra.mxu0 %vm1326_vm4, %v2730_v26  ;;  %v9727_v26 = vpop.permute.xlu1 %2027 }
 0x37d   : > { %7519 = vmatpush3.xpose.msk.msra.mxu0 %vm1326_vm4, %v3017_v22  ;;  %7498 = vmatprep.mubr.msk.f32.mxu0 %vm8943_vm0, %v8942_v1 }
 0x37e   : > { %7520 = vmatprep.subr.mxu0 %v8942_v1 }
 0x37f   : > { %v2732_v28 = vpop.permute.xlu0 %2731 }
 0x380   : > { %7499 = vmatmul.mubr.msk.f32.gmra.mxu0 %vm1326_vm4, %v2732_v28 }
 0x381   : > { %7521 = vmatpush3.xpose.msk.msra.mxu0 %vm1326_vm4, %v3015_v25  ;;  %7522 = vmatprep.mubr.msk.f32.mxu0 %vm8943_vm0, %v8942_v1 }
 0x382   : > { %7546 = vmatprep.subr.mxu0 %v8942_v1 }
 0x383   : > { %v3009_v31 = vpop.permute.xlu0 %3008 }
 0x384   : > { %7523 = vmatmul.mubr.msk.f32.vlgmr.msra.gmra.mxu0 %vm1326_vm4, %v3009_v31 }
 0x385   : > { %7547 = vmatpush3.xpose.msk.msra.mxu0 %vm1326_vm4, %v3300_v30  ;;  %7525 = vmatprep.mubr.msk.f32.mxu0 %vm8943_vm0, %v8942_v1 }
 0x386   : > { %7548 = vmatprep.subr.mxu0 %v8942_v1 }
 0x387   : > { %v3011_v33 = vpop.permute.xlu0 %3010 }
 0x388   : > { %7526 = vmatmul.mubr.msk.f32.gmra.mxu0 %vm1326_vm4, %v3011_v33 }
 0x389   : > { %7549 = vmatpush3.xpose.msk.msra.mxu0 %vm1326_vm4, %v3298_v32  ;;  %7528 = vmatprep.mubr.msk.f32.mxu0 %vm8943_vm0, %v8942_v1  ;;  %v9729_v32 = vpop.permute.xlu1 %2312 }
 0x38a   : > { %7550 = vmatprep.subr.mxu0 %v8942_v1 }
 0x38b   : > { %v3013_v34 = vpop.permute.xlu0 %3012 }
 0x38c   : > { %7529 = vmatmul.mubr.msk.f32.gmra.mxu0 %vm1326_vm4, %v3013_v34 }
 0x38d   : > { %7551 = vmatpush3.xpose.msk.msra.mxu0 %vm1326_vm4, %v3296_v36  ;;  %7552 = vmatprep.mubr.msk.f32.mxu0 %vm8943_vm0, %v8942_v1 }
 0x38e   : > { %7576 = vmatprep.subr.mxu0 %v8942_v1 }
 0x38f   : > { %v3290_v37 = vpop.permute.xlu0 %3289 }
 0x390   : > { %7553 = vmatmul.mubr.msk.f32.vlgmr.msra.gmra.mxu0 %vm1326_vm4, %v3290_v37 }
 0x391   : > { %7555 = vmatprep.mubr.msk.f32.mxu0 %vm8943_vm0, %v8942_v1 }
 0x393   : > { %v3294_v44 = vpop.permute.xlu0 %3293 }
 0x394   : > { %7556 = vmatmul.mubr.msk.f32.gmra.mxu0 %vm1326_vm4, %v3292_v38  ;;  %v9737_v38 = vpop.permute.xlu1 %2308 }
 0x395   : > { %v1408_v39 = vpop.f32.mrf.mxu0  ;;  %7558 = vmatprep.mubr.msk.f32.mxu0 %vm8943_vm0, %v8942_v1 }
 0x396   : > { %v1422_v41 = vmul.f32 0.35355338, %v1408_v39 }
 0x397   : > { %v7344_v46 = vpop.f32.mrf.mxu0  ;;  %v9731_v34 = vpop.permute.xlu0 %1748 }
 0x398   : > { %7559 = vmatmul.mubr.msk.f32.gmra.mxu0 %vm1326_vm4, %v3294_v44  ;;  %v9681_v47 = vadd.f32 %v1422_v41, %v9677_v40 }
 0x399   : > { %7592 = vmatprep.mubr.msk.f32.mxu0 %vm8943_vm0, %v8942_v1 }
 0x39a   : > { %v1428_v48 = vsel %vm1224_vm3, %v9681_v47, -inf }
 0x39b   : > { %v1413_v49 = vpop.f32.mrf.mxu0  ;;  %1429 = vmax.xlane.f32.xlu1 %v1428_v48  ;;  %v9739_v41 = vpop.permute.xlu0 %2029 }
 0x39c   : > { %v1423_v51 = vmul.f32 0.35355338, %v1413_v49  ;;  %v9743_v48 = vpop.permute.xlu1 %2593 }
 0x39d   : > { %v7347_v52 = vpop.f32.mrf.mxu0 }
 0x39e   : > { %v9690_v53 = vadd.f32 %v1423_v51, %v9687_v50 }
 0x39f   : > { %v1418_v54 = vpop.f32.mrf.mxu0  ;;  %v9745_v51 = vpop.permute.xlu0 %2310 }
 0x3a0   : > { %v1424_v56 = vmul.f32 0.35355338, %v1418_v54  ;;  %v1431_v57 = vsel %vm1224_vm3, %v9690_v53, -inf }
 0x3a1   : > { %1432 = vmax.xlane.f32.xlu0 %v1431_v57  ;;  %v7350_v58 = vpop.f32.mrf.mxu0 }
 0x3a2   : > { %v9697_v59 = vadd.f32 %v1424_v56, %v9692_v55  ;;  %v9747_v56 = vpop.permute.xlu1 %2589 }
 0x3a3   : > { %v9751_v58 = vpop.permute.xlu0 %2591 }
 0x3a4   : > { %v1434_v60 = vsel %vm1224_vm3, %v9697_v59, -inf }
 0x3a5   : > { %1435 = vmax.xlane.f32.xlu0 %v1434_v60 }
 0x408   : > { %v1690_v61 = vpop.f32.mrf.mxu0 }
 0x409   : > { %v1704_v62 = vmul.f32 0.35355338, %v1690_v61 }
 0x40a   : > { %v7374_v63 = vpop.f32.mrf.mxu0 }
 0x40b   : > { %v9702_v0 = vadd.f32 %v1704_v62, %v9677_v40  ;;  %v9753_v63 = vpop.permute.xlu1 %2874 }
 0x40c   : > { %v1695_v2 = vpop.f32.mrf.mxu0 }
 0x40d   : > { %v1705_v3 = vmul.f32 0.35355338, %v1695_v2  ;;  %v1710_v4 = vsel %vm1224_vm3, %v9702_v0, -inf }
 0x40e   : > { %1711 = vmax.xlane.f32.xlu1 %v1710_v4  ;;  %v7377_v6 = vpop.f32.mrf.mxu0 }
 0x40f   : > { %v9709_v7 = vadd.f32 %v1705_v3, %v9687_v50 }
 0x410   : > { %v1700_v8 = vpop.f32.mrf.mxu0 }
 0x411   : > { %v1706_v9 = vmul.f32 0.35355338, %v1700_v8  ;;  %v1713_v10 = vsel %vm1224_vm3, %v9709_v7, -inf }
 0x412   : > { %1714 = vmax.xlane.f32.xlu0 %v1713_v10  ;;  %v7380_v11 = vpop.f32.mrf.mxu0 }
 0x413   : > { %v9714_v12 = vadd.f32 %v1706_v9, %v9692_v55 }
 0x414   : > { %v1974_v14 = vpop.f32.mrf.mxu0 }
 0x415   : > { %v1988_v15 = vmul.f32 0.35355338, %v1974_v14  ;;  %v1716_v16 = vsel %vm1224_vm3, %v9714_v12, -inf }
 0x416   : > { %1717 = vmax.xlane.f32.xlu1 %v1716_v16  ;;  %v7404_v17 = vpop.f32.mrf.mxu0 }
 0x417   : > { %v9721_v18 = vadd.f32 %v1988_v15, %v9677_v40 }
 0x418   : > { %v1979_v19 = vpop.f32.mrf.mxu0 }
 0x419   : > { %v1994_v20 = vsel %vm1224_vm3, %v9721_v18, -inf  ;;  %v1989_v9 = vmul.f32 0.35355338, %v1979_v19 }
 0x41a   : > { %1995 = vmax.xlane.f32.xlu0 %v1994_v20  ;;  %v7407_v22 = vpop.f32.mrf.mxu0 }
 0x41b   : > { %v9762_v20 = vadd.f32 %v1989_v9, %v9687_v50 }
 0x41c   : > { %v1984_v23 = vpop.f32.mrf.mxu0 }
 0x41d   : > { %v1990_v14 = vmul.f32 0.35355338, %v1984_v23 }
 0x41e   : > { %v7410_v25 = vpop.f32.mrf.mxu0 }
 0x41f   : > { %v9766_v19 = vadd.f32 %v1990_v14, %v9692_v55 }
 0x420   : > { %v2255_v28 = vpop.f32.mrf.mxu0 }
 0x421   : > { %v2269_v22 = vmul.f32 0.35355338, %v2255_v28 }
 0x422   : > { %v7434_v30 = vpop.f32.mrf.mxu0 }
 0x424   : > { %v2260_v31 = vpop.f32.mrf.mxu0  ;;  %v1430_v4 = vpop.xlane.xlu1 %1429 }
 0x425   : > { %v1437_v11 = vsub.f32 %v9681_v47, %v1430_v4  ;;  %v2270_v30 = vmul.f32 0.35355338, %v2260_v31 }
 0x426   : > { %v7437_v33 = vpop.f32.mrf.mxu0 }
 0x427   : > { %2870 = vrot.lane.b32.xlu1 %v9464_v45, %s8957_s27  ;;  %v1440_v25 = vmul.f32 1.442695, %v1437_v11  ;;  %v9774_v28 = vadd.f32 %v2270_v30, %v9687_v50 }
 0x428   : > { %v2265_v36 = vpop.f32.mrf.mxu0 }
 0x429   : > { %8204 = vpow2.f32 %v1440_v25  ;;  %v2271_v23 = vmul.f32 0.35355338, %v2265_v36  ;;  %v2278_v36 = vsel %vm1224_vm3, %v9774_v28, -inf }
 0x42a   : > { %v7440_v37 = vpop.f32.mrf.mxu0  ;;  %v1433_v62 = vpop.xlane.xlu0 %1432 }
 0x42b   : > { %3155 = vrot.lane.b32.xlu1 %v9449_v42, %s11313_s3  ;;  %v1438_v33 = vsub.f32 %v9690_v53, %v1433_v62  ;;  %v9783_v4 = vadd.f32 %v2271_v23, %v9692_v55 }
 0x42c   : > { %v2536_v39 = vpop.f32.mrf.mxu0 }
 0x42d   : > { %v1442_v31 = vmul.f32 1.442695, %v1438_v33  ;;  %v2550_v53 = vmul.f32 0.35355338, %v2536_v39 }
 0x42e   : > { %v7464_v44 = vpop.f32.mrf.mxu0  ;;  %v1436_v8 = vpop.xlane.xlu0 %1435 }
 0x42f   : > { %v1439_v15 = vsub.f32 %v9697_v59, %v1436_v8  ;;  %v1997_v59 = vsel %vm1224_vm3, %v9762_v20, -inf  ;;  %v9786_v9 = vadd.f32 %v2550_v53, %v9677_v40 }
 0x430   : > { %2872 = vrot.lane.b32.xlu0 %v9454_v43, %s8957_s27  ;;  %v2541_v46 = vpop.f32.mrf.mxu0 }
 0x431   : > { %v1444_v37 = vmul.f32 1.442695, %v1439_v15  ;;  %v2281_v15 = vsel %vm1224_vm3, %v9783_v4, -inf }
 0x432   : > { %v7467_v49 = vpop.f32.mrf.mxu0 }
 0x433   : > { %v9771_v49 = vadd.f32 %v2269_v22, %v9677_v40  ;;  %8206 = vpow2.f32 %v1444_v37 }
 0x434   : > { %v2546_v52 = vpop.f32.mrf.mxu0  ;;  %8208 = vpow2.f32 %v1442_v31 }
 0x435   : > { %v2552_v8 = vmul.f32 0.35355338, %v2546_v52 }
 0x436   : > { %v7470_v54 = vpop.f32.mrf.mxu0  ;;  %v9798_v25 = vpop.eup %8204 }
 0x437   : > { %v1446_v53 = vsel %vm1224_vm3, %v9798_v25, 0.0 }
 0x438   : > { %v9749_v57 = vpop.f32.mrf.mxu0 }
 0x439   : > { %v2831_v23 = vmul.f32 0.35355338, %v9749_v57 }
 0x43a   : > { %v7494_v60 = vpop.f32.mrf.mxu0 }
 0x43b   : > { %v2000_v60 = vsel %vm1224_vm3, %v9766_v19, -inf }
 0x43c   : > { %v2822_v61 = vpop.f32.mrf.mxu0 }
 0x43d   : > { %v2832_v30 = vmul.f32 0.35355338, %v2822_v61 }
 0x43e   : > { %v7497_v2 = vpop.f32.mrf.mxu0 }
 0x43f   : > { %v2275_v2 = vsel %vm1224_vm3, %v9771_v49, -inf }
 0x440   : > { %v9755_v3 = vpop.f32.mrf.mxu0 }
 0x442   : > { %v7500_v6 = vpop.f32.mrf.mxu0 }
 0x443   : > { %v2551_v6 = vmul.f32 0.35355338, %v2541_v46  ;;  %v9796_v46 = vadd.f32 %v2552_v8, %v9692_v55 }
 0x444   : > { %v3098_v10 = vpop.f32.mrf.mxu0 }
 0x445   : > { %v9793_v22 = vadd.f32 %v2551_v6, %v9687_v50  ;;  %v3112_v31 = vmul.f32 0.35355338, %v3098_v10 }
 0x446   : > { %v7524_v16 = vpop.f32.mrf.mxu0 }
 0x447   : > { %v2556_v16 = vsel %vm1224_vm3, %v9786_v9, -inf  ;;  %v2559_v37 = vsel %vm1224_vm3, %v9793_v22, -inf  ;;  %v9825_v8 = vadd.f32 %v3112_v31, %v9677_v40 }
 0x448   : > { %v9759_v17 = vpop.f32.mrf.mxu0 }
 0x44a   : > { %v7527_v44 = vpop.f32.mrf.mxu0 }
 0x44b   : > { %v2562_v44 = vsel %vm1224_vm3, %v9796_v46, -inf }
 0x44c   : > { %v3108_v47 = vpop.f32.mrf.mxu0 }
 0x44d   : > { %v3114_v57 = vmul.f32 0.35355338, %v3108_v47 }
 0x44e   : > { %v7530_v54 = vpop.f32.mrf.mxu0 }
 0x44f   : > { %1998 = vmax.xlane.f32.xlu1 %v1997_v59  ;;  %2001 = vmax.xlane.f32.xlu0 %v2000_v60  ;;  %v9804_v59 = vpop.eup %8206  ;;  %v9812_v54 = vadd.f32 %v2832_v30, %v9687_v50 }
 0x450   : > { %v3379_v62 = vpop.f32.mrf.mxu0  ;;  %v1452_v61 = vsel %vm1224_vm3, %v9804_v59, 0.0  ;;  %v9814_v60 = vpop.eup %8208 }
 0x451   : > { %v1449_v10 = vsel %vm1224_vm3, %v9814_v60, 0.0  ;;  %v2840_v6 = vsel %vm1224_vm3, %v9812_v54, -inf }
 0x452   : > { %v7554_v39 = vpop.f32.mrf.mxu0 }
 0x453   : > { %2276 = vmax.xlane.f32.xlu1 %v2275_v2  ;;  %2279 = vmax.xlane.f32.xlu0 %v2278_v36  ;;  %v2833_v2 = vmul.f32 0.35355338, %v9755_v3  ;;  %v9818_v36 = vadd.f32 %v2831_v23, %v9677_v40  ;;  %v3113_v39 = vmul.f32 0.35355338, %v9759_v17 }
 0x454   : > { %v3384_v11 = vpop.f32.mrf.mxu0 }
 0x455   : > { %v3394_v3 = vmul.f32 0.35355338, %v3384_v11  ;;  %v2837_v47 = vsel %vm1224_vm3, %v9818_v36, -inf  ;;  %v9841_v17 = vadd.f32 %v3113_v39, %v9687_v50 }
 0x456   : > { %v7557_v14 = vpop.f32.mrf.mxu0 }
 0x457   : > { %2282 = vmax.xlane.f32.xlu1 %v2281_v15  ;;  %2557 = vmax.xlane.f32.xlu0 %v2556_v16  ;;  %v9829_v14 = vadd.f32 %v2833_v2, %v9692_v55  ;;  %v3118_v15 = vsel %vm1224_vm3, %v9825_v8, -inf  ;;  %v9836_v16 = vadd.f32 %v3114_v57, %v9692_v55  ;;  %v3121_v23 = vsel %vm1224_vm3, %v9841_v17, -inf }
 0x458   : > { %v3389_v52 = vpop.f32.mrf.mxu0 }
 0x459   : > { %v2843_v30 = vsel %vm1224_vm3, %v9829_v14, -inf  ;;  %v3124_v11 = vsel %vm1224_vm3, %v9836_v16, -inf }
 0x45a   : > { %v7560_v33 = vpop.f32.mrf.mxu0 }
 0x45b   : > { %2560 = vmax.xlane.f32.xlu1 %v2559_v37  ;;  %2563 = vmax.xlane.f32.xlu0 %v2562_v44  ;;  %v3393_v33 = vmul.f32 0.35355338, %v3379_v62  ;;  %v3395_v37 = vmul.f32 0.35355338, %v3389_v52  ;;  %v9846_v44 = vadd.f32 %v3394_v3, %v9687_v50 }
 0x45d   : > { %v3402_v31 = vsel %vm1224_vm3, %v9846_v44, -inf  ;;  %v9856_v62 = vadd.f32 %v3395_v37, %v9692_v55 }
 0x45f   : > { %1447 = vadd.xlane.f32.xlu1 %v1446_v53  ;;  %1453 = vadd.xlane.f32.xlu0 %v1452_v61  ;;  %v9853_v53 = vadd.f32 %v3393_v33, %v9677_v40  ;;  %v3405_v52 = vsel %vm1224_vm3, %v9856_v62, -inf }
 0x461   : > { %v3399_v50 = vsel %vm1224_vm3, %v9853_v53, -inf }
 0x463   : > { %1450 = vadd.xlane.f32.xlu1 %v1449_v10  ;;  %2841 = vmax.xlane.f32.xlu0 %v2840_v6 }
 0x467   : > { %2838 = vmax.xlane.f32.xlu1 %v2837_v47  ;;  %3119 = vmax.xlane.f32.xlu0 %v3118_v15 }
 0x46b   : > { %2844 = vmax.xlane.f32.xlu1 %v2843_v30  ;;  %3125 = vmax.xlane.f32.xlu0 %v3124_v11 }
 0x46f   : > { %3122 = vmax.xlane.f32.xlu1 %v3121_v23  ;;  %3403 = vmax.xlane.f32.xlu0 %v3402_v31 }
 0x473   : > { %3400 = vmax.xlane.f32.xlu1 %v3399_v50  ;;  %3406 = vmax.xlane.f32.xlu0 %v3405_v52 }
 0x497   : > { %v1712_v61 = vpop.xlane.xlu1 %1711 }
 0x498   : > { %v1719_v2 = vsub.f32 %v9702_v0, %v1712_v61 }
 0x49a   : > { %v1722_v57 = vmul.f32 1.442695, %v1719_v2 }
 0x49b   : > { %v1715_v10 = vpop.xlane.xlu0 %1714 }
 0x49c   : > { %8210 = vpow2.f32 %v1722_v57  ;;  %v1720_v40 = vsub.f32 %v9709_v7, %v1715_v10 }
 0x49e   : > { %v1724_v55 = vmul.f32 1.442695, %v1720_v40 }
 0x49f   : > { %v1718_v6 = vpop.xlane.xlu1 %1717 }
 0x4a0   : > { %8212 = vpow2.f32 %v1724_v55  ;;  %v1721_v39 = vsub.f32 %v9714_v12, %v1718_v6 }
 0x4a2   : > { %v1726_v3 = vmul.f32 1.442695, %v1721_v39 }
 0x4a3   : > { %v1996_v47 = vpop.xlane.xlu0 %1995  ;;  %v9882_v31 = vpop.permute.xlu1 %2870 }
 0x4a4   : > { %8214 = vpow2.f32 %v1726_v3  ;;  %v2003_v15 = vsub.f32 %v9721_v18, %v1996_v47 }
 0x4a6   : > { %v2006_v30 = vmul.f32 1.442695, %v2003_v15 }
 0x4a7   : > { %v9884_v50 = vpop.permute.xlu1 %3155  ;;  %v9886_v52 = vpop.permute.xlu0 %2872 }
 0x4a8   : > { %8216 = vpow2.f32 %v2006_v30 }
 0x4a9   : > { %v9866_v33 = vpop.eup %8210 }
 0x4aa   : > { %v1728_v0 = vsel %vm1224_vm3, %v9866_v33, 0.0 }
 0x4ab   : > { %1729 = vadd.xlane.f32.xlu1 %v1728_v0 }
 0x4ad   : > { %v9870_v37 = vpop.eup %8212 }
 0x4ae   : > { %v1731_v7 = vsel %vm1224_vm3, %v9870_v37, 0.0 }
 0x4af   : > { %1732 = vadd.xlane.f32.xlu0 %v1731_v7 }
 0x4b1   : > { %v9874_v12 = vpop.eup %8214 }
 0x4b2   : > { %v1734_v11 = vsel %vm1224_vm3, %v9874_v12, 0.0 }
 0x4b3   : > { %1735 = vadd.xlane.f32.xlu1 %v1734_v11 }
 0x4b5   : > { %v9878_v18 = vpop.eup %8216 }
 0x4b6   : > { %v2012_v23 = vsel %vm1224_vm3, %v9878_v18, 0.0 }
 0x4b7   : > { %2013 = vadd.xlane.f32.xlu0 %v2012_v23 }
 0x4d8   : > { %v1999_v61 = vpop.xlane.xlu1 %1998  ;;  %v2002_v2 = vpop.xlane.xlu0 %2001 }
 0x4d9   : > { %v2004_v57 = vsub.f32 %v9762_v20, %v1999_v61  ;;  %v2005_v10 = vsub.f32 %v9766_v19, %v2002_v2 }
 0x4db   : > { %v2008_v40 = vmul.f32 1.442695, %v2004_v57  ;;  %v2010_v55 = vmul.f32 1.442695, %v2005_v10 }
 0x4dc   : > { %v2277_v6 = vpop.xlane.xlu1 %2276  ;;  %v2280_v39 = vpop.xlane.xlu0 %2279 }
 0x4dd   : > { %8218 = vpow2.f32 %v2008_v40  ;;  %v2284_v3 = vsub.f32 %v9771_v49, %v2277_v6  ;;  %v2285_v47 = vsub.f32 %v9774_v28, %v2280_v39 }
 0x4de   : > { %8220 = vpow2.f32 %v2010_v55 }
 0x4df   : > { %v2287_v15 = vmul.f32 1.442695, %v2284_v3  ;;  %v2289_v30 = vmul.f32 1.442695, %v2285_v47 }
 0x4e0   : > { %v2283_v0 = vpop.xlane.xlu1 %2282  ;;  %v2558_v7 = vpop.xlane.xlu0 %2557 }
 0x4e1   : > { %8222 = vpow2.f32 %v2287_v15  ;;  %v2286_v11 = vsub.f32 %v9783_v4, %v2283_v0  ;;  %v2565_v20 = vsub.f32 %v9786_v9, %v2558_v7 }
 0x4e2   : > { %8224 = vpow2.f32 %v2289_v30 }
 0x4e3   : > { %v2291_v19 = vmul.f32 1.442695, %v2286_v11  ;;  %v2568_v23 = vmul.f32 1.442695, %v2565_v20 }
 0x4e4   : > { %v2561_v61 = vpop.xlane.xlu1 %2560  ;;  %v2564_v2 = vpop.xlane.xlu0 %2563 }
 0x4e5   : > { %8226 = vpow2.f32 %v2291_v19 }
 0x4e6   : > { %8228 = vpow2.f32 %v2568_v23 }
 0x4e8   : > { %v1448_v49 = vpop.xlane.xlu1 %1447  ;;  %v1454_v55 = vpop.xlane.xlu0 %1453 }
 0x4e9   : > { %8230 = vrcp.f32 %v1448_v49  ;;  %v2567_v49 = vsub.f32 %v9796_v46, %v2564_v2 }
 0x4ea   : > { %v9894_v57 = vpop.eup %8218 }
 0x4eb   : > { %v9896_v28 = vpop.eup %8220  ;;  %v2015_v10 = vsel %vm1224_vm3, %v9894_v57, 0.0 }
 0x4ec   : > { %v1451_v40 = vpop.xlane.xlu1 %1450  ;;  %2016 = vadd.xlane.f32.xlu1 %v2015_v10  ;;  %v2018_v4 = vsel %vm1224_vm3, %v9896_v28, 0.0 }
 0x4ed   : > { %8232 = vrcp.f32 %v1451_v40  ;;  %2019 = vadd.xlane.f32.xlu0 %v2018_v4  ;;  %v2572_v4 = vmul.f32 1.442695, %v2567_v49 }
 0x4ee   : > { %v9902_v9 = vpop.eup %8222  ;;  %8234 = vrcp.f32 %v1454_v55 }
 0x4ef   : > { %v9904_v6 = vpop.eup %8224  ;;  %v2293_v39 = vsel %vm1224_vm3, %v9902_v9, 0.0 }
 0x4f0   : > { %v2296_v3 = vsel %vm1224_vm3, %v9904_v6, 0.0 }
 0x4f1   : > { %2297 = vadd.xlane.f32.xlu1 %v2296_v3  ;;  %2294 = vadd.xlane.f32.xlu0 %v2293_v39 }
 0x4f2   : > { %v9910_v47 = vpop.eup %8226 }
 0x4f3   : > { %v2299_v15 = vsel %vm1224_vm3, %v9910_v47, 0.0  ;;  %v9914_v30 = vpop.eup %8228 }
 0x4f4   : > { %v2574_v7 = vsel %vm1224_vm3, %v9914_v30, 0.0 }
 0x4f5   : > { %2300 = vadd.xlane.f32.xlu0 %v2299_v15 }
 0x4f6   : > { %v8231_v0 = vpop.eup %8230 }
 0x4f7   : > { %v1456_v11 = vmul.f32 %v8231_v0, %v9798_v25 }
 0x4f9   : > { %2575 = vadd.xlane.f32.xlu0 %v2574_v7  ;;  %7358 = vmatmul.mubr.msk.f32.vlgmr.msra.gmra.mxu1 %vm1224_vm3, %v1456_v11 }
 0x4fa   : > { %v8233_v20 = vpop.eup %8232  ;;  %7382 = vmatpush3.msra.mxu1 %v9706_v5  ;;  %7360 = vmatprep.mubr.msk.f32.mxu1 %vm8943_vm0, %v8942_v1  ;;  %v2566_v5 = vsub.f32 %v9793_v22, %v2561_v61 }
 0x4fb   : > { %v1458_v19 = vmul.f32 %v8233_v20, %v9814_v60  ;;  %7383 = vmatprep.subr.mxu1 %v8942_v1  ;;  %v8235_v23 = vpop.eup %8234 }
 0x4fc   : > { %7384 = vmatpush3.msra.mxu1 %v9731_v34  ;;  %v1460_v25 = vmul.f32 %v8235_v23, %v9804_v59  ;;  %v2842_v34 = vpop.xlane.xlu0 %2841  ;;  %v2839_v59 = vpop.xlane.xlu1 %2838 }
 0x4fd   : > { %7385 = vmatprep.subr.mxu1 %v8942_v1  ;;  %7361 = vmatmul.mubr.msk.f32.gmra.mxu1 %vm1224_vm3, %v1458_v19  ;;  %v2847_v60 = vsub.f32 %v9812_v54, %v2842_v34  ;;  %v2846_v55 = vsub.f32 %v9818_v36, %v2839_v59 }
 0x4fe   : > { %7386 = vmatpush3.msra.mxu1 %v9716_v13  ;;  %7363 = vmatprep.mubr.msk.f32.mxu1 %vm8943_vm0, %v8942_v1  ;;  %v2570_v13 = vmul.f32 1.442695, %v2566_v5 }
 0x4ff   : > { %7411 = vmatprep.subr.mxu1 %v8942_v1  ;;  %v2851_v10 = vmul.f32 1.442695, %v2847_v60  ;;  %v2849_v22 = vmul.f32 1.442695, %v2846_v55 }
 0x500   : > { %8236 = vpow2.f32 %v2570_v13  ;;  %v3120_v40 = vpop.xlane.xlu0 %3119  ;;  %v2845_v39 = vpop.xlane.xlu1 %2844 }
 0x501   : > { %7364 = vmatmul.mubr.msk.f32.gmra.mxu1 %vm1224_vm3, %v1460_v25  ;;  %8238 = vpow2.f32 %v2851_v10  ;;  %v2848_v61 = vsub.f32 %v9829_v14, %v2845_v39  ;;  %v3127_v54 = vsub.f32 %v9825_v8, %v3120_v40 }
 0x502   : > { %3151 = vrot.lane.b32.xlu1 %v9464_v45, %s11313_s3  ;;  %7387 = vmatprep.mubr.msk.f32.mxu1 %vm8943_vm0, %v8942_v1  ;;  %8240 = vpow2.f32 %v2572_v4 }
 0x503   : > { %8242 = vpow2.f32 %v2849_v22  ;;  %v2853_v0 = vmul.f32 1.442695, %v2848_v61  ;;  %v3130_v2 = vmul.f32 1.442695, %v3127_v54 }
 0x504   : > { %v3126_v3 = vpop.xlane.xlu0 %3125  ;;  %v9945_v15 = vpop.xlane.xlu1 %3122 }
 0x505   : > { %8244 = vpow2.f32 %v2853_v0  ;;  %v3129_v36 = vsub.f32 %v9836_v16, %v3126_v3 }
 0x506   : > { %8246 = vpow2.f32 %v3130_v2 }
 0x507   : > { %v3134_v19 = vmul.f32 1.442695, %v3129_v36 }
 0x508   : > { %v9950_v46 = vpop.xlane.xlu0 %3403  ;;  %v3401_v14 = vpop.xlane.xlu1 %3400 }
 0x509   : > { %v3408_v8 = vsub.f32 %v9853_v53, %v3401_v14  ;;  %8248 = vpow2.f32 %v3134_v19  ;;  %v3128_v19 = vsub.f32 %v9841_v17, %v9945_v15  ;;  %v3409_v17 = vsub.f32 %v9846_v44, %v9950_v46 }
 0x50b   : > { %v3411_v34 = vmul.f32 1.442695, %v3408_v8 }
 0x50c   : > { %v3407_v23 = vpop.xlane.xlu0 %3406 }
 0x50d   : > { %v9948_v7 = vpop.eup %8236  ;;  %v3410_v16 = vsub.f32 %v9856_v62, %v3407_v23  ;;  %8250 = vpow2.f32 %v3411_v34  ;;  %v3132_v23 = vmul.f32 1.442695, %v3128_v19 }
 0x50e   : > { %v2577_v11 = vsel %vm1224_vm3, %v9948_v7, 0.0  ;;  %v9955_v20 = vpop.eup %8238 }
 0x50f   : > { %3153 = vrot.lane.b32.xlu0 %v9454_v43, %s11313_s3  ;;  %v2858_v25 = vsel %vm1224_vm3, %v9955_v20, 0.0  ;;  %v9960_v5 = vpop.eup %8240  ;;  %v3415_v59 = vmul.f32 1.442695, %v3410_v16 }
 0x510   : > { %v2580_v13 = vsel %vm1224_vm3, %v9960_v5, 0.0  ;;  %v9965_v60 = vpop.eup %8242 }
 0x511   : > { %v2855_v53 = vsel %vm1224_vm3, %v9965_v60, 0.0  ;;  %8252 = vpow2.f32 %v3415_v59 }
 0x512   : > { %v9969_v49 = vpop.eup %8244 }
 0x513   : > { %v2861_v62 = vsel %vm1224_vm3, %v9969_v49, 0.0  ;;  %v9973_v40 = vpop.eup %8246 }
 0x514   : > { %v3136_v55 = vsel %vm1224_vm3, %v9973_v40, 0.0 }
 0x516   : > { %v9977_v39 = vpop.eup %8248 }
 0x517   : > { %v3142_v61 = vsel %vm1224_vm3, %v9977_v39, 0.0 }
 0x51a   : > { %v9983_v3 = vpop.eup %8250 }
 0x51b   : > { %v3417_v2 = vsel %vm1224_vm3, %v9983_v3, 0.0 }
 0x51e   : > { %v9985_v0 = vpop.eup %8252 }
 0x526   : > { %2578 = vadd.xlane.f32.xlu1 %v2577_v11 }
 0x52a   : > { %2859 = vadd.xlane.f32.xlu1 %v2858_v25 }
 0x52e   : > { %2581 = vadd.xlane.f32.xlu0 %v2580_v13 }
 0x532   : > { %2856 = vadd.xlane.f32.xlu0 %v2855_v53 }
 0x534   : > { %v1730_v10 = vpop.xlane.xlu1 %1729 }
 0x535   : > { %8254 = vrcp.f32 %v1730_v10 }
 0x536   : > { %2862 = vadd.xlane.f32.xlu0 %v2861_v62 }
 0x538   : > { %v1733_v4 = vpop.xlane.xlu0 %1732 }
 0x539   : > { %8256 = vrcp.f32 %v1733_v4 }
 0x53a   : > { %3137 = vadd.xlane.f32.xlu0 %v3136_v55 }
 0x53b   : > { %3436 = vrot.lane.b32.xlu1 %v9449_v42, %s11311_s9  ;;  %v3423_v42 = vsel %vm1224_vm3, %v9985_v0, 0.0 }
 0x53c   : > { %v1736_v22 = vpop.xlane.xlu1 %1735 }
 0x53d   : > { %8258 = vrcp.f32 %v1736_v22 }
 0x53e   : > { %3143 = vadd.xlane.f32.xlu0 %v3142_v61 }
 0x540   : > { %v2014_v54 = vpop.xlane.xlu0 %2013 }
 0x541   : > { %8260 = vrcp.f32 %v2014_v54 }
 0x542   : > { %v8255_v36 = vpop.eup %8254  ;;  %3418 = vadd.xlane.f32.xlu0 %v3417_v2  ;;  %8262 = vpow2.f32 %v3132_v23 }
 0x543   : > { %v1738_v11 = vmul.f32 %v8255_v36, %v9866_v33 }
 0x545   : > { %7388 = vmatmul.mubr.msk.f32.vlgmr.msra.gmra.mxu1 %vm1224_vm3, %v1738_v11 }
 0x546   : > { %v8257_v14 = vpop.eup %8256  ;;  %7412 = vmatpush3.msra.mxu1 %v9725_v21  ;;  %3424 = vadd.xlane.f32.xlu0 %v3423_v42 }
 0x547   : > { %7413 = vmatprep.subr.mxu1 %v8942_v1  ;;  %7390 = vmatprep.mubr.msk.f32.mxu1 %vm8943_vm0, %v8942_v1  ;;  %v1740_v8 = vmul.f32 %v8257_v14, %v9870_v37  ;;  %v3413_v37 = vmul.f32 1.442695, %v3409_v17 }
 0x548   : > { %7414 = vmatpush3.msra.mxu1 %v9739_v41 }
 0x549   : > { %7415 = vmatprep.subr.mxu1 %v8942_v1  ;;  %7391 = vmatmul.mubr.msk.f32.gmra.mxu1 %vm1224_vm3, %v1740_v8  ;;  %8264 = vpow2.f32 %v3413_v37 }
 0x54a   : > { %v8259_v33 = vpop.eup %8258  ;;  %7416 = vmatpush3.msra.mxu1 %v9727_v26  ;;  %7393 = vmatprep.mubr.msk.f32.mxu1 %vm8943_vm0, %v8942_v1 }
 0x54b   : > { %v1742_v21 = vmul.f32 %v8259_v33, %v9874_v12  ;;  %7441 = vmatprep.subr.mxu1 %v8942_v1 }
 0x54d   : > { %7394 = vmatmul.mubr.msk.f32.gmra.mxu1 %vm1224_vm3, %v1742_v21 }
 0x54e   : > { %v8261_v41 = vpop.eup %8260  ;;  %7417 = vmatprep.mubr.msk.f32.mxu1 %vm8943_vm0, %v8942_v1 }
 0x54f   : > { %v2022_v15 = vmul.f32 %v8261_v41, %v9878_v18  ;;  %v10023_v26 = vpop.eup %8262 }
 0x551   : > { %7418 = vmatmul.mubr.msk.f32.vlgmr.msra.gmra.mxu1 %vm1224_vm3, %v2022_v15 }
 0x552   : > { %7442 = vmatpush3.msra.mxu1 %v9729_v32  ;;  %7420 = vmatprep.mubr.msk.f32.mxu1 %vm8943_vm0, %v8942_v1  ;;  %v3139_v32 = vsel %vm1224_vm3, %v10023_v26, 0.0 }
 0x553   : > { %7443 = vmatprep.subr.mxu1 %v8942_v1 }
 0x554   : > { %7444 = vmatpush3.msra.mxu1 %v9745_v51 }
 0x555   : > { %7445 = vmatprep.subr.mxu1 %v8942_v1 }
 0x556   : > { %7446 = vmatpush3.msra.mxu1 %v9737_v38  ;;  %v10029_v44 = vpop.eup %8264 }
 0x557   : > { %7471 = vmatprep.subr.mxu1 %v8942_v1  ;;  %v3420_v51 = vsel %vm1224_vm3, %v10029_v44, 0.0 }
 0x55c   : > { %3434 = vrot.lane.b32.xlu0 %v9454_v43, %s11311_s9 }
 0x55f   : > { %3140 = vadd.xlane.f32.xlu1 %v3139_v32 }
 0x563   : > { %3421 = vadd.xlane.f32.xlu1 %v3420_v51 }
 0x574   : > { %3432 = vrot.lane.b32.xlu1 %v9464_v45, %s11311_s9  ;;  %s11377_s9 = sld [smem:[#allocation43_spill]] }
 0x575   : > { %v2017_v38 = vpop.xlane.xlu1 %2016 }
 0x576   : > { %8266 = vrcp.f32 %v2017_v38  ;;  %v2020_v12 = vpop.xlane.xlu0 %2019 }
 0x577   : > { %8268 = vrcp.f32 %v2020_v12 }
 0x57a   : > { %v2295_v18 = vpop.xlane.xlu0 %2294  ;;  %v2298_v43 = vpop.xlane.xlu1 %2297 }
 0x57b   : > { %8270 = vrcp.f32 %v2295_v18 }
 0x57c   : > { %8272 = vrcp.f32 %v2298_v43 }
 0x57e   : > { %v2301_v46 = vpop.xlane.xlu0 %2300 }
 0x57f   : > { %8274 = vrcp.f32 %v2301_v46 }
 0x582   : > { %v2576_v13 = vpop.xlane.xlu0 %2575 }
 0x583   : > { %v8267_v25 = vpop.eup %8266  ;;  %8276 = vrcp.f32 %v2576_v13 }
 0x584   : > { %v2024_v16 = vmul.f32 %v8267_v25, %v9894_v57  ;;  %v8269_v34 = vpop.eup %8268 }
 0x585   : > { %v2026_v45 = vmul.f32 %v8269_v34, %v9896_v28 }
 0x586   : > { %7421 = vmatmul.mubr.msk.f32.gmra.mxu1 %vm1224_vm3, %v2024_v16 }
 0x587   : > { %7423 = vmatprep.mubr.msk.f32.mxu1 %vm8943_vm0, %v8942_v1 }
 0x588   : > { %v8271_v59 = vpop.eup %8270 }
 0x589   : > { %v2303_v53 = vmul.f32 %v8271_v59, %v9902_v9  ;;  %v8273_v10 = vpop.eup %8272 }
 0x58a   : > { %7424 = vmatmul.mubr.msk.f32.gmra.mxu1 %vm1224_vm3, %v2026_v45  ;;  %v2305_v57 = vmul.f32 %v8273_v10, %v9904_v6 }
 0x58b   : > { %7447 = vmatprep.mubr.msk.f32.mxu1 %vm8943_vm0, %v8942_v1 }
 0x58c   : > { %v8275_v28 = vpop.eup %8274 }
 0x58e   : > { %7448 = vmatmul.mubr.msk.f32.vlgmr.msra.gmra.mxu1 %vm1224_vm3, %v2303_v53 }
 0x58f   : > { %7472 = vmatpush3.msra.mxu1 %v9743_v48  ;;  %7450 = vmatprep.mubr.msk.f32.mxu1 %vm8943_vm0, %v8942_v1  ;;  %v2307_v48 = vmul.f32 %v8275_v28, %v9910_v47  ;;  %v3154_v47 = vpop.permute.xlu0 %3153 }
 0x590   : > { %7473 = vmatprep.subr.mxu1 %v8942_v1  ;;  %v8277_v9 = vpop.eup %8276 }
 0x591   : > { %7474 = vmatpush3.msra.mxu1 %v9751_v58  ;;  %v2584_v58 = vmul.f32 %v8277_v9, %v9914_v30 }
 0x592   : > { %7475 = vmatprep.subr.mxu1 %v8942_v1  ;;  %7451 = vmatmul.mubr.msk.f32.gmra.mxu1 %vm1224_vm3, %v2305_v57 }
 0x593   : > { %7476 = vmatpush3.msra.mxu1 %v9747_v56  ;;  %7453 = vmatprep.mubr.msk.f32.mxu1 %vm8943_vm0, %v8942_v1  ;;  %v3152_v56 = vpop.permute.xlu1 %3151 }
 0x594   : > { %7501 = vmatprep.subr.mxu1 %v8942_v1 }
 0x596   : > { %7454 = vmatmul.mubr.msk.f32.gmra.mxu1 %vm1224_vm3, %v2307_v48 }
 0x597   : > { %7477 = vmatprep.mubr.msk.f32.mxu1 %vm8943_vm0, %v8942_v1 }
 0x59a   : > { %7478 = vmatmul.mubr.msk.f32.vlgmr.msra.gmra.mxu1 %vm1224_vm3, %v2584_v58 }
 0x59b   : > { %7502 = vmatpush3.msra.mxu1 %v9753_v63  ;;  %7480 = vmatprep.mubr.msk.f32.mxu1 %vm8943_vm0, %v8942_v1 }
 0x59c   : > { %7503 = vmatprep.subr.mxu1 %v8942_v1 }
 0x59d   : > { %7504 = vmatpush3.msra.mxu1 %v9886_v52 }
 0x59e   : > { %7505 = vmatprep.subr.mxu1 %v8942_v1 }
 0x59f   : > { %7506 = vmatpush3.msra.mxu1 %v9882_v31 }
 0x5a0   : > { %7531 = vmatprep.subr.mxu1 %v8942_v1 }
 0x5af   : > { %v2579_v6 = vpop.xlane.xlu1 %2578 }
 0x5b0   : > { %8278 = vrcp.f32 %v2579_v6 }
 0x5b3   : > { %v2860_v4 = vpop.xlane.xlu1 %2859 }
 0x5b7   : > { %v2582_v30 = vpop.xlane.xlu0 %2581  ;;  %v3437_v41 = vpop.permute.xlu1 %3436 }
 0x5b8   : > { %8280 = vrcp.f32 %v2582_v30  ;;  %v3579_v30 = vld [vmem:[%s11374_s30 + $0x30] sm:$0xff] }
 0x5b9   : > { %v1536_v63 = vpop.f32.mrf.mxu1 }
 0x5ba   : > { %1551 = vst.msk [vmem:[#allocation2] sm:$0x7] %vm1550_vm5, %v1536_v63  ;;  %1559 = vrot.lane.b32.xlu1 %v1536_v63, %s8950_s5  ;;  %1553 = vrot.lane.b32.xlu0 %v1536_v63, %s8951_s15  ;;  %v3578_v63 = vld [vmem:[%s11374_s30 + $0x28] sm:$0xff] }
 0x5bb   : > { %v2857_v62 = vpop.xlane.xlu0 %2856  ;;  %v7359_v52 = vpop.f32.mrf.mxu1 }
 0x5bc   : > { %8282 = vrcp.f32 %v2857_v62 }
 0x5bd   : > { %v8279_v31 = vpop.eup %8278  ;;  %8284 = vrcp.f32 %v2860_v4  ;;  %v1541_v22 = vpop.f32.mrf.mxu1 }
 0x5be   : > { %v2586_v55 = vmul.f32 %v8279_v31, %v9948_v7  ;;  %1569 = vrot.lane.b32.xlu1 %v1541_v22, %s8949_s11  ;;  %1561 = vrot.lane.b32.xlu0 %v1541_v22, %s8950_s5  ;;  %v3577_v31 = vld [vmem:[%s11374_s30 + $0x20] sm:$0xff] }
 0x5bf   : > { %v2863_v61 = vpop.xlane.xlu0 %2862  ;;  %v7362_v54 = vpop.f32.mrf.mxu1 }
 0x5c0   : > { %7481 = vmatmul.mubr.msk.f32.gmra.mxu1 %vm1224_vm3, %v2586_v55  ;;  %8286 = vrcp.f32 %v2863_v61  ;;  %v3576_v55 = vld [vmem:[%s11374_s30 + $0x18] sm:$0xff]  ;;  %v3575_v61 = vld [vmem:[%s11374_s30 + $0x10] sm:$0xff] }
 0x5c1   : > { %7483 = vmatprep.mubr.msk.f32.mxu1 %vm8943_vm0, %v8942_v1  ;;  %v1546_v2 = vpop.f32.mrf.mxu1 }
 0x5c2   : > { %1580 = vrot.lane.b32.xlu1 %v1541_v22, %s8947_s13  ;;  %1574 = vrot.lane.b32.xlu0 %v1541_v22, %s8948_s2 }
 0x5c3   : > { %v3138_v36 = vpop.xlane.xlu0 %3137  ;;  %v7365_v11 = vpop.f32.mrf.mxu1 }
 0x5c4   : > { %8288 = vrcp.f32 %v3138_v36  ;;  %v3573_v11 = vld [vmem:[%s11374_s30] sm:$0xff] }
 0x5c5   : > { %v8281_v7 = vpop.eup %8280 }
 0x5c6   : > { %v2588_v42 = vmul.f32 %v8281_v7, %v9960_v5  ;;  %1595 = vrot.lane.b32.xlu1 %v1546_v2, %s8945_s1  ;;  %1582 = vrot.lane.b32.xlu0 %v1546_v2, %s8947_s13 }
 0x5c7   : > { %v3144_v19 = vpop.xlane.xlu0 %3143 }
 0x5c8   : > { %7484 = vmatmul.mubr.msk.f32.gmra.mxu1 %vm1224_vm3, %v2588_v42 }
 0x5c9   : > { %v8283_v14 = vpop.eup %8282  ;;  %7507 = vmatprep.mubr.msk.f32.mxu1 %vm8943_vm0, %v8942_v1 }
 0x5ca   : > { %v2865_v8 = vmul.f32 %v8283_v14, %v9965_v60  ;;  %v8285_v33 = vpop.eup %8284  ;;  %1590 = vrot.lane.b32.xlu0 %v1546_v2, %s8946_s29  ;;  %v3574_v2 = vld [vmem:[%s11374_s30 + $0x8] sm:$0xff] }
 0x5cb   : > { %v3419_v5 = vpop.xlane.xlu0 %3418  ;;  %v2867_v23 = vmul.f32 %v8285_v33, %v9955_v20 }
 0x5cc   : > { %7508 = vmatmul.mubr.msk.f32.vlgmr.msra.gmra.mxu1 %vm1224_vm3, %v2865_v8 }
 0x5cd   : > { %7532 = vmatpush3.msra.mxu1 %v9884_v50  ;;  %7510 = vmatprep.mubr.msk.f32.mxu1 %vm8943_vm0, %v8942_v1  ;;  %v8287_v17 = vpop.eup %8286 }
 0x5ce   : > { %7533 = vmatprep.subr.mxu1 %v8942_v1  ;;  %v2869_v50 = vmul.f32 %v8287_v17, %v9969_v49 }
 0x5cf   : > { %7534 = vmatpush3.msra.mxu1 %v3154_v47  ;;  %v3425_v21 = vpop.xlane.xlu0 %3424  ;;  %v3580_v47 = vld [vmem:[%s11374_s30 + $0x38] sm:$0xff] }
 0x5d0   : > { %7535 = vmatprep.subr.mxu1 %v8942_v1  ;;  %7511 = vmatmul.mubr.msk.f32.gmra.mxu1 %vm1224_vm3, %v2867_v23 }
 0x5d1   : > { %7536 = vmatpush3.msra.mxu1 %v3152_v56  ;;  %7513 = vmatprep.mubr.msk.f32.mxu1 %vm8943_vm0, %v8942_v1  ;;  %v8289_v60 = vpop.eup %8288 }
 0x5d2   : > { %7561 = vmatprep.subr.mxu1 %v8942_v1  ;;  %v3146_v20 = vmul.f32 %v8289_v60, %v9973_v40  ;;  %7577 = vmatpush3.msra.mxu0 %v3580_v47 }
 0x5d3   : > { %v3435_v37 = vpop.permute.xlu0 %3434  ;;  %7578 = vmatprep.subr.mxu0 %v8942_v1 }
 0x5d4   : > { %7514 = vmatmul.mubr.msk.f32.gmra.mxu1 %vm1224_vm3, %v2869_v50  ;;  %7579 = vmatpush3.msra.mxu0 %v3579_v30 }
 0x5d5   : > { %7537 = vmatprep.mubr.msk.f32.mxu1 %vm8943_vm0, %v8942_v1  ;;  %7580 = vmatprep.subr.mxu0 %v8942_v1 }
 0x5d6   : > { %7581 = vmatpush3.msra.mxu0 %v3578_v63 }
 0x5d7   : > { %7582 = vmatprep.subr.mxu0 %v8942_v1 }
 0x5d8   : > { %7538 = vmatmul.mubr.msk.f32.vlgmr.msra.gmra.mxu1 %vm1224_vm3, %v3146_v20  ;;  %7583 = vmatpush3.msra.mxu0 %v3577_v31 }
 0x5d9   : > { %7562 = vmatpush3.msra.mxu1 %v3437_v41  ;;  %7540 = vmatprep.mubr.msk.f32.mxu1 %vm8943_vm0, %v8942_v1 }
 0x5da   : > { %7563 = vmatprep.subr.mxu1 %v8942_v1  ;;  %7584 = vmatprep.subr.mxu0 %v8942_v1 }
 0x5db   : > { %7564 = vmatpush3.msra.mxu1 %v3435_v37  ;;  %7585 = vmatpush3.msra.mxu0 %v3576_v55 }
 0x5dc   : > { %7565 = vmatprep.subr.mxu1 %v8942_v1  ;;  %7586 = vmatprep.subr.mxu0 %v8942_v1 }
 0x5dd   : > { %7587 = vmatpush3.msra.mxu0 %v3575_v61 }
 0x5de   : > { %7588 = vmatprep.subr.mxu0 %v8942_v1 }
 0x5df   : > { %7589 = vmatpush3.msra.mxu0 %v3574_v2 }
 0x5e0   : > { %7590 = vmatprep.subr.mxu0 %v8942_v1 }
 0x5e1   : > { %7591 = vmatpush3.msra.mxu0 %v3573_v11 }
 0x5e2   : > { %7626 = vmatprep.subr.mxu0 %v8942_v1 }
 0x5e8   : > { %v3141_v49 = vpop.xlane.xlu1 %3140 }
 0x5e9   : > { %8290 = vrcp.f32 %v3141_v49 }
 0x5ea   : > { %8292 = vrcp.f32 %v3144_v19 }
 0x5eb   : > { %8294 = vrcp.f32 %v3419_v5 }
 0x5ec   : > { %v3422_v15 = vpop.xlane.xlu1 %3421 }
 0x5ed   : > { %8296 = vrcp.f32 %v3422_v15 }
 0x5ee   : > { %8298 = vrcp.f32 %v3425_v21 }
 0x5f0   : > { %v3433_v32 = vpop.permute.xlu1 %3432 }
 0x5f1   : > { %7566 = vmatpush3.msra.mxu1 %v3433_v32 }
 0x5f2   : > { %7601 = vmatprep.subr.mxu1 %v8942_v1 }
 0x5f6   : > { %v8291_v40 = vpop.eup %8290 }
 0x5f7   : > { %v3148_v51 = vmul.f32 %v8291_v40, %v10023_v26  ;;  %v8293_v38 = vpop.eup %8292 }
 0x5f8   : > { %v3150_v12 = vmul.f32 %v8293_v38, %v9977_v39  ;;  %v8295_v18 = vpop.eup %8294 }
 0x5f9   : > { %7541 = vmatmul.mubr.msk.f32.gmra.mxu1 %vm1224_vm3, %v3148_v51  ;;  %v3427_v43 = vmul.f32 %v8295_v18, %v9983_v3 }
 0x5fa   : > { %7543 = vmatprep.mubr.msk.f32.mxu1 %vm8943_vm0, %v8942_v1  ;;  %v8297_v46 = vpop.eup %8296 }
 0x5fb   : > { %v3429_v26 = vmul.f32 %v8297_v46, %v10029_v44  ;;  %v8299_v25 = vpop.eup %8298 }
 0x5fc   : > { %v3431_v16 = vmul.f32 %v8299_v25, %v9985_v0 }
 0x5fd   : > { %7544 = vmatmul.mubr.msk.f32.gmra.mxu1 %vm1224_vm3, %v3150_v12 }
 0x5fe   : > { %7567 = vmatprep.mubr.msk.f32.mxu1 %vm8943_vm0, %v8942_v1 }
 0x601   : > { %7568 = vmatmul.mubr.msk.f32.vlgmr.msra.gmra.mxu1 %vm1224_vm3, %v3427_v43 }
 0x602   : > { %7570 = vmatprep.mubr.msk.f32.mxu1 %vm8943_vm0, %v8942_v1 }
 0x605   : > { %7571 = vmatmul.mubr.msk.f32.gmra.mxu1 %vm1224_vm3, %v3429_v26  ;;  %v1830_v39 = vpop.f32.mrf.mxu1 }
 0x606   : > { %1844 = vst.msk [vmem:[#allocation2 + $0x3] sm:$0x7] %vm1550_vm5, %v1830_v39  ;;  %1846 = vrot.lane.b32.xlu1 %v1830_v39, %s8951_s15  ;;  %7573 = vmatprep.mubr.msk.f32.mxu1 %vm8943_vm0, %v8942_v1 }
 0x607   : > { %v7389_v3 = vpop.f32.mrf.mxu1 }
 0x609   : > { %7574 = vmatmul.mubr.msk.f32.gmra.mxu1 %vm1224_vm3, %v3431_v16  ;;  %v1835_v34 = vpop.f32.mrf.mxu1 }
 0x60a   : > { %1851 = vrot.lane.b32.xlu1 %v1830_v39, %s8950_s5  ;;  %1853 = vrot.lane.b32.xlu0 %v1835_v34, %s8950_s5 }
 0x60b   : > { %v7392_v44 = vpop.f32.mrf.mxu1  ;;  %7617 = vmatprep.mubr.msk.f32.mxu1 %vm8943_vm0, %v8942_v1 }
 0x60d   : > { %v1840_v13 = vpop.f32.mrf.mxu1 }
 0x60e   : > { %1863 = vrot.lane.b32.xlu1 %v1835_v34, %s8948_s2  ;;  %1859 = vrot.lane.b32.xlu0 %v1835_v34, %s8949_s11 }
 0x60f   : > { %v7395_v45 = vpop.f32.mrf.mxu1 }
 0x611   : > { %v2111_v59 = vpop.f32.mrf.mxu1 }
 0x612   : > { %2125 = vst.msk [vmem:[#allocation2 + $0x6] sm:$0x7] %vm1550_vm5, %v2111_v59  ;;  %1868 = vrot.lane.b32.xlu1 %v1835_v34, %s8947_s13  ;;  %1870 = vrot.lane.b32.xlu0 %v1840_v13, %s8947_s13 }
 0x613   : > { %v7419_v0 = vpop.f32.mrf.mxu1 }
 0x616   : > { %1876 = vrot.lane.b32.xlu1 %v1840_v13, %s8946_s29  ;;  %1880 = vrot.lane.b32.xlu0 %v1840_v13, %s8945_s1 }
 0x61a   : > { %2132 = vrot.lane.b32.xlu1 %v2111_v59, %s8950_s5  ;;  %2127 = vrot.lane.b32.xlu0 %v2111_v59, %s8951_s15 }
 0x62c   : > { %v1560_v53 = vpop.permute.xlu1 %1559  ;;  %v1554_v10 = vpop.permute.xlu0 %1553 }
 0x62d   : > { %1557 = vst.msk [vmem:[#allocation2 - $0x3] sm:$0x38] %vm1556_vm6, %v1554_v10 }
 0x62e   : > { %1566 = vst.msk [vmem:[#allocation2 - $0x6] sm:$0xc0] %vm1565_vm7, %v1560_v53 }
 0x630   : > { %v1570_v57 = vpop.permute.xlu1 %1569  ;;  %v1562_v28 = vpop.permute.xlu0 %1561 }
 0x631   : > { %1568 = vst.msk [vmem:[#allocation2 + $0x2] sm:$0x1] %vm1567_vm8, %v1562_v28 }
 0x632   : > { %1573 = vst.msk [vmem:[#allocation2 - $0x1] sm:$0xe] %vm1572_vm9, %v1570_v57 }
 0x634   : > { %v1581_v48 = vpop.permute.xlu1 %1580  ;;  %v1575_v9 = vpop.permute.xlu0 %1574 }
 0x635   : > { %1578 = vst.msk [vmem:[#allocation2 - $0x4] sm:$0x70] %vm1577_vm10, %v1575_v9 }
 0x636   : > { %1587 = vst.msk [vmem:[#allocation2 - $0x7] sm:$0x80] %vm1586_vm11, %v1581_v48 }
 0x638   : > { %v1583_v58 = vpop.permute.xlu0 %1582  ;;  %v1596_v6 = vpop.permute.xlu1 %1595 }
 0x639   : > { %1589 = vst.msk [vmem:[#allocation2 + $0x1] sm:$0x3] %vm1588_vm12, %v1583_v58 }
 0x63c   : > { %v1591_v56 = vpop.permute.xlu0 %1590 }
 0x63d   : > { %1594 = vst.msk [vmem:[#allocation2 - $0x2] sm:$0x1c] %vm1593_vm13, %v1591_v56 }
 0x63e   : > { %1599 = vst.msk [vmem:[#allocation2 - $0x5] sm:$0xe0] %vm1598_vm14, %v1596_v6 }
 0x646   : > { %v2116_v62 = vpop.f32.mrf.mxu1 }
 0x647   : > { %2140 = vrot.lane.b32.xlu1 %v2116_v62, %s8949_s11  ;;  %2134 = vrot.lane.b32.xlu0 %v2116_v62, %s8950_s5 }
 0x648   : > { %v7422_v4 = vpop.f32.mrf.mxu1 }
 0x64a   : > { %v2121_v52 = vpop.f32.mrf.mxu1 }
 0x64b   : > { %2149 = vrot.lane.b32.xlu1 %v2116_v62, %s8947_s13  ;;  %2144 = vrot.lane.b32.xlu0 %v2116_v62, %s8948_s2 }
 0x64c   : > { %v7425_v22 = vpop.f32.mrf.mxu1 }
 0x64e   : > { %v2392_v54 = vpop.f32.mrf.mxu1 }
 0x64f   : > { %2406 = vst.msk [vmem:[#allocation2 + $0x9] sm:$0x7] %vm1550_vm5, %v2392_v54  ;;  %2161 = vrot.lane.b32.xlu1 %v2121_v52, %s8945_s1  ;;  %2151 = vrot.lane.b32.xlu0 %v2121_v52, %s8947_s13 }
 0x650   : > { %v7449_v36 = vpop.f32.mrf.mxu1 }
 0x652   : > { %v2397_v7 = vpop.f32.mrf.mxu1 }
 0x653   : > { %2157 = vrot.lane.b32.xlu0 %v2121_v52, %s8946_s29  ;;  %2408 = vrot.lane.b32.xlu1 %v2392_v54, %s8951_s15 }
 0x654   : > { %v7452_v42 = vpop.f32.mrf.mxu1 }
 0x656   : > { %v2402_v14 = vpop.f32.mrf.mxu1 }
 0x657   : > { %2413 = vrot.lane.b32.xlu1 %v2392_v54, %s8950_s5  ;;  %2415 = vrot.lane.b32.xlu0 %v2397_v7, %s8950_s5 }
 0x658   : > { %v7455_v19 = vpop.f32.mrf.mxu1 }
 0x65a   : > { %v2673_v8 = vpop.f32.mrf.mxu1 }
 0x65b   : > { %2687 = vst.msk [vmem:[#allocation2 + $0xc] sm:$0x7] %vm1550_vm5, %v2673_v8  ;;  %2425 = vrot.lane.b32.xlu1 %v2397_v7, %s8948_s2  ;;  %2421 = vrot.lane.b32.xlu0 %v2397_v7, %s8949_s11 }
 0x65c   : > { %v7479_v33 = vpop.f32.mrf.mxu1 }
 0x65f   : > { %2430 = vrot.lane.b32.xlu0 %v2397_v7, %s8947_s13  ;;  %2432 = vrot.lane.b32.xlu1 %v2402_v14, %s8947_s13 }
 0x663   : > { %2438 = vrot.lane.b32.xlu0 %v2402_v14, %s8946_s29  ;;  %2442 = vrot.lane.b32.xlu1 %v2402_v14, %s8945_s1 }
 0x667   : > { %2694 = vrot.lane.b32.xlu1 %v2673_v8, %s8950_s5  ;;  %2689 = vrot.lane.b32.xlu0 %v2673_v8, %s8951_s15 }
 0x678   : > { %v1847_v5 = vpop.permute.xlu1 %1846 }
 0x679   : > { %1849 = vst.msk [vmem:[#allocation2] sm:$0x38] %vm1556_vm6, %v1847_v5 }
 0x67c   : > { %v1852_v23 = vpop.permute.xlu1 %1851  ;;  %v1854_v17 = vpop.permute.xlu0 %1853 }
 0x67d   : > { %1857 = vst.msk [vmem:[#allocation2 - $0x3] sm:$0xc0] %vm1565_vm7, %v1852_v23 }
 0x67e   : > { %1858 = vst.msk [vmem:[#allocation2 + $0x5] sm:$0x1] %vm1567_vm8, %v1854_v17 }
 0x680   : > { %v1864_v50 = vpop.permute.xlu1 %1863  ;;  %v1860_v60 = vpop.permute.xlu0 %1859 }
 0x681   : > { %v2678_v21 = vpop.f32.mrf.mxu1  ;;  %1862 = vst.msk [vmem:[#allocation2 + $0x2] sm:$0xe] %vm1572_vm9, %v1860_v60 }
 0x682   : > { %2702 = vrot.lane.b32.xlu1 %v2678_v21, %s8949_s11  ;;  %2696 = vrot.lane.b32.xlu0 %v2678_v21, %s8950_s5  ;;  %1866 = vst.msk [vmem:[#allocation2 - $0x1] sm:$0x70] %vm1577_vm10, %v1864_v50 }
 0x683   : > { %v7482_v20 = vpop.f32.mrf.mxu1 }
 0x684   : > { %v1869_v41 = vpop.permute.xlu1 %1868  ;;  %v1871_v37 = vpop.permute.xlu0 %1870 }
 0x685   : > { %1874 = vst.msk [vmem:[#allocation2 - $0x4] sm:$0x80] %vm1586_vm11, %v1869_v41 }
 0x686   : > { %1875 = vst.msk [vmem:[#allocation2 + $0x4] sm:$0x3] %vm1588_vm12, %v1871_v37  ;;  %2706 = vrot.lane.b32.xlu0 %v2678_v21, %s8948_s2 }
 0x688   : > { %v1877_v49 = vpop.permute.xlu1 %1876  ;;  %v1881_v15 = vpop.permute.xlu0 %1880 }
 0x689   : > { %v2683_v32 = vpop.f32.mrf.mxu1  ;;  %1879 = vst.msk [vmem:[#allocation2 + $0x1] sm:$0x1c] %vm1593_vm13, %v1877_v49 }
 0x68a   : > { %2711 = vrot.lane.b32.xlu0 %v2678_v21, %s8947_s13  ;;  %2713 = vrot.lane.b32.xlu1 %v2683_v32, %s8947_s13  ;;  %1883 = vst.msk [vmem:[#allocation2 - $0x2] sm:$0xe0] %vm1598_vm14, %v1881_v15 }
 0x68b   : > { %v7485_v40 = vpop.f32.mrf.mxu1 }
 0x68c   : > { %v2133_v51 = vpop.permute.xlu1 %2132  ;;  %v2128_v38 = vpop.permute.xlu0 %2127 }
 0x68d   : > { %v2954_v12 = vpop.f32.mrf.mxu1  ;;  %2130 = vst.msk [vmem:[#allocation2 + $0x3] sm:$0x38] %vm1556_vm6, %v2128_v38 }
 0x68e   : > { %2968 = vst.msk [vmem:[#allocation2 + $0xf] sm:$0x7] %vm1550_vm5, %v2954_v12  ;;  %2723 = vrot.lane.b32.xlu0 %v2683_v32, %s8945_s1  ;;  %2719 = vrot.lane.b32.xlu1 %v2683_v32, %s8946_s29  ;;  %v8959_v32 = vmov 0  }
 0x68f   : > { %2138 = vst.msk [vmem:[#allocation2] sm:$0xc0] %vm1565_vm7, %v2133_v51  ;;  %v7509_v18 = vpop.f32.mrf.mxu1  ;;  %8203 = vset.pattern.permute.xlu1 %v8959_v32  ;;  %8202 = vset.pattern.permute.xlu0 %v8959_v32 }
 0x691   : > { %v2959_v43 = vpop.f32.mrf.mxu1 }
 0x692   : > { %2970 = vrot.lane.b32.xlu1 %v2954_v12, %s8951_s15  ;;  %2977 = vrot.lane.b32.xlu0 %v2959_v43, %s8950_s5 }
 0x693   : > { %v7512_v46 = vpop.f32.mrf.mxu1 }
 0x695   : > { %v2964_v26 = vpop.f32.mrf.mxu1 }
 0x696   : > { %2975 = vrot.lane.b32.xlu1 %v2954_v12, %s8950_s5  ;;  %2983 = vrot.lane.b32.xlu0 %v2959_v43, %s8949_s11 }
 0x697   : > { %v7515_v25 = vpop.f32.mrf.mxu1 }
 0x699   : > { %v3235_v39 = vpop.f32.mrf.mxu1 }
 0x69a   : > { %3249 = vst.msk [vmem:[#allocation2 + $0x12] sm:$0x7] %vm1550_vm5, %v3235_v39  ;;  %2987 = vrot.lane.b32.xlu1 %v2959_v43, %s8948_s2  ;;  %2992 = vrot.lane.b32.xlu0 %v2959_v43, %s8947_s13 }
 0x69b   : > { %v7539_v3 = vpop.f32.mrf.mxu1 }
 0x69e   : > { %3000 = vrot.lane.b32.xlu0 %v2964_v26, %s8946_s29  ;;  %2994 = vrot.lane.b32.xlu1 %v2964_v26, %s8947_s13 }
 0x6a2   : > { %3004 = vrot.lane.b32.xlu1 %v2964_v26, %s8945_s1  ;;  %3251 = vrot.lane.b32.xlu0 %v3235_v39, %s8951_s15 }
 0x6a6   : > { %3256 = vrot.lane.b32.xlu1 %v3235_v39, %s8950_s5 }
 0x6b9   : > { %v3240_v16 = vpop.f32.mrf.mxu1  ;;  %v2141_v34 = vpop.permute.xlu1 %2140 }
 0x6ba   : > { %3258 = vrot.lane.b32.xlu0 %v3240_v16, %s8950_s5  ;;  %v2135_v44 = vpop.permute.xlu0 %2134 }
 0x6bb   : > { %2139 = vst.msk [vmem:[#allocation2 + $0x8] sm:$0x1] %vm1567_vm8, %v2135_v44  ;;  %v7542_v13 = vpop.f32.mrf.mxu1 }
 0x6bc   : > { %2143 = vst.msk [vmem:[#allocation2 + $0x5] sm:$0xe] %vm1572_vm9, %v2141_v34 }
 0x6bd   : > { %v3245_v45 = vpop.f32.mrf.mxu1  ;;  %v2150_v59 = vpop.permute.xlu1 %2149 }
 0x6be   : > { %3264 = vrot.lane.b32.xlu0 %v3240_v16, %s8949_s11  ;;  %3275 = vrot.lane.b32.xlu1 %v3245_v45, %s8947_s13  ;;  %v2145_v0 = vpop.permute.xlu0 %2144 }
 0x6bf   : > { %2147 = vst.msk [vmem:[#allocation2 + $0x2] sm:$0x70] %vm1577_vm10, %v2145_v0  ;;  %v7545_v53 = vpop.f32.mrf.mxu1 }
 0x6c0   : > { %2155 = vst.msk [vmem:[#allocation2 - $0x1] sm:$0x80] %vm1586_vm11, %v2150_v59 }
 0x6c1   : > { %v3516_v10 = vpop.f32.mrf.mxu1  ;;  %v2162_v57 = vpop.permute.xlu1 %2161 }
 0x6c2   : > { %3530 = vst.msk [vmem:[#allocation2 + $0x15] sm:$0x7] %vm1550_vm5, %v3516_v10  ;;  %3268 = vrot.lane.b32.xlu0 %v3240_v16, %s8948_s2  ;;  %3532 = vrot.lane.b32.xlu1 %v3516_v10, %s8951_s15  ;;  %v2152_v28 = vpop.permute.xlu0 %2151  ;;  %vm5452_vm5 = vcmask 392512  }
 0x6c3   : > { %2156 = vst.msk [vmem:[#allocation2 + $0x7] sm:$0x3] %vm1588_vm12, %v2152_v28  ;;  %v7569_v48 = vpop.f32.mrf.mxu1 }
 0x6c5   : > { %v3521_v9 = vpop.f32.mrf.mxu1  ;;  %v2409_v58 = vpop.permute.xlu1 %2408 }
 0x6c6   : > { %2411 = vst.msk [vmem:[#allocation2 + $0x6] sm:$0x38] %vm1556_vm6, %v2409_v58  ;;  %3273 = vrot.lane.b32.xlu0 %v3240_v16, %s8947_s13  ;;  %3537 = vrot.lane.b32.xlu1 %v3516_v10, %s8950_s5  ;;  %v2158_v56 = vpop.permute.xlu0 %2157  ;;  %v10315_v10 = vld [vmem:[#allocation12] ss:$0 sm:$0xff] }
 0x6c7   : > { %2160 = vst.msk [vmem:[#allocation2 + $0x4] sm:$0x1c] %vm1593_vm13, %v2158_v56  ;;  %v7572_v6 = vpop.f32.mrf.mxu1 }
 0x6c8   : > { %2164 = vst.msk [vmem:[#allocation2 + $0x1] sm:$0xe0] %vm1598_vm14, %v2162_v57  ;;  %v8426_v57 = vld [vmem:[%s9375_s8] sm:$0xff] }
 0x6c9   : > { %v3526_v47 = vpop.f32.mrf.mxu1  ;;  %v2414_v30 = vpop.permute.xlu1 %2413 }
 0x6ca   : > { %2419 = vst.msk [vmem:[#allocation2 + $0x3] sm:$0xc0] %vm1565_vm7, %v2414_v30  ;;  %3281 = vrot.lane.b32.xlu0 %v3245_v45, %s8946_s29  ;;  %3545 = vrot.lane.b32.xlu1 %v3521_v9, %s8949_s11  ;;  %v2416_v63 = vpop.permute.xlu0 %2415  ;;  %v3750_v30 = vld [vmem:[#allocation14 + $0x38] sm:$0xff] }
 0x6cb   : > { %2420 = vst.msk [vmem:[#allocation2 + $0xb] sm:$0x1] %vm1567_vm8, %v2416_v63  ;;  %v7575_v62 = vpop.f32.mrf.mxu1  ;;  %7602 = vmatpush3.msra.mxu1 %v3750_v30  ;;  %v3749_v63 = vld [vmem:[#allocation14 + $0x30] sm:$0xff] }
 0x6cc   : > { %7603 = vmatprep.subr.mxu1 %v8942_v1  ;;  %v3748_v62 = vld [vmem:[#allocation14 + $0x28] sm:$0xff] }
 0x6cd   : > { %v2426_v4 = vpop.permute.xlu1 %2425  ;;  %7604 = vmatpush3.msra.mxu1 %v3749_v63 }
 0x6ce   : > { %3549 = vrot.lane.b32.xlu1 %v3521_v9, %s8948_s2  ;;  %3539 = vrot.lane.b32.xlu0 %v3521_v9, %s8950_s5  ;;  %v2422_v31 = vpop.permute.xlu0 %2421 }
 0x6cf   : > { %2424 = vst.msk [vmem:[#allocation2 + $0x8] sm:$0xe] %vm1572_vm9, %v2422_v31  ;;  %v3570_v52 = vld [vmem:[#allocation2] sm:$0xff]  ;;  %7605 = vmatprep.subr.mxu1 %v8942_v1  ;;  %v3746_v31 = vld [vmem:[#allocation14 + $0x18] sm:$0xff] }
 0x6d0   : > { %2428 = vst.msk [vmem:[#allocation2 + $0x5] sm:$0x70] %vm1577_vm10, %v2426_v4  ;;  %7593 = vmatmul.mubr.msk.f32.vlgmr.msra.gmra.mxu0 %vm1128_vm2, %v3570_v52  ;;  %7606 = vmatpush3.msra.mxu1 %v3748_v62  ;;  %v3747_v4 = vld [vmem:[#allocation14 + $0x20] sm:$0xff]  ;;  %v3745_v52 = vld [vmem:[#allocation14 + $0x10] sm:$0xff] }
 0x6d1   : > { %v2433_v55 = vpop.permute.xlu1 %2432  ;;  %7595 = vmatprep.mubr.msk.f32.mxu0 %vm8943_vm0, %v8942_v1  ;;  %7607 = vmatprep.subr.mxu1 %v8942_v1  ;;  %v1092_v62 = vld [vmem:[%s11377_s9 + $0x8] sm:$0xff] }
 0x6d2   : > { %2437 = vst.msk [vmem:[#allocation2 + $0xa] sm:$0x3] %vm1588_vm12, %v2433_v55  ;;  %3554 = vrot.lane.b32.xlu0 %v3521_v9, %s8947_s13  ;;  %3556 = vrot.lane.b32.xlu1 %v3526_v47, %s8947_s13  ;;  %v2431_v22 = vpop.permute.xlu0 %2430  ;;  %v3744_v55 = vld [vmem:[#allocation14 + $0x8] sm:$0xff] }
 0x6d3   : > { %2436 = vst.msk [vmem:[#allocation2 + $0x2] sm:$0x80] %vm1586_vm11, %v2431_v22  ;;  %7608 = vmatpush3.msra.mxu1 %v3747_v4  ;;  %v3743_v22 = vld [vmem:[#allocation14] sm:$0xff] }
 0x6d4   : > { %7609 = vmatprep.subr.mxu1 %v8942_v1 }
 0x6d5   : > { %v2443_v61 = vpop.permute.xlu1 %2442  ;;  %7610 = vmatpush3.msra.mxu1 %v3746_v31 }
 0x6d6   : > { %3285 = vrot.lane.b32.xlu0 %v3245_v45, %s8945_s1  ;;  %3562 = vrot.lane.b32.xlu1 %v3526_v47, %s8946_s29  ;;  %v2439_v54 = vpop.permute.xlu0 %2438 }
 0x6d7   : > { %2441 = vst.msk [vmem:[#allocation2 + $0x7] sm:$0x1c] %vm1593_vm13, %v2439_v54  ;;  %7611 = vmatprep.subr.mxu1 %v8942_v1  ;;  %v8427_v54 = vld [vmem:[%s9375_s8 + $0x8] sm:$0xff] }
 0x6d8   : > { %2445 = vst.msk [vmem:[#allocation2 + $0x4] sm:$0xe0] %vm1598_vm14, %v2443_v61  ;;  %7612 = vmatpush3.msra.mxu1 %v3745_v52 }
 0x6d9   : > { %v2695_v2 = vpop.permute.xlu1 %2694  ;;  %7613 = vmatprep.subr.mxu1 %v8942_v1 }
 0x6da   : > { %3566 = vrot.lane.b32.xlu1 %v3526_v47, %s8945_s1  ;;  %v2690_v36 = vpop.permute.xlu0 %2689  ;;  %v1067_v47 = vld [vmem:[%s11375_s10 + $0x8] sm:$0xff]  ;;  %7614 = vmatpush3.msra.mxu1 %v3744_v55 }
 0x6db   : > { %2692 = vst.msk [vmem:[#allocation2 + $0x9] sm:$0x38] %vm1556_vm6, %v2690_v36  ;;  %7615 = vmatprep.subr.mxu1 %v8942_v1 }
 0x6dc   : > { %2700 = vst.msk [vmem:[#allocation2 + $0x6] sm:$0xc0] %vm1565_vm7, %v2695_v2  ;;  %7616 = vmatpush3.msra.mxu1 %v3743_v22 }
 0x6dd   : > { %7651 = vmatprep.subr.mxu1 %v8942_v1 }
 0x6f4   : > { %v2703_v7 = vpop.permute.xlu1 %2702  ;;  %v2697_v11 = vpop.permute.xlu0 %2696 }
 0x6f5   : > { %2701 = vst.msk [vmem:[#allocation2 + $0xe] sm:$0x1] %vm1567_vm8, %v2697_v11 }
 0x6f6   : > { %2705 = vst.msk [vmem:[#allocation2 + $0xb] sm:$0xe] %vm1572_vm9, %v2703_v7 }
 0x6f8   : > { %v2707_v42 = vpop.permute.xlu0 %2706 }
 0x6f9   : > { %2709 = vst.msk [vmem:[#allocation2 + $0x8] sm:$0x70] %vm1577_vm10, %v2707_v42 }
 0x6fc   : > { %v2714_v14 = vpop.permute.xlu1 %2713  ;;  %v2712_v19 = vpop.permute.xlu0 %2711 }
 0x6fd   : > { %2718 = vst.msk [vmem:[#allocation2 + $0xd] sm:$0x3] %vm1588_vm12, %v2714_v14 }
 0x6fe   : > { %2717 = vst.msk [vmem:[#allocation2 + $0x5] sm:$0x80] %vm1586_vm11, %v2712_v19  ;;  %v3854_v19 = vld [vmem:[#allocation17 + $0x38] sm:$0xff] }
 0x6ff   : > { %7627 = vmatpush3.msra.mxu0 %v3854_v19  ;;  %v1093_v19 = vld [vmem:[%s11377_s9 + $0x10] sm:$0xff] }
 0x700   : > { %v2720_v8 = vpop.permute.xlu1 %2719  ;;  %v2724_v33 = vpop.permute.xlu0 %2723  ;;  %7628 = vmatprep.subr.mxu0 %v8942_v1 }
 0x701   : > { %2722 = vst.msk [vmem:[#allocation2 + $0xa] sm:$0x1c] %vm1593_vm13, %v2720_v8  ;;  %v3853_v8 = vld [vmem:[#allocation17 + $0x30] sm:$0xff] }
 0x702   : > { %2726 = vst.msk [vmem:[#allocation2 + $0x7] sm:$0xe0] %vm1598_vm14, %v2724_v33  ;;  %7629 = vmatpush3.msra.mxu0 %v3853_v8  ;;  %v3852_v33 = vld [vmem:[#allocation17 + $0x28] sm:$0xff] }
 0x703   : > { %7630 = vmatprep.subr.mxu0 %v8942_v1 }
 0x704   : > { %v2971_v5 = vpop.permute.xlu1 %2970  ;;  %v2978_v23 = vpop.permute.xlu0 %2977  ;;  %7631 = vmatpush3.msra.mxu0 %v3852_v33 }
 0x705   : > { %2973 = vst.msk [vmem:[#allocation2 + $0xc] sm:$0x38] %vm1556_vm6, %v2971_v5  ;;  %7632 = vmatprep.subr.mxu0 %v8942_v1  ;;  %v3851_v5 = vld [vmem:[#allocation17 + $0x20] sm:$0xff] }
 0x706   : > { %2982 = vst.msk [vmem:[#allocation2 + $0x11] sm:$0x1] %vm1567_vm8, %v2978_v23  ;;  %7633 = vmatpush3.msra.mxu0 %v3851_v5  ;;  %v3850_v23 = vld [vmem:[#allocation17 + $0x18] sm:$0xff] }
 0x707   : > { %7634 = vmatprep.subr.mxu0 %v8942_v1 }
 0x708   : > { %v2976_v17 = vpop.permute.xlu1 %2975  ;;  %v2984_v50 = vpop.permute.xlu0 %2983  ;;  %7635 = vmatpush3.msra.mxu0 %v3850_v23 }
 0x709   : > { %2981 = vst.msk [vmem:[#allocation2 + $0x9] sm:$0xc0] %vm1565_vm7, %v2976_v17  ;;  %v1066_v17 = vld [vmem:[%s11375_s10] sm:$0xff]  ;;  %7636 = vmatprep.subr.mxu0 %v8942_v1 }
 0x70a   : > { %2986 = vst.msk [vmem:[#allocation2 + $0xe] sm:$0xe] %vm1572_vm9, %v2984_v50  ;;  %v3849_v50 = vld [vmem:[#allocation17 + $0x10] sm:$0xff] }
 0x70b   : > { %7637 = vmatpush3.msra.mxu0 %v3849_v50 }
 0x70c   : > { %v2988_v60 = vpop.permute.xlu1 %2987  ;;  %v2993_v21 = vpop.permute.xlu0 %2992  ;;  %7638 = vmatprep.subr.mxu0 %v8942_v1 }
 0x70d   : > { %2990 = vst.msk [vmem:[#allocation2 + $0xb] sm:$0x70] %vm1577_vm10, %v2988_v60  ;;  %v3848_v60 = vld [vmem:[#allocation17 + $0x8] sm:$0xff] }
 0x70e   : > { %2998 = vst.msk [vmem:[#allocation2 + $0x8] sm:$0x80] %vm1586_vm11, %v2993_v21  ;;  %7639 = vmatpush3.msra.mxu0 %v3848_v60  ;;  %v3847_v21 = vld [vmem:[#allocation17] sm:$0xff] }
 0x70f   : > { %7640 = vmatprep.subr.mxu0 %v8942_v1 }
 0x710   : > { %v2995_v20 = vpop.permute.xlu1 %2994  ;;  %v3001_v41 = vpop.permute.xlu0 %3000  ;;  %7641 = vmatpush3.msra.mxu0 %v3847_v21 }
 0x711   : > { %2999 = vst.msk [vmem:[#allocation2 + $0x10] sm:$0x3] %vm1588_vm12, %v2995_v20  ;;  %7666 = vmatprep.subr.mxu0 %v8942_v1 }
 0x712   : > { %3003 = vst.msk [vmem:[#allocation2 + $0xd] sm:$0x1c] %vm1593_vm13, %v3001_v41  ;;  %v8428_v41 = vld [vmem:[%s9375_s8 + $0x10] sm:$0xff] }
 0x714   : > { %v3005_v37 = vpop.permute.xlu1 %3004  ;;  %v3252_v49 = vpop.permute.xlu0 %3251 }
 0x715   : > { %3007 = vst.msk [vmem:[#allocation2 + $0xa] sm:$0xe0] %vm1598_vm14, %v3005_v37 }
 0x716   : > { %3254 = vst.msk [vmem:[#allocation2 + $0xf] sm:$0x38] %vm1556_vm6, %v3252_v49 }
 0x718   : > { %v3257_v15 = vpop.permute.xlu1 %3256 }
 0x719   : > { %3262 = vst.msk [vmem:[#allocation2 + $0xc] sm:$0xc0] %vm1565_vm7, %v3257_v15 }
 0x71c   : > { %v3571_v40 = vld [vmem:[#allocation2 + $0x8] sm:$0xff] }
 0x71d   : > { %7596 = vmatmul.mubr.msk.f32.gmra.mxu0 %vm1128_vm2, %v3571_v40 }
 0x71e   : > { %7598 = vmatprep.mubr.msk.f32.mxu0 %vm8943_vm0, %v8942_v1 }
 0x72c   : > { %v3259_v51 = vpop.permute.xlu0 %3258 }
 0x72d   : > { %3263 = vst.msk [vmem:[#allocation2 + $0x14] sm:$0x1] %vm1567_vm8, %v3259_v51 }
 0x730   : > { %v3276_v38 = vpop.permute.xlu1 %3275  ;;  %v3265_v12 = vpop.permute.xlu0 %3264 }
 0x731   : > { %3267 = vst.msk [vmem:[#allocation2 + $0x11] sm:$0xe] %vm1572_vm9, %v3265_v12 }
 0x734   : > { %v3533_v18 = vpop.permute.xlu1 %3532  ;;  %v3269_v43 = vpop.permute.xlu0 %3268 }
 0x735   : > { %3535 = vst.msk [vmem:[#allocation2 + $0x12] sm:$0x38] %vm1556_vm6, %v3533_v18  ;;  %vm5706_vm6 = vcmask 458112  }
 0x736   : > { %3271 = vst.msk [vmem:[#allocation2 + $0xe] sm:$0x70] %vm1577_vm10, %v3269_v43 }
 0x737   : > { %3280 = vst.msk [vmem:[#allocation2 + $0x13] sm:$0x3] %vm1588_vm12, %v3276_v38 }
 0x738   : > { %v3538_v46 = vpop.permute.xlu1 %3537  ;;  %v3274_v26 = vpop.permute.xlu0 %3273 }
 0x739   : > { %3543 = vst.msk [vmem:[#allocation2 + $0xf] sm:$0xc0] %vm1565_vm7, %v3538_v46  ;;  %vm5960_vm7 = vcmask 523712  }
 0x73a   : > { %3279 = vst.msk [vmem:[#allocation2 + $0xb] sm:$0x80] %vm1586_vm11, %v3274_v26 }
 0x73c   : > { %v3546_v25 = vpop.permute.xlu1 %3545  ;;  %v3282_v39 = vpop.permute.xlu0 %3281 }
 0x73d   : > { %3284 = vst.msk [vmem:[#allocation2 + $0x10] sm:$0x1c] %vm1593_vm13, %v3282_v39  ;;  %v1068_v39 = vld [vmem:[%s11375_s10 + $0x10] sm:$0xff] }
 0x740   : > { %v3550_v3 = vpop.permute.xlu1 %3549  ;;  %v3540_v16 = vpop.permute.xlu0 %3539 }
 0x741   : > { %3544 = vst.msk [vmem:[#allocation2 + $0x17] sm:$0x1] %vm1567_vm8, %v3540_v16  ;;  %vm6596_vm8 = vcmask 7168  }
 0x742   : > { %3548 = vst.msk [vmem:[#allocation2 + $0x14] sm:$0xe] %vm1572_vm9, %v3546_v25 }
 0x743   : > { %3552 = vst.msk [vmem:[#allocation2 + $0x11] sm:$0x70] %vm1577_vm10, %v3550_v3  ;;  %v988_v3 = vld [vmem:[%s11376_s20] sm:$0xff] }
 0x744   : > { %v3557_v34 = vpop.permute.xlu1 %3556  ;;  %v3555_v44 = vpop.permute.xlu0 %3554  ;;  %v3732_v16 = vrot.slane %v988_v3, %v9439_v29 }
 0x745   : > { %3561 = vst.msk [vmem:[#allocation2 + $0x16] sm:$0x3] %vm1588_vm12, %v3557_v34 }
 0x746   : > { %3560 = vst.msk [vmem:[#allocation2 + $0xe] sm:$0x80] %vm1586_vm11, %v3555_v44 }
 0x748   : > { %v3563_v13 = vpop.permute.xlu1 %3562  ;;  %v3286_v45 = vpop.permute.xlu0 %3285 }
 0x749   : > { %3565 = vst.msk [vmem:[#allocation2 + $0x13] sm:$0x1c] %vm1593_vm13, %v3563_v13  ;;  %v3739_v13 = vrot.slane %v988_v3, %v1124_v35  ;;  %v1087_v35 = vrot.slane %v9434_v24, %v9439_v29 }
 0x74a   : > { %3288 = vst.msk [vmem:[#allocation2 + $0xd] sm:$0xe0] %vm1598_vm14, %v3286_v45 }
 0x74c   : > { %v3567_v59 = vpop.permute.xlu1 %3566 }
 0x74d   : > { %3569 = vst.msk [vmem:[#allocation2 + $0x10] sm:$0xe0] %vm1598_vm14, %v3567_v59 }
 0x754   : > { %v3572_v0 = vld [vmem:[#allocation2 + $0x10] sm:$0xff] }
 0x755   : > { %7599 = vmatmul.mubr.msk.f32.gmra.mxu0 %vm1128_vm2, %v3572_v0 }
 0x756   : > { %7642 = vmatprep.mubr.msk.f32.mxu0 %vm8943_vm0, %v8942_v1 }
 0x790   : > { %v3656_v53 = vpop.f32.mrf.mxu0 }
 0x791   : > { %v3670_v28 = vadd.f32 %v8426_v57, %v3656_v53 }
 0x792   : > { %v7594_v48 = vpop.f32.mrf.mxu0 }
 0x793   : > { %v10319_v9 = vadd.f32 %v10315_v10, %v3670_v28 }
 0x795   : > { %v3683_v58 = vsel %vm1128_vm2, %v10319_v9, 0.0  ;;  %v3696_v56 = vmul.f32 %v10319_v9, %v10319_v9 }
 0x796   : > { %3684 = vadd.xlane.f32.xlu0 %v3683_v58 }
 0x797   : > { %v3699_v6 = vsel %vm1128_vm2, %v3696_v56, 0.0 }
 0x798   : > { %3700 = vadd.xlane.f32.xlu1 %v3699_v6  ;;  %v1091_v6 = vld [vmem:[%s11377_s9] sm:$0xff] }
 0x7a9   : > { %1076 = vperm.xlu1 %8203, %v1067_v47  }
 0x7dd   : > { %v3661_v61 = vpop.f32.mrf.mxu0 }
 0x7de   : > { %v3671_v2 = vadd.f32 %v8427_v54, %v3661_v61 }
 0x7df   : > { %v7597_v36 = vpop.f32.mrf.mxu0 }
 0x7e0   : > { %v10339_v7 = vadd.f32 %v10315_v10, %v3671_v2 }
 0x7e2   : > { %v3686_v11 = vsel %vm1128_vm2, %v10339_v7, 0.0  ;;  %v3697_v42 = vmul.f32 %v10339_v7, %v10339_v7 }
 0x7e3   : > { %3687 = vadd.xlane.f32.xlu0 %v3686_v11 }
 0x7e4   : > { %v3702_v14 = vsel %vm1128_vm2, %v3697_v42, 0.0 }
 0x7e7   : > { %3703 = vadd.xlane.f32.xlu0 %v3702_v14 }
 0x7fd   : > { %1071 = vperm.xlu0 %8202, %v1066_v17  }
 0x815   : > { %v3666_v20 = vpop.f32.mrf.mxu0 }
 0x816   : > { %v3672_v37 = vadd.f32 %v8428_v41, %v3666_v20 }
 0x817   : > { %v7600_v49 = vpop.f32.mrf.mxu0 }
 0x818   : > { %v10359_v15 = vadd.f32 %v10315_v10, %v3672_v37 }
 0x81a   : > { %v3689_v32 = vsel %vm1128_vm2, %v10359_v15, 0.0  ;;  %v3698_v40 = vmul.f32 %v10359_v15, %v10359_v15 }
 0x81b   : > { %3690 = vadd.xlane.f32.xlu1 %v3689_v32 }
 0x81c   : > { %v3705_v51 = vsel %vm1128_vm2, %v3698_v40, 0.0 }
 0x81f   : > { %v3685_v38 = vpop.xlane.xlu0 %3684  ;;  %3706 = vadd.xlane.f32.xlu1 %v3705_v51  ;;  %v6942_v51 = vld [vmem:[#allocation18] ss:$0 sm:$0xff] }
 0x820   : > { %v3693_v12 = vmul.f32 0.015625, %v3685_v38 }
 0x821   : > { %v3701_v18 = vpop.xlane.xlu1 %3700 }
 0x822   : > { %v3711_v43 = vmul.f32 %v3693_v12, %v3693_v12  ;;  %v3708_v46 = vmul.f32 0.015625, %v3701_v18  ;;  %v3717_v34 = vsub.f32 %v10319_v9, %v3693_v12  ;;  %v6938_v18 = vld [vmem:[#allocation15] ss:$0 sm:$0xff] }
 0x824   : > { %v3714_v26 = vsub.f32 %v3708_v46, %v3711_v43 }
 0x825   : > { %v1077_v56 = vpop.permute.xlu1 %1076 }
 0x826   : > { %v3720_v25 = vadd.f32 1e-05, %v3714_v26  ;;  %v1089_v30 = vmul.f32 %v1087_v35, %v1077_v56 }
 0x828   : > { %8300 = vrsqrt.f32 %v3720_v25  ;;  %v1095_v31 = vadd.f32 %v1092_v62, %v1089_v30 }
 0x82a   : > { %v1098_v24 = vmax.f32 %v1095_v31, 0.0 }
 0x830   : > { %1081 = vperm.xlu1 %8203, %v1068_v39  }
 0x835   : > { %v8301_v44 = vpop.eup %8300 }
 0x836   : > { %v3726_v45 = vmul.f32 %v8301_v44, %v3717_v34 }
 0x838   : > { %v3733_v59 = vmul.f32 %v3732_v16, %v3726_v45 }
 0x83a   : > { %v10376_v0 = vadd.f32 %v3739_v13, %v3733_v59 }
 0x83c   : > { %7618 = vmatmul.mubr.msk.f32.vlgmr.msra.gmra.mxu1 %vm1128_vm2, %v10376_v0 }
 0x83d   : > { %7620 = vmatprep.mubr.msk.f32.mxu1 %vm8943_vm0, %v8942_v1 }
 0x86c   : > { %v3688_v53 = vpop.xlane.xlu0 %3687 }
 0x86d   : > { %v3694_v10 = vmul.f32 0.015625, %v3688_v53 }
 0x86f   : > { %v3712_v28 = vmul.f32 %v3694_v10, %v3694_v10  ;;  %v3718_v29 = vsub.f32 %v10339_v7, %v3694_v10 }
 0x870   : > { %v3704_v57 = vpop.xlane.xlu0 %3703 }
 0x871   : > { %v3709_v48 = vmul.f32 0.015625, %v3704_v57 }
 0x873   : > { %v3715_v9 = vsub.f32 %v3709_v48, %v3712_v28 }
 0x875   : > { %v3721_v58 = vadd.f32 1e-05, %v3715_v9 }
 0x877   : > { %8302 = vrsqrt.f32 %v3721_v58 }
 0x878   : > { %v1072_v47 = vpop.permute.xlu0 %1071 }
 0x879   : > { %v1088_v63 = vmul.f32 %v1087_v35, %v1072_v47 }
 0x87b   : > { %v1094_v4 = vadd.f32 %v1091_v6, %v1088_v63 }
 0x87d   : > { %v1097_v52 = vmax.f32 %v1094_v4, 0.0 }
 0x87f   : > { %7643 = vmatmul.mubr.msk.f32.vlgmr.msra.gmra.mxu0 %vm1128_vm2, %v1097_v52 }
 0x880   : > { %7645 = vmatprep.mubr.msk.f32.mxu0 %vm8943_vm0, %v8942_v1 }
 0x883   : > { %7646 = vmatmul.mubr.msk.f32.gmra.mxu0 %vm1128_vm2, %v1098_v24 }
 0x884   : > { %v8303_v55 = vpop.eup %8302  ;;  %7648 = vmatprep.mubr.msk.f32.mxu0 %vm8943_vm0, %v8942_v1 }
 0x885   : > { %v3727_v22 = vmul.f32 %v8303_v55, %v3718_v29 }
 0x887   : > { %v3734_v61 = vmul.f32 %v3732_v16, %v3727_v22 }
 0x889   : > { %v10397_v54 = vadd.f32 %v3739_v13, %v3734_v61 }
 0x88b   : > { %7621 = vmatmul.mubr.msk.f32.gmra.mxu1 %vm1128_vm2, %v10397_v54 }
 0x88c   : > { %7623 = vmatprep.mubr.msk.f32.mxu1 %vm8943_vm0, %v8942_v1 }
 0x8a4   : > { %v3691_v2 = vpop.xlane.xlu1 %3690 }
 0x8a5   : > { %v3695_v36 = vmul.f32 0.015625, %v3691_v2 }
 0x8a7   : > { %v3713_v7 = vmul.f32 %v3695_v36, %v3695_v36  ;;  %v3719_v50 = vsub.f32 %v10359_v15, %v3695_v36 }
 0x8a8   : > { %v3707_v11 = vpop.xlane.xlu1 %3706 }
 0x8a9   : > { %v3710_v42 = vmul.f32 0.015625, %v3707_v11 }
 0x8ab   : > { %v3716_v14 = vsub.f32 %v3710_v42, %v3713_v7 }
 0x8ac   : > { %v1082_v8 = vpop.permute.xlu1 %1081 }
 0x8ad   : > { %v3722_v33 = vadd.f32 1e-05, %v3716_v14  ;;  %v1090_v5 = vmul.f32 %v1087_v35, %v1082_v8 }
 0x8af   : > { %8304 = vrsqrt.f32 %v3722_v33  ;;  %v1096_v23 = vadd.f32 %v1093_v19, %v1090_v5 }
 0x8b1   : > { %v1099_v17 = vmax.f32 %v1096_v23, 0.0 }
 0x8b3   : > { %7649 = vmatmul.mubr.msk.f32.gmra.mxu0 %vm1128_vm2, %v1099_v17 }
 0x8b4   : > { %7672 = vmatprep.mubr.msk.f32.mxu0 %vm8943_vm0, %v8942_v1 }
 0x8bc   : > { %v8305_v60 = vpop.eup %8304 }
 0x8bd   : > { %v3728_v21 = vmul.f32 %v8305_v60, %v3719_v50 }
 0x8bf   : > { %v3735_v20 = vmul.f32 %v3732_v16, %v3728_v21 }
 0x8c1   : > { %v10410_v41 = vadd.f32 %v3739_v13, %v3735_v20 }
 0x8c3   : > { %7624 = vmatmul.mubr.msk.f32.gmra.mxu1 %vm1128_vm2, %v10410_v41 }
 0x8c4   : > { %7657 = vmatprep.mubr.msk.f32.mxu1 %vm8943_vm0, %v8942_v1 }
 0x8fc   : > { %v3833_v37 = vpop.f32.mrf.mxu1 }
 0x8fd   : > { %v3834_v34 = vadd.f32 %v6938_v18, %v3833_v37 }
 0x8fe   : > { %v7619_v49 = vpop.f32.mrf.mxu1 }
 0x93f   : > { %v3937_v32 = vpop.f32.mrf.mxu0 }
 0x940   : > { %v10428_v16 = vadd.f32 %v6942_v51, %v3937_v32 }
 0x941   : > { %v7644_v40 = vpop.f32.mrf.mxu0 }
 0x943   : > { %v3942_v38 = vpop.f32.mrf.mxu0 }
 0x944   : > { %v10416_v12 = vadd.f32 %v6942_v51, %v3942_v38 }
 0x945   : > { %v7647_v15 = vpop.f32.mrf.mxu0 }
 0x946   : > { %4194 = vrot.lane.b32.xlu1 %v10416_v12, %s8952_s18 }
 0x94b   : > { %v3838_v43 = vpop.f32.mrf.mxu1 }
 0x94c   : > { %v3839_v46 = vadd.f32 %v6938_v18, %v3838_v43 }
 0x94d   : > { %v7622_v26 = vpop.f32.mrf.mxu1 }
 0x94e   : > { %4188 = vrot.lane.b32.xlu0 %v3839_v46, %s8952_s18 }
 0x973   : > { %v3947_v25 = vpop.f32.mrf.mxu0 }
 0x974   : > { %v10421_v39 = vadd.f32 %v6942_v51, %v3947_v25 }
 0x975   : > { %v7650_v3 = vpop.f32.mrf.mxu0 }
 0x976   : > { %4196 = vrot.lane.b32.xlu1 %v10421_v39, %s8952_s18  ;;  %7652 = vmatpush3.xpose.msk.msra.mxu1 %vm1326_vm4, %v10421_v39 }
 0x977   : > { %7653 = vmatprep.subr.mxu1 %v8942_v1 }
 0x97a   : > { %4192 = vrot.lane.b32.xlu1 %v10428_v16, %s8952_s18  ;;  %7654 = vmatpush3.xpose.msk.msra.mxu1 %vm1326_vm4, %v10416_v12 }
 0x97b   : > { %7655 = vmatprep.subr.mxu1 %v8942_v1 }
 0x97e   : > { %4186 = vrot.lane.b32.xlu1 %v3834_v34, %s8952_s18  ;;  %7656 = vmatpush3.xpose.msk.msra.mxu1 %vm1326_vm4, %v10428_v16 }
 0x97f   : > { %7681 = vmatprep.subr.mxu1 %v8942_v1 }
 0x981   : > { %7658 = vmatmul.mubr.msk.f32.vlgmr.msra.gmra.mxu1 %vm1326_vm4, %v3834_v34 }
 0x982   : > { %4450 = vrot.lane.b32.xlu1 %v10421_v39, %s8954_s14  ;;  %7660 = vmatprep.mubr.msk.f32.mxu1 %vm8943_vm0, %v8942_v1 }
 0x983   : > { %v3843_v44 = vpop.f32.mrf.mxu1 }
 0x984   : > { %v3844_v13 = vadd.f32 %v6938_v18, %v3843_v44 }
 0x985   : > { %v7625_v45 = vpop.f32.mrf.mxu1  ;;  %7661 = vmatmul.mubr.msk.f32.gmra.mxu1 %vm1326_vm4, %v3839_v46 }
 0x986   : > { %4190 = vrot.lane.b32.xlu0 %v3844_v13, %s8952_s18  ;;  %4448 = vrot.lane.b32.xlu1 %v10416_v12, %s8954_s14  ;;  %s11378_s18 = smov 80  }
 0x987   : > { %7663 = vmatprep.mubr.msk.f32.mxu1 %vm8943_vm0, %v8942_v1 }
 0x989   : > { %7664 = vmatmul.mubr.msk.f32.gmra.mxu1 %vm1326_vm4, %v3844_v13 }
 0x98a   : > { %4440 = vrot.lane.b32.xlu0 %v3834_v34, %s8954_s14  ;;  %4446 = vrot.lane.b32.xlu1 %v10428_v16, %s8954_s14 }
 0x98b   : > { %7687 = vmatprep.mubr.msk.f32.mxu1 %vm8943_vm0, %v8942_v1 }
 0x98e   : > { %4442 = vrot.lane.b32.xlu0 %v3839_v46, %s8954_s14  ;;  %4704 = vrot.lane.b32.xlu1 %v10421_v39, %s8955_s21 }
 0x992   : > { %4444 = vrot.lane.b32.xlu0 %v3844_v13, %s8954_s14  ;;  %4702 = vrot.lane.b32.xlu1 %v10416_v12, %s8955_s21  ;;  %s11379_s14 = smov 72  }
 0x996   : > { %4694 = vrot.lane.b32.xlu0 %v3834_v34, %s8955_s21  ;;  %4700 = vrot.lane.b32.xlu1 %v10428_v16, %s8955_s21 }
 0x99a   : > { %4696 = vrot.lane.b32.xlu0 %v3839_v46, %s8955_s21  ;;  %4958 = vrot.lane.b32.xlu1 %v10421_v39, %s8956_s7 }
 0x99e   : > { %4698 = vrot.lane.b32.xlu0 %v3844_v13, %s8955_s21  ;;  %4956 = vrot.lane.b32.xlu1 %v10416_v12, %s8956_s7  ;;  %s11380_s21 = smov 64  }
 0x9a2   : > { %4948 = vrot.lane.b32.xlu0 %v3834_v34, %s8956_s7  ;;  %4954 = vrot.lane.b32.xlu1 %v10428_v16, %s8956_s7 }
 0x9a6   : > { %4950 = vrot.lane.b32.xlu0 %v3839_v46, %s8956_s7  ;;  %5212 = vrot.lane.b32.xlu1 %v10421_v39, %s8957_s27 }
 0x9aa   : > { %4952 = vrot.lane.b32.xlu0 %v3844_v13, %s8956_s7  ;;  %5210 = vrot.lane.b32.xlu1 %v10416_v12, %s8957_s27  ;;  %s11382_s7 = sld [smem:[#allocation57_spill]] }
 0x9ae   : > { %5202 = vrot.lane.b32.xlu0 %v3834_v34, %s8957_s27  ;;  %5208 = vrot.lane.b32.xlu1 %v10428_v16, %s8957_s27 }
 0x9b2   : > { %5204 = vrot.lane.b32.xlu0 %v3839_v46, %s8957_s27  ;;  %5466 = vrot.lane.b32.xlu1 %v10421_v39, %s11378_s18 }
 0x9b6   : > { %5206 = vrot.lane.b32.xlu0 %v3844_v13, %s8957_s27  ;;  %5464 = vrot.lane.b32.xlu1 %v10416_v12, %s11378_s18 }
 0x9b8   : > { %v4195_v59 = vpop.permute.xlu1 %4194 }
 0x9ba   : > { %5456 = vrot.lane.b32.xlu0 %v3834_v34, %s11378_s18  ;;  %5462 = vrot.lane.b32.xlu1 %v10428_v16, %s11378_s18 }
 0x9be   : > { %5458 = vrot.lane.b32.xlu0 %v3839_v46, %s11378_s18  ;;  %5720 = vrot.lane.b32.xlu1 %v10421_v39, %s11379_s14 }
 0x9c0   : > { %v4189_v28 = vpop.permute.xlu0 %4188 }
 0x9c2   : > { %5460 = vrot.lane.b32.xlu0 %v3844_v13, %s11378_s18  ;;  %5718 = vrot.lane.b32.xlu1 %v10416_v12, %s11379_s14 }
 0x9c6   : > { %5710 = vrot.lane.b32.xlu0 %v3834_v34, %s11379_s14  ;;  %5716 = vrot.lane.b32.xlu1 %v10428_v16, %s11379_s14 }
 0x9ca   : > { %5714 = vrot.lane.b32.xlu0 %v3844_v13, %s11379_s14  ;;  %5712 = vrot.lane.b32.xlu1 %v3839_v46, %s11379_s14 }
 0x9ce   : > { %4089 = vrot.lane.b32.xlu0 %v10421_v39, %s11380_s21  ;;  %4087 = vrot.lane.b32.xlu1 %v10416_v12, %s11380_s21 }
 0x9d2   : > { %4085 = vrot.lane.b32.xlu0 %v10428_v16, %s11380_s21  ;;  %4328 = vrot.lane.b32.xlu1 %v10416_v12, %s8945_s1 }
 0x9d6   : > { %4330 = vrot.lane.b32.xlu0 %v10421_v39, %s8945_s1  ;;  %4582 = vrot.lane.b32.xlu1 %v10416_v12, %s8946_s29 }
 0x9da   : > { %4326 = vrot.lane.b32.xlu0 %v10428_v16, %s8945_s1  ;;  %4836 = vrot.lane.b32.xlu1 %v10416_v12, %s8947_s13 }
 0x9de   : > { %4584 = vrot.lane.b32.xlu0 %v10421_v39, %s8946_s29  ;;  %5090 = vrot.lane.b32.xlu1 %v10416_v12, %s8948_s2 }
 0x9e2   : > { %4580 = vrot.lane.b32.xlu0 %v10428_v16, %s8946_s29  ;;  %5344 = vrot.lane.b32.xlu1 %v10416_v12, %s8949_s11 }
 0x9e6   : > { %4838 = vrot.lane.b32.xlu0 %v10421_v39, %s8947_s13 }
 0x9e8   : > { %v4197_v53 = vpop.permute.xlu1 %4196 }
 0x9e9   : > { %7682 = vmatpush3.xpose.msk.msra.mxu1 %vm1326_vm4, %v4197_v53 }
 0x9ea   : > { %4834 = vrot.lane.b32.xlu0 %v10428_v16, %s8947_s13  ;;  %7683 = vmatprep.subr.mxu1 %v8942_v1 }
 0x9ec   : > { %v4193_v10 = vpop.permute.xlu1 %4192 }
 0x9ed   : > { %7684 = vmatpush3.xpose.msk.msra.mxu1 %vm1326_vm4, %v4195_v59 }
 0x9ee   : > { %5092 = vrot.lane.b32.xlu0 %v10421_v39, %s8948_s2  ;;  %7685 = vmatprep.subr.mxu1 %v8942_v1 }
 0x9f0   : > { %v4187_v57 = vpop.permute.xlu1 %4186 }
 0x9f1   : > { %7686 = vmatpush3.xpose.msk.msra.mxu1 %vm1326_vm4, %v4193_v10 }
 0x9f2   : > { %5088 = vrot.lane.b32.xlu0 %v10428_v16, %s8948_s2  ;;  %7711 = vmatprep.subr.mxu1 %v8942_v1 }
 0x9f4   : > { %v4451_v48 = vpop.permute.xlu1 %4450  ;;  %7688 = vmatmul.mubr.msk.f32.vlgmr.msra.gmra.mxu1 %vm1326_vm4, %v4187_v57 }
 0x9f5   : > { %7712 = vmatpush3.xpose.msk.msra.mxu1 %vm1326_vm4, %v4451_v48  ;;  %7690 = vmatprep.mubr.msk.f32.mxu1 %vm8943_vm0, %v8942_v1 }
 0x9f6   : > { %5346 = vrot.lane.b32.xlu0 %v10421_v39, %s8949_s11  ;;  %7713 = vmatprep.subr.mxu1 %v8942_v1 }
 0x9f8   : > { %v4191_v9 = vpop.permute.xlu0 %4190  ;;  %v4449_v58 = vpop.permute.xlu1 %4448  ;;  %7691 = vmatmul.mubr.msk.f32.gmra.mxu1 %vm1326_vm4, %v4189_v28 }
 0x9f9   : > { %7714 = vmatpush3.xpose.msk.msra.mxu1 %vm1326_vm4, %v4449_v58  ;;  %7693 = vmatprep.mubr.msk.f32.mxu1 %vm8943_vm0, %v8942_v1 }
 0x9fa   : > { %5342 = vrot.lane.b32.xlu0 %v10428_v16, %s8949_s11  ;;  %7715 = vmatprep.subr.mxu1 %v8942_v1 }
 0x9fc   : > { %v4441_v56 = vpop.permute.xlu0 %4440  ;;  %v4447_v35 = vpop.permute.xlu1 %4446  ;;  %7694 = vmatmul.mubr.msk.f32.gmra.mxu1 %vm1326_vm4, %v4191_v9 }
 0x9fd   : > { %7716 = vmatpush3.xpose.msk.msra.mxu1 %vm1326_vm4, %v4447_v35  ;;  %7717 = vmatprep.mubr.msk.f32.mxu1 %vm8943_vm0, %v8942_v1 }
 0x9fe   : > { %7741 = vmatprep.subr.mxu1 %v8942_v1 }
 0xa00   : > { %v4443_v6 = vpop.permute.xlu0 %4442  ;;  %v4705_v47 = vpop.permute.xlu1 %4704  ;;  %7718 = vmatmul.mubr.msk.f32.vlgmr.msra.gmra.mxu1 %vm1326_vm4, %v4441_v56 }
 0xa01   : > { %7742 = vmatpush3.xpose.msk.msra.mxu1 %vm1326_vm4, %v4705_v47  ;;  %7720 = vmatprep.mubr.msk.f32.mxu1 %vm8943_vm0, %v8942_v1 }
 0xa02   : > { %7743 = vmatprep.subr.mxu1 %v8942_v1 }
 0xa04   : > { %v4445_v30 = vpop.permute.xlu0 %4444  ;;  %v4703_v63 = vpop.permute.xlu1 %4702  ;;  %7721 = vmatmul.mubr.msk.f32.gmra.mxu1 %vm1326_vm4, %v4443_v6 }
 0xa05   : > { %7744 = vmatpush3.xpose.msk.msra.mxu1 %vm1326_vm4, %v4703_v63  ;;  %7723 = vmatprep.mubr.msk.f32.mxu1 %vm8943_vm0, %v8942_v1 }
 0xa06   : > { %7745 = vmatprep.subr.mxu1 %v8942_v1 }
 0xa08   : > { %v4695_v62 = vpop.permute.xlu0 %4694  ;;  %v4701_v4 = vpop.permute.xlu1 %4700  ;;  %7724 = vmatmul.mubr.msk.f32.gmra.mxu1 %vm1326_vm4, %v4445_v30 }
 0xa09   : > { %7746 = vmatpush3.xpose.msk.msra.mxu1 %vm1326_vm4, %v4701_v4  ;;  %7747 = vmatprep.mubr.msk.f32.mxu1 %vm8943_vm0, %v8942_v1 }
 0xa0a   : > { %7771 = vmatprep.subr.mxu1 %v8942_v1 }
 0xa0c   : > { %v4697_v31 = vpop.permute.xlu0 %4696  ;;  %v4959_v52 = vpop.permute.xlu1 %4958  ;;  %7748 = vmatmul.mubr.msk.f32.vlgmr.msra.gmra.mxu1 %vm1326_vm4, %v4695_v62 }
 0xa0d   : > { %7772 = vmatpush3.xpose.msk.msra.mxu1 %vm1326_vm4, %v4959_v52  ;;  %7750 = vmatprep.mubr.msk.f32.mxu1 %vm8943_vm0, %v8942_v1 }
 0xa0e   : > { %7773 = vmatprep.subr.mxu1 %v8942_v1 }
 0xa10   : > { %v4699_v24 = vpop.permute.xlu0 %4698  ;;  %v4957_v29 = vpop.permute.xlu1 %4956  ;;  %7751 = vmatmul.mubr.msk.f32.gmra.mxu1 %vm1326_vm4, %v4697_v31 }
 0xa11   : > { %7774 = vmatpush3.xpose.msk.msra.mxu1 %vm1326_vm4, %v4957_v29  ;;  %7753 = vmatprep.mubr.msk.f32.mxu1 %vm8943_vm0, %v8942_v1 }
 0xa12   : > { %7775 = vmatprep.subr.mxu1 %v8942_v1 }
 0xa14   : > { %v4949_v55 = vpop.permute.xlu0 %4948  ;;  %v4955_v22 = vpop.permute.xlu1 %4954  ;;  %7754 = vmatmul.mubr.msk.f32.gmra.mxu1 %vm1326_vm4, %v4699_v24 }
 0xa15   : > { %7776 = vmatpush3.xpose.msk.msra.mxu1 %vm1326_vm4, %v4955_v22  ;;  %7777 = vmatprep.mubr.msk.f32.mxu1 %vm8943_vm0, %v8942_v1 }
 0xa16   : > { %7801 = vmatprep.subr.mxu1 %v8942_v1 }
 0xa18   : > { %v4951_v61 = vpop.permute.xlu0 %4950  ;;  %v5213_v2 = vpop.permute.xlu1 %5212  ;;  %7778 = vmatmul.mubr.msk.f32.vlgmr.msra.gmra.mxu1 %vm1326_vm4, %v4949_v55 }
 0xa19   : > { %7802 = vmatpush3.xpose.msk.msra.mxu1 %vm1326_vm4, %v5213_v2  ;;  %7780 = vmatprep.mubr.msk.f32.mxu1 %vm8943_vm0, %v8942_v1 }
 0xa1a   : > { %7803 = vmatprep.subr.mxu1 %v8942_v1 }
 0xa1c   : > { %v4953_v36 = vpop.permute.xlu0 %4952  ;;  %v5211_v11 = vpop.permute.xlu1 %5210  ;;  %7781 = vmatmul.mubr.msk.f32.gmra.mxu1 %vm1326_vm4, %v4951_v61 }
 0xa1d   : > { %7804 = vmatpush3.xpose.msk.msra.mxu1 %vm1326_vm4, %v5211_v11  ;;  %7783 = vmatprep.mubr.msk.f32.mxu1 %vm8943_vm0, %v8942_v1 }
 0xa1e   : > { %7805 = vmatprep.subr.mxu1 %v8942_v1 }
 0xa20   : > { %v5203_v7 = vpop.permute.xlu0 %5202  ;;  %v5209_v42 = vpop.permute.xlu1 %5208  ;;  %7784 = vmatmul.mubr.msk.f32.gmra.mxu1 %vm1326_vm4, %v4953_v36 }
 0xa21   : > { %7806 = vmatpush3.xpose.msk.msra.mxu1 %vm1326_vm4, %v5209_v42  ;;  %7807 = vmatprep.mubr.msk.f32.mxu1 %vm8943_vm0, %v8942_v1 }
 0xa22   : > { %7831 = vmatprep.subr.mxu1 %v8942_v1 }
 0xa24   : > { %v5205_v14 = vpop.permute.xlu0 %5204  ;;  %v5467_v19 = vpop.permute.xlu1 %5466  ;;  %7808 = vmatmul.mubr.msk.f32.vlgmr.msra.gmra.mxu1 %vm1326_vm4, %v5203_v7 }
 0xa25   : > { %7832 = vmatpush3.xpose.msk.msra.mxu1 %vm1326_vm4, %v5467_v19  ;;  %7810 = vmatprep.mubr.msk.f32.mxu1 %vm8943_vm0, %v8942_v1 }
 0xa26   : > { %7833 = vmatprep.subr.mxu1 %v8942_v1 }
 0xa28   : > { %v5207_v8 = vpop.permute.xlu0 %5206  ;;  %v5465_v33 = vpop.permute.xlu1 %5464  ;;  %7811 = vmatmul.mubr.msk.f32.gmra.mxu1 %vm1326_vm4, %v5205_v14 }
 0xa29   : > { %7834 = vmatpush3.xpose.msk.msra.mxu1 %vm1326_vm4, %v5465_v33  ;;  %7813 = vmatprep.mubr.msk.f32.mxu1 %vm8943_vm0, %v8942_v1 }
 0xa2a   : > { %7835 = vmatprep.subr.mxu1 %v8942_v1 }
 0xa2c   : > { %v5457_v5 = vpop.permute.xlu0 %5456  ;;  %v5463_v23 = vpop.permute.xlu1 %5462  ;;  %7814 = vmatmul.mubr.msk.f32.gmra.mxu1 %vm1326_vm4, %v5207_v8 }
 0xa2d   : > { %7836 = vmatpush3.xpose.msk.msra.mxu1 %vm1326_vm4, %v5463_v23  ;;  %7837 = vmatprep.mubr.msk.f32.mxu1 %vm8943_vm0, %v8942_v1 }
 0xa2e   : > { %7861 = vmatprep.subr.mxu1 %v8942_v1 }
 0xa30   : > { %v5459_v17 = vpop.permute.xlu0 %5458  ;;  %v5721_v50 = vpop.permute.xlu1 %5720  ;;  %7838 = vmatmul.mubr.msk.f32.vlgmr.msra.gmra.mxu1 %vm1326_vm4, %v5457_v5 }
 0xa31   : > { %7862 = vmatpush3.xpose.msk.msra.mxu1 %vm1326_vm4, %v5721_v50  ;;  %7840 = vmatprep.mubr.msk.f32.mxu1 %vm8943_vm0, %v8942_v1 }
 0xa32   : > { %7863 = vmatprep.subr.mxu1 %v8942_v1 }
 0xa34   : > { %v5461_v60 = vpop.permute.xlu0 %5460  ;;  %v5719_v21 = vpop.permute.xlu1 %5718  ;;  %7841 = vmatmul.mubr.msk.f32.gmra.mxu1 %vm1326_vm4, %v5459_v17 }
 0xa35   : > { %7864 = vmatpush3.xpose.msk.msra.mxu1 %vm1326_vm4, %v5719_v21  ;;  %7843 = vmatprep.mubr.msk.f32.mxu1 %vm8943_vm0, %v8942_v1 }
 0xa36   : > { %7865 = vmatprep.subr.mxu1 %v8942_v1 }
 0xa38   : > { %v5711_v20 = vpop.permute.xlu0 %5710  ;;  %v5717_v37 = vpop.permute.xlu1 %5716  ;;  %7844 = vmatmul.mubr.msk.f32.gmra.mxu1 %vm1326_vm4, %v5461_v60 }
 0xa39   : > { %7866 = vmatpush3.xpose.msk.msra.mxu1 %vm1326_vm4, %v5717_v37  ;;  %7867 = vmatprep.mubr.msk.f32.mxu1 %vm8943_vm0, %v8942_v1 }
 0xa3a   : > { %7891 = vmatprep.subr.mxu1 %v8942_v1 }
 0xa3c   : > { %v5715_v49 = vpop.permute.xlu0 %5714  ;;  %v5713_v32 = vpop.permute.xlu1 %5712  ;;  %7868 = vmatmul.mubr.msk.f32.vlgmr.msra.gmra.mxu1 %vm1326_vm4, %v5711_v20 }
 0xa3d   : > { %7870 = vmatprep.mubr.msk.f32.mxu1 %vm8943_vm0, %v8942_v1 }
 0xa40   : > { %v4090_v40 = vpop.permute.xlu0 %4089  ;;  %7871 = vmatmul.mubr.msk.f32.gmra.mxu1 %vm1326_vm4, %v5713_v32  ;;  %v4088_v38 = vpop.permute.xlu1 %4087 }
 0xa41   : > { %v4035_v51 = vpop.f32.mrf.mxu1  ;;  %7667 = vmatpush3.msra.mxu0 %v4090_v40  ;;  %7873 = vmatprep.mubr.msk.f32.mxu1 %vm8943_vm0, %v8942_v1 }
 0xa42   : > { %v10641_v15 = vmul.f32 0.35355338, %v4035_v51  ;;  %7668 = vmatprep.subr.mxu0 %v8942_v1 }
 0xa43   : > { %v7659_v18 = vpop.f32.mrf.mxu1  ;;  %7669 = vmatpush3.msra.mxu0 %v4088_v38 }
 0xa44   : > { %v4086_v43 = vpop.permute.xlu0 %4085  ;;  %7670 = vmatprep.subr.mxu0 %v8942_v1  ;;  %7874 = vmatmul.mubr.msk.f32.gmra.mxu1 %vm1326_vm4, %v5715_v49  ;;  %v4052_v46 = vsel %vm1224_vm3, %v10641_v15, -inf  ;;  %v10666_v9 = vpop.permute.xlu1 %4328 }
 0xa45   : > { %7671 = vmatpush3.msra.mxu0 %v4086_v43  ;;  %4053 = vmax.xlane.f32.xlu1 %v4052_v46  ;;  %v4040_v26 = vpop.f32.mrf.mxu1 }
 0xa46   : > { %v10648_v25 = vmul.f32 0.35355338, %v4040_v26  ;;  %7696 = vmatprep.subr.mxu0 %v8942_v1  ;;  %7907 = vmatprep.mubr.msk.f32.mxu1 %vm8943_vm0, %v8942_v1 }
 0xa47   : > { %v7662_v3 = vpop.f32.mrf.mxu1 }
 0xa48   : > { %v4055_v34 = vsel %vm1224_vm3, %v10648_v25, -inf  ;;  %v10656_v53 = vpop.permute.xlu0 %4330  ;;  %v10674_v30 = vpop.permute.xlu1 %4582 }
 0xa49   : > { %4056 = vmax.xlane.f32.xlu0 %v4055_v34  ;;  %v4045_v44 = vpop.f32.mrf.mxu1 }
 0xa4a   : > { %v4051_v13 = vmul.f32 0.35355338, %v4045_v44 }
 0xa4b   : > { %v7665_v45 = vpop.f32.mrf.mxu1 }
 0xa4c   : > { %v4058_v59 = vsel %vm1224_vm3, %v4051_v13, -inf  ;;  %v10658_v10 = vpop.permute.xlu0 %4326  ;;  %v10682_v29 = vpop.permute.xlu1 %4836 }
 0xa4d   : > { %4059 = vmax.xlane.f32.xlu0 %v4058_v59 }
 0xa50   : > { %v10660_v57 = vpop.permute.xlu0 %4584  ;;  %v10690_v7 = vpop.permute.xlu1 %5090 }
 0xa54   : > { %v10662_v28 = vpop.permute.xlu0 %4580  ;;  %v10696_v5 = vpop.permute.xlu1 %5344 }
 0xa58   : > { %v10664_v48 = vpop.permute.xlu0 %4838 }
 0xa5c   : > { %v10668_v56 = vpop.permute.xlu0 %4834 }
 0xa60   : > { %v10678_v31 = vpop.permute.xlu0 %5092 }
 0xa64   : > { %v10684_v61 = vpop.permute.xlu0 %5088 }
 0xa68   : > { %v10692_v19 = vpop.permute.xlu0 %5346 }
 0xa6c   : > { %v10700_v60 = vpop.permute.xlu0 %5342 }
 0xab4   : > { %v4276_v58 = vpop.f32.mrf.mxu1 }
 0xab5   : > { %v10670_v35 = vmul.f32 0.35355338, %v4276_v58 }
 0xab6   : > { %v7689_v6 = vpop.f32.mrf.mxu1 }
 0xab7   : > { %v4293_v47 = vsel %vm1224_vm3, %v10670_v35, -inf }
 0xab8   : > { %4294 = vmax.xlane.f32.xlu1 %v4293_v47  ;;  %v4281_v63 = vpop.f32.mrf.mxu1 }
 0xab9   : > { %v10676_v62 = vmul.f32 0.35355338, %v4281_v63 }
 0xaba   : > { %v7692_v4 = vpop.f32.mrf.mxu1 }
 0xabb   : > { %v4296_v52 = vsel %vm1224_vm3, %v10676_v62, -inf }
 0xabc   : > { %4297 = vmax.xlane.f32.xlu0 %v4296_v52  ;;  %v4286_v24 = vpop.f32.mrf.mxu1 }
 0xabe   : > { %v7695_v55 = vpop.f32.mrf.mxu1 }
 0xabf   : > { %v10714_v55 = vmul.f32 0.35355338, %v4286_v24 }
 0xac0   : > { %v4530_v22 = vpop.f32.mrf.mxu1 }
 0xac1   : > { %v10686_v2 = vmul.f32 0.35355338, %v4530_v22 }
 0xac2   : > { %v7719_v36 = vpop.f32.mrf.mxu1 }
 0xac3   : > { %v4547_v11 = vsel %vm1224_vm3, %v10686_v2, -inf }
 0xac4   : > { %4548 = vmax.xlane.f32.xlu0 %v4547_v11  ;;  %v4535_v42 = vpop.f32.mrf.mxu1 }
 0xac6   : > { %v7722_v14 = vpop.f32.mrf.mxu1 }
 0xac7   : > { %v10722_v14 = vmul.f32 0.35355338, %v4535_v42 }
 0xac8   : > { %v4540_v8 = vpop.f32.mrf.mxu1 }
 0xac9   : > { %v10694_v33 = vmul.f32 0.35355338, %v4540_v8  ;;  %v4299_v8 = vsel %vm1224_vm3, %v10714_v55, -inf }
 0xaca   : > { %v7725_v23 = vpop.f32.mrf.mxu1 }
 0xacb   : > { %v4553_v17 = vsel %vm1224_vm3, %v10694_v33, -inf }
 0xacc   : > { %4554 = vmax.xlane.f32.xlu0 %v4553_v17  ;;  %v4784_v50 = vpop.f32.mrf.mxu1 }
 0xace   : > { %v4054_v21 = vpop.xlane.xlu1 %4053  ;;  %v7749_v20 = vpop.f32.mrf.mxu1 }
 0xacf   : > { %v4061_v37 = vsub.f32 %v10641_v15, %v4054_v21  ;;  %v10728_v21 = vmul.f32 0.35355338, %v4784_v50 }
 0xad0   : > { %v4789_v49 = vpop.f32.mrf.mxu1 }
 0xad1   : > { %v4064_v32 = vmul.f32 1.442695, %v4061_v37  ;;  %v10703_v40 = vmul.f32 0.35355338, %v4789_v49  ;;  %v4550_v37 = vsel %vm1224_vm3, %v10722_v14, -inf }
 0xad2   : > { %v4057_v51 = vpop.xlane.xlu0 %4056  ;;  %v7752_v38 = vpop.f32.mrf.mxu1 }
 0xad3   : > { %8306 = vpow2.f32 %v4064_v32  ;;  %v4804_v18 = vsel %vm1224_vm3, %v10703_v40, -inf  ;;  %v4062_v44 = vsub.f32 %v10648_v25, %v4057_v51  ;;  %v4801_v51 = vsel %vm1224_vm3, %v10728_v21, -inf }
 0xad4   : > { %4805 = vmax.xlane.f32.xlu0 %v4804_v18  ;;  %v4794_v43 = vpop.f32.mrf.mxu1 }
 0xad5   : > { %v4066_v47 = vmul.f32 1.442695, %v4062_v44 }
 0xad6   : > { %v4060_v46 = vpop.xlane.xlu0 %4059  ;;  %v7755_v26 = vpop.f32.mrf.mxu1 }
 0xad7   : > { %v4063_v3 = vsub.f32 %v4051_v13, %v4060_v46  ;;  %v10742_v26 = vmul.f32 0.35355338, %v4794_v43 }
 0xad8   : > { %v5038_v34 = vpop.f32.mrf.mxu1 }
 0xad9   : > { %v4068_v45 = vmul.f32 1.442695, %v4063_v3  ;;  %v10708_v15 = vmul.f32 0.35355338, %v5038_v34 }
 0xada   : > { %v7779_v59 = vpop.f32.mrf.mxu1 }
 0xadb   : > { %8308 = vpow2.f32 %v4068_v45  ;;  %v5055_v58 = vsel %vm1224_vm3, %v10708_v15, -inf }
 0xadc   : > { %5056 = vmax.xlane.f32.xlu0 %v5055_v58  ;;  %v5043_v6 = vpop.f32.mrf.mxu1  ;;  %8310 = vpow2.f32 %v4066_v47  ;;  %v4807_v47 = vsel %vm1224_vm3, %v10742_v26, -inf }
 0xadd   : > { %v10750_v58 = vmul.f32 0.35355338, %v5043_v6 }
 0xade   : > { %v7782_v63 = vpop.f32.mrf.mxu1 }
 0xae0   : > { %v10712_v4 = vpop.eup %8306  ;;  %v5048_v52 = vpop.f32.mrf.mxu1 }
 0xae1   : > { %v10716_v13 = vmul.f32 0.35355338, %v5048_v52  ;;  %v4070_v25 = vsel %vm1224_vm3, %v10712_v4, 0.0 }
 0xae2   : > { %4071 = vadd.xlane.f32.xlu1 %v4070_v25  ;;  %v7785_v22 = vpop.f32.mrf.mxu1 }
 0xae3   : > { %v5061_v36 = vsel %vm1224_vm3, %v10716_v13, -inf  ;;  %v5058_v22 = vsel %vm1224_vm3, %v10750_v58, -inf }
 0xae4   : > { %5062 = vmax.xlane.f32.xlu0 %v5061_v36  ;;  %v5292_v11 = vpop.f32.mrf.mxu1 }
 0xae5   : > { %v10754_v52 = vmul.f32 0.35355338, %v5292_v11 }
 0xae6   : > { %4300 = vmax.xlane.f32.xlu1 %v4299_v8  ;;  %v7809_v24 = vpop.f32.mrf.mxu1 }
 0xae8   : > { %v10726_v23 = vpop.eup %8308  ;;  %v5297_v17 = vpop.f32.mrf.mxu1 }
 0xae9   : > { %v10730_v20 = vmul.f32 0.35355338, %v5297_v17  ;;  %v4076_v49 = vsel %vm1224_vm3, %v10726_v23, 0.0  ;;  %v10740_v50 = vpop.eup %8310  ;;  %v5309_v17 = vsel %vm1224_vm3, %v10754_v52, -inf }
 0xaea   : > { %4551 = vmax.xlane.f32.xlu1 %v4550_v37  ;;  %4077 = vadd.xlane.f32.xlu0 %v4076_v49  ;;  %v7812_v42 = vpop.f32.mrf.mxu1  ;;  %v4073_v34 = vsel %vm1224_vm3, %v10740_v50, 0.0 }
 0xaeb   : > { %v5312_v38 = vsel %vm1224_vm3, %v10730_v20, -inf }
 0xaec   : > { %v5302_v32 = vpop.f32.mrf.mxu1 }
 0xaed   : > { %v10762_v24 = vmul.f32 0.35355338, %v5302_v32 }
 0xaee   : > { %4802 = vmax.xlane.f32.xlu1 %v4801_v51  ;;  %5313 = vmax.xlane.f32.xlu0 %v5312_v38  ;;  %v7815_v18 = vpop.f32.mrf.mxu1 }
 0xaef   : > { %v5315_v42 = vsel %vm1224_vm3, %v10762_v24, -inf }
 0xaf0   : > { %v5546_v46 = vpop.f32.mrf.mxu1 }
 0xaf1   : > { %v10744_v3 = vmul.f32 0.35355338, %v5546_v46 }
 0xaf2   : > { %4074 = vadd.xlane.f32.xlu1 %v4073_v34  ;;  %v7839_v44 = vpop.f32.mrf.mxu1 }
 0xaf3   : > { %v5563_v45 = vsel %vm1224_vm3, %v10744_v3, -inf }
 0xaf4   : > { %5564 = vmax.xlane.f32.xlu0 %v5563_v45  ;;  %v5551_v59 = vpop.f32.mrf.mxu1 }
 0xaf5   : > { %v10766_v49 = vmul.f32 0.35355338, %v5551_v59 }
 0xaf6   : > { %4808 = vmax.xlane.f32.xlu1 %v4807_v47  ;;  %v7842_v43 = vpop.f32.mrf.mxu1 }
 0xaf7   : > { %v5566_v18 = vsel %vm1224_vm3, %v10766_v49, -inf }
 0xaf8   : > { %v5556_v63 = vpop.f32.mrf.mxu1 }
 0xaf9   : > { %v10756_v25 = vmul.f32 0.35355338, %v5556_v63 }
 0xafa   : > { %5059 = vmax.xlane.f32.xlu1 %v5058_v22  ;;  %v7845_v36 = vpop.f32.mrf.mxu1 }
 0xafb   : > { %v5569_v8 = vsel %vm1224_vm3, %v10756_v25, -inf }
 0xafc   : > { %5570 = vmax.xlane.f32.xlu0 %v5569_v8  ;;  %v5800_v6 = vpop.f32.mrf.mxu1 }
 0xafd   : > { %v10784_v59 = vmul.f32 0.35355338, %v5800_v6 }
 0xafe   : > { %5310 = vmax.xlane.f32.xlu1 %v5309_v17  ;;  %v7869_v11 = vpop.f32.mrf.mxu1 }
 0xaff   : > { %v5817_v47 = vsel %vm1224_vm3, %v10784_v59, -inf }
 0xb00   : > { %v5805_v37 = vpop.f32.mrf.mxu1 }
 0xb01   : > { %v10776_v46 = vmul.f32 0.35355338, %v5805_v37 }
 0xb02   : > { %5316 = vmax.xlane.f32.xlu1 %v5315_v42  ;;  %v7872_v51 = vpop.f32.mrf.mxu1 }
 0xb03   : > { %v5820_v44 = vsel %vm1224_vm3, %v10776_v46, -inf }
 0xb04   : > { %v5810_v38 = vpop.f32.mrf.mxu1 }
 0xb05   : > { %v10778_v34 = vmul.f32 0.35355338, %v5810_v38 }
 0xb06   : > { %5567 = vmax.xlane.f32.xlu1 %v5566_v18  ;;  %v7875_v32 = vpop.f32.mrf.mxu1 }
 0xb07   : > { %v5823_v45 = vsel %vm1224_vm3, %v10778_v34, -inf }
 0xb12   : > { %5600 = vrot.lane.b32.xlu0 %v10421_v39, %s8950_s5 }
 0xb17   : > { %5598 = vrot.lane.b32.xlu1 %v10416_v12, %s8950_s5 }
 0xb31   : > { %5821 = vmax.xlane.f32.xlu0 %v5820_v44 }
 0xb35   : > { %5824 = vmax.xlane.f32.xlu0 %v5823_v45 }
 0xb3b   : > { %5818 = vmax.xlane.f32.xlu1 %v5817_v47 }
 0xb41   : > { %v4295_v43 = vpop.xlane.xlu1 %4294 }
 0xb42   : > { %v4302_v63 = vsub.f32 %v10670_v35, %v4295_v43 }
 0xb44   : > { %v4305_v22 = vmul.f32 1.442695, %v4302_v63 }
 0xb45   : > { %v4298_v36 = vpop.xlane.xlu0 %4297 }
 0xb46   : > { %8312 = vpow2.f32 %v4305_v22  ;;  %v4303_v8 = vsub.f32 %v10676_v62, %v4298_v36 }
 0xb48   : > { %v4307_v17 = vmul.f32 1.442695, %v4303_v8 }
 0xb4a   : > { %8314 = vpow2.f32 %v4307_v17 }
 0xb4d   : > { %v4549_v11 = vpop.xlane.xlu0 %4548 }
 0xb4e   : > { %v4556_v45 = vsub.f32 %v10686_v2, %v4549_v11 }
 0xb50   : > { %v4559_v63 = vmul.f32 1.442695, %v4556_v45 }
 0xb53   : > { %v10790_v37 = vpop.eup %8312 }
 0xb54   : > { %v4311_v6 = vsel %vm1224_vm3, %v10790_v37, 0.0 }
 0xb55   : > { %v4555_v42 = vpop.xlane.xlu0 %4554  ;;  %4312 = vadd.xlane.f32.xlu1 %v4311_v6 }
 0xb56   : > { %v4558_v51 = vsub.f32 %v10694_v33, %v4555_v42 }
 0xb57   : > { %v10795_v38 = vpop.eup %8314 }
 0xb58   : > { %v4563_v35 = vmul.f32 1.442695, %v4558_v51  ;;  %v4314_v18 = vsel %vm1224_vm3, %v10795_v38, 0.0 }
 0xb59   : > { %4315 = vadd.xlane.f32.xlu0 %v4314_v18 }
 0xb5a   : > { %8316 = vpow2.f32 %v4563_v35 }
 0xb5d   : > { %v4806_v43 = vpop.xlane.xlu0 %4805 }
 0xb5e   : > { %v4811_v2 = vsub.f32 %v10703_v40, %v4806_v43 }
 0xb65   : > { %v10806_v17 = vpop.xlane.xlu0 %5056 }
 0xb67   : > { %v10799_v62 = vpop.eup %8316 }
 0xb68   : > { %v4571_v32 = vsel %vm1224_vm3, %v10799_v62, 0.0 }
 0xb69   : > { %4572 = vadd.xlane.f32.xlu0 %v4571_v32 }
 0xb6b   : > { %v4072_v44 = vpop.xlane.xlu1 %4071 }
 0xb6c   : > { %8318 = vrcp.f32 %v4072_v44 }
 0xb6d   : > { %v5063_v18 = vpop.xlane.xlu0 %5062 }
 0xb6f   : > { %v4301_v47 = vpop.xlane.xlu1 %4300 }
 0xb70   : > { %v4304_v33 = vsub.f32 %v10714_v55, %v4301_v47 }
 0xb72   : > { %v4309_v22 = vmul.f32 1.442695, %v4304_v33 }
 0xb73   : > { %v4552_v36 = vpop.xlane.xlu1 %4551  ;;  %v4078_v44 = vpop.xlane.xlu0 %4077 }
 0xb74   : > { %8320 = vpow2.f32 %v4309_v22  ;;  %v4557_v8 = vsub.f32 %v10722_v14, %v4552_v36  ;;  %v4815_v14 = vmul.f32 1.442695, %v4811_v2 }
 0xb75   : > { %8322 = vpow2.f32 %v4559_v63 }
 0xb76   : > { %v4561_v6 = vmul.f32 1.442695, %v4557_v8 }
 0xb77   : > { %v4803_v42 = vpop.xlane.xlu1 %4802 }
 0xb78   : > { %v4810_v51 = vsub.f32 %v10728_v21, %v4803_v42  ;;  %8324 = vpow2.f32 %v4561_v6  ;;  %v5066_v21 = vsub.f32 %v10716_v13, %v5063_v18 }
 0xb79   : > { %v8319_v35 = vpop.eup %8318 }
 0xb7a   : > { %v4080_v55 = vmul.f32 %v8319_v35, %v10712_v4  ;;  %v4813_v11 = vmul.f32 1.442695, %v4810_v51 }
 0xb7b   : > { %v4075_v32 = vpop.xlane.xlu1 %4074 }
 0xb7c   : > { %7673 = vmatmul.mubr.msk.f32.vlgmr.msra.gmra.mxu0 %vm1224_vm3, %v4080_v55  ;;  %8326 = vpow2.f32 %v4813_v11 }
 0xb7d   : > { %7697 = vmatpush3.msra.mxu0 %v10656_v53  ;;  %7675 = vmatprep.mubr.msk.f32.mxu0 %vm8943_vm0, %v8942_v1  ;;  %8328 = vrcp.f32 %v4075_v32  ;;  %v5071_v53 = vmul.f32 1.442695, %v5066_v21  ;;  %v5314_v21 = vpop.xlane.xlu0 %5313 }
 0xb7e   : > { %7698 = vmatprep.subr.mxu0 %v8942_v1  ;;  %8330 = vrcp.f32 %v4078_v44 }
 0xb7f   : > { %7699 = vmatpush3.msra.mxu0 %v10666_v9  ;;  %v4809_v40 = vpop.xlane.xlu1 %4808  ;;  %8332 = vpow2.f32 %v4815_v14 }
 0xb80   : > { %7700 = vmatprep.subr.mxu0 %v8942_v1  ;;  %v4812_v4 = vsub.f32 %v10742_v26, %v4809_v40 }
 0xb81   : > { %v10820_v45 = vpop.eup %8320  ;;  %7701 = vmatpush3.msra.mxu0 %v10658_v10  ;;  %v5565_v40 = vpop.xlane.xlu0 %5564 }
 0xb82   : > { %v4817_v47 = vmul.f32 1.442695, %v4812_v4  ;;  %v4317_v13 = vsel %vm1224_vm3, %v10820_v45, 0.0  ;;  %7726 = vmatprep.subr.mxu0 %v8942_v1  ;;  %v10826_v33 = vpop.eup %8322  ;;  %v5064_v4 = vsub.f32 %v10708_v15, %v10806_v17 }
 0xb83   : > { %v5060_v9 = vpop.xlane.xlu1 %5059  ;;  %4318 = vadd.xlane.f32.xlu1 %v4317_v13  ;;  %v4565_v26 = vsel %vm1224_vm3, %v10826_v33, 0.0 }
 0xb84   : > { %8334 = vpow2.f32 %v4817_v47  ;;  %v5067_v47 = vmul.f32 1.442695, %v5064_v4  ;;  %v5065_v13 = vsub.f32 %v10750_v58, %v5060_v9  ;;  %v5572_v58 = vsub.f32 %v10744_v3, %v5565_v40 }
 0xb85   : > { %8336 = vpow2.f32 %v5071_v53  ;;  %v10830_v43 = vpop.eup %8324  ;;  %v5571_v53 = vpop.xlane.xlu0 %5570 }
 0xb86   : > { %v4568_v22 = vsel %vm1224_vm3, %v10830_v43, 0.0  ;;  %v5574_v15 = vsub.f32 %v10756_v25, %v5571_v53 }
 0xb87   : > { %v5311_v10 = vpop.xlane.xlu1 %5310  ;;  %4566 = vadd.xlane.f32.xlu1 %v4565_v26 }
 0xb89   : > { %v10832_v63 = vpop.eup %8326  ;;  %v10870_v26 = vpop.permute.xlu0 %5600 }
 0xb8a   : > { %v8329_v36 = vpop.eup %8328  ;;  %v4819_v18 = vsel %vm1224_vm3, %v10832_v63, 0.0 }
 0xb8b   : > { %v5317_v8 = vpop.xlane.xlu1 %5316  ;;  %4569 = vadd.xlane.f32.xlu1 %v4568_v22  ;;  %v4082_v42 = vmul.f32 %v8329_v36, %v10740_v50  ;;  %v8331_v51 = vpop.eup %8330  ;;  %v5069_v22 = vmul.f32 1.442695, %v5065_v13  ;;  %v5318_v36 = vsub.f32 %v10754_v52, %v5311_v10  ;;  %v5575_v52 = vmul.f32 1.442695, %v5572_v58 }
 0xb8c   : > { %v5320_v6 = vsub.f32 %v10762_v24, %v5317_v8  ;;  %v10841_v2 = vpop.eup %8332  ;;  %v4084_v55 = vmul.f32 %v8331_v51, %v10726_v23  ;;  %v5319_v8 = vsub.f32 %v10730_v20, %v5314_v21 }
 0xb8d   : > { %7676 = vmatmul.mubr.msk.f32.gmra.mxu0 %vm1224_vm3, %v4082_v42  ;;  %v4822_v50 = vsel %vm1224_vm3, %v10841_v2, 0.0  ;;  %v5321_v17 = vmul.f32 1.442695, %v5318_v36 }
 0xb8e   : > { %v5325_v35 = vmul.f32 1.442695, %v5320_v6  ;;  %7678 = vmatprep.mubr.msk.f32.mxu0 %vm8943_vm0, %v8942_v1  ;;  %v5323_v51 = vmul.f32 1.442695, %v5319_v8 }
 0xb8f   : > { %4820 = vadd.xlane.f32.xlu1 %v4819_v18  ;;  %v5568_v6 = vpop.xlane.xlu1 %5567 }
 0xb90   : > { %8338 = vpow2.f32 %v5325_v35  ;;  %v5579_v35 = vmul.f32 1.442695, %v5574_v15  ;;  %v5573_v20 = vsub.f32 %v10766_v49, %v5568_v6 }
 0xb91   : > { %v10846_v11 = vpop.eup %8334  ;;  %7679 = vmatmul.mubr.msk.f32.gmra.mxu0 %vm1224_vm3, %v4084_v55  ;;  %8340 = vpow2.f32 %v5067_v47 }
 0xb92   : > { %v4825_v24 = vsel %vm1224_vm3, %v10846_v11, 0.0  ;;  %v10853_v32 = vpop.eup %8336  ;;  %7702 = vmatprep.mubr.msk.f32.mxu0 %vm8943_vm0, %v8942_v1  ;;  %8342 = vpow2.f32 %v5069_v22 }
 0xb93   : > { %4823 = vadd.xlane.f32.xlu1 %v4822_v50  ;;  %4826 = vadd.xlane.f32.xlu0 %v4825_v24  ;;  %v5079_v23 = vsel %vm1224_vm3, %v10853_v32, 0.0  ;;  %8344 = vpow2.f32 %v5321_v17  ;;  %v10877_v18 = vpop.permute.xlu1 %5598  ;;  %v5577_v50 = vmul.f32 1.442695, %v5573_v20 }
 0xb94   : > { %8346 = vpow2.f32 %v5323_v51 }
 0xb95   : > { %8348 = vpow2.f32 %v5579_v35 }
 0xb96   : > { %8350 = vpow2.f32 %v5575_v52 }
 0xb97   : > { %5080 = vadd.xlane.f32.xlu0 %v5079_v23 }
 0xb9d   : > { %v10859_v44 = vpop.eup %8338 }
 0xb9e   : > { %v5333_v14 = vsel %vm1224_vm3, %v10859_v44, 0.0  ;;  %v10880_v55 = vpop.eup %8340 }
 0xb9f   : > { %5334 = vadd.xlane.f32.xlu0 %v5333_v14  ;;  %v5073_v24 = vsel %vm1224_vm3, %v10880_v55, 0.0 }
 0xba4   : > { %5596 = vrot.lane.b32.xlu1 %v10428_v16, %s8950_s5 }
 0xbb5   : > { %5854 = vrot.lane.b32.xlu0 %v10421_v39, %s8951_s15 }
 0xbba   : > { %v5822_v42 = vpop.xlane.xlu0 %5821 }
 0xbbb   : > { %v5827_v23 = vsub.f32 %v10776_v46, %v5822_v42 }
 0xbbd   : > { %v5831_v4 = vmul.f32 1.442695, %v5827_v23 }
 0xbbe   : > { %v5825_v9 = vpop.xlane.xlu0 %5824 }
 0xbbf   : > { %v5828_v39 = vsub.f32 %v10778_v34, %v5825_v9  ;;  %v10885_v34 = vpop.eup %8342 }
 0xbc0   : > { %v5076_v49 = vsel %vm1224_vm3, %v10885_v34, 0.0  ;;  %v10890_v21 = vpop.eup %8344 }
 0xbc1   : > { %v5833_v10 = vmul.f32 1.442695, %v5828_v39  ;;  %v10892_v40 = vpop.eup %8346 }
 0xbc2   : > { %v10896_v53 = vpop.eup %8348  ;;  %v5330_v46 = vsel %vm1224_vm3, %v10892_v40, 0.0 }
 0xbc3   : > { %8352 = vpow2.f32 %v5833_v10  ;;  %v10898_v47 = vpop.eup %8350  ;;  %v5587_v13 = vsel %vm1224_vm3, %v10896_v53, 0.0 }
 0xbc4   : > { %v5819_v25 = vpop.xlane.xlu1 %5818  ;;  %8354 = vpow2.f32 %v5577_v50  ;;  %v5581_v36 = vsel %vm1224_vm3, %v10898_v47, 0.0 }
 0xbc5   : > { %v5826_v3 = vsub.f32 %v10784_v59, %v5819_v25  ;;  %v5327_v59 = vsel %vm1224_vm3, %v10890_v21, 0.0 }
 0xbc7   : > { %v5829_v14 = vmul.f32 1.442695, %v5826_v3 }
 0xbc8   : > { %5074 = vadd.xlane.f32.xlu1 %v5073_v24 }
 0xbc9   : > { %8356 = vpow2.f32 %v5829_v14 }
 0xbca   : > { %8358 = vpow2.f32 %v5831_v4 }
 0xbcc   : > { %5077 = vadd.xlane.f32.xlu1 %v5076_v49 }
 0xbd0   : > { %5328 = vadd.xlane.f32.xlu1 %v5327_v59  ;;  %v10904_v22 = vpop.eup %8352 }
 0xbd1   : > { %v5841_v8 = vsel %vm1224_vm3, %v10904_v22, 0.0  ;;  %v10910_v6 = vpop.eup %8354 }
 0xbd2   : > { %v5584_v42 = vsel %vm1224_vm3, %v10910_v6, 0.0 }
 0xbd4   : > { %5331 = vadd.xlane.f32.xlu1 %v5330_v46  ;;  %5588 = vadd.xlane.f32.xlu0 %v5587_v13 }
 0xbd6   : > { %v10914_v15 = vpop.eup %8356 }
 0xbd7   : > { %v5835_v51 = vsel %vm1224_vm3, %v10914_v15, 0.0  ;;  %v10918_v58 = vpop.eup %8358 }
 0xbd8   : > { %5582 = vadd.xlane.f32.xlu1 %v5581_v36  ;;  %5842 = vadd.xlane.f32.xlu0 %v5841_v8  ;;  %v5838_v35 = vsel %vm1224_vm3, %v10918_v58, 0.0 }
 0xbdc   : > { %5585 = vadd.xlane.f32.xlu1 %v5584_v42 }
 0xbde   : > { %v4313_v17 = vpop.xlane.xlu1 %4312 }
 0xbdf   : > { %8360 = vrcp.f32 %v4313_v17 }
 0xbe0   : > { %5836 = vadd.xlane.f32.xlu1 %v5835_v51 }
 0xbe2   : > { %v4316_v9 = vpop.xlane.xlu0 %4315 }
 0xbe3   : > { %8362 = vrcp.f32 %v4316_v9 }
 0xbe4   : > { %5839 = vadd.xlane.f32.xlu1 %v5838_v35 }
 0xbec   : > { %v8361_v39 = vpop.eup %8360 }
 0xbed   : > { %v4321_v52 = vmul.f32 %v8361_v39, %v10790_v37 }
 0xbee   : > { %5850 = vrot.lane.b32.xlu0 %v10428_v16, %s8951_s15 }
 0xbef   : > { %7703 = vmatmul.mubr.msk.f32.vlgmr.msra.gmra.mxu0 %vm1224_vm3, %v4321_v52 }
 0xbf0   : > { %v8363_v20 = vpop.eup %8362  ;;  %7727 = vmatpush3.msra.mxu0 %v10660_v57  ;;  %7705 = vmatprep.mubr.msk.f32.mxu0 %vm8943_vm0, %v8942_v1 }
 0xbf1   : > { %7728 = vmatprep.subr.mxu0 %v8942_v1  ;;  %v4323_v10 = vmul.f32 %v8363_v20, %v10795_v38 }
 0xbf2   : > { %7729 = vmatpush3.msra.mxu0 %v10674_v30  ;;  %v4573_v37 = vpop.xlane.xlu0 %4572 }
 0xbf3   : > { %7730 = vmatprep.subr.mxu0 %v8942_v1  ;;  %7706 = vmatmul.mubr.msk.f32.gmra.mxu0 %vm1224_vm3, %v4323_v10 }
 0xbf4   : > { %7731 = vmatpush3.msra.mxu0 %v10662_v28  ;;  %7708 = vmatprep.mubr.msk.f32.mxu0 %vm8943_vm0, %v8942_v1 }
 0xbf5   : > { %5852 = vrot.lane.b32.xlu1 %v10416_v12, %s8951_s15  ;;  %7756 = vmatprep.subr.mxu0 %v8942_v1 }
 0xc0c   : > { %v4319_v16 = vpop.xlane.xlu1 %4318 }
 0xc0d   : > { %8364 = vrcp.f32 %v4319_v16 }
 0xc10   : > { %v4567_v57 = vpop.xlane.xlu1 %4566 }
 0xc11   : > { %8366 = vrcp.f32 %v4567_v57 }
 0xc14   : > { %v4570_v30 = vpop.xlane.xlu1 %4569 }
 0xc15   : > { %8368 = vrcp.f32 %v4570_v30 }
 0xc16   : > { %8370 = vrcp.f32 %v4573_v37 }
 0xc18   : > { %v4821_v38 = vpop.xlane.xlu1 %4820 }
 0xc19   : > { %8372 = vrcp.f32 %v4821_v38 }
 0xc1a   : > { %v8365_v25 = vpop.eup %8364 }
 0xc1b   : > { %v4325_v28 = vmul.f32 %v8365_v25, %v10820_v45 }
 0xc1c   : > { %v4824_v50 = vpop.xlane.xlu1 %4823  ;;  %v4827_v24 = vpop.xlane.xlu0 %4826 }
 0xc1d   : > { %7709 = vmatmul.mubr.msk.f32.gmra.mxu0 %vm1224_vm3, %v4325_v28  ;;  %8374 = vrcp.f32 %v4824_v50 }
 0xc1e   : > { %v8367_v3 = vpop.eup %8366  ;;  %7732 = vmatprep.mubr.msk.f32.mxu0 %vm8943_vm0, %v8942_v1  ;;  %8376 = vrcp.f32 %v4827_v24 }
 0xc1f   : > { %v4575_v12 = vmul.f32 %v8367_v3, %v10826_v33 }
 0xc20   : > { %v5081_v46 = vpop.xlane.xlu0 %5080 }
 0xc21   : > { %7733 = vmatmul.mubr.msk.f32.vlgmr.msra.gmra.mxu0 %vm1224_vm3, %v4575_v12 }
 0xc22   : > { %v8369_v23 = vpop.eup %8368  ;;  %7757 = vmatpush3.msra.mxu0 %v10664_v48  ;;  %7735 = vmatprep.mubr.msk.f32.mxu0 %vm8943_vm0, %v8942_v1 }
 0xc23   : > { %7758 = vmatprep.subr.mxu0 %v8942_v1  ;;  %v4577_v45 = vmul.f32 %v8369_v23, %v10830_v43  ;;  %v8371_v14 = vpop.eup %8370 }
 0xc24   : > { %7759 = vmatpush3.msra.mxu0 %v10682_v29  ;;  %v4579_v48 = vmul.f32 %v8371_v14, %v10799_v62 }
 0xc25   : > { %7760 = vmatprep.subr.mxu0 %v8942_v1  ;;  %7736 = vmatmul.mubr.msk.f32.gmra.mxu0 %vm1224_vm3, %v4577_v45 }
 0xc26   : > { %7761 = vmatpush3.msra.mxu0 %v10668_v56  ;;  %7738 = vmatprep.mubr.msk.f32.mxu0 %vm8943_vm0, %v8942_v1  ;;  %v8373_v33 = vpop.eup %8372 }
 0xc27   : > { %7786 = vmatprep.subr.mxu0 %v8942_v1  ;;  %v4829_v29 = vmul.f32 %v8373_v33, %v10832_v63 }
 0xc28   : > { %v5335_v51 = vpop.xlane.xlu0 %5334 }
 0xc29   : > { %7739 = vmatmul.mubr.msk.f32.gmra.mxu0 %vm1224_vm3, %v4579_v48 }
 0xc2a   : > { %7762 = vmatprep.mubr.msk.f32.mxu0 %vm8943_vm0, %v8942_v1  ;;  %v8375_v43 = vpop.eup %8374 }
 0xc2b   : > { %v4831_v56 = vmul.f32 %v8375_v43, %v10841_v2  ;;  %v8377_v62 = vpop.eup %8376  ;;  %v5597_v2 = vpop.permute.xlu1 %5596 }
 0xc2c   : > { %v5855_v20 = vpop.permute.xlu0 %5854 }
 0xc2d   : > { %7763 = vmatmul.mubr.msk.f32.vlgmr.msra.gmra.mxu0 %vm1224_vm3, %v4829_v29 }
 0xc2e   : > { %7787 = vmatpush3.msra.mxu0 %v10678_v31  ;;  %7765 = vmatprep.mubr.msk.f32.mxu0 %vm8943_vm0, %v8942_v1  ;;  %v4833_v31 = vmul.f32 %v8377_v62, %v10846_v11 }
 0xc2f   : > { %7788 = vmatprep.subr.mxu0 %v8942_v1 }
 0xc30   : > { %7789 = vmatpush3.msra.mxu0 %v10690_v7 }
 0xc31   : > { %7790 = vmatprep.subr.mxu0 %v8942_v1  ;;  %7766 = vmatmul.mubr.msk.f32.gmra.mxu0 %vm1224_vm3, %v4831_v56 }
 0xc32   : > { %7791 = vmatpush3.msra.mxu0 %v10684_v61  ;;  %7768 = vmatprep.mubr.msk.f32.mxu0 %vm8943_vm0, %v8942_v1 }
 0xc33   : > { %7816 = vmatprep.subr.mxu0 %v8942_v1 }
 0xc35   : > { %7769 = vmatmul.mubr.msk.f32.gmra.mxu0 %vm1224_vm3, %v4833_v31 }
 0xc36   : > { %7792 = vmatprep.mubr.msk.f32.mxu0 %vm8943_vm0, %v8942_v1 }
 0xc3c   : > { %v4169_v63 = vpop.f32.mrf.mxu0 }
 0xc3d   : > { %4183 = vst.msk [vmem:[#allocation2] sm:$0xff] %vm1326_vm4, %v4169_v63 }
 0xc3e   : > { %v7674_v7 = vpop.f32.mrf.mxu0 }
 0xc4d   : > { %v4174_v49 = vpop.f32.mrf.mxu0 }
 0xc4e   : > { %4184 = vst.msk [vmem:[#allocation2 + $0x8] sm:$0xff] %vm1326_vm4, %v4174_v49 }
 0xc4f   : > { %v7677_v61 = vpop.f32.mrf.mxu0 }
 0xc51   : > { %v5075_v4 = vpop.xlane.xlu1 %5074  ;;  %v4179_v59 = vpop.f32.mrf.mxu0 }
 0xc52   : > { %8378 = vrcp.f32 %v5075_v4  ;;  %4185 = vst.msk [vmem:[#allocation2 + $0x10] sm:$0xff] %vm1326_vm4, %v4179_v59  ;;  %vm5198_vm4 = vcmask 326912  }
 0xc53   : > { %v7680_v11 = vpop.f32.mrf.mxu0 }
 0xc55   : > { %v5078_v13 = vpop.xlane.xlu1 %5077 }
 0xc56   : > { %8380 = vrcp.f32 %v5078_v13 }
 0xc57   : > { %8382 = vrcp.f32 %v5081_v46 }
 0xc59   : > { %v5329_v36 = vpop.xlane.xlu1 %5328 }
 0xc5a   : > { %8384 = vrcp.f32 %v5329_v36 }
 0xc5d   : > { %v5332_v8 = vpop.xlane.xlu1 %5331  ;;  %v5589_v10 = vpop.xlane.xlu0 %5588 }
 0xc5e   : > { %8386 = vrcp.f32 %v5332_v8 }
 0xc5f   : > { %v8379_v42 = vpop.eup %8378  ;;  %8388 = vrcp.f32 %v5335_v51 }
 0xc60   : > { %v5083_v17 = vmul.f32 %v8379_v42, %v10880_v55 }
 0xc61   : > { %v5583_v35 = vpop.xlane.xlu1 %5582 }
 0xc62   : > { %7793 = vmatmul.mubr.msk.f32.vlgmr.msra.gmra.mxu0 %vm1224_vm3, %v5083_v17  ;;  %8390 = vrcp.f32 %v5583_v35  ;;  %v5974_v35 = vld [vmem:[#allocation20 + $0x38] sm:$0xff] }
 0xc63   : > { %v8381_v9 = vpop.eup %8380  ;;  %7817 = vmatpush3.msra.mxu0 %v10692_v19  ;;  %7795 = vmatprep.mubr.msk.f32.mxu0 %vm8943_vm0, %v8942_v1 }
 0xc64   : > { %7818 = vmatprep.subr.mxu0 %v8942_v1  ;;  %v5085_v39 = vmul.f32 %v8381_v9, %v10885_v34  ;;  %v8383_v52 = vpop.eup %8382  ;;  %7892 = vmatpush3.msra.mxu1 %v5974_v35 }
 0xc65   : > { %7819 = vmatpush3.msra.mxu0 %v10696_v5  ;;  %v5087_v19 = vmul.f32 %v8383_v52, %v10853_v32  ;;  %v5586_v34 = vpop.xlane.xlu1 %5585  ;;  %7893 = vmatprep.subr.mxu1 %v8942_v1 }
 0xc66   : > { %7820 = vmatprep.subr.mxu0 %v8942_v1  ;;  %7796 = vmatmul.mubr.msk.f32.gmra.mxu0 %vm1224_vm3, %v5085_v39  ;;  %8392 = vrcp.f32 %v5586_v34  ;;  %v5973_v39 = vld [vmem:[#allocation20 + $0x30] sm:$0xff] }
 0xc67   : > { %7821 = vmatpush3.msra.mxu0 %v10700_v60  ;;  %7798 = vmatprep.mubr.msk.f32.mxu0 %vm8943_vm0, %v8942_v1  ;;  %v8385_v55 = vpop.eup %8384  ;;  %8394 = vrcp.f32 %v5589_v10  ;;  %v5969_v10 = vld [vmem:[#allocation20 + $0x10] sm:$0xff] }
 0xc68   : > { %7846 = vmatprep.subr.mxu0 %v8942_v1  ;;  %v5337_v5 = vmul.f32 %v8385_v55, %v10890_v21  ;;  %7894 = vmatpush3.msra.mxu1 %v5973_v39 }
 0xc69   : > { %v5837_v16 = vpop.xlane.xlu1 %5836  ;;  %7895 = vmatprep.subr.mxu1 %v8942_v1 }
 0xc6a   : > { %7799 = vmatmul.mubr.msk.f32.gmra.mxu0 %vm1224_vm3, %v5087_v19  ;;  %8396 = vrcp.f32 %v5837_v16  ;;  %v5972_v19 = vld [vmem:[#allocation20 + $0x28] sm:$0xff] }
 0xc6b   : > { %7822 = vmatprep.mubr.msk.f32.mxu0 %vm8943_vm0, %v8942_v1  ;;  %v8387_v60 = vpop.eup %8386  ;;  %7896 = vmatpush3.msra.mxu1 %v5972_v19 }
 0xc6c   : > { %v5339_v32 = vmul.f32 %v8387_v60, %v10892_v40  ;;  %v8389_v57 = vpop.eup %8388  ;;  %v5843_v40 = vpop.xlane.xlu0 %5842  ;;  %7897 = vmatprep.subr.mxu1 %v8942_v1  ;;  %v5970_v60 = vld [vmem:[#allocation20 + $0x18] sm:$0xff] }
 0xc6d   : > { %v5840_v37 = vpop.xlane.xlu1 %5839 }
 0xc6e   : > { %7823 = vmatmul.mubr.msk.f32.vlgmr.msra.gmra.mxu0 %vm1224_vm3, %v5337_v5  ;;  %8398 = vrcp.f32 %v5840_v37 }
 0xc6f   : > { %7847 = vmatpush3.msra.mxu0 %v10870_v26  ;;  %7825 = vmatprep.mubr.msk.f32.mxu0 %vm8943_vm0, %v8942_v1  ;;  %v5341_v26 = vmul.f32 %v8389_v57, %v10859_v44  ;;  %v8391_v21 = vpop.eup %8390  ;;  %8400 = vrcp.f32 %v5843_v40  ;;  %v5968_v57 = vld [vmem:[#allocation20 + $0x8] sm:$0xff] }
 0xc70   : > { %7848 = vmatprep.subr.mxu0 %v8942_v1  ;;  %v5851_v28 = vpop.permute.xlu0 %5850 }
 0xc71   : > { %7849 = vmatpush3.msra.mxu0 %v10877_v18  ;;  %v5591_v18 = vmul.f32 %v8391_v21, %v10898_v47  ;;  %v5853_v44 = vpop.permute.xlu1 %5852 }
 0xc72   : > { %7850 = vmatprep.subr.mxu0 %v8942_v1  ;;  %7826 = vmatmul.mubr.msk.f32.gmra.mxu0 %vm1224_vm3, %v5339_v32 }
 0xc73   : > { %7851 = vmatpush3.msra.mxu0 %v5597_v2  ;;  %7828 = vmatprep.mubr.msk.f32.mxu0 %vm8943_vm0, %v8942_v1  ;;  %v8393_v30 = vpop.eup %8392 }
 0xc74   : > { %7876 = vmatprep.subr.mxu0 %v8942_v1  ;;  %v5593_v38 = vmul.f32 %v8393_v30, %v10910_v6  ;;  %v8395_v25 = vpop.eup %8394 }
 0xc75   : > { %v5595_v47 = vmul.f32 %v8395_v25, %v10896_v53 }
 0xc76   : > { %7829 = vmatmul.mubr.msk.f32.gmra.mxu0 %vm1224_vm3, %v5341_v26  ;;  %v5967_v26 = vld [vmem:[#allocation20] sm:$0xff] }
 0xc77   : > { %7852 = vmatprep.mubr.msk.f32.mxu0 %vm8943_vm0, %v8942_v1  ;;  %v8397_v50 = vpop.eup %8396 }
 0xc78   : > { %v5845_v6 = vmul.f32 %v8397_v50, %v10914_v15 }
 0xc7a   : > { %7853 = vmatmul.mubr.msk.f32.vlgmr.msra.gmra.mxu0 %vm1224_vm3, %v5591_v18 }
 0xc7b   : > { %7877 = vmatpush3.msra.mxu0 %v5855_v20  ;;  %7855 = vmatprep.mubr.msk.f32.mxu0 %vm8943_vm0, %v8942_v1  ;;  %v8399_v3 = vpop.eup %8398  ;;  %v5971_v20 = vld [vmem:[#allocation20 + $0x20] sm:$0xff] }
 0xc7c   : > { %7878 = vmatprep.subr.mxu0 %v8942_v1  ;;  %v5847_v12 = vmul.f32 %v8399_v3, %v10918_v58  ;;  %v8401_v24 = vpop.eup %8400  ;;  %7898 = vmatpush3.msra.mxu1 %v5971_v20 }
 0xc7d   : > { %7879 = vmatpush3.msra.mxu0 %v5853_v44  ;;  %v5849_v53 = vmul.f32 %v8401_v24, %v10904_v22  ;;  %7899 = vmatprep.subr.mxu1 %v8942_v1 }
 0xc7e   : > { %7880 = vmatprep.subr.mxu0 %v8942_v1  ;;  %7856 = vmatmul.mubr.msk.f32.gmra.mxu0 %vm1224_vm3, %v5593_v38 }
 0xc7f   : > { %7881 = vmatpush3.msra.mxu0 %v5851_v28  ;;  %7858 = vmatprep.mubr.msk.f32.mxu0 %vm8943_vm0, %v8942_v1 }
 0xc80   : > { %7916 = vmatprep.subr.mxu0 %v8942_v1  ;;  %7900 = vmatpush3.msra.mxu1 %v5970_v60  ;;  %v6140_v60 = vld [vmem:[#allocation23 + $0x20] sm:$0xff] }
 0xc81   : > { %7901 = vmatprep.subr.mxu1 %v8942_v1 }
 0xc82   : > { %7859 = vmatmul.mubr.msk.f32.gmra.mxu0 %vm1224_vm3, %v5595_v47  ;;  %7902 = vmatpush3.msra.mxu1 %v5969_v10  ;;  %v6139_v10 = vld [vmem:[#allocation23 + $0x18] sm:$0xff] }
 0xc83   : > { %7882 = vmatprep.mubr.msk.f32.mxu0 %vm8943_vm0, %v8942_v1  ;;  %7903 = vmatprep.subr.mxu1 %v8942_v1 }
 0xc84   : > { %7904 = vmatpush3.msra.mxu1 %v5968_v57  ;;  %v6136_v57 = vld [vmem:[#allocation23] sm:$0xff] }
 0xc85   : > { %7905 = vmatprep.subr.mxu1 %v8942_v1 }
 0xc86   : > { %7883 = vmatmul.mubr.msk.f32.vlgmr.msra.gmra.mxu0 %vm1224_vm3, %v5845_v6  ;;  %7906 = vmatpush3.msra.mxu1 %v5967_v26 }
 0xc87   : > { %7885 = vmatprep.mubr.msk.f32.mxu0 %vm8943_vm0, %v8942_v1  ;;  %7941 = vmatprep.subr.mxu1 %v8942_v1 }
 0xc8a   : > { %7886 = vmatmul.mubr.msk.f32.gmra.mxu0 %vm1224_vm3, %v5847_v12 }
 0xc8b   : > { %7888 = vmatprep.mubr.msk.f32.mxu0 %vm8943_vm0, %v8942_v1 }
 0xc8e   : > { %7889 = vmatmul.mubr.msk.f32.gmra.mxu0 %vm1224_vm3, %v5849_v53  ;;  %vm4944_vm3 = vcmask 261312  }
 0xc8f   : > { %7932 = vmatprep.mubr.msk.f32.mxu0 %vm8943_vm0, %v8942_v1 }
 0xcaf   : > { %v4410_v15 = vpop.f32.mrf.mxu0 }
 0xcb0   : > { %4427 = vrot.lane.b32.xlu1 %v4410_v15, %s8951_s15 }
 0xcb1   : > { %v7704_v23 = vpop.f32.mrf.mxu0 }
 0xcb3   : > { %v4415_v45 = vpop.f32.mrf.mxu0 }
 0xcb4   : > { %4429 = vrot.lane.b32.xlu1 %v4415_v45, %s8951_s15 }
 0xcb5   : > { %v7707_v58 = vpop.f32.mrf.mxu0 }
 0xcdd   : > { %v4420_v14 = vpop.f32.mrf.mxu0 }
 0xcde   : > { %4431 = vrot.lane.b32.xlu0 %v4420_v14, %s8951_s15  ;;  %s7994_s15 = smul.u32 24, %s11389_s0 }
 0xcdf   : > { %v7710_v48 = vpop.f32.mrf.mxu0 }
 0xce0   : > { %s984_s4 = scalar_lea.vmem %s11383_s12, %s7994_s15 }
 0xce1   : > { %v4664_v33 = vpop.f32.mrf.mxu0 }
 0xce2   : > { %4681 = vrot.lane.b32.xlu0 %v4664_v33, %s8950_s5 }
 0xce3   : > { %v7734_v22 = vpop.f32.mrf.mxu0 }
 0xce5   : > { %v4669_v29 = vpop.f32.mrf.mxu0 }
 0xce6   : > { %4683 = vrot.lane.b32.xlu1 %v4669_v29, %s8950_s5 }
 0xce7   : > { %v7737_v43 = vpop.f32.mrf.mxu0 }
 0xce9   : > { %v4674_v56 = vpop.f32.mrf.mxu0 }
 0xcea   : > { %4685 = vrot.lane.b32.xlu0 %v4674_v56, %s8950_s5 }
 0xceb   : > { %v7740_v62 = vpop.f32.mrf.mxu0 }
 0xced   : > { %v4918_v31 = vpop.f32.mrf.mxu0 }
 0xcee   : > { %4935 = vrot.lane.b32.xlu1 %v4918_v31, %s8949_s11 }
 0xcef   : > { %v7764_v63 = vpop.f32.mrf.mxu0 }
 0xcf1   : > { %v4923_v7 = vpop.f32.mrf.mxu0 }
 0xcf2   : > { %4937 = vrot.lane.b32.xlu1 %v4923_v7, %s8949_s11 }
 0xcf3   : > { %v7767_v2 = vpop.f32.mrf.mxu0 }
 0xcf5   : > { %v4928_v49 = vpop.f32.mrf.mxu0 }
 0xcf6   : > { %4939 = vrot.lane.b32.xlu0 %v4928_v49, %s8949_s11  ;;  %v7021_v49 = vld [vmem:[#allocation21] ss:$0 sm:$0xff]  ;;  %s11381_s11 = sld [smem:[#allocation55_spill]] }
 0xcf7   : > { %v7770_v61 = vpop.f32.mrf.mxu0 }
 0xd22   : > { %v4428_v4 = vpop.permute.xlu1 %4427  ;;  %v5172_v59 = vpop.f32.mrf.mxu0 }
 0xd23   : > { %4437 = vst.msk [vmem:[#allocation2] sm:$0xff] %vm4436_vm15, %v4428_v4  ;;  %5189 = vrot.lane.b32.xlu0 %v5172_v59, %s8948_s2 }
 0xd24   : > { %v7794_v11 = vpop.f32.mrf.mxu0 }
 0xd26   : > { %v4430_v46 = vpop.permute.xlu1 %4429  ;;  %v5177_v13 = vpop.f32.mrf.mxu0 }
 0xd27   : > { %4438 = vst.msk [vmem:[#allocation2 + $0x8] sm:$0xff] %vm4436_vm15, %v4430_v46  ;;  %5191 = vrot.lane.b32.xlu1 %v5177_v13, %s8948_s2 }
 0xd28   : > { %v7797_v36 = vpop.f32.mrf.mxu0 }
 0xd2a   : > { %v5182_v8 = vpop.f32.mrf.mxu0 }
 0xd2c   : > { %v7800_v42 = vpop.f32.mrf.mxu0 }
 0xd2e   : > { %v5426_v17 = vpop.f32.mrf.mxu0 }
 0xd2f   : > { %5443 = vrot.lane.b32.xlu0 %v5426_v17, %s8947_s13 }
 0xd30   : > { %v7824_v51 = vpop.f32.mrf.mxu0 }
 0xd32   : > { %v5431_v9 = vpop.f32.mrf.mxu0 }
 0xd33   : > { %5445 = vrot.lane.b32.xlu1 %v5431_v9, %s8947_s13 }
 0xd34   : > { %v7827_v52 = vpop.f32.mrf.mxu0 }
 0xd36   : > { %v5436_v55 = vpop.f32.mrf.mxu0 }
 0xd38   : > { %v7830_v34 = vpop.f32.mrf.mxu0 }
 0xd39   : > { %v6143_v34 = vld [vmem:[#allocation23 + $0x38] sm:$0xff] }
 0xd3a   : > { %v5680_v5 = vpop.f32.mrf.mxu0  ;;  %7917 = vmatpush3.msra.mxu0 %v6143_v34 }
 0xd3b   : > { %5697 = vrot.lane.b32.xlu0 %v5680_v5, %s8946_s29  ;;  %7918 = vmatprep.subr.mxu0 %v8942_v1  ;;  %v6141_v5 = vld [vmem:[#allocation23 + $0x28] sm:$0xff] }
 0xd3c   : > { %v7854_v16 = vpop.f32.mrf.mxu0 }
 0xd3d   : > { %v6138_v16 = vld [vmem:[#allocation23 + $0x10] sm:$0xff] }
 0xd3e   : > { %v5685_v32 = vpop.f32.mrf.mxu0 }
 0xd3f   : > { %5699 = vrot.lane.b32.xlu1 %v5685_v32, %s8946_s29  ;;  %v6137_v32 = vld [vmem:[#allocation23 + $0x8] sm:$0xff] }
 0xd40   : > { %v7857_v21 = vpop.f32.mrf.mxu0 }
 0xd42   : > { %v5690_v37 = vpop.f32.mrf.mxu0 }
 0xd43   : > { %5447 = vrot.lane.b32.xlu1 %v5436_v55, %s8947_s13 }
 0xd44   : > { %v7860_v18 = vpop.f32.mrf.mxu0 }
 0xd46   : > { %v5934_v40 = vpop.f32.mrf.mxu0 }
 0xd47   : > { %5951 = vrot.lane.b32.xlu0 %v5934_v40, %s8945_s1 }
 0xd48   : > { %v7884_v30 = vpop.f32.mrf.mxu0 }
 0xd4a   : > { %v5939_v44 = vpop.f32.mrf.mxu0 }
 0xd4b   : > { %5193 = vrot.lane.b32.xlu0 %v5182_v8, %s8948_s2  ;;  %5953 = vrot.lane.b32.xlu1 %v5939_v44, %s8945_s1 }
 0xd4c   : > { %v7887_v38 = vpop.f32.mrf.mxu0 }
 0xd4e   : > { %v5944_v25 = vpop.f32.mrf.mxu0 }
 0xd4f   : > { %5701 = vrot.lane.b32.xlu0 %v5690_v37, %s8946_s29  ;;  %5955 = vrot.lane.b32.xlu1 %v5944_v25, %s8945_s1 }
 0xd50   : > { %v4432_v28 = vpop.permute.xlu0 %4431  ;;  %v7890_v47 = vpop.f32.mrf.mxu0 }
 0xd51   : > { %4439 = vst.msk [vmem:[#allocation2 + $0x10] sm:$0xff] %vm4436_vm15, %v4432_v28 }
 0xd54   : > { %v4682_v50 = vpop.permute.xlu0 %4681 }
 0xd55   : > { %4691 = vst.msk [vmem:[#allocation2] sm:$0xff] %vm4690_vm1, %v4682_v50 }
 0xd58   : > { %v4684_v6 = vpop.permute.xlu1 %4683 }
 0xd59   : > { %4692 = vst.msk [vmem:[#allocation2 + $0x8] sm:$0xff] %vm4690_vm1, %v4684_v6 }
 0xd5c   : > { %v4686_v3 = vpop.permute.xlu0 %4685 }
 0xd5d   : > { %4693 = vst.msk [vmem:[#allocation2 + $0x10] sm:$0xff] %vm4690_vm1, %v4686_v3 }
 0xd60   : > { %v4936_v12 = vpop.permute.xlu1 %4935 }
 0xd61   : > { %4945 = vst.msk [vmem:[#allocation2] sm:$0xff] %vm4944_vm3, %v4936_v12 }
 0xd64   : > { %v4938_v24 = vpop.permute.xlu1 %4937 }
 0xd65   : > { %4946 = vst.msk [vmem:[#allocation2 + $0x8] sm:$0xff] %vm4944_vm3, %v4938_v24 }
 0xd68   : > { %v4940_v53 = vpop.permute.xlu0 %4939 }
 0xd69   : > { %4947 = vst.msk [vmem:[#allocation2 + $0x10] sm:$0xff] %vm4944_vm3, %v4940_v53 }
 0xd95   : > { %v5190_v15 = vpop.permute.xlu0 %5189 }
 0xd96   : > { %5199 = vst.msk [vmem:[#allocation2] sm:$0xff] %vm5198_vm4, %v5190_v15 }
 0xd99   : > { %v5192_v23 = vpop.permute.xlu1 %5191 }
 0xd9a   : > { %5200 = vst.msk [vmem:[#allocation2 + $0x8] sm:$0xff] %vm5198_vm4, %v5192_v23 }
 0xda1   : > { %v5444_v45 = vpop.permute.xlu0 %5443 }
 0xda2   : > { %5453 = vst.msk [vmem:[#allocation2] sm:$0xff] %vm5452_vm5, %v5444_v45 }
 0xda5   : > { %v5446_v58 = vpop.permute.xlu1 %5445 }
 0xda6   : > { %5454 = vst.msk [vmem:[#allocation2 + $0x8] sm:$0xff] %vm5452_vm5, %v5446_v58  ;;  %v6124_v58 = vsub.s32 2, %v9436_v27 }
 0xdad   : > { %v5698_v14 = vpop.permute.xlu0 %5697 }
 0xdae   : > { %5707 = vst.msk [vmem:[#allocation2] sm:$0xff] %vm5706_vm6, %v5698_v14 }
 0xdb1   : > { %v5700_v48 = vpop.permute.xlu1 %5699 }
 0xdb2   : > { %5708 = vst.msk [vmem:[#allocation2 + $0x8] sm:$0xff] %vm5706_vm6, %v5700_v48  ;;  %v6131_v48 = vsub.s32 3, %v9436_v27 }
 0xdb5   : > { %v5448_v33 = vpop.permute.xlu1 %5447 }
 0xdb9   : > { %v5952_v22 = vpop.permute.xlu0 %5951 }
 0xdba   : > { %5961 = vst.msk [vmem:[#allocation2] sm:$0xff] %vm5960_vm7, %v5952_v22  ;;  %v11133_v22 = vld [vmem:[%s11376_s20] sm:$0xff] }
 0xdbd   : > { %v5194_v29 = vpop.permute.xlu0 %5193  ;;  %v5954_v43 = vpop.permute.xlu1 %5953 }
 0xdbe   : > { %5201 = vst.msk [vmem:[#allocation2 + $0x10] sm:$0xff] %vm5198_vm4, %v5194_v29  ;;  %v6125_v29 = vrot.slane %v11133_v22, %v6124_v58 }
 0xdbf   : > { %5962 = vst.msk [vmem:[#allocation2 + $0x8] sm:$0xff] %vm5960_vm7, %v5954_v43 }
 0xdc0   : > { %5455 = vst.msk [vmem:[#allocation2 + $0x10] sm:$0xff] %vm5452_vm5, %v5448_v33 }
 0xdc1   : > { %v5702_v56 = vpop.permute.xlu0 %5701  ;;  %v5956_v62 = vpop.permute.xlu1 %5955  ;;  %v5964_v31 = vld [vmem:[#allocation2] sm:$0xff] }
 0xdc2   : > { %5709 = vst.msk [vmem:[#allocation2 + $0x10] sm:$0xff] %vm5706_vm6, %v5702_v56  ;;  %7908 = vmatmul.mubr.msk.f32.vlgmr.msra.gmra.mxu1 %vm1128_vm2, %v5964_v31  ;;  %v6132_v56 = vrot.slane %v11133_v22, %v6131_v48 }
 0xdc3   : > { %5963 = vst.msk [vmem:[#allocation2 + $0x10] sm:$0xff] %vm5960_vm7, %v5956_v62  ;;  %7910 = vmatprep.mubr.msk.f32.mxu1 %vm8943_vm0, %v8942_v1 }
 0xdc6   : > { %v5965_v63 = vld [vmem:[#allocation2 + $0x8] sm:$0xff] }
 0xdc7   : > { %7911 = vmatmul.mubr.msk.f32.gmra.mxu1 %vm1128_vm2, %v5965_v63 }
 0xdc8   : > { %7913 = vmatprep.mubr.msk.f32.mxu1 %vm8943_vm0, %v8942_v1 }
 0xdca   : > { %v5966_v7 = vld [vmem:[#allocation2 + $0x10] sm:$0xff] }
 0xdcb   : > { %7914 = vmatmul.mubr.msk.f32.gmra.mxu1 %vm1128_vm2, %v5966_v7 }
 0xdcc   : > { %7957 = vmatprep.mubr.msk.f32.mxu1 %vm8943_vm0, %v8942_v1 }
 0xe82   : > { %v6050_v2 = vpop.f32.mrf.mxu1 }
 0xe83   : > { %v6064_v61 = vadd.f32 %v6050_v2, %v10376_v0 }
 0xe84   : > { %v7909_v4 = vpop.f32.mrf.mxu1 }
 0xe85   : > { %v11096_v59 = vadd.f32 %v7021_v49, %v6064_v61 }
 0xe87   : > { %v6055_v11 = vpop.f32.mrf.mxu1  ;;  %v6077_v13 = vsel %vm1128_vm2, %v11096_v59, 0.0  ;;  %v6089_v36 = vmul.f32 %v11096_v59, %v11096_v59 }
 0xe88   : > { %v6065_v46 = vadd.f32 %v6055_v11, %v10397_v54  ;;  %6078 = vadd.xlane.f32.xlu0 %v6077_v13 }
 0xe89   : > { %v7912_v8 = vpop.f32.mrf.mxu1  ;;  %v6092_v17 = vsel %vm1128_vm2, %v6089_v36, 0.0 }
 0xe8a   : > { %v11103_v42 = vadd.f32 %v7021_v49, %v6065_v46  ;;  %6093 = vadd.xlane.f32.xlu1 %v6092_v17  ;;  %v6274_v8 = vld [vmem:[#allocation26 + $0x38] sm:$0xff]  ;;  %v6272_v17 = vld [vmem:[#allocation26 + $0x28] sm:$0xff] }
 0xe8b   : > { %v6060_v0 = vpop.f32.mrf.mxu1  ;;  %7942 = vmatpush3.msra.mxu1 %v6274_v8 }
 0xe8c   : > { %v6080_v51 = vsel %vm1128_vm2, %v11103_v42, 0.0  ;;  %v6090_v54 = vmul.f32 %v11103_v42, %v11103_v42  ;;  %v6066_v9 = vadd.f32 %v6060_v0, %v10410_v41  ;;  %v6142_v41 = vld [vmem:[#allocation23 + $0x30] sm:$0xff]  ;;  %7943 = vmatprep.subr.mxu1 %v8942_v1  ;;  %v6271_v0 = vld [vmem:[#allocation26 + $0x20] sm:$0xff] }
 0xe8d   : > { %6081 = vadd.xlane.f32.xlu0 %v6080_v51  ;;  %v7915_v35 = vpop.f32.mrf.mxu1  ;;  %7919 = vmatpush3.msra.mxu0 %v6142_v41  ;;  %v6270_v51 = vld [vmem:[#allocation26 + $0x18] sm:$0xff] }
 0xe8e   : > { %v11111_v39 = vadd.f32 %v7021_v49, %v6066_v9  ;;  %v6095_v52 = vsel %vm1128_vm2, %v6090_v54, 0.0  ;;  %7920 = vmatprep.subr.mxu0 %v8942_v1  ;;  %v6269_v54 = vld [vmem:[#allocation26 + $0x10] sm:$0xff]  ;;  %v6268_v9 = vld [vmem:[#allocation26 + $0x8] sm:$0xff]  ;;  %v6267_v35 = vld [vmem:[#allocation26] sm:$0xff] }
 0xe8f   : > { %7921 = vmatpush3.msra.mxu0 %v6141_v5 }
 0xe90   : > { %v6083_v19 = vsel %vm1128_vm2, %v11111_v39, 0.0  ;;  %v6091_v55 = vmul.f32 %v11111_v39, %v11111_v39  ;;  %7922 = vmatprep.subr.mxu0 %v8942_v1 }
 0xe91   : > { %6096 = vadd.xlane.f32.xlu0 %v6095_v52  ;;  %6084 = vadd.xlane.f32.xlu1 %v6083_v19 }
 0xe92   : > { %v6098_v20 = vsel %vm1128_vm2, %v6091_v55, 0.0  ;;  %7923 = vmatpush3.msra.mxu0 %v6140_v60 }
 0xe93   : > { %7924 = vmatprep.subr.mxu0 %v8942_v1 }
 0xe94   : > { %7925 = vmatpush3.msra.mxu0 %v6139_v10 }
 0xe95   : > { %6099 = vadd.xlane.f32.xlu0 %v6098_v20  ;;  %7926 = vmatprep.subr.mxu0 %v8942_v1 }
 0xe96   : > { %7927 = vmatpush3.msra.mxu0 %v6138_v16 }
 0xe97   : > { %7928 = vmatprep.subr.mxu0 %v8942_v1 }
 0xe98   : > { %7929 = vmatpush3.msra.mxu0 %v6137_v32 }
 0xe99   : > { %7930 = vmatprep.subr.mxu0 %v8942_v1 }
 0xe9a   : > { %7931 = vmatpush3.msra.mxu0 %v6136_v57 }
 0xe9b   : > { %7966 = vmatprep.subr.mxu0 %v8942_v1 }
 0xf11   : > { %v6079_v26 = vpop.xlane.xlu0 %6078 }
 0xf12   : > { %v6086_v21 = vmul.f32 0.015625, %v6079_v26 }
 0xf13   : > { %v6094_v37 = vpop.xlane.xlu1 %6093 }
 0xf14   : > { %v6104_v18 = vmul.f32 %v6086_v21, %v6086_v21  ;;  %v6101_v40 = vmul.f32 0.015625, %v6094_v37  ;;  %v6110_v33 = vsub.f32 %v11096_v59, %v6086_v21 }
 0xf16   : > { %v6082_v30 = vpop.xlane.xlu0 %6081  ;;  %v6107_v44 = vsub.f32 %v6101_v40, %v6104_v18 }
 0xf17   : > { %v6087_v38 = vmul.f32 0.015625, %v6082_v30 }
 0xf18   : > { %v6113_v25 = vadd.f32 1e-05, %v6107_v44 }
 0xf19   : > { %v6105_v47 = vmul.f32 %v6087_v38, %v6087_v38  ;;  %v6111_v7 = vsub.f32 %v11103_v42, %v6087_v38  ;;  %v6273_v42 = vld [vmem:[#allocation26 + $0x30] sm:$0xff] }
 0xf1a   : > { %v6097_v28 = vpop.xlane.xlu0 %6096  ;;  %8402 = vrsqrt.f32 %v6113_v25  ;;  %v6085_v6 = vpop.xlane.xlu1 %6084  ;;  %7944 = vmatpush3.msra.mxu1 %v6273_v42 }
 0xf1b   : > { %v6102_v50 = vmul.f32 0.015625, %v6097_v28  ;;  %v6088_v3 = vmul.f32 0.015625, %v6085_v6  ;;  %7945 = vmatprep.subr.mxu1 %v8942_v1 }
 0xf1c   : > { %7946 = vmatpush3.msra.mxu1 %v6272_v17 }
 0xf1d   : > { %v6108_v12 = vsub.f32 %v6102_v50, %v6105_v47  ;;  %v6106_v24 = vmul.f32 %v6088_v3, %v6088_v3  ;;  %v6112_v61 = vsub.f32 %v11111_v39, %v6088_v3  ;;  %7947 = vmatprep.subr.mxu1 %v8942_v1  ;;  %v7022_v39 = vld [vmem:[#allocation24] ss:$0 sm:$0xff] }
 0xf1e   : > { %v6100_v53 = vpop.xlane.xlu0 %6099  ;;  %7948 = vmatpush3.msra.mxu1 %v6271_v0 }
 0xf1f   : > { %v6114_v15 = vadd.f32 1e-05, %v6108_v12  ;;  %v6103_v23 = vmul.f32 0.015625, %v6100_v53  ;;  %7949 = vmatprep.subr.mxu1 %v8942_v1 }
 0xf20   : > { %7950 = vmatpush3.msra.mxu1 %v6270_v51 }
 0xf21   : > { %8404 = vrsqrt.f32 %v6114_v15  ;;  %v6109_v45 = vsub.f32 %v6103_v23, %v6106_v24  ;;  %7951 = vmatprep.subr.mxu1 %v8942_v1 }
 0xf22   : > { %7952 = vmatpush3.msra.mxu1 %v6269_v54 }
 0xf23   : > { %v6115_v14 = vadd.f32 1e-05, %v6109_v45  ;;  %7953 = vmatprep.subr.mxu1 %v8942_v1 }
 0xf24   : > { %7954 = vmatpush3.msra.mxu1 %v6268_v9 }
 0xf25   : > { %8406 = vrsqrt.f32 %v6115_v14  ;;  %7955 = vmatprep.subr.mxu1 %v8942_v1 }
 0xf26   : > { %7956 = vmatpush3.msra.mxu1 %v6267_v35 }
 0xf27   : > { %v8403_v43 = vpop.eup %8402 }
 0xf28   : > { %v6119_v62 = vmul.f32 %v8403_v43, %v6110_v33 }
 0xf2a   : > { %v6126_v31 = vmul.f32 %v6125_v29, %v6119_v62 }
 0xf2c   : > { %v11137_v63 = vadd.f32 %v6132_v56, %v6126_v31 }
 0xf2e   : > { %v8405_v2 = vpop.eup %8404  ;;  %7933 = vmatmul.mubr.msk.f32.vlgmr.msra.gmra.mxu0 %vm1128_vm2, %v11137_v63 }
 0xf2f   : > { %v6120_v49 = vmul.f32 %v8405_v2, %v6111_v7  ;;  %7935 = vmatprep.mubr.msk.f32.mxu0 %vm8943_vm0, %v8942_v1 }
 0xf31   : > { %v6127_v4 = vmul.f32 %v6125_v29, %v6120_v49 }
 0xf32   : > { %v8407_v59 = vpop.eup %8406 }
 0xf33   : > { %v11145_v11 = vadd.f32 %v6132_v56, %v6127_v4  ;;  %v6121_v46 = vmul.f32 %v8407_v59, %v6112_v61 }
 0xf35   : > { %7936 = vmatmul.mubr.msk.f32.gmra.mxu0 %vm1128_vm2, %v11145_v11  ;;  %v6128_v13 = vmul.f32 %v6125_v29, %v6121_v46  ;;  %v7026_v29 = vld [vmem:[%s11381_s11] ss:$0 sm:$0xff] }
 0xf36   : > { %7938 = vmatprep.mubr.msk.f32.mxu0 %vm8943_vm0, %v8942_v1 }
 0xf37   : > { %v11151_v36 = vadd.f32 %v6132_v56, %v6128_v13 }
 0xf39   : > { %7939 = vmatmul.mubr.msk.f32.gmra.mxu0 %vm1128_vm2, %v11151_v36 }
 0xf3a   : > { %7982 = vmatprep.mubr.msk.f32.mxu0 %vm8943_vm0, %v8942_v1 }
 0xfee   : > { %v6226_v52 = vpop.f32.mrf.mxu0 }
 0xfef   : > { %v6227_v19 = vadd.f32 %v7022_v39, %v6226_v52 }
 0xff0   : > { %v7934_v55 = vpop.f32.mrf.mxu0 }
 0xff1   : > { %v6240_v20 = vmul.f32 %v6227_v19, %v6227_v19 }
 0xff3   : > { %v6243_v34 = vmul.f32 %v6240_v20, %v6227_v19 }
 0xff5   : > { %v6231_v41 = vpop.f32.mrf.mxu0  ;;  %v6246_v5 = vmul.f32 0.044715, %v6243_v34 }
 0xff6   : > { %v6232_v60 = vadd.f32 %v7022_v39, %v6231_v41 }
 0xff7   : > { %v7937_v10 = vpop.f32.mrf.mxu0  ;;  %v6249_v16 = vadd.f32 %v6246_v5, %v6227_v19 }
 0xff8   : > { %v6241_v32 = vmul.f32 %v6232_v60, %v6232_v60 }
 0xff9   : > { %v6236_v57 = vpop.f32.mrf.mxu0  ;;  %v6252_v26 = vmul.f32 0.7978846, %v6249_v16 }
 0xffa   : > { %v6244_v21 = vmul.f32 %v6241_v32, %v6232_v60  ;;  %v6237_v37 = vadd.f32 %v7022_v39, %v6236_v57 }
 0xffb   : > { %v7940_v18 = vpop.f32.mrf.mxu0  ;;  %8408 = vtanh.f32 %v6252_v26 }
 0xffc   : > { %v6247_v40 = vmul.f32 0.044715, %v6244_v21  ;;  %v6242_v30 = vmul.f32 %v6237_v37, %v6237_v37 }
 0xffe   : > { %v6250_v44 = vadd.f32 %v6247_v40, %v6232_v60  ;;  %v6245_v38 = vmul.f32 %v6242_v30, %v6237_v37 }
0x1000   : > { %v6253_v25 = vmul.f32 0.7978846, %v6250_v44  ;;  %v6248_v28 = vmul.f32 0.044715, %v6245_v38  ;;  %v6421_v44 = vsub.s32 4, %v9436_v27  ;;  %v6428_v38 = vsub.s32 5, %v9436_v27 }
0x1002   : > { %8410 = vtanh.f32 %v6253_v25  ;;  %v6251_v47 = vadd.f32 %v6248_v28, %v6237_v37  ;;  %v6422_v28 = vrot.slane %v11133_v22, %v6421_v44 }
0x1004   : > { %v6254_v50 = vmul.f32 0.7978846, %v6251_v47 }
0x1006   : > { %8412 = vtanh.f32 %v6254_v50 }
0x1008   : > { %v8409_v6 = vpop.eup %8408 }
0x1009   : > { %v6258_v3 = vadd.f32 1.0, %v8409_v6  ;;  %v6429_v6 = vrot.slane %v11133_v22, %v6428_v38 }
0x100b   : > { %v6261_v12 = vmul.f32 0.5, %v6258_v3 }
0x100d   : > { %v6264_v24 = vmul.f32 %v6261_v12, %v6227_v19 }
0x100f   : > { %v8411_v53 = vpop.eup %8410  ;;  %7958 = vmatmul.mubr.msk.f32.vlgmr.msra.gmra.mxu1 %vm1128_vm2, %v6264_v24 }
0x1010   : > { %v6259_v15 = vadd.f32 1.0, %v8411_v53  ;;  %7960 = vmatprep.mubr.msk.f32.mxu1 %vm8943_vm0, %v8942_v1 }
0x1012   : > { %v6262_v23 = vmul.f32 0.5, %v6259_v15 }
0x1013   : > { %v8413_v45 = vpop.eup %8412 }
0x1014   : > { %v6265_v58 = vmul.f32 %v6262_v23, %v6232_v60  ;;  %v6260_v14 = vadd.f32 1.0, %v8413_v45 }
0x1016   : > { %v6263_v48 = vmul.f32 0.5, %v6260_v14  ;;  %7961 = vmatmul.mubr.msk.f32.gmra.mxu1 %vm1128_vm2, %v6265_v58 }
0x1017   : > { %7963 = vmatprep.mubr.msk.f32.mxu1 %vm8943_vm0, %v8942_v1 }
0x1018   : > { %v6266_v33 = vmul.f32 %v6263_v48, %v6237_v37 }
0x101a   : > { %7964 = vmatmul.mubr.msk.f32.gmra.mxu1 %vm1128_vm2, %v6266_v33 }
0x10cf   : > { %v6357_v43 = vpop.f32.mrf.mxu1 }
0x10d0   : > { %v6358_v56 = vadd.f32 %v7026_v29, %v6357_v43 }
0x10d1   : > { %v7959_v62 = vpop.f32.mrf.mxu1 }
0x10d2   : > { %v6371_v31 = vadd.f32 %v6358_v56, %v11137_v63 }
0x10d4   : > { %v6374_v7 = vsel %vm1128_vm2, %v6371_v31, 0.0  ;;  %v6386_v2 = vmul.f32 %v6371_v31, %v6371_v31 }
0x10d5   : > { %6375 = vadd.xlane.f32.xlu1 %v6374_v7 }
0x10d6   : > { %v6362_v49 = vpop.f32.mrf.mxu1  ;;  %v6389_v4 = vsel %vm1128_vm2, %v6386_v2, 0.0 }
0x10d7   : > { %v6363_v61 = vadd.f32 %v7026_v29, %v6362_v49  ;;  %6390 = vadd.xlane.f32.xlu0 %v6389_v4 }
0x10d8   : > { %v7962_v59 = vpop.f32.mrf.mxu1 }
0x10d9   : > { %v6372_v46 = vadd.f32 %v6363_v61, %v11145_v11  ;;  %v6499_v59 = vld [vmem:[%s11382_s7 + $0x38] sm:$0xff] }
0x10da   : > { %v6367_v13 = vpop.f32.mrf.mxu1  ;;  %7967 = vmatpush3.msra.mxu0 %v6499_v59 }
0x10db   : > { %v6368_v8 = vadd.f32 %v7026_v29, %v6367_v13  ;;  %v6377_v42 = vsel %vm1128_vm2, %v6372_v46, 0.0  ;;  %v6387_v17 = vmul.f32 %v6372_v46, %v6372_v46  ;;  %7968 = vmatprep.subr.mxu0 %v8942_v1  ;;  %v6497_v13 = vld [vmem:[%s11382_s7 + $0x28] sm:$0xff] }
0x10dc   : > { %6378 = vadd.xlane.f32.xlu1 %v6377_v42  ;;  %v7965_v0 = vpop.f32.mrf.mxu1  ;;  %v6495_v42 = vld [vmem:[%s11382_s7 + $0x18] sm:$0xff] }
0x10dd   : > { %v6373_v63 = vadd.f32 %v6368_v8, %v11151_v36  ;;  %v6392_v51 = vsel %vm1128_vm2, %v6387_v17, 0.0  ;;  %v6496_v8 = vld [vmem:[%s11382_s7 + $0x20] sm:$0xff]  ;;  %v6494_v17 = vld [vmem:[%s11382_s7 + $0x10] sm:$0xff]  ;;  %v6493_v0 = vld [vmem:[%s11382_s7 + $0x8] sm:$0xff] }
0x10de   : > { %6393 = vadd.xlane.f32.xlu0 %v6392_v51 }
0x10df   : > { %v6380_v54 = vsel %vm1128_vm2, %v6373_v63, 0.0  ;;  %v6388_v9 = vmul.f32 %v6373_v63, %v6373_v63 }
0x10e0   : > { %6381 = vadd.xlane.f32.xlu1 %v6380_v54 }
0x10e1   : > { %v6395_v35 = vsel %vm1128_vm2, %v6388_v9, 0.0 }
0x10e2   : > { %6396 = vadd.xlane.f32.xlu0 %v6395_v35 }
0x115e   : > { %v6376_v11 = vpop.xlane.xlu1 %6375 }
0x115f   : > { %v6383_v39 = vmul.f32 0.015625, %v6376_v11 }
0x1160   : > { %v6391_v52 = vpop.xlane.xlu0 %6390 }
0x1161   : > { %v6401_v19 = vmul.f32 %v6383_v39, %v6383_v39  ;;  %v6398_v55 = vmul.f32 0.015625, %v6391_v52  ;;  %v6407_v25 = vsub.f32 %v6371_v31, %v6383_v39 }
0x1163   : > { %v6404_v20 = vsub.f32 %v6398_v55, %v6401_v19 }
0x1165   : > { %v6379_v34 = vpop.xlane.xlu1 %6378  ;;  %v6410_v41 = vadd.f32 1e-05, %v6404_v20 }
0x1166   : > { %v6384_v5 = vmul.f32 0.015625, %v6379_v34 }
0x1167   : > { %v6394_v36 = vpop.xlane.xlu0 %6393  ;;  %8414 = vrsqrt.f32 %v6410_v41 }
0x1168   : > { %v6402_v60 = vmul.f32 %v6384_v5, %v6384_v5  ;;  %v6399_v10 = vmul.f32 0.015625, %v6394_v36  ;;  %v6408_v12 = vsub.f32 %v6372_v46, %v6384_v5  ;;  %v6498_v46 = vld [vmem:[%s11382_s7 + $0x30] sm:$0xff] }
0x1169   : > { %v6382_v16 = vpop.xlane.xlu1 %6381  ;;  %7969 = vmatpush3.msra.mxu0 %v6498_v46 }
0x116a   : > { %v6405_v32 = vsub.f32 %v6399_v10, %v6402_v60  ;;  %v6385_v57 = vmul.f32 0.015625, %v6382_v16  ;;  %7970 = vmatprep.subr.mxu0 %v8942_v1 }
0x116b   : > { %v6397_v26 = vpop.xlane.xlu0 %6396  ;;  %7971 = vmatpush3.msra.mxu0 %v6497_v13 }
0x116c   : > { %v6411_v21 = vadd.f32 1e-05, %v6405_v32  ;;  %v6403_v37 = vmul.f32 %v6385_v57, %v6385_v57  ;;  %v6400_v18 = vmul.f32 0.015625, %v6397_v26  ;;  %v6409_v58 = vsub.f32 %v6373_v63, %v6385_v57  ;;  %7972 = vmatprep.subr.mxu0 %v8942_v1  ;;  %v6492_v63 = vld [vmem:[%s11382_s7] sm:$0xff] }
0x116d   : > { %7973 = vmatpush3.msra.mxu0 %v6496_v8 }
0x116e   : > { %8416 = vrsqrt.f32 %v6411_v21  ;;  %v6406_v40 = vsub.f32 %v6400_v18, %v6403_v37  ;;  %7974 = vmatprep.subr.mxu0 %v8942_v1  ;;  %v6480_v21 = vsub.s32 6, %v9436_v27  ;;  %v6487_v18 = vsub.s32 7, %v9436_v27 }
0x116f   : > { %7975 = vmatpush3.msra.mxu0 %v6495_v42 }
0x1170   : > { %v6412_v30 = vadd.f32 1e-05, %v6406_v40  ;;  %7976 = vmatprep.subr.mxu0 %v8942_v1  ;;  %v6488_v38 = vrot.slane %v11133_v22, %v6487_v18 }
0x1171   : > { %7977 = vmatpush3.msra.mxu0 %v6494_v17 }
0x1172   : > { %8418 = vrsqrt.f32 %v6412_v30  ;;  %7978 = vmatprep.subr.mxu0 %v8942_v1  ;;  %v6481_v30 = vrot.slane %v11133_v22, %v6480_v21 }
0x1173   : > { %7979 = vmatpush3.msra.mxu0 %v6493_v0 }
0x1174   : > { %v8415_v47 = vpop.eup %8414  ;;  %7980 = vmatprep.subr.mxu0 %v8942_v1 }
0x1175   : > { %v6416_v50 = vmul.f32 %v8415_v47, %v6407_v25  ;;  %7981 = vmatpush3.msra.mxu0 %v6492_v63 }
0x1177   : > { %v6423_v3 = vmul.f32 %v6422_v28, %v6416_v50 }
0x1179   : > { %v11187_v24 = vadd.f32 %v6429_v6, %v6423_v3 }
0x117b   : > { %v8417_v53 = vpop.eup %8416  ;;  %v6433_v15 = vsel %vm1128_vm2, %v11187_v24, 0.0  ;;  %v6445_v23 = vmul.f32 %v11187_v24, %v11187_v24 }
0x117c   : > { %v6417_v45 = vmul.f32 %v8417_v53, %v6408_v12  ;;  %6434 = vadd.xlane.f32.xlu1 %v6433_v15 }
0x117d   : > { %v6448_v14 = vsel %vm1128_vm2, %v6445_v23, 0.0 }
0x117e   : > { %v6424_v48 = vmul.f32 %v6422_v28, %v6417_v45  ;;  %6449 = vadd.xlane.f32.xlu0 %v6448_v14  ;;  %v7030_v45 = vld [vmem:[#allocation3] ss:$0 sm:$0xff] }
0x117f   : > { %v8419_v33 = vpop.eup %8418 }
0x1180   : > { %v11194_v29 = vadd.f32 %v6429_v6, %v6424_v48  ;;  %v6418_v43 = vmul.f32 %v8419_v33, %v6409_v58 }
0x1182   : > { %v6436_v56 = vsel %vm1128_vm2, %v11194_v29, 0.0  ;;  %v6446_v62 = vmul.f32 %v11194_v29, %v11194_v29  ;;  %v6425_v31 = vmul.f32 %v6422_v28, %v6418_v43 }
0x1183   : > { %6437 = vadd.xlane.f32.xlu1 %v6436_v56 }
0x1184   : > { %v6451_v7 = vsel %vm1128_vm2, %v6446_v62, 0.0  ;;  %v11201_v2 = vadd.f32 %v6429_v6, %v6425_v31 }
0x1185   : > { %6452 = vadd.xlane.f32.xlu0 %v6451_v7 }
0x1186   : > { %v6439_v49 = vsel %vm1128_vm2, %v11201_v2, 0.0  ;;  %v6447_v61 = vmul.f32 %v11201_v2, %v11201_v2 }
0x1187   : > { %6440 = vadd.xlane.f32.xlu1 %v6439_v49 }
0x1188   : > { %v6454_v4 = vsel %vm1128_vm2, %v6447_v61, 0.0 }
0x1189   : > { %6455 = vadd.xlane.f32.xlu0 %v6454_v4 }
0x1205   : > { %v6435_v51 = vpop.xlane.xlu1 %6434 }
0x1206   : > { %v6442_v54 = vmul.f32 0.015625, %v6435_v51 }
0x1207   : > { %v6450_v9 = vpop.xlane.xlu0 %6449 }
0x1208   : > { %v6460_v35 = vmul.f32 %v6442_v54, %v6442_v54  ;;  %v6457_v11 = vmul.f32 0.015625, %v6450_v9  ;;  %v6466_v40 = vsub.f32 %v11187_v24, %v6442_v54 }
0x120a   : > { %v6463_v39 = vsub.f32 %v6457_v11, %v6460_v35 }
0x120c   : > { %v6438_v52 = vpop.xlane.xlu1 %6437  ;;  %v6469_v19 = vadd.f32 1e-05, %v6463_v39 }
0x120d   : > { %v6443_v55 = vmul.f32 0.015625, %v6438_v52 }
0x120e   : > { %v6453_v20 = vpop.xlane.xlu0 %6452  ;;  %8420 = vrsqrt.f32 %v6469_v19 }
0x120f   : > { %v6461_v34 = vmul.f32 %v6443_v55, %v6443_v55  ;;  %v6458_v41 = vmul.f32 0.015625, %v6453_v20  ;;  %v6467_v50 = vsub.f32 %v11194_v29, %v6443_v55 }
0x1210   : > { %v6441_v5 = vpop.xlane.xlu1 %6440 }
0x1211   : > { %v6464_v36 = vsub.f32 %v6458_v41, %v6461_v34  ;;  %v6444_v60 = vmul.f32 0.015625, %v6441_v5 }
0x1212   : > { %v6456_v10 = vpop.xlane.xlu0 %6455 }
0x1213   : > { %v6470_v16 = vadd.f32 1e-05, %v6464_v36  ;;  %v6462_v32 = vmul.f32 %v6444_v60, %v6444_v60  ;;  %v6459_v57 = vmul.f32 0.015625, %v6456_v10  ;;  %v6468_v27 = vsub.f32 %v11201_v2, %v6444_v60 }
0x1215   : > { %8422 = vrsqrt.f32 %v6470_v16  ;;  %v6465_v26 = vsub.f32 %v6459_v57, %v6462_v32 }
0x1217   : > { %v6471_v37 = vadd.f32 1e-05, %v6465_v26 }
0x1219   : > { %8424 = vrsqrt.f32 %v6471_v37 }
0x121b   : > { %v8421_v44 = vpop.eup %8420 }
0x121c   : > { %v6475_v25 = vmul.f32 %v8421_v44, %v6466_v40 }
0x121e   : > { %v6482_v28 = vmul.f32 %v6481_v30, %v6475_v25 }
0x1220   : > { %v6489_v47 = vadd.f32 %v6488_v38, %v6482_v28 }
0x1222   : > { %v8423_v6 = vpop.eup %8422  ;;  %7983 = vmatmul.mubr.msk.f32.vlgmr.msra.gmra.mxu0 %vm1128_vm2, %v6489_v47 }
0x1223   : > { %v6476_v3 = vmul.f32 %v8423_v6, %v6467_v50  ;;  %7985 = vmatprep.mubr.msk.f32.mxu0 %vm8943_vm0, %v8942_v1 }
0x1225   : > { %v6483_v12 = vmul.f32 %v6481_v30, %v6476_v3 }
0x1226   : > { %v8425_v24 = vpop.eup %8424 }
0x1227   : > { %v6490_v53 = vadd.f32 %v6488_v38, %v6483_v12  ;;  %v6477_v22 = vmul.f32 %v8425_v24, %v6468_v27 }
0x1229   : > { %7986 = vmatmul.mubr.msk.f32.gmra.mxu0 %vm1128_vm2, %v6490_v53  ;;  %v6484_v15 = vmul.f32 %v6481_v30, %v6477_v22 }
0x122a   : > { %7988 = vmatprep.mubr.msk.f32.mxu0 %vm8943_vm0, %v8942_v1 }
0x122b   : > { %v6491_v23 = vadd.f32 %v6488_v38, %v6484_v15 }
0x122d   : > { %7989 = vmatmul.mubr.msk.f32.gmra.mxu0 %vm1128_vm2, %v6491_v23 }
0x12e2   : > { %v6582_v58 = vpop.f32.mrf.mxu0 }
0x12e3   : > { %v6583_v14 = vadd.f32 %v7030_v45, %v6582_v58 }
0x12e4   : > { %v7984_v48 = vpop.f32.mrf.mxu0 }
0x12e5   : > { %6597 = vst.msk [vmem:[%s984_s4] sm:$0xff] %vm6596_vm8, %v6583_v14 }
0x12e9   : > { %v6587_v33 = vpop.f32.mrf.mxu0 }
0x12ea   : > { %v6588_v29 = vadd.f32 %v7030_v45, %v6587_v33 }
0x12eb   : > { %v7987_v43 = vpop.f32.mrf.mxu0 }
0x12ec   : > { %6598 = vst.msk [vmem:[%s984_s4 + $0x8] sm:$0xff] %vm6596_vm8, %v6588_v29 }
0x12ed   : > { %v6592_v1 = vpop.f32.mrf.mxu0 }
0x12ee   : > { %v6593_v56 = vadd.f32 %v7030_v45, %v6592_v1 }
0x12ef   : > { %v7990_v62 = vpop.f32.mrf.mxu0 }
0x12f0   : > { %6599 = vst.msk [vmem:[%s984_s4 + $0x10] sm:$0xff] %vm6596_vm8, %v6593_v56 }
0x12f1 PF: > { %p46_p3 = scmp.ge.s32.totalorder %s9262_s25, 4   ;;  %s11384_s27 = smov %s8912_s28 }
0x12f2   : > { %s11385_s28 = smov %s8916_s6  ;;  %s11386_s6 = smov %s9274_s24 }
0x12f3   : > { %s11387_s2 = smov %s9262_s25  ;;  %48 = sbr.rel (!%p46_p3) target bundleno = 33 (0x21), region = 225 }
0x12f8   :  { %6621 = vsyncpa [#allocation5], 1 }
0x12f9   :  { %6623 = vsyncpa [#allocation5 + $0x1], 1 }
0x12fa   :  { %6624 = vsyncpa [#allocation7], 1 }
0x12fb   :  { %6626 = vsyncpa [#allocation7 + $0x1], 1 }
0x12fc   :  { %6627 = vsyncpa [#allocation10], 1 }
0x12fd   :  { %6628 = vsyncpa [#allocation13], 1 }
0x12fe   :  { %6629 = vsyncpa [#allocation16], 1 }
0x12ff   :  { %6630 = vsyncpa [#allocation19], 1 }
0x1300   :  { %6631 = vsyncpa [#allocation22], 1 }
0x1301   :  { %6632 = vsyncpa [#allocation25], 1 }
0x1302   :  { %6633 = vsyncpa [#allocation28], 1 }

</bundles_post_ra>
